<compile_context>
chip_gen: v7x
topology: tpu7x:2x2x1
jax: 0.10.0
libtpu: 0.0.40
codegen_flags: <defaults>
</compile_context>

<pallas_src>
import jax
import jax.numpy as jnp
from jax.experimental import pallas as pl
from jax.experimental.pallas import tpu as pltpu

LANES = 128
ACC_ROWS = 8                 # f32 sublane tile; accumulator strip height
_MIN_KERNEL_ELEMS = 1 << 16  # below this, plain XLA wins (launch/step overhead)


def _tpu_config():
    """Per-generation block geometry / partials / VMEM budget."""
    try:
        kind = jax.devices()[0].device_kind.lower()
    except Exception:
        kind = ""
    if "v7" in kind:
        # 64 MiB VMEM per TC, ~3.2 TB/s: bigger blocks + both TensorCores.
        return dict(block_bytes=4 << 20, num_partials=2, vmem_limit=48 << 20,
                    core_parallel=True, scale_rows_for_dtype=True)
    if "v6" in kind:
        return dict(block_bytes=4 << 20, num_partials=1, vmem_limit=64 << 20,
                    core_parallel=False, scale_rows_for_dtype=True)
    # v5e (and conservative default): stay inside the 16 MiB scoped default.
    return dict(block_bytes=2 << 20, num_partials=1, vmem_limit=None,
                core_parallel=False, scale_rows_for_dtype=False)


def _ssd_jnp(a, b):
    """Plain-XLA sum of squared differences (f32)."""
    d = a.astype(jnp.float32) - b.astype(jnp.float32)
    return jnp.sum(d * d)


def _ssd_pallas(x2, t2, *, br, nb_full, npart, steps, cfg):
    rows, cols = x2.shape
    have_phantom = npart * steps != nb_full   # only possible when npart > 1
    sub_blocks = br // ACC_ROWS

    def index_map(c, i):
        b = c * steps + i
        if have_phantom:
            b = jnp.minimum(b, nb_full - 1)   # keep phantom-block DMAs in bounds
        return (b, 0)

    def kernel(x_ref, t_ref, out_ref, acc_ref):
        c = pl.program_id(0)
        i = pl.program_id(1)

        @pl.when(i == 0)
        def _():
            acc_ref[...] = jnp.zeros_like(acc_ref)

        def accumulate():
            d = x_ref[...].astype(jnp.float32) - t_ref[...].astype(jnp.float32)
            sq = d * d
            # Fold the block onto an (8, cols) strip: leading-axis sum only
            # (pure VALU adds, no cross-lane movement; hides under the DMA).
            acc_ref[...] += jnp.sum(sq.reshape(sub_blocks, ACC_ROWS, cols), axis=0)

        if have_phantom:
            # Skip the duplicated (clamped) trailing block(s) of the last partial.
            pl.when(c * steps + i < nb_full)(accumulate)
        else:
            accumulate()

        @pl.when(i == steps - 1)
        def _():
            # Single cross-lane/sublane reduce per partial, outside the hot loop.
            out_ref[...] = jnp.broadcast_to(jnp.sum(acc_ref[...]), out_ref.shape)

    dim0 = "parallel"
    if cfg["core_parallel"] and npart > 1:
        # v7x: genuinely shard the partials axis across the two TensorCores.
        dim0 = getattr(pltpu, "CORE_PARALLEL", "parallel")
    cp_kwargs = dict(dimension_semantics=(dim0, "arbitrary"))
    if cfg["vmem_limit"] is not None:
        cp_kwargs["vmem_limit_bytes"] = cfg["vmem_limit"]

    partials = pl.pallas_call(
        kernel,
        out_shape=jax.ShapeDtypeStruct((npart, 1), jnp.float32),
        grid_spec=pltpu.PrefetchScalarGridSpec(
            num_scalar_prefetch=0,
            grid=(npart, steps),
            in_specs=[pl.BlockSpec((br, cols), index_map),
                      pl.BlockSpec((br, cols), index_map)],
            out_specs=pl.BlockSpec((1, 1), lambda c, i: (c, 0)),
            scratch_shapes=[pltpu.VMEM((ACC_ROWS, cols), jnp.float32)],
        ),
        compiler_params=pltpu.CompilerParams(**cp_kwargs),
    )(x2, t2)
    return jnp.sum(partials)


def _sum_squared_diff(x, t):
    """sum((x - t)^2) over all elements, accumulated in f32."""
    n = x.size
    # Widest lane-dense column count that divides n, so the flat array
    # reshapes to (rows, cols) with NO pad and NO slice copy.
    cols = next((c for c in (1024, 512, 256, 128) if n % c == 0), 0)
    if cols == 0 or n < _MIN_KERNEL_ELEMS:
        # Tiny or not 128-aligned: plain XLA is already ~2N reads; the kernel
        # would need a pad/slice copy (~3N) to get a 2-D view.
        return _ssd_jnp(x, t)

    cfg = _tpu_config()
    itemsize = jnp.dtype(x.dtype).itemsize
    # Sublane tile: 8 for 4-byte, 16 for 2-byte, 32 for 1-byte dtypes.
    sub_mult = max(ACC_ROWS, 32 // max(1, itemsize))
    eff_item = max(2, itemsize) if cfg["scale_rows_for_dtype"] else 4
    br = cfg["block_bytes"] // (cols * eff_item)
    br = max(sub_mult, (br // sub_mult) * sub_mult)

    rows = n // cols
    nb_full = rows // br
    if nb_full == 0:
        return _ssd_jnp(x, t)   # less than one block: skip the kernel

    x2 = x.reshape(rows, cols)
    t2 = t.reshape(rows, cols)
    npart = max(1, min(cfg["num_partials"], nb_full))
    steps = -(-nb_full // npart)

    ssd = _ssd_pallas(x2, t2, br=br, nb_full=nb_full, npart=npart,
                      steps=steps, cfg=cfg)
    rem_rows = rows - nb_full * br
    if rem_rows:
        # <1 block of ragged rows: cheaper in plain jnp than in-kernel masking.
        ssd = ssd + _ssd_jnp(x2[nb_full * br:], t2[nb_full * br:])
    return ssd


def content_loss_forward(x, target):
    """Returns (input_passthrough, mse_loss). Mirrors ContentLoss.forward."""
    assert x.shape == target.shape, (x.shape, target.shape)
    loss = _sum_squared_diff(x, target) / jnp.float32(x.size)
    return x, loss


class ContentLoss:
    """JAX/Pallas port of the PyTorch module: stores target, exposes .loss."""

    def __init__(self, target):
        self.target = jax.lax.stop_gradient(target)   # ~ target.detach()
        self.loss = None

    def __call__(self, input):
        input, self.loss = content_loss_forward(input, self.target)
        return input


if __name__ == "__main__":
    key = jax.random.PRNGKey(0)
    cases = [
        ("small -> jnp fallback",      (2, 4, 16, 16),    jnp.float32),
        ("kernel, exact blocks",       (4, 16, 128, 128), jnp.float32),
        ("kernel + row remainder",     (4, 17, 128, 128), jnp.float32),
        ("misaligned -> jnp fallback", (3, 5, 7, 11),     jnp.float32),
        ("kernel, bf16 input",         (8, 16, 128, 128), jnp.bfloat16),
    ]
    for name, shape, dtype in cases:
        key, kx, kt = jax.random.split(key, 3)
        x = jax.random.normal(kx, shape, dtype=jnp.float32).astype(dtype)
        target = jax.random.normal(kt, shape, dtype=jnp.float32).astype(dtype)

        module = ContentLoss(target)
        y = module(x)
        jax.block_until_ready((y, module.loss))

        ref = jnp.mean((x.astype(jnp.float32) - target.astype(jnp.float32)) ** 2)
        assert jnp.allclose(module.loss, ref, rtol=1e-4, atol=1e-6), \
            (name, float(module.loss), float(ref))
        assert jnp.array_equal(y, x), name   # forward returns input unchanged

    print("KERNEL_OK")
</pallas_src>

<mosaic_0001>
module attributes {stable_mosaic.version = 11 : i64} {
  func.func @kernel(%arg0: i32, %arg1: i32, %arg2: memref<512x1024xf32, #tpu.memory_space<vmem>>, %arg3: memref<512x1024xf32, #tpu.memory_space<vmem>>, %arg4: memref<1x1xf32, #tpu.memory_space<vmem>>, %arg5: memref<8x1024xf32, #tpu.memory_space<vmem>>) attributes {dimension_semantics = [#tpu.dimension_semantics<parallel>, #tpu.dimension_semantics<arbitrary>], iteration_bounds = array<i64: 1, 2>, scalar_prefetch = 0 : i64, scratch_operands = 1 : i64, tpu.core_type = #tpu.core_type<tc>, window_params = [{transform_indices = @transform_0, window_bounds = array<i64: 512, 1024>}, {transform_indices = @transform_1, window_bounds = array<i64: 512, 1024>}, {transform_indices = @transform_2, window_bounds = array<i64: 1, 1>}]} {
    %c0_i32 = arith.constant 0 : i32
    %0 = arith.cmpi eq, %arg1, %c0_i32 : i32
    %1 = arith.extui %0 : i1 to i32
    %c0_i32_0 = arith.constant 0 : i32
    %2 = arith.cmpi ne, %1, %c0_i32_0 : i32
    scf.if %2 {
      %cst_9 = arith.constant 0.000000e+00 : f32
      %15 = vector.broadcast %cst_9 : f32 to vector<8x1024xf32>
      %c0_10 = arith.constant 0 : index
      %c0_11 = arith.constant 0 : index
      %16 = vector.load %arg5[%c0_10, %c0_11] : memref<8x1024xf32, #tpu.memory_space<vmem>>, vector<8x1024xf32>
      tpu.vector_store %arg5[%c0_10, %c0_11], %15 {strides = array<i32>} : memref<8x1024xf32, #tpu.memory_space<vmem>>, vector<8x1024xf32>,
    } else {
    }
    %c0 = arith.constant 0 : index
    %c0_1 = arith.constant 0 : index
    %3 = vector.load %arg2[%c0, %c0_1] : memref<512x1024xf32, #tpu.memory_space<vmem>>, vector<512x1024xf32>
    %c0_2 = arith.constant 0 : index
    %c0_3 = arith.constant 0 : index
    %4 = vector.load %arg3[%c0_2, %c0_3] : memref<512x1024xf32, #tpu.memory_space<vmem>>, vector<512x1024xf32>
    %5 = arith.subf %3, %4 : vector<512x1024xf32>
    %6 = arith.mulf %5, %5 : vector<512x1024xf32>
    %c0_4 = arith.constant 0 : index
    %c0_5 = arith.constant 0 : index
    %7 = vector.load %arg5[%c0_4, %c0_5] : memref<8x1024xf32, #tpu.memory_space<vmem>>, vector<8x1024xf32>
    %8 = vector.shape_cast %6 : vector<512x1024xf32> to vector<64x8x1024xf32>
    %cst = arith.constant dense<0.000000e+00> : vector<8x1024xf32>
    %9 = vector.multi_reduction <add>, %8, %cst [0] : vector<64x8x1024xf32> to vector<8x1024xf32>
    %10 = arith.addf %7, %9 : vector<8x1024xf32>
    %c0_6 = arith.constant 0 : index
    %c0_7 = arith.constant 0 : index
    %11 = vector.load %arg5[%c0_6, %c0_7] : memref<8x1024xf32, #tpu.memory_space<vmem>>, vector<8x1024xf32>
    tpu.vector_store %arg5[%c0_6, %c0_7], %10 {strides = array<i32>} : memref<8x1024xf32, #tpu.memory_space<vmem>>, vector<8x1024xf32>,
    %c1_i32 = arith.constant 1 : i32
    %12 = arith.cmpi eq, %arg1, %c1_i32 : i32
    %13 = arith.extui %12 : i1 to i32
    %c0_i32_8 = arith.constant 0 : i32
    %14 = arith.cmpi ne, %13, %c0_i32_8 : i32
    scf.if %14 {
      %c0_9 = arith.constant 0 : index
      %c0_10 = arith.constant 0 : index
      %15 = vector.load %arg5[%c0_9, %c0_10] : memref<8x1024xf32, #tpu.memory_space<vmem>>, vector<8x1024xf32>
      %16 = vector.shape_cast %15 : vector<8x1024xf32> to vector<1x8x1024xf32>
      %cst_11 = arith.constant dense<0.000000e+00> : vector<1xf32>
      %17 = vector.multi_reduction <add>, %16, %cst_11 [1, 2] : vector<1x8x1024xf32> to vector<1xf32>
      %18 = vector.shape_cast %17 : vector<1xf32> to vector<1x1x1xf32>
      %19 = vector.extract %18[0, 0, 0] : f32 from vector<1x1x1xf32>
      %20 = vector.broadcast %19 : f32 to vector<1x1xf32>
      %c0_12 = arith.constant 0 : index
      %c0_13 = arith.constant 0 : index
      %21 = vector.load %arg4[%c0_12, %c0_13] : memref<1x1xf32, #tpu.memory_space<vmem>>, vector<1x1xf32>
      tpu.vector_store %arg4[%c0_12, %c0_13], %20 {strides = array<i32>} : memref<1x1xf32, #tpu.memory_space<vmem>>, vector<1x1xf32>,
    } else {
    }
    return
  }
  func.func @transform_0(%arg0: i32, %arg1: i32) -> (i32, i32) {
    %c2_i32 = arith.constant 2 : i32
    %0 = arith.muli %arg0, %c2_i32 : i32
    %1 = arith.addi %0, %arg1 : i32
    %c0_i32 = arith.constant 0 : i32
    %c0_i32_0 = arith.constant 0 : i32
    return %1, %c0_i32 : i32, i32
  }
  func.func @transform_1(%arg0: i32, %arg1: i32) -> (i32, i32) {
    %c2_i32 = arith.constant 2 : i32
    %0 = arith.muli %arg0, %c2_i32 : i32
    %1 = arith.addi %0, %arg1 : i32
    %c0_i32 = arith.constant 0 : i32
    %c0_i32_0 = arith.constant 0 : i32
    return %1, %c0_i32 : i32, i32
  }
  func.func @transform_2(%arg0: i32, %arg1: i32) -> (i32, i32) {
    %c0_i32 = arith.constant 0 : i32
    %c0_i32_0 = arith.constant 0 : i32
    return %arg0, %c0_i32 : i32, i32
  }
}

</mosaic_0001>

<bundles_post_ra>
// kernel: tpu_custom_call.1
= control target key start
LH: loop header
LB: loop body
LE: loop exit
PB: predicated region body
PF: predicated region fallthrough
CT: control target
= control target key end

     0   :  { %7 = vsyncpa [#allocation4], 0  ;;  %s8001_s0 = inlined_call_operand.hbm [shape: f32[1024,1024], index: 0, kind: input, shape index: {}]   ;;  %s8002_s1 = inlined_call_operand.hbm [shape: f32[1024,1024], index: 1, kind: input, shape index: {}]   ;;  %s8003_s2 = inlined_call_operand.hbm [shape: f32[1,1], index: 2, kind: output, shape index: {}]  }
   0x1   :  { %9 = vsyncpa [#allocation4 + $0x1], 0 }
   0x2   :  { %10 = vsyncpa [#allocation7], 0 }
   0x3   :  { %12 = vsyncpa [#allocation7 + $0x1], 0 }
   0x4   :  { %13 = vsyncpa [#allocation5], 0  ;;  %s3206_s9 = smov 0   ;;  %s3208_s10 = smov 0  }
   0x5   :  { %s3210_s11 = smov 0   ;;  %s3212_s12 = smov 0  }
   0x6   :  { %s3214_s13 = smov 0   ;;  %s3216_s14 = smov 0  }
   0x7 LB: > { %s2943_s15 = sadd.s32 4294967295, %s3183_s14   ;;  %s28_s16 = sadd.s32 1, %s3179_s13  ;;  %s3183_s14 = sphi %s3216_s14, %s19_s14   ;;  %s3179_s13 = sphi %s3214_s13, %s9743_s13   ;;  %s3175_s12 = sphi %s3212_s12, %s9742_s12   ;;  %s3171_s11 = sphi %s3210_s11, %s9741_s11   ;;  %s3167_s10 = sphi %s3208_s10, %s9740_s10   ;;  %s3163_s9 = sphi %s3206_s9, %s9739_s9  }
   0x8   : > { %p29_p0 = scmp.ge.s32.totalorder %s28_s16, 2  ;;  %s42_s17 = sadd.s32 1, %s3171_s11 }
   0x9   : > { %p49_p1 = scmp.ne.s32.totalorder %s3171_s11, %s3167_s10  ;;  %p50_p2 = scmp.eq.s32.totalorder %s3183_s14, 0 }
   0xa   : > { %s9745_s16 = smov (%p29_p0, %s28_s16), 0  ;;  %p55_p4 = scmp.ne.s32.totalorder %s3167_s10, %s3163_s9 }
   0xb   : > { %p3242_p3 = por %p50_p2, %p49_p1  ;;  %s39_s19 = ssub.s32 %s3179_s13, %s9745_s16 }
   0xc   : > { %p56_p5 = scmp.eq.s32.totalorder %s2943_s15, 0  ;;  %p40_p6 = scmp.eq.s32.totalorder %s39_s19, 0 }
   0xd   : > { %p2984_p8 = scmp.lt.s32.totalorder %s3183_s14, 2  ;;  %s3260_s22 = sand.u32 1, %s3171_s11  }
   0xe   : > { %p3251_p7 = por %p56_p5, %p55_p4  ;;  %s2964_s23 = sshll.u32 %s3179_s13, 16 }
   0xf   : > { %s3257_s21 = scalar_select %p40_p6, %s3171_s11, %s42_s17  }
  0x10   : > { %s8006_s20 = scalar_select %p3251_p7, 1, 0 }
  0x11   : > { %s2946_s24 = sshll.u32 %s3260_s22, 12  ;;  %s3269_s27 = scalar_lea.hbm %s8001_s0, %s2964_s23 }
  0x12   : > { %s139_s28 = scalar_lea.vmem [#allocation3], %s2946_s24  ;;  %p3275_p9 = pnand %p2984_p8, %p3242_p3 }
  0x13   : > { %s149_s29 = sshll.u32 %s139_s28, 4  ;;  %s136_s3 = scalar_lea.sflag [#allocation4], %s3260_s22  ;;  %s3279_s29 = int_to_ptr.vmem [resolvable:$true] %s149_s29 }
  0x14   : > { %s3039_s4 = scalar_lea.hbm %s3269_s27, 65536  ;;  %p3041_p11 = pneg %p3275_p9 }
  0x15   : > { %p3040_p10 = scmp.ne.s32.totalorder %s3269_s27, %s3039_s4  ;;  %s3044_s7 = scalar_lea.hbm %s8001_s0, 131072 }
  0x16   : > { %p3045_p0 = scmp.lt.u32.totalorder %s3269_s27, %s8001_s0  ;;  %p3046_p1 = scmp.lt.u32.totalorder %s3044_s7, %s3039_s4 }
  0x17   : > { %p3042_p12 = pnand %p3041_p11, %p3040_p10  ;;  %p3048_p3 = scmp.lt.u32.totalorder %s3039_s4, %s3269_s27 }
  0x18   : > { %p3047_p2 = por %p3046_p1, %p3045_p0 }
  0x19   : > { %p3043_p13 = pneg %p3042_p12 }
  0x1a   : > { %p3049_p4 = por %p3048_p3, %p3047_p2 }
  0x1c   : > { %p3050_p5 = pnand %p3049_p4, %p3043_p13 }
  0x1e   : > { %3053 = shalt.err (!%p3050_p5)
}
  0x1f   : > { %s3054_s17 = scalar_lea.vmem %s3279_s29, 65536  ;;  %s3185_s18 = smov [#allocation3]  }
  0x20   : > { %p3055_p6 = scmp.ne.s32.totalorder %s3279_s29, %s3054_s17  ;;  %s3059_s19 = sshll.u32 %s3185_s18, 4  ;;  %s3060_s19 = int_to_ptr.vmem [resolvable:$false] %s3059_s19 }
  0x21   : > { %s3061_s25 = scalar_lea.vmem %s3060_s19, 131072  ;;  %p3062_p12 = scmp.lt.s32.totalorder %s3279_s29, %s3060_s19 }
  0x22   : > { %p3057_p8 = pnand %p3055_p6, %p3041_p11  ;;  %p3063_p0 = scmp.lt.s32.totalorder %s3061_s25, %s3054_s17 }
  0x24   : > { %p3058_p10 = pneg %p3057_p8  ;;  %p3064_p1 = por %p3063_p0, %p3062_p12 }
  0x26   : > { %p3065_p2 = pnand %p3064_p1, %p3058_p10 }
  0x28   : > { %3068 = shalt.err (!%p3065_p2)
}
  0x29   : > { %s3186_s26 = smov 1024   ;;  %s3187_s28 = smov 64  }
  0x2a   : > { %2980 = dma.hbm_to_vmem [thread:$0]  (!%p3275_p9), %s3269_s27, 65536, %s3279_s29, %s136_s3, %s3186_s26, %s3186_s26, %s3187_s28  }
  0x2b   : > { %p2954_p13 = scmp.ge.s32.totalorder %s3183_s14, 1  ;;  %p181_p3 = scmp.lt.s32.totalorder %s3183_s14, 3 }
  0x2c   : > { %s3323_s7 = scalar_lea.hbm %s8002_s1, %s2964_s23  ;;  %s163_s8 = scalar_lea.vmem [#allocation6], %s2946_s24 }
  0x2d   : > { %p3314_p4 = pnand %p2954_p13, %p181_p3  ;;  %s173_s9 = sshll.u32 %s163_s8, 4  ;;  %s3327_s9 = int_to_ptr.vmem [resolvable:$true] %s173_s9 }
  0x2e   : > { %s160_s27 = scalar_lea.sflag [#allocation7], %s3260_s22  ;;  %s3069_s29 = scalar_lea.hbm %s3323_s7, 65536 }
  0x2f   : > { %p3070_p5 = scmp.ne.s32.totalorder %s3323_s7, %s3069_s29  ;;  %s3074_s23 = scalar_lea.hbm %s8002_s1, 131072 }
  0x30   : > { %p3075_p10 = scmp.lt.u32.totalorder %s3323_s7, %s8002_s1  ;;  %p3076_p12 = scmp.lt.u32.totalorder %s3074_s23, %s3069_s29 }
  0x31   : > { %p3072_p6 = pnand %p3070_p5, %p3041_p11  ;;  %p3078_p1 = scmp.lt.u32.totalorder %s3069_s29, %s3323_s7 }
  0x32   : > { %p3077_p0 = por %p3076_p12, %p3075_p10 }
  0x33   : > { %p3073_p8 = pneg %p3072_p6 }
  0x34   : > { %p3079_p2 = por %p3078_p1, %p3077_p0 }
  0x36   : > { %p3080_p13 = pnand %p3079_p2, %p3073_p8 }
  0x38   : > { %3083 = shalt.err (!%p3080_p13)
}
  0x39   : > { %s3084_s24 = scalar_lea.vmem %s3327_s9, 65536  ;;  %s3188_s25 = smov [#allocation6]  }
  0x3a   : > { %p3085_p3 = scmp.ne.s32.totalorder %s3327_s9, %s3084_s24  ;;  %s3089_s5 = sshll.u32 %s3188_s25, 4  ;;  %s3090_s5 = int_to_ptr.vmem [resolvable:$false] %s3089_s5 }
  0x3b   : > { %s3091_s6 = scalar_lea.vmem %s3090_s5, 131072  ;;  %p3092_p7 = scmp.lt.s32.totalorder %s3327_s9, %s3090_s5 }
  0x3c   : > { %p3087_p5 = pnand %p3085_p3, %p3041_p11  ;;  %p3093_p10 = scmp.lt.s32.totalorder %s3091_s6, %s3084_s24 }
  0x3e   : > { %p3088_p6 = pneg %p3087_p5  ;;  %p3094_p12 = por %p3093_p10, %p3092_p7 }
  0x40   : > { %p3095_p0 = pnand %p3094_p12, %p3088_p6 }
  0x42   : > { %3098 = shalt.err (!%p3095_p0)
}
  0x43   : > { %2983 = dma.hbm_to_vmem [thread:$0]  (!%p3275_p9), %s3323_s7, 65536, %s3327_s9, %s160_s27, %s3186_s26, %s3186_s26, %s3187_s28  }
  0x44   : > { %185 = sbr.rel (%p3314_p4) target bundleno = 1105 (0x451), region = 28 }
  0x4b   : > { %s187_s8 = sand.u32 1, %s3167_s10   ;;  %p8009_p7 = scmp.ne.s32.totalorder %s8006_s20, 0 }
  0x4c   : > { %s2955_s29 = sshll.u32 %s187_s8, 12  ;;  %s188_s3 = scalar_lea.sflag [#allocation4], %s187_s8 }
  0x4d   : > { %s3361_s17 = scalar_lea.vmem [#allocation3], %s2955_s29 }
  0x4e   : > { %3150 = dma.done.wait (%p8009_p7), %s188_s3, 65536  }
  0x4f   : > { %3152 = vsyncadd (%p8009_p7), %s188_s3, 4294901760  ;;  %s197_s22 = scalar_lea.sflag [#allocation7], %s187_s8  ;;  %s3367_s30 = scalar_lea.vmem [#allocation6], %s2955_s29 }
  0x50   : > { %3154 = dma.done.wait (%p8009_p7), %s197_s22, 65536  }
  0x51   : > { %3156 = vsyncadd (%p8009_p7), %s197_s22, 4294901760  ;;  %p2957_p9 = scmp.ne.s32.totalorder %s3175_s12, 0 }
  0x52   : > { %v3189_v0 = vmov (!%p2957_p9), 0.0  }
  0x53   : > { %230 = sbr.rel (%p2957_p9) target bundleno = 90 (0x5a), region = 40  ;;  %231 = vst [vmem:[#allocation2] sm:$0xff] (!%p2957_p9), %v3189_v0  ;;  %232 = vst [vmem:[#allocation2 + $0x8] sm:$0xff] (!%p2957_p9), %v3189_v0 }
  0x54   : > { %233 = vst [vmem:[#allocation2 + $0x10] sm:$0xff] (!%p2957_p9), %v3189_v0  ;;  %234 = vst [vmem:[#allocation2 + $0x18] sm:$0xff] (!%p2957_p9), %v3189_v0 }
  0x55   : > { %235 = vst [vmem:[#allocation2 + $0x20] sm:$0xff] (!%p2957_p9), %v3189_v0  ;;  %236 = vst [vmem:[#allocation2 + $0x28] sm:$0xff] (!%p2957_p9), %v3189_v0 }
  0x56   : > { %237 = vst [vmem:[#allocation2 + $0x30] sm:$0xff] (!%p2957_p9), %v3189_v0  ;;  %238 = vst [vmem:[#allocation2 + $0x38] sm:$0xff] (!%p2957_p9), %v3189_v0 }
  0x5a PF: > { %v239_v1 = vld [vmem:[%s3361_s17] sm:$0xff]  ;;  %v240_v2 = vld [vmem:[%s3361_s17 + $0x8] sm:$0xff]  ;;  %v241_v3 = vld [vmem:[%s3361_s17 + $0x10] sm:$0xff]  ;;  %p2958_p11 = scmp.ne.s32.totalorder %s3175_s12, 1 }
  0x5b   : > { %v242_v4 = vld [vmem:[%s3361_s17 + $0x18] sm:$0xff]  ;;  %v243_v5 = vld [vmem:[%s3361_s17 + $0x20] sm:$0xff]  ;;  %v244_v6 = vld [vmem:[%s3361_s17 + $0x28] sm:$0xff]  ;;  %vm2844_vm0 = vcmask (!%p2958_p11), 0  }
  0x5c   : > { %v245_v7 = vld [vmem:[%s3361_s17 + $0x30] sm:$0xff]  ;;  %v246_v8 = vld [vmem:[%s3361_s17 + $0x38] sm:$0xff]  ;;  %v247_v9 = vld [vmem:[%s3361_s17 + $0x40] sm:$0xff] }
  0x5d   : > { %v248_v10 = vld [vmem:[%s3361_s17 + $0x48] sm:$0xff]  ;;  %v249_v11 = vld [vmem:[%s3361_s17 + $0x50] sm:$0xff]  ;;  %v250_v12 = vld [vmem:[%s3361_s17 + $0x58] sm:$0xff] }
  0x5e   : > { %v251_v13 = vld [vmem:[%s3361_s17 + $0x60] sm:$0xff]  ;;  %v252_v15 = vld [vmem:[%s3361_s17 + $0x68] sm:$0xff]  ;;  %v253_v16 = vld [vmem:[%s3361_s17 + $0x70] sm:$0xff] }
  0x5f   : > { %v751_v14 = vld [vmem:[%s3367_s30] sm:$0xff]  ;;  %v254_v17 = vld [vmem:[%s3361_s17 + $0x78] sm:$0xff]  ;;  %v752_v18 = vld [vmem:[%s3367_s30 + $0x8] sm:$0xff] }
  0x60   : > { %v753_v19 = vld [vmem:[%s3367_s30 + $0x10] sm:$0xff]  ;;  %v754_v20 = vld [vmem:[%s3367_s30 + $0x18] sm:$0xff]  ;;  %v1263_v21 = vsub.f32 %v239_v1, %v751_v14  ;;  %v255_v22 = vld [vmem:[%s3361_s17 + $0x80] sm:$0xff]  ;;  %v1264_v28 = vsub.f32 %v240_v2, %v752_v18 }
  0x61   : > { %v256_v23 = vld [vmem:[%s3361_s17 + $0x88] sm:$0xff]  ;;  %v257_v24 = vld [vmem:[%s3361_s17 + $0x90] sm:$0xff]  ;;  %v755_v25 = vld [vmem:[%s3367_s30 + $0x20] sm:$0xff]  ;;  %v1265_v29 = vsub.f32 %v241_v3, %v753_v19  ;;  %v1266_v30 = vsub.f32 %v242_v4, %v754_v20 }
  0x62   : > { %v756_v26 = vld [vmem:[%s3367_s30 + $0x28] sm:$0xff]  ;;  %v757_v27 = vld [vmem:[%s3367_s30 + $0x30] sm:$0xff]  ;;  %v258_v31 = vld [vmem:[%s3361_s17 + $0x98] sm:$0xff]  ;;  %v1267_v37 = vsub.f32 %v243_v5, %v755_v25  ;;  %v3406_v40 = vmul.f32 %v1263_v21, %v1263_v21  ;;  %v3420_v50 = vmul.f32 %v1264_v28, %v1264_v28 }
  0x63   : > { %v259_v32 = vld [vmem:[%s3361_s17 + $0xa0] sm:$0xff]  ;;  %v260_v33 = vld [vmem:[%s3361_s17 + $0xa8] sm:$0xff]  ;;  %v758_v34 = vld [vmem:[%s3367_s30 + $0x38] sm:$0xff]  ;;  %v1268_v38 = vsub.f32 %v244_v6, %v756_v26  ;;  %v1269_v39 = vsub.f32 %v245_v7, %v757_v27  ;;  %v3434_v60 = vmul.f32 %v1265_v29, %v1265_v29  ;;  %v3448_v6 = vmul.f32 %v1266_v30, %v1266_v30 }
  0x64   : > { %v759_v35 = vld [vmem:[%s3367_s30 + $0x40] sm:$0xff]  ;;  %v760_v36 = vld [vmem:[%s3367_s30 + $0x48] sm:$0xff]  ;;  %8010 = vst [vmem:[#allocation12_spill] sm:$0xff] %v3406_v40  ;;  %v261_v41 = vld [vmem:[%s3361_s17 + $0xb0] sm:$0xff]  ;;  %v3414_v47 = vsub.f32 %v246_v8, %v758_v34 }
  0x65   : > { %v262_v42 = vld [vmem:[%s3361_s17 + $0xb8] sm:$0xff]  ;;  %v263_v43 = vld [vmem:[%s3361_s17 + $0xc0] sm:$0xff]  ;;  %v761_v44 = vld [vmem:[%s3367_s30 + $0x50] sm:$0xff]  ;;  %v3416_v48 = vsub.f32 %v247_v9, %v759_v35  ;;  %v3418_v49 = vsub.f32 %v248_v10, %v760_v36  ;;  %8011 = vst [vmem:[#allocation13_spill] sm:$0xff] %v3420_v50  ;;  %v3476_v26 = vmul.f32 %v1268_v38, %v1268_v38  ;;  %v3490_v36 = vmul.f32 %v1269_v39, %v1269_v39 }
  0x66   : > { %v762_v45 = vld [vmem:[%s3367_s30 + $0x58] sm:$0xff]  ;;  %v763_v46 = vld [vmem:[%s3367_s30 + $0x60] sm:$0xff]  ;;  %v264_v51 = vld [vmem:[%s3361_s17 + $0xc8] sm:$0xff]  ;;  %v3428_v57 = vsub.f32 %v249_v11, %v761_v44  ;;  %8012 = vst [vmem:[#allocation14_spill] sm:$0xff] %v3434_v60  ;;  %v3506_v39 = vmul.f32 %v3414_v47, %v3414_v47 }
  0x67   : > { %v265_v52 = vld [vmem:[%s3361_s17 + $0xd0] sm:$0xff]  ;;  %v266_v53 = vld [vmem:[%s3361_s17 + $0xd8] sm:$0xff]  ;;  %v764_v54 = vld [vmem:[%s3367_s30 + $0x68] sm:$0xff]  ;;  %v3430_v58 = vsub.f32 %v250_v12, %v762_v45  ;;  %v3432_v59 = vsub.f32 %v251_v13, %v763_v46  ;;  %8013 = vst [vmem:[#allocation15_spill] sm:$0xff] %v3448_v6  ;;  %v3522_v47 = vmul.f32 %v3416_v48, %v3416_v48  ;;  %v3538_v48 = vmul.f32 %v3418_v49, %v3418_v49 }
  0x68   : > { %v765_v55 = vld [vmem:[%s3367_s30 + $0x70] sm:$0xff]  ;;  %v766_v56 = vld [vmem:[%s3367_s30 + $0x78] sm:$0xff]  ;;  %v267_v61 = vld [vmem:[%s3361_s17 + $0xe0] sm:$0xff]  ;;  %v3442_v3 = vsub.f32 %v252_v15, %v764_v54  ;;  %8015 = vst [vmem:[#allocation17_spill] sm:$0xff] %v3476_v26  ;;  %v3554_v49 = vmul.f32 %v3428_v57, %v3428_v57 }
  0x69   : > { %v268_v62 = vld [vmem:[%s3361_s17 + $0xe8] sm:$0xff]  ;;  %v269_v63 = vld [vmem:[%s3361_s17 + $0xf0] sm:$0xff]  ;;  %v767_v0 = vld [vmem:[%s3367_s30 + $0x80] sm:$0xff]  ;;  %v3444_v4 = vsub.f32 %v253_v16, %v765_v55  ;;  %v3446_v5 = vsub.f32 %v254_v17, %v766_v56  ;;  %v3462_v16 = vmul.f32 %v1267_v37, %v1267_v37  ;;  %8016 = vst [vmem:[#allocation18_spill] sm:$0xff] %v3490_v36  ;;  %v3570_v57 = vmul.f32 %v3430_v58, %v3430_v58 }
  0x6a   : > { %v768_v1 = vld [vmem:[%s3367_s30 + $0x88] sm:$0xff]  ;;  %v769_v2 = vld [vmem:[%s3367_s30 + $0x90] sm:$0xff]  ;;  %v270_v7 = vld [vmem:[%s3361_s17 + $0xf8] sm:$0xff]  ;;  %v3456_v13 = vsub.f32 %v255_v22, %v767_v0  ;;  %8017 = vst [vmem:[#allocation19_spill] sm:$0xff] %v3506_v39  ;;  %v3586_v58 = vmul.f32 %v3432_v59, %v3432_v59  ;;  %v3602_v59 = vmul.f32 %v3442_v3, %v3442_v3 }
  0x6b   : > { %v271_v8 = vld [vmem:[%s3361_s17 + $0x100] sm:$0xff]  ;;  %v272_v9 = vld [vmem:[%s3361_s17 + $0x108] sm:$0xff]  ;;  %v770_v10 = vld [vmem:[%s3367_s30 + $0x98] sm:$0xff]  ;;  %v3458_v14 = vsub.f32 %v256_v23, %v768_v1  ;;  %v3460_v15 = vsub.f32 %v257_v24, %v769_v2  ;;  %8014 = vst [vmem:[#allocation16_spill] sm:$0xff] %v3462_v16  ;;  %v3618_v3 = vmul.f32 %v3444_v4, %v3444_v4  ;;  %v3634_v4 = vmul.f32 %v3446_v5, %v3446_v5 }
  0x6c   : > { %v771_v11 = vld [vmem:[%s3367_s30 + $0xa0] sm:$0xff]  ;;  %v772_v12 = vld [vmem:[%s3367_s30 + $0xa8] sm:$0xff]  ;;  %v273_v17 = vld [vmem:[%s3361_s17 + $0x110] sm:$0xff]  ;;  %v3470_v22 = vsub.f32 %v258_v31, %v770_v10  ;;  %8018 = vst [vmem:[#allocation20_spill] sm:$0xff] %v3522_v47  ;;  %v3650_v5 = vmul.f32 %v3456_v13, %v3456_v13 }
  0x6d   : > { %v274_v18 = vld [vmem:[%s3361_s17 + $0x118] sm:$0xff]  ;;  %v275_v19 = vld [vmem:[%s3361_s17 + $0x120] sm:$0xff]  ;;  %v773_v20 = vld [vmem:[%s3367_s30 + $0xb0] sm:$0xff]  ;;  %v3472_v23 = vsub.f32 %v259_v32, %v771_v11  ;;  %v3474_v24 = vsub.f32 %v260_v33, %v772_v12  ;;  %8019 = vst [vmem:[#allocation21_spill] sm:$0xff] %v3538_v48  ;;  %v3666_v13 = vmul.f32 %v3458_v14, %v3458_v14  ;;  %v3682_v14 = vmul.f32 %v3460_v15, %v3460_v15 }
  0x6e   : > { %v774_v21 = vld [vmem:[%s3367_s30 + $0xb8] sm:$0xff]  ;;  %v775_v25 = vld [vmem:[%s3367_s30 + $0xc0] sm:$0xff]  ;;  %v276_v27 = vld [vmem:[%s3361_s17 + $0x128] sm:$0xff]  ;;  %v3484_v31 = vsub.f32 %v261_v41, %v773_v20  ;;  %8020 = vst [vmem:[#allocation22_spill] sm:$0xff] %v3554_v49  ;;  %v3698_v15 = vmul.f32 %v3470_v22, %v3470_v22 }
  0x6f   : > { %v277_v28 = vld [vmem:[%s3361_s17 + $0x130] sm:$0xff]  ;;  %v278_v29 = vld [vmem:[%s3361_s17 + $0x138] sm:$0xff]  ;;  %v776_v30 = vld [vmem:[%s3367_s30 + $0xc8] sm:$0xff]  ;;  %v3486_v32 = vsub.f32 %v262_v42, %v774_v21  ;;  %v3488_v33 = vsub.f32 %v263_v43, %v775_v25  ;;  %8021 = vst [vmem:[#allocation23_spill] sm:$0xff] %v3570_v57  ;;  %v3714_v22 = vmul.f32 %v3472_v23, %v3472_v23  ;;  %v3730_v23 = vmul.f32 %v3474_v24, %v3474_v24 }
  0x70   : > { %v777_v34 = vld [vmem:[%s3367_s30 + $0xd0] sm:$0xff]  ;;  %v778_v35 = vld [vmem:[%s3367_s30 + $0xd8] sm:$0xff]  ;;  %v279_v37 = vld [vmem:[%s3361_s17 + $0x140] sm:$0xff]  ;;  %v3498_v41 = vsub.f32 %v264_v51, %v776_v30  ;;  %8022 = vst [vmem:[#allocation24_spill] sm:$0xff] %v3586_v58  ;;  %v3746_v24 = vmul.f32 %v3484_v31, %v3484_v31 }
  0x71   : > { %v280_v38 = vld [vmem:[%s3361_s17 + $0x148] sm:$0xff]  ;;  %v281_v44 = vld [vmem:[%s3361_s17 + $0x150] sm:$0xff]  ;;  %v779_v45 = vld [vmem:[%s3367_s30 + $0xe0] sm:$0xff]  ;;  %v3500_v42 = vsub.f32 %v265_v52, %v777_v34  ;;  %v3502_v43 = vsub.f32 %v266_v53, %v778_v35  ;;  %8024 = vst [vmem:[#allocation26_spill] sm:$0xff] %v3602_v59  ;;  %v3762_v31 = vmul.f32 %v3486_v32, %v3486_v32  ;;  %v3778_v32 = vmul.f32 %v3488_v33, %v3488_v33 }
  0x72   : > { %v780_v46 = vld [vmem:[%s3367_s30 + $0xe8] sm:$0xff]  ;;  %v781_v54 = vld [vmem:[%s3367_s30 + $0xf0] sm:$0xff]  ;;  %v282_v55 = vld [vmem:[%s3361_s17 + $0x158] sm:$0xff]  ;;  %v3514_v10 = vsub.f32 %v267_v61, %v779_v45  ;;  %8027 = vst [vmem:[#allocation29_spill] sm:$0xff] %v3618_v3  ;;  %v3794_v33 = vmul.f32 %v3498_v41, %v3498_v41 }
  0x73   : > { %v283_v56 = vld [vmem:[%s3361_s17 + $0x160] sm:$0xff]  ;;  %v284_v0 = vld [vmem:[%s3361_s17 + $0x168] sm:$0xff]  ;;  %v782_v1 = vld [vmem:[%s3367_s30 + $0xf8] sm:$0xff]  ;;  %v3516_v52 = vsub.f32 %v268_v62, %v780_v46  ;;  %v3518_v53 = vsub.f32 %v269_v63, %v781_v54  ;;  %8030 = vst [vmem:[#allocation32_spill] sm:$0xff] %v3634_v4  ;;  %v3810_v41 = vmul.f32 %v3500_v42, %v3500_v42  ;;  %v3826_v42 = vmul.f32 %v3502_v43, %v3502_v43 }
  0x74   : > { %v783_v2 = vld [vmem:[%s3367_s30 + $0x100] sm:$0xff]  ;;  %v784_v51 = vld [vmem:[%s3367_s30 + $0x108] sm:$0xff]  ;;  %v285_v11 = vld [vmem:[%s3361_s17 + $0x170] sm:$0xff]  ;;  %v3530_v30 = vsub.f32 %v270_v7, %v782_v1  ;;  %8033 = vst [vmem:[#allocation35_spill] sm:$0xff] %v3650_v5  ;;  %v3842_v43 = vmul.f32 %v3514_v10, %v3514_v10 }
  0x75   : > { %v286_v12 = vld [vmem:[%s3361_s17 + $0x178] sm:$0xff]  ;;  %v287_v20 = vld [vmem:[%s3361_s17 + $0x180] sm:$0xff]  ;;  %v785_v21 = vld [vmem:[%s3367_s30 + $0x110] sm:$0xff]  ;;  %v3532_v62 = vsub.f32 %v271_v8, %v783_v2  ;;  %v3534_v63 = vsub.f32 %v272_v9, %v784_v51  ;;  %8036 = vst [vmem:[#allocation38_spill] sm:$0xff] %v3666_v13  ;;  %v3858_v10 = vmul.f32 %v3516_v52, %v3516_v52  ;;  %v3874_v52 = vmul.f32 %v3518_v53, %v3518_v53 }
  0x76   : > { %v786_v25 = vld [vmem:[%s3367_s30 + $0x118] sm:$0xff]  ;;  %v787_v61 = vld [vmem:[%s3367_s30 + $0x120] sm:$0xff]  ;;  %v288_v34 = vld [vmem:[%s3361_s17 + $0x188] sm:$0xff]  ;;  %v3546_v1 = vsub.f32 %v273_v17, %v785_v21  ;;  %8039 = vst [vmem:[#allocation41_spill] sm:$0xff] %v3682_v14  ;;  %v3890_v53 = vmul.f32 %v3530_v30, %v3530_v30 }
  0x77   : > { %v289_v35 = vld [vmem:[%s3361_s17 + $0x190] sm:$0xff]  ;;  %v290_v45 = vld [vmem:[%s3361_s17 + $0x198] sm:$0xff]  ;;  %v788_v46 = vld [vmem:[%s3367_s30 + $0x128] sm:$0xff]  ;;  %v3548_v8 = vsub.f32 %v274_v18, %v786_v25  ;;  %v3550_v9 = vsub.f32 %v275_v19, %v787_v61  ;;  %8042 = vst [vmem:[#allocation44_spill] sm:$0xff] %v3698_v15  ;;  %v3906_v30 = vmul.f32 %v3532_v62, %v3532_v62  ;;  %v3922_v62 = vmul.f32 %v3534_v63, %v3534_v63 }
  0x78   : > { %v789_v54 = vld [vmem:[%s3367_s30 + $0x130] sm:$0xff]  ;;  %v790_v7 = vld [vmem:[%s3367_s30 + $0x138] sm:$0xff]  ;;  %v291_v2 = vld [vmem:[%s3361_s17 + $0x1a0] sm:$0xff]  ;;  %v3562_v21 = vsub.f32 %v276_v27, %v788_v46  ;;  %8045 = vst [vmem:[#allocation47_spill] sm:$0xff] %v3714_v22  ;;  %v3938_v63 = vmul.f32 %v3546_v1, %v3546_v1 }
  0x79   : > { %v292_v51 = vld [vmem:[%s3361_s17 + $0x1a8] sm:$0xff]  ;;  %v293_v39 = vld [vmem:[%s3361_s17 + $0x1b0] sm:$0xff]  ;;  %v791_v36 = vld [vmem:[%s3367_s30 + $0x140] sm:$0xff]  ;;  %v3564_v18 = vsub.f32 %v277_v28, %v789_v54  ;;  %v3566_v19 = vsub.f32 %v278_v29, %v790_v7  ;;  %8048 = vst [vmem:[#allocation50_spill] sm:$0xff] %v3730_v23  ;;  %v3954_v1 = vmul.f32 %v3548_v8, %v3548_v8  ;;  %v3970_v8 = vmul.f32 %v3550_v9, %v3550_v9 }
  0x7a   : > { %v792_v26 = vld [vmem:[%s3367_s30 + $0x148] sm:$0xff]  ;;  %v793_v17 = vld [vmem:[%s3367_s30 + $0x150] sm:$0xff]  ;;  %v294_v25 = vld [vmem:[%s3361_s17 + $0x1b8] sm:$0xff]  ;;  %v3578_v46 = vsub.f32 %v279_v37, %v791_v36  ;;  %8051 = vst [vmem:[#allocation53_spill] sm:$0xff] %v3746_v24  ;;  %v3986_v9 = vmul.f32 %v3562_v21, %v3562_v21 }
  0x7b   : > { %v295_v61 = vld [vmem:[%s3361_s17 + $0x1c0] sm:$0xff]  ;;  %v296_v16 = vld [vmem:[%s3361_s17 + $0x1c8] sm:$0xff]  ;;  %v794_v6 = vld [vmem:[%s3367_s30 + $0x158] sm:$0xff]  ;;  %v3580_v28 = vsub.f32 %v280_v38, %v792_v26  ;;  %v3582_v29 = vsub.f32 %v281_v44, %v793_v17  ;;  %8054 = vst [vmem:[#allocation56_spill] sm:$0xff] %v3762_v31  ;;  %v4002_v21 = vmul.f32 %v3564_v18, %v3564_v18  ;;  %v4018_v18 = vmul.f32 %v3566_v19, %v3566_v19 }
  0x7c   : > { %v795_v49 = vld [vmem:[%s3367_s30 + $0x160] sm:$0xff]  ;;  %v796_v27 = vld [vmem:[%s3367_s30 + $0x168] sm:$0xff]  ;;  %v297_v54 = vld [vmem:[%s3361_s17 + $0x1d0] sm:$0xff]  ;;  %v3594_v37 = vsub.f32 %v282_v55, %v794_v6  ;;  %8057 = vst [vmem:[#allocation59_spill] sm:$0xff] %v3778_v32  ;;  %v4034_v19 = vmul.f32 %v3578_v46, %v3578_v46 }
  0x7d   : > { %v298_v7 = vld [vmem:[%s3361_s17 + $0x1d8] sm:$0xff]  ;;  %v299_v57 = vld [vmem:[%s3361_s17 + $0x1e0] sm:$0xff]  ;;  %v797_v60 = vld [vmem:[%s3367_s30 + $0x170] sm:$0xff]  ;;  %v3596_v26 = vsub.f32 %v283_v56, %v795_v49  ;;  %v3598_v38 = vsub.f32 %v284_v0, %v796_v27  ;;  %8060 = vst [vmem:[#allocation62_spill] sm:$0xff] %v3794_v33  ;;  %v4050_v46 = vmul.f32 %v3580_v28, %v3580_v28  ;;  %v4066_v28 = vmul.f32 %v3582_v29, %v3582_v29 }
  0x7e   : > { %v798_v48 = vld [vmem:[%s3367_s30 + $0x178] sm:$0xff]  ;;  %v799_v36 = vld [vmem:[%s3367_s30 + $0x180] sm:$0xff]  ;;  %v300_v44 = vld [vmem:[%s3361_s17 + $0x1e8] sm:$0xff]  ;;  %v3610_v55 = vsub.f32 %v285_v11, %v797_v60  ;;  %8063 = vst [vmem:[#allocation65_spill] sm:$0xff] %v3810_v41  ;;  %v4082_v29 = vmul.f32 %v3594_v37, %v3594_v37 }
  0x7f   : > { %8023 = vst [vmem:[#allocation25_spill] sm:$0xff] %v3598_v38  ;;  %v301_v17 = vld [vmem:[%s3361_s17 + $0x1f0] sm:$0xff]  ;;  %v302_v58 = vld [vmem:[%s3361_s17 + $0x1f8] sm:$0xff]  ;;  %v800_v50 = vld [vmem:[%s3367_s30 + $0x188] sm:$0xff]  ;;  %v3612_v56 = vsub.f32 %v286_v12, %v798_v48  ;;  %v3614_v0 = vsub.f32 %v287_v20, %v799_v36  ;;  %v4098_v37 = vmul.f32 %v3596_v26, %v3596_v26 }
  0x80   : > { %v801_v47 = vld [vmem:[%s3367_s30 + $0x190] sm:$0xff]  ;;  %v802_v6 = vld [vmem:[%s3367_s30 + $0x198] sm:$0xff]  ;;  %v303_v49 = vld [vmem:[%s3361_s17 + $0x200] sm:$0xff]  ;;  %v3626_v11 = vsub.f32 %v288_v34, %v800_v50  ;;  %8066 = vst [vmem:[#allocation68_spill] sm:$0xff] %v3826_v42 }
  0x81   : > { %8025 = vst [vmem:[#allocation27_spill] sm:$0xff] %v3612_v56  ;;  %8026 = vst [vmem:[#allocation28_spill] sm:$0xff] %v3614_v0  ;;  %v304_v27 = vld [vmem:[%s3361_s17 + $0x208] sm:$0xff]  ;;  %v305_v59 = vld [vmem:[%s3361_s17 + $0x210] sm:$0xff]  ;;  %v3628_v12 = vsub.f32 %v289_v35, %v801_v47  ;;  %v3630_v20 = vsub.f32 %v290_v45, %v802_v6 }
  0x82   : > { %v803_v40 = vld [vmem:[%s3367_s30 + $0x1a0] sm:$0xff]  ;;  %v804_v38 = vld [vmem:[%s3367_s30 + $0x1a8] sm:$0xff]  ;;  %v805_v60 = vld [vmem:[%s3367_s30 + $0x1b0] sm:$0xff]  ;;  %8069 = vst [vmem:[#allocation71_spill] sm:$0xff] %v3842_v43 }
  0x83   : > { %8028 = vst [vmem:[#allocation30_spill] sm:$0xff] %v3628_v12  ;;  %8029 = vst [vmem:[#allocation31_spill] sm:$0xff] %v3630_v20  ;;  %v306_v48 = vld [vmem:[%s3361_s17 + $0x218] sm:$0xff]  ;;  %v307_v36 = vld [vmem:[%s3361_s17 + $0x220] sm:$0xff]  ;;  %v3642_v34 = vsub.f32 %v291_v2, %v803_v40  ;;  %v3644_v47 = vsub.f32 %v292_v51, %v804_v38  ;;  %v3646_v35 = vsub.f32 %v293_v39, %v805_v60 }
  0x84   : > { %v308_v3 = vld [vmem:[%s3361_s17 + $0x228] sm:$0xff]  ;;  %v806_v0 = vld [vmem:[%s3367_s30 + $0x1b8] sm:$0xff]  ;;  %v807_v56 = vld [vmem:[%s3367_s30 + $0x1c0] sm:$0xff]  ;;  %8072 = vst [vmem:[#allocation74_spill] sm:$0xff] %v3858_v10 }
  0x85   : > { %v808_v50 = vld [vmem:[%s3367_s30 + $0x1c8] sm:$0xff]  ;;  %8031 = vst [vmem:[#allocation33_spill] sm:$0xff] %v3644_v47  ;;  %8032 = vst [vmem:[#allocation34_spill] sm:$0xff] %v3646_v35  ;;  %v309_v45 = vld [vmem:[%s3361_s17 + $0x230] sm:$0xff]  ;;  %v3658_v2 = vsub.f32 %v294_v25, %v806_v0  ;;  %v3660_v51 = vsub.f32 %v295_v61, %v807_v56 }
  0x86   : > { %v310_v6 = vld [vmem:[%s3361_s17 + $0x238] sm:$0xff]  ;;  %v311_v4 = vld [vmem:[%s3361_s17 + $0x240] sm:$0xff]  ;;  %v809_v20 = vld [vmem:[%s3367_s30 + $0x1d0] sm:$0xff]  ;;  %v3662_v39 = vsub.f32 %v296_v16, %v808_v50  ;;  %8075 = vst [vmem:[#allocation77_spill] sm:$0xff] %v3874_v52 }
  0x87   : > { %v810_v12 = vld [vmem:[%s3367_s30 + $0x1d8] sm:$0xff]  ;;  %v811_v40 = vld [vmem:[%s3367_s30 + $0x1e0] sm:$0xff]  ;;  %8034 = vst [vmem:[#allocation36_spill] sm:$0xff] %v3660_v51  ;;  %v312_v38 = vld [vmem:[%s3361_s17 + $0x248] sm:$0xff]  ;;  %v3674_v0 = vsub.f32 %v297_v54, %v809_v20 }
  0x88   : > { %8035 = vst [vmem:[#allocation37_spill] sm:$0xff] %v3662_v39  ;;  %v313_v60 = vld [vmem:[%s3361_s17 + $0x250] sm:$0xff]  ;;  %v314_v5 = vld [vmem:[%s3361_s17 + $0x258] sm:$0xff]  ;;  %v812_v35 = vld [vmem:[%s3367_s30 + $0x1e8] sm:$0xff]  ;;  %v3676_v61 = vsub.f32 %v298_v7, %v810_v12  ;;  %v3678_v16 = vsub.f32 %v299_v57, %v811_v40 }
  0x89   : > { %v813_v47 = vld [vmem:[%s3367_s30 + $0x1f0] sm:$0xff]  ;;  %v814_v25 = vld [vmem:[%s3367_s30 + $0x1f8] sm:$0xff]  ;;  %v315_v56 = vld [vmem:[%s3361_s17 + $0x260] sm:$0xff]  ;;  %v3690_v20 = vsub.f32 %v300_v44, %v812_v35  ;;  %8078 = vst [vmem:[#allocation80_spill] sm:$0xff] %v3890_v53 }
  0x8a   : > { %8037 = vst [vmem:[#allocation39_spill] sm:$0xff] %v3676_v61  ;;  %8038 = vst [vmem:[#allocation40_spill] sm:$0xff] %v3678_v16  ;;  %v316_v50 = vld [vmem:[%s3361_s17 + $0x268] sm:$0xff]  ;;  %v317_v13 = vld [vmem:[%s3361_s17 + $0x270] sm:$0xff]  ;;  %v3692_v7 = vsub.f32 %v301_v17, %v813_v47  ;;  %v3694_v57 = vsub.f32 %v302_v58, %v814_v25 }
  0x8b   : > { %v815_v39 = vld [vmem:[%s3367_s30 + $0x200] sm:$0xff]  ;;  %v816_v51 = vld [vmem:[%s3367_s30 + $0x208] sm:$0xff]  ;;  %v817_v54 = vld [vmem:[%s3367_s30 + $0x210] sm:$0xff]  ;;  %8081 = vst [vmem:[#allocation83_spill] sm:$0xff] %v3906_v30 }
  0x8c   : > { %8040 = vst [vmem:[#allocation42_spill] sm:$0xff] %v3692_v7  ;;  %8041 = vst [vmem:[#allocation43_spill] sm:$0xff] %v3694_v57  ;;  %v318_v12 = vld [vmem:[%s3361_s17 + $0x278] sm:$0xff]  ;;  %v319_v40 = vld [vmem:[%s3361_s17 + $0x280] sm:$0xff]  ;;  %v3706_v35 = vsub.f32 %v303_v49, %v815_v39  ;;  %v3708_v17 = vsub.f32 %v304_v27, %v816_v51  ;;  %v3710_v58 = vsub.f32 %v305_v59, %v817_v54 }
  0x8d   : > { %v320_v14 = vld [vmem:[%s3361_s17 + $0x288] sm:$0xff]  ;;  %v818_v16 = vld [vmem:[%s3367_s30 + $0x218] sm:$0xff]  ;;  %v819_v61 = vld [vmem:[%s3367_s30 + $0x220] sm:$0xff]  ;;  %8084 = vst [vmem:[#allocation86_spill] sm:$0xff] %v3922_v62 }
  0x8e   : > { %v820_v44 = vld [vmem:[%s3367_s30 + $0x228] sm:$0xff]  ;;  %8043 = vst [vmem:[#allocation45_spill] sm:$0xff] %v3708_v17  ;;  %8044 = vst [vmem:[#allocation46_spill] sm:$0xff] %v3710_v58  ;;  %v321_v47 = vld [vmem:[%s3361_s17 + $0x290] sm:$0xff]  ;;  %v3722_v39 = vsub.f32 %v306_v48, %v818_v16  ;;  %v3724_v27 = vsub.f32 %v307_v36, %v819_v61 }
  0x8f   : > { %v322_v25 = vld [vmem:[%s3361_s17 + $0x298] sm:$0xff]  ;;  %v323_v15 = vld [vmem:[%s3361_s17 + $0x2a0] sm:$0xff]  ;;  %v821_v57 = vld [vmem:[%s3367_s30 + $0x230] sm:$0xff]  ;;  %v3726_v59 = vsub.f32 %v308_v3, %v820_v44  ;;  %8087 = vst [vmem:[#allocation89_spill] sm:$0xff] %v3938_v63 }
  0x90   : > { %v822_v7 = vld [vmem:[%s3367_s30 + $0x238] sm:$0xff]  ;;  %v823_v49 = vld [vmem:[%s3367_s30 + $0x240] sm:$0xff]  ;;  %8046 = vst [vmem:[#allocation48_spill] sm:$0xff] %v3724_v27  ;;  %v324_v51 = vld [vmem:[%s3361_s17 + $0x2a8] sm:$0xff]  ;;  %v3738_v16 = vsub.f32 %v309_v45, %v821_v57 }
  0x91   : > { %8047 = vst [vmem:[#allocation49_spill] sm:$0xff] %v3726_v59  ;;  %v325_v54 = vld [vmem:[%s3361_s17 + $0x2b0] sm:$0xff]  ;;  %v326_v22 = vld [vmem:[%s3361_s17 + $0x2b8] sm:$0xff]  ;;  %v824_v58 = vld [vmem:[%s3367_s30 + $0x248] sm:$0xff]  ;;  %v3740_v36 = vsub.f32 %v310_v6, %v822_v7  ;;  %v3742_v3 = vsub.f32 %v311_v4, %v823_v49 }
  0x92   : > { %v825_v17 = vld [vmem:[%s3367_s30 + $0x250] sm:$0xff]  ;;  %v826_v48 = vld [vmem:[%s3367_s30 + $0x258] sm:$0xff]  ;;  %v327_v61 = vld [vmem:[%s3361_s17 + $0x2c0] sm:$0xff]  ;;  %v3754_v57 = vsub.f32 %v312_v38, %v824_v58  ;;  %8090 = vst [vmem:[#allocation92_spill] sm:$0xff] %v3954_v1 }
  0x93   : > { %8049 = vst [vmem:[#allocation51_spill] sm:$0xff] %v3740_v36  ;;  %8050 = vst [vmem:[#allocation52_spill] sm:$0xff] %v3742_v3  ;;  %v328_v44 = vld [vmem:[%s3361_s17 + $0x2c8] sm:$0xff]  ;;  %v329_v23 = vld [vmem:[%s3361_s17 + $0x2d0] sm:$0xff]  ;;  %v3756_v6 = vsub.f32 %v313_v60, %v825_v17  ;;  %v3758_v4 = vsub.f32 %v314_v5, %v826_v48 }
  0x94   : > { %v827_v59 = vld [vmem:[%s3367_s30 + $0x260] sm:$0xff]  ;;  %v828_v27 = vld [vmem:[%s3367_s30 + $0x268] sm:$0xff]  ;;  %v829_v45 = vld [vmem:[%s3367_s30 + $0x270] sm:$0xff]  ;;  %8093 = vst [vmem:[#allocation95_spill] sm:$0xff] %v3970_v8 }
  0x95   : > { %8052 = vst [vmem:[#allocation54_spill] sm:$0xff] %v3756_v6  ;;  %8053 = vst [vmem:[#allocation55_spill] sm:$0xff] %v3758_v4  ;;  %v330_v7 = vld [vmem:[%s3361_s17 + $0x2d8] sm:$0xff]  ;;  %v331_v49 = vld [vmem:[%s3361_s17 + $0x2e0] sm:$0xff]  ;;  %v3770_v58 = vsub.f32 %v315_v56, %v827_v59  ;;  %v3772_v60 = vsub.f32 %v316_v50, %v828_v27  ;;  %v3774_v5 = vsub.f32 %v317_v13, %v829_v45 }
  0x96   : > { %v332_v24 = vld [vmem:[%s3361_s17 + $0x2e8] sm:$0xff]  ;;  %v830_v3 = vld [vmem:[%s3367_s30 + $0x278] sm:$0xff]  ;;  %v831_v36 = vld [vmem:[%s3367_s30 + $0x280] sm:$0xff]  ;;  %8096 = vst [vmem:[#allocation98_spill] sm:$0xff] %v3986_v9 }
  0x97   : > { %v832_v38 = vld [vmem:[%s3367_s30 + $0x288] sm:$0xff]  ;;  %8055 = vst [vmem:[#allocation57_spill] sm:$0xff] %v3772_v60  ;;  %8056 = vst [vmem:[#allocation58_spill] sm:$0xff] %v3774_v5  ;;  %v333_v17 = vld [vmem:[%s3361_s17 + $0x2f0] sm:$0xff]  ;;  %v3786_v59 = vsub.f32 %v318_v12, %v830_v3  ;;  %v3788_v50 = vsub.f32 %v319_v40, %v831_v36 }
  0x98   : > { %v334_v48 = vld [vmem:[%s3361_s17 + $0x2f8] sm:$0xff]  ;;  %v335_v31 = vld [vmem:[%s3361_s17 + $0x300] sm:$0xff]  ;;  %v833_v4 = vld [vmem:[%s3367_s30 + $0x290] sm:$0xff]  ;;  %v3790_v13 = vsub.f32 %v320_v14, %v832_v38  ;;  %8099 = vst [vmem:[#allocation101_spill] sm:$0xff] %v4002_v21 }
  0x99   : > { %v834_v6 = vld [vmem:[%s3367_s30 + $0x298] sm:$0xff]  ;;  %v835_v56 = vld [vmem:[%s3367_s30 + $0x2a0] sm:$0xff]  ;;  %8058 = vst [vmem:[#allocation60_spill] sm:$0xff] %v3788_v50  ;;  %v336_v27 = vld [vmem:[%s3361_s17 + $0x308] sm:$0xff]  ;;  %v3802_v3 = vsub.f32 %v321_v47, %v833_v4 }
  0x9a   : > { %8059 = vst [vmem:[#allocation61_spill] sm:$0xff] %v3790_v13  ;;  %v337_v45 = vld [vmem:[%s3361_s17 + $0x310] sm:$0xff]  ;;  %v338_v32 = vld [vmem:[%s3361_s17 + $0x318] sm:$0xff]  ;;  %v836_v5 = vld [vmem:[%s3367_s30 + $0x2a8] sm:$0xff]  ;;  %v3804_v40 = vsub.f32 %v322_v25, %v834_v6  ;;  %v3806_v14 = vsub.f32 %v323_v15, %v835_v56 }
  0x9b   : > { %v837_v60 = vld [vmem:[%s3367_s30 + $0x2b0] sm:$0xff]  ;;  %v838_v12 = vld [vmem:[%s3367_s30 + $0x2b8] sm:$0xff]  ;;  %v339_v36 = vld [vmem:[%s3361_s17 + $0x320] sm:$0xff]  ;;  %v3818_v4 = vsub.f32 %v324_v51, %v836_v5  ;;  %8102 = vst [vmem:[#allocation104_spill] sm:$0xff] %v4018_v18 }
  0x9c   : > { %8061 = vst [vmem:[#allocation63_spill] sm:$0xff] %v3804_v40  ;;  %8062 = vst [vmem:[#allocation64_spill] sm:$0xff] %v3806_v14  ;;  %v340_v38 = vld [vmem:[%s3361_s17 + $0x328] sm:$0xff]  ;;  %v341_v33 = vld [vmem:[%s3361_s17 + $0x330] sm:$0xff]  ;;  %v3820_v25 = vsub.f32 %v325_v54, %v837_v60  ;;  %v3822_v15 = vsub.f32 %v326_v22, %v838_v12 }
  0x9d   : > { %v839_v13 = vld [vmem:[%s3367_s30 + $0x2c0] sm:$0xff]  ;;  %v840_v50 = vld [vmem:[%s3367_s30 + $0x2c8] sm:$0xff]  ;;  %v841_v47 = vld [vmem:[%s3367_s30 + $0x2d0] sm:$0xff]  ;;  %8105 = vst [vmem:[#allocation107_spill] sm:$0xff] %v4034_v19 }
  0x9e   : > { %8064 = vst [vmem:[#allocation66_spill] sm:$0xff] %v3820_v25  ;;  %8065 = vst [vmem:[#allocation67_spill] sm:$0xff] %v3822_v15  ;;  %v342_v6 = vld [vmem:[%s3361_s17 + $0x338] sm:$0xff]  ;;  %v343_v56 = vld [vmem:[%s3361_s17 + $0x340] sm:$0xff]  ;;  %v3834_v5 = vsub.f32 %v327_v61, %v839_v13  ;;  %v3836_v54 = vsub.f32 %v328_v44, %v840_v50  ;;  %v3838_v22 = vsub.f32 %v329_v23, %v841_v47 }
  0x9f   : > { %v344_v41 = vld [vmem:[%s3361_s17 + $0x348] sm:$0xff]  ;;  %v842_v14 = vld [vmem:[%s3367_s30 + $0x2d8] sm:$0xff]  ;;  %v843_v40 = vld [vmem:[%s3367_s30 + $0x2e0] sm:$0xff]  ;;  %8108 = vst [vmem:[#allocation110_spill] sm:$0xff] %v4050_v46 }
  0xa0   : > { %v844_v51 = vld [vmem:[%s3367_s30 + $0x2e8] sm:$0xff]  ;;  %8067 = vst [vmem:[#allocation69_spill] sm:$0xff] %v3836_v54  ;;  %8068 = vst [vmem:[#allocation70_spill] sm:$0xff] %v3838_v22  ;;  %v345_v60 = vld [vmem:[%s3361_s17 + $0x350] sm:$0xff]  ;;  %v3850_v13 = vsub.f32 %v330_v7, %v842_v14  ;;  %v3852_v44 = vsub.f32 %v331_v49, %v843_v40 }
  0xa1   : > { %v346_v12 = vld [vmem:[%s3361_s17 + $0x358] sm:$0xff]  ;;  %v347_v42 = vld [vmem:[%s3361_s17 + $0x360] sm:$0xff]  ;;  %v845_v15 = vld [vmem:[%s3367_s30 + $0x2f0] sm:$0xff]  ;;  %v3854_v23 = vsub.f32 %v332_v24, %v844_v51  ;;  %8111 = vst [vmem:[#allocation113_spill] sm:$0xff] %v4066_v28 }
  0xa2   : > { %v846_v25 = vld [vmem:[%s3367_s30 + $0x2f8] sm:$0xff]  ;;  %v847_v61 = vld [vmem:[%s3367_s30 + $0x300] sm:$0xff]  ;;  %8070 = vst [vmem:[#allocation72_spill] sm:$0xff] %v3852_v44  ;;  %v348_v50 = vld [vmem:[%s3361_s17 + $0x368] sm:$0xff]  ;;  %v3866_v14 = vsub.f32 %v333_v17, %v845_v15 }
  0xa3   : > { %8071 = vst [vmem:[#allocation73_spill] sm:$0xff] %v3854_v23  ;;  %v349_v47 = vld [vmem:[%s3361_s17 + $0x370] sm:$0xff]  ;;  %v350_v43 = vld [vmem:[%s3361_s17 + $0x378] sm:$0xff]  ;;  %v848_v22 = vld [vmem:[%s3367_s30 + $0x308] sm:$0xff]  ;;  %v3868_v49 = vsub.f32 %v334_v48, %v846_v25  ;;  %v3870_v24 = vsub.f32 %v335_v31, %v847_v61 }
  0xa4   : > { %v849_v54 = vld [vmem:[%s3367_s30 + $0x310] sm:$0xff]  ;;  %v850_v7 = vld [vmem:[%s3367_s30 + $0x318] sm:$0xff]  ;;  %v351_v40 = vld [vmem:[%s3361_s17 + $0x380] sm:$0xff]  ;;  %v3882_v15 = vsub.f32 %v336_v27, %v848_v22  ;;  %8114 = vst [vmem:[#allocation116_spill] sm:$0xff] %v4082_v29 }
  0xa5   : > { %8073 = vst [vmem:[#allocation75_spill] sm:$0xff] %v3868_v49  ;;  %8074 = vst [vmem:[#allocation76_spill] sm:$0xff] %v3870_v24  ;;  %v352_v51 = vld [vmem:[%s3361_s17 + $0x388] sm:$0xff]  ;;  %v353_v10 = vld [vmem:[%s3361_s17 + $0x390] sm:$0xff]  ;;  %v3884_v48 = vsub.f32 %v337_v45, %v849_v54  ;;  %v3886_v31 = vsub.f32 %v338_v32, %v850_v7 }
  0xa6   : > { %v851_v23 = vld [vmem:[%s3367_s30 + $0x320] sm:$0xff]  ;;  %v852_v44 = vld [vmem:[%s3367_s30 + $0x328] sm:$0xff]  ;;  %v853_v17 = vld [vmem:[%s3367_s30 + $0x330] sm:$0xff]  ;;  %8118 = vst [vmem:[#allocation120_spill] sm:$0xff] %v4098_v37 }
  0xa7   : > { %8076 = vst [vmem:[#allocation78_spill] sm:$0xff] %v3884_v48  ;;  %8077 = vst [vmem:[#allocation79_spill] sm:$0xff] %v3886_v31  ;;  %v354_v25 = vld [vmem:[%s3361_s17 + $0x398] sm:$0xff]  ;;  %v355_v61 = vld [vmem:[%s3361_s17 + $0x3a0] sm:$0xff]  ;;  %v3898_v22 = vsub.f32 %v339_v36, %v851_v23  ;;  %v3900_v45 = vsub.f32 %v340_v38, %v852_v44  ;;  %v3902_v32 = vsub.f32 %v341_v33, %v853_v17 }
  0xa8   : > { %v356_v52 = vld [vmem:[%s3361_s17 + $0x3a8] sm:$0xff]  ;;  %v854_v24 = vld [vmem:[%s3367_s30 + $0x338] sm:$0xff]  ;;  %v855_v49 = vld [vmem:[%s3367_s30 + $0x340] sm:$0xff] }
  0xa9   : > { %v856_v27 = vld [vmem:[%s3367_s30 + $0x348] sm:$0xff]  ;;  %8079 = vst [vmem:[#allocation81_spill] sm:$0xff] %v3900_v45  ;;  %8080 = vst [vmem:[#allocation82_spill] sm:$0xff] %v3902_v32  ;;  %v357_v54 = vld [vmem:[%s3361_s17 + $0x3b0] sm:$0xff]  ;;  %v3914_v23 = vsub.f32 %v342_v6, %v854_v24  ;;  %v3916_v38 = vsub.f32 %v343_v56, %v855_v49 }
  0xaa   : > { %v358_v7 = vld [vmem:[%s3361_s17 + $0x3b8] sm:$0xff]  ;;  %v359_v53 = vld [vmem:[%s3361_s17 + $0x3c0] sm:$0xff]  ;;  %v857_v31 = vld [vmem:[%s3367_s30 + $0x350] sm:$0xff]  ;;  %v3918_v33 = vsub.f32 %v344_v41, %v856_v27 }
  0xab   : > { %v858_v48 = vld [vmem:[%s3367_s30 + $0x358] sm:$0xff]  ;;  %v859_v36 = vld [vmem:[%s3367_s30 + $0x360] sm:$0xff]  ;;  %8082 = vst [vmem:[#allocation84_spill] sm:$0xff] %v3916_v38  ;;  %v360_v44 = vld [vmem:[%s3361_s17 + $0x3c8] sm:$0xff]  ;;  %v3930_v24 = vsub.f32 %v345_v60, %v857_v31 }
  0xac   : > { %8083 = vst [vmem:[#allocation85_spill] sm:$0xff] %v3918_v33  ;;  %v361_v17 = vld [vmem:[%s3361_s17 + $0x3d0] sm:$0xff]  ;;  %v362_v30 = vld [vmem:[%s3361_s17 + $0x3d8] sm:$0xff]  ;;  %v860_v32 = vld [vmem:[%s3367_s30 + $0x368] sm:$0xff]  ;;  %v3932_v56 = vsub.f32 %v346_v12, %v858_v48  ;;  %v3934_v41 = vsub.f32 %v347_v42, %v859_v36 }
  0xad   : > { %v861_v45 = vld [vmem:[%s3367_s30 + $0x370] sm:$0xff]  ;;  %v862_v6 = vld [vmem:[%s3367_s30 + $0x378] sm:$0xff]  ;;  %v363_v49 = vld [vmem:[%s3361_s17 + $0x3e0] sm:$0xff]  ;;  %v3946_v31 = vsub.f32 %v348_v50, %v860_v32 }
  0xae   : > { %8085 = vst [vmem:[#allocation87_spill] sm:$0xff] %v3932_v56  ;;  %8086 = vst [vmem:[#allocation88_spill] sm:$0xff] %v3934_v41  ;;  %v364_v27 = vld [vmem:[%s3361_s17 + $0x3e8] sm:$0xff]  ;;  %v365_v62 = vld [vmem:[%s3361_s17 + $0x3f0] sm:$0xff]  ;;  %v3948_v12 = vsub.f32 %v349_v47, %v861_v45  ;;  %v3950_v42 = vsub.f32 %v350_v43, %v862_v6 }
  0xaf   : > { %v863_v33 = vld [vmem:[%s3367_s30 + $0x380] sm:$0xff]  ;;  %v864_v38 = vld [vmem:[%s3367_s30 + $0x388] sm:$0xff]  ;;  %v865_v60 = vld [vmem:[%s3367_s30 + $0x390] sm:$0xff] }
  0xb0   : > { %8088 = vst [vmem:[#allocation90_spill] sm:$0xff] %v3948_v12  ;;  %8089 = vst [vmem:[#allocation91_spill] sm:$0xff] %v3950_v42  ;;  %v366_v48 = vld [vmem:[%s3361_s17 + $0x3f8] sm:$0xff]  ;;  %v367_v36 = vld [vmem:[%s3361_s17 + $0x400] sm:$0xff]  ;;  %v3962_v32 = vsub.f32 %v351_v40, %v863_v33  ;;  %v3964_v47 = vsub.f32 %v352_v51, %v864_v38  ;;  %v3966_v43 = vsub.f32 %v353_v10, %v865_v60 }
  0xb1   : > { %v368_v63 = vld [vmem:[%s3361_s17 + $0x408] sm:$0xff]  ;;  %v866_v41 = vld [vmem:[%s3367_s30 + $0x398] sm:$0xff]  ;;  %v867_v56 = vld [vmem:[%s3367_s30 + $0x3a0] sm:$0xff] }
  0xb2   : > { %v868_v50 = vld [vmem:[%s3367_s30 + $0x3a8] sm:$0xff]  ;;  %8091 = vst [vmem:[#allocation93_spill] sm:$0xff] %v3964_v47  ;;  %8092 = vst [vmem:[#allocation94_spill] sm:$0xff] %v3966_v43  ;;  %v369_v45 = vld [vmem:[%s3361_s17 + $0x410] sm:$0xff]  ;;  %v3978_v33 = vsub.f32 %v354_v25, %v866_v41  ;;  %v3980_v51 = vsub.f32 %v355_v61, %v867_v56 }
  0xb3   : > { %v370_v6 = vld [vmem:[%s3361_s17 + $0x418] sm:$0xff]  ;;  %v371_v1 = vld [vmem:[%s3361_s17 + $0x420] sm:$0xff]  ;;  %v869_v42 = vld [vmem:[%s3367_s30 + $0x3b0] sm:$0xff]  ;;  %v3982_v10 = vsub.f32 %v356_v52, %v868_v50 }
  0xb4   : > { %v870_v12 = vld [vmem:[%s3367_s30 + $0x3b8] sm:$0xff]  ;;  %v871_v40 = vld [vmem:[%s3367_s30 + $0x3c0] sm:$0xff]  ;;  %8094 = vst [vmem:[#allocation96_spill] sm:$0xff] %v3980_v51  ;;  %v372_v38 = vld [vmem:[%s3361_s17 + $0x428] sm:$0xff]  ;;  %v3994_v41 = vsub.f32 %v357_v54, %v869_v42 }
  0xb5   : > { %8095 = vst [vmem:[#allocation97_spill] sm:$0xff] %v3982_v10  ;;  %v373_v60 = vld [vmem:[%s3361_s17 + $0x430] sm:$0xff]  ;;  %v374_v8 = vld [vmem:[%s3361_s17 + $0x438] sm:$0xff]  ;;  %v872_v43 = vld [vmem:[%s3367_s30 + $0x3c8] sm:$0xff]  ;;  %v3996_v61 = vsub.f32 %v358_v7, %v870_v12  ;;  %v3998_v52 = vsub.f32 %v359_v53, %v871_v40 }
  0xb6   : > { %v873_v47 = vld [vmem:[%s3367_s30 + $0x3d0] sm:$0xff]  ;;  %v874_v25 = vld [vmem:[%s3367_s30 + $0x3d8] sm:$0xff]  ;;  %v375_v56 = vld [vmem:[%s3361_s17 + $0x440] sm:$0xff]  ;;  %v4010_v42 = vsub.f32 %v360_v44, %v872_v43 }
  0xb7   : > { %8097 = vst [vmem:[#allocation99_spill] sm:$0xff] %v3996_v61  ;;  %8098 = vst [vmem:[#allocation100_spill] sm:$0xff] %v3998_v52  ;;  %v376_v50 = vld [vmem:[%s3361_s17 + $0x448] sm:$0xff]  ;;  %v377_v9 = vld [vmem:[%s3361_s17 + $0x450] sm:$0xff]  ;;  %v4012_v7 = vsub.f32 %v361_v17, %v873_v47  ;;  %v4014_v53 = vsub.f32 %v362_v30, %v874_v25 }
  0xb8   : > { %v875_v10 = vld [vmem:[%s3367_s30 + $0x3e0] sm:$0xff]  ;;  %v876_v51 = vld [vmem:[%s3367_s30 + $0x3e8] sm:$0xff]  ;;  %v877_v54 = vld [vmem:[%s3367_s30 + $0x3f0] sm:$0xff] }
  0xb9   : > { %8100 = vst [vmem:[#allocation102_spill] sm:$0xff] %v4012_v7  ;;  %8101 = vst [vmem:[#allocation103_spill] sm:$0xff] %v4014_v53  ;;  %v378_v12 = vld [vmem:[%s3361_s17 + $0x458] sm:$0xff]  ;;  %v379_v40 = vld [vmem:[%s3361_s17 + $0x460] sm:$0xff]  ;;  %v4026_v43 = vsub.f32 %v363_v49, %v875_v10  ;;  %v4028_v17 = vsub.f32 %v364_v27, %v876_v51  ;;  %v4030_v30 = vsub.f32 %v365_v62, %v877_v54 }
  0xba   : > { %v380_v21 = vld [vmem:[%s3361_s17 + $0x468] sm:$0xff]  ;;  %v878_v52 = vld [vmem:[%s3367_s30 + $0x3f8] sm:$0xff]  ;;  %v879_v61 = vld [vmem:[%s3367_s30 + $0x400] sm:$0xff] }
  0xbb   : > { %v880_v44 = vld [vmem:[%s3367_s30 + $0x408] sm:$0xff]  ;;  %8103 = vst [vmem:[#allocation105_spill] sm:$0xff] %v4028_v17  ;;  %8104 = vst [vmem:[#allocation106_spill] sm:$0xff] %v4030_v30  ;;  %v381_v47 = vld [vmem:[%s3361_s17 + $0x470] sm:$0xff]  ;;  %v4042_v10 = vsub.f32 %v366_v48, %v878_v52  ;;  %v4044_v27 = vsub.f32 %v367_v36, %v879_v61 }
  0xbc   : > { %v382_v25 = vld [vmem:[%s3361_s17 + $0x478] sm:$0xff]  ;;  %v383_v18 = vld [vmem:[%s3361_s17 + $0x480] sm:$0xff]  ;;  %v881_v53 = vld [vmem:[%s3367_s30 + $0x410] sm:$0xff]  ;;  %v4046_v62 = vsub.f32 %v368_v63, %v880_v44 }
  0xbd   : > { %v882_v7 = vld [vmem:[%s3367_s30 + $0x418] sm:$0xff]  ;;  %v883_v49 = vld [vmem:[%s3367_s30 + $0x420] sm:$0xff]  ;;  %8106 = vst [vmem:[#allocation108_spill] sm:$0xff] %v4044_v27  ;;  %v384_v51 = vld [vmem:[%s3361_s17 + $0x488] sm:$0xff]  ;;  %v4058_v52 = vsub.f32 %v369_v45, %v881_v53 }
  0xbe   : > { %8107 = vst [vmem:[#allocation109_spill] sm:$0xff] %v4046_v62  ;;  %v385_v54 = vld [vmem:[%s3361_s17 + $0x490] sm:$0xff]  ;;  %v386_v19 = vld [vmem:[%s3361_s17 + $0x498] sm:$0xff]  ;;  %v884_v30 = vld [vmem:[%s3367_s30 + $0x428] sm:$0xff]  ;;  %v4060_v36 = vsub.f32 %v370_v6, %v882_v7  ;;  %v4062_v63 = vsub.f32 %v371_v1, %v883_v49 }
  0xbf   : > { %v885_v17 = vld [vmem:[%s3367_s30 + $0x430] sm:$0xff]  ;;  %v886_v48 = vld [vmem:[%s3367_s30 + $0x438] sm:$0xff]  ;;  %v387_v61 = vld [vmem:[%s3361_s17 + $0x4a0] sm:$0xff]  ;;  %v4074_v53 = vsub.f32 %v372_v38, %v884_v30 }
  0xc0   : > { %8109 = vst [vmem:[#allocation111_spill] sm:$0xff] %v4060_v36  ;;  %8110 = vst [vmem:[#allocation112_spill] sm:$0xff] %v4062_v63  ;;  %v388_v44 = vld [vmem:[%s3361_s17 + $0x4a8] sm:$0xff]  ;;  %v389_v46 = vld [vmem:[%s3361_s17 + $0x4b0] sm:$0xff]  ;;  %v4076_v6 = vsub.f32 %v373_v60, %v885_v17  ;;  %v4078_v1 = vsub.f32 %v374_v8, %v886_v48 }
  0xc1   : > { %v887_v62 = vld [vmem:[%s3367_s30 + $0x440] sm:$0xff]  ;;  %v888_v27 = vld [vmem:[%s3367_s30 + $0x448] sm:$0xff]  ;;  %v889_v45 = vld [vmem:[%s3367_s30 + $0x450] sm:$0xff] }
  0xc2   : > { %8112 = vst [vmem:[#allocation114_spill] sm:$0xff] %v4076_v6  ;;  %8113 = vst [vmem:[#allocation115_spill] sm:$0xff] %v4078_v1  ;;  %v390_v7 = vld [vmem:[%s3361_s17 + $0x4b8] sm:$0xff]  ;;  %v391_v49 = vld [vmem:[%s3361_s17 + $0x4c0] sm:$0xff]  ;;  %v4090_v30 = vsub.f32 %v375_v56, %v887_v62  ;;  %v4092_v60 = vsub.f32 %v376_v50, %v888_v27  ;;  %v4094_v8 = vsub.f32 %v377_v9, %v889_v45 }
  0xc3   : > { %v392_v28 = vld [vmem:[%s3361_s17 + $0x4c8] sm:$0xff]  ;;  %v890_v63 = vld [vmem:[%s3367_s30 + $0x458] sm:$0xff]  ;;  %v891_v36 = vld [vmem:[%s3367_s30 + $0x460] sm:$0xff] }
  0xc4   : > { %v892_v38 = vld [vmem:[%s3367_s30 + $0x468] sm:$0xff]  ;;  %8115 = vst [vmem:[#allocation117_spill] sm:$0xff] %v4090_v30  ;;  %8116 = vst [vmem:[#allocation118_spill] sm:$0xff] %v4092_v60  ;;  %v393_v17 = vld [vmem:[%s3361_s17 + $0x4d0] sm:$0xff]  ;;  %v4106_v62 = vsub.f32 %v378_v12, %v890_v63  ;;  %v4108_v50 = vsub.f32 %v379_v40, %v891_v36  ;;  %v4130_v36 = vmul.f32 %v3610_v55, %v3610_v55 }
  0xc5   : > { %8117 = vst [vmem:[#allocation119_spill] sm:$0xff] %v4094_v8  ;;  %v394_v48 = vld [vmem:[%s3361_s17 + $0x4d8] sm:$0xff]  ;;  %v395_v29 = vld [vmem:[%s3361_s17 + $0x4e0] sm:$0xff]  ;;  %v893_v1 = vld [vmem:[%s3367_s30 + $0x470] sm:$0xff]  ;;  %v4110_v9 = vsub.f32 %v380_v21, %v892_v38 }
  0xc6   : > { %v894_v6 = vld [vmem:[%s3367_s30 + $0x478] sm:$0xff]  ;;  %v895_v56 = vld [vmem:[%s3367_s30 + $0x480] sm:$0xff]  ;;  %8119 = vst [vmem:[#allocation121_spill] sm:$0xff] %v4108_v50  ;;  %v8121_v27 = vld [vmem:[#allocation25_spill] sm:$0xff]  ;;  %v4122_v63 = vsub.f32 %v381_v47, %v893_v1 }
  0xc7   : > { %8120 = vst [vmem:[#allocation122_spill] sm:$0xff] %v4110_v9  ;;  %v4114_v26 = vmul.f32 %v8121_v27, %v8121_v27  ;;  %v396_v45 = vld [vmem:[%s3361_s17 + $0x4e8] sm:$0xff]  ;;  %v397_v37 = vld [vmem:[%s3361_s17 + $0x4f0] sm:$0xff]  ;;  %v398_v8 = vld [vmem:[%s3361_s17 + $0x4f8] sm:$0xff]  ;;  %v4124_v40 = vsub.f32 %v382_v25, %v894_v6  ;;  %v4126_v21 = vsub.f32 %v383_v18, %v895_v56 }
  0xc8   : > { %v896_v60 = vld [vmem:[%s3367_s30 + $0x488] sm:$0xff]  ;;  %v897_v30 = vld [vmem:[%s3367_s30 + $0x490] sm:$0xff]  ;;  %v898_v12 = vld [vmem:[%s3367_s30 + $0x498] sm:$0xff]  ;;  %8123 = vst [vmem:[#allocation123_spill] sm:$0xff] %v4122_v63 }
  0xc9   : > { %8122 = vst [vmem:[#allocation25_spill] sm:$0xff] %v4114_v26  ;;  %8124 = vst [vmem:[#allocation124_spill] sm:$0xff] %v4124_v40  ;;  %v399_v38 = vld [vmem:[%s3361_s17 + $0x500] sm:$0xff]  ;;  %v400_v27 = vld [vmem:[%s3361_s17 + $0x508] sm:$0xff]  ;;  %v4138_v1 = vsub.f32 %v384_v51, %v896_v60  ;;  %v4140_v25 = vsub.f32 %v385_v54, %v897_v30  ;;  %v4142_v18 = vsub.f32 %v386_v19, %v898_v12 }
  0xca   : > { %8125 = vst [vmem:[#allocation125_spill] sm:$0xff] %v4126_v21  ;;  %8126 = vst [vmem:[#allocation126_spill] sm:$0xff] %v4130_v36  ;;  %v401_v26 = vld [vmem:[%s3361_s17 + $0x510] sm:$0xff]  ;;  %v899_v9 = vld [vmem:[%s3367_s30 + $0x4a0] sm:$0xff] }
  0xcb   : > { %v900_v50 = vld [vmem:[%s3367_s30 + $0x4a8] sm:$0xff]  ;;  %v901_v47 = vld [vmem:[%s3367_s30 + $0x4b0] sm:$0xff]  ;;  %8127 = vst [vmem:[#allocation127_spill] sm:$0xff] %v4138_v1  ;;  %8128 = vst [vmem:[#allocation128_spill] sm:$0xff] %v4140_v25  ;;  %v4154_v60 = vsub.f32 %v387_v61, %v899_v9 }
  0xcc   : > { %8129 = vst [vmem:[#allocation129_spill] sm:$0xff] %v4142_v18  ;;  %v8130_v6 = vld [vmem:[#allocation27_spill] sm:$0xff]  ;;  %v404_v21 = vld [vmem:[%s3361_s17 + $0x528] sm:$0xff]  ;;  %v4156_v54 = vsub.f32 %v388_v44, %v900_v50  ;;  %v4158_v19 = vsub.f32 %v389_v46, %v901_v47  ;;  %v905_v25 = vld [vmem:[%s3367_s30 + $0x4d0] sm:$0xff]  ;;  %v4178_v50 = vmul.f32 %v3626_v11, %v3626_v11 }
  0xcd   : > { %v4146_v55 = vmul.f32 %v8130_v6, %v8130_v6  ;;  %v402_v56 = vld [vmem:[%s3361_s17 + $0x518] sm:$0xff]  ;;  %v403_v36 = vld [vmem:[%s3361_s17 + $0x520] sm:$0xff]  ;;  %v904_v51 = vld [vmem:[%s3367_s30 + $0x4c8] sm:$0xff] }
  0xce   : > { %v902_v40 = vld [vmem:[%s3367_s30 + $0x4b8] sm:$0xff]  ;;  %v903_v63 = vld [vmem:[%s3367_s30 + $0x4c0] sm:$0xff]  ;;  %8132 = vst [vmem:[#allocation130_spill] sm:$0xff] %v4156_v54  ;;  %8133 = vst [vmem:[#allocation131_spill] sm:$0xff] %v4158_v19  ;;  %v4174_v46 = vsub.f32 %v392_v28, %v904_v51 }
  0xcf   : > { %8131 = vst [vmem:[#allocation27_spill] sm:$0xff] %v4146_v55  ;;  %v8134_v30 = vld [vmem:[#allocation28_spill] sm:$0xff]  ;;  %v405_v6 = vld [vmem:[%s3361_s17 + $0x530] sm:$0xff]  ;;  %v406_v55 = vld [vmem:[%s3361_s17 + $0x538] sm:$0xff]  ;;  %v4170_v9 = vsub.f32 %v390_v7, %v902_v40  ;;  %v4172_v44 = vsub.f32 %v391_v49, %v903_v63  ;;  %v4186_v40 = vsub.f32 %v393_v17, %v905_v25 }
  0xd0   : > { %v4162_v12 = vmul.f32 %v8134_v30, %v8134_v30  ;;  %v407_v18 = vld [vmem:[%s3361_s17 + $0x540] sm:$0xff]  ;;  %v906_v1 = vld [vmem:[%s3367_s30 + $0x4d8] sm:$0xff]  ;;  %8138 = vst [vmem:[#allocation134_spill] sm:$0xff] %v4174_v46  ;;  %8139 = vst [vmem:[#allocation135_spill] sm:$0xff] %v4178_v50 }
  0xd1   : > { %v907_v61 = vld [vmem:[%s3367_s30 + $0x4e0] sm:$0xff]  ;;  %8136 = vst [vmem:[#allocation132_spill] sm:$0xff] %v4170_v9  ;;  %8137 = vst [vmem:[#allocation133_spill] sm:$0xff] %v4172_v44  ;;  %v408_v47 = vld [vmem:[%s3361_s17 + $0x548] sm:$0xff]  ;;  %v4188_v49 = vsub.f32 %v394_v48, %v906_v1 }
  0xd2   : > { %8135 = vst [vmem:[#allocation28_spill] sm:$0xff] %v4162_v12  ;;  %v409_v30 = vld [vmem:[%s3361_s17 + $0x550] sm:$0xff]  ;;  %v410_v12 = vld [vmem:[%s3361_s17 + $0x558] sm:$0xff]  ;;  %v908_v19 = vld [vmem:[%s3367_s30 + $0x4e8] sm:$0xff]  ;;  %v4190_v28 = vsub.f32 %v395_v29, %v907_v61 }
  0xd3   : > { %v909_v54 = vld [vmem:[%s3367_s30 + $0x4f0] sm:$0xff]  ;;  %v910_v7 = vld [vmem:[%s3367_s30 + $0x4f8] sm:$0xff]  ;;  %8140 = vst [vmem:[#allocation136_spill] sm:$0xff] %v4186_v40  ;;  %8141 = vst [vmem:[#allocation137_spill] sm:$0xff] %v4188_v49  ;;  %v4202_v25 = vsub.f32 %v396_v45, %v908_v19 }
  0xd4   : > { %8142 = vst [vmem:[#allocation138_spill] sm:$0xff] %v4190_v28  ;;  %v8143_v63 = vld [vmem:[#allocation30_spill] sm:$0xff]  ;;  %v411_v51 = vld [vmem:[%s3361_s17 + $0x560] sm:$0xff]  ;;  %v412_v50 = vld [vmem:[%s3361_s17 + $0x568] sm:$0xff]  ;;  %v4204_v48 = vsub.f32 %v397_v37, %v909_v54  ;;  %v4206_v29 = vsub.f32 %v398_v8, %v910_v7  ;;  %v4226_v54 = vmul.f32 %v3642_v34, %v3642_v34 }
  0xd5   : > { %v4194_v11 = vmul.f32 %v8143_v63, %v8143_v63  ;;  %v413_v46 = vld [vmem:[%s3361_s17 + $0x570] sm:$0xff]  ;;  %v911_v44 = vld [vmem:[%s3367_s30 + $0x500] sm:$0xff]  ;;  %v912_v9 = vld [vmem:[%s3367_s30 + $0x508] sm:$0xff] }
  0xd6   : > { %v913_v17 = vld [vmem:[%s3367_s30 + $0x510] sm:$0xff]  ;;  %8145 = vst [vmem:[#allocation139_spill] sm:$0xff] %v4204_v48  ;;  %8146 = vst [vmem:[#allocation140_spill] sm:$0xff] %v4206_v29  ;;  %v8147_v1 = vld [vmem:[#allocation31_spill] sm:$0xff]  ;;  %v4218_v19 = vsub.f32 %v399_v38, %v911_v44  ;;  %v4220_v37 = vsub.f32 %v400_v27, %v912_v9 }
  0xd7   : > { %8144 = vst [vmem:[#allocation30_spill] sm:$0xff] %v4194_v11  ;;  %v4210_v61 = vmul.f32 %v8147_v1, %v8147_v1  ;;  %v414_v63 = vld [vmem:[%s3361_s17 + $0x578] sm:$0xff]  ;;  %v415_v11 = vld [vmem:[%s3361_s17 + $0x580] sm:$0xff]  ;;  %v416_v28 = vld [vmem:[%s3361_s17 + $0x588] sm:$0xff]  ;;  %v4222_v8 = vsub.f32 %v401_v26, %v913_v17 }
  0xd8   : > { %v914_v49 = vld [vmem:[%s3367_s30 + $0x518] sm:$0xff]  ;;  %v915_v40 = vld [vmem:[%s3367_s30 + $0x520] sm:$0xff]  ;;  %v916_v45 = vld [vmem:[%s3367_s30 + $0x528] sm:$0xff]  ;;  %8149 = vst [vmem:[#allocation141_spill] sm:$0xff] %v4218_v19 }
  0xd9   : > { %8148 = vst [vmem:[#allocation31_spill] sm:$0xff] %v4210_v61  ;;  %8150 = vst [vmem:[#allocation142_spill] sm:$0xff] %v4220_v37  ;;  %v417_v7 = vld [vmem:[%s3361_s17 + $0x590] sm:$0xff]  ;;  %v418_v1 = vld [vmem:[%s3361_s17 + $0x598] sm:$0xff]  ;;  %v4234_v44 = vsub.f32 %v402_v56, %v914_v49  ;;  %v4236_v27 = vsub.f32 %v403_v36, %v915_v40  ;;  %v4238_v26 = vsub.f32 %v404_v21, %v916_v45 }
  0xda   : > { %8151 = vst [vmem:[#allocation143_spill] sm:$0xff] %v4222_v8  ;;  %8152 = vst [vmem:[#allocation144_spill] sm:$0xff] %v4226_v54  ;;  %v419_v61 = vld [vmem:[%s3361_s17 + $0x5a0] sm:$0xff]  ;;  %v917_v29 = vld [vmem:[%s3367_s30 + $0x530] sm:$0xff] }
  0xdb   : > { %v918_v48 = vld [vmem:[%s3367_s30 + $0x538] sm:$0xff]  ;;  %v919_v38 = vld [vmem:[%s3367_s30 + $0x540] sm:$0xff]  ;;  %8153 = vst [vmem:[#allocation145_spill] sm:$0xff] %v4234_v44  ;;  %8154 = vst [vmem:[#allocation146_spill] sm:$0xff] %v4236_v27  ;;  %v4250_v49 = vsub.f32 %v405_v6, %v917_v29 }
  0xdc   : > { %8155 = vst [vmem:[#allocation147_spill] sm:$0xff] %v4238_v26  ;;  %v8156_v9 = vld [vmem:[#allocation33_spill] sm:$0xff]  ;;  %v422_v8 = vld [vmem:[%s3361_s17 + $0x5b8] sm:$0xff]  ;;  %v4252_v36 = vsub.f32 %v406_v55, %v918_v48  ;;  %v4254_v21 = vsub.f32 %v407_v18, %v919_v38  ;;  %v923_v27 = vld [vmem:[%s3367_s30 + $0x560] sm:$0xff]  ;;  %v4274_v48 = vmul.f32 %v3658_v2, %v3658_v2 }
  0xdd   : > { %v4242_v34 = vmul.f32 %v8156_v9, %v8156_v9  ;;  %v420_v17 = vld [vmem:[%s3361_s17 + $0x5a8] sm:$0xff]  ;;  %v421_v54 = vld [vmem:[%s3361_s17 + $0x5b0] sm:$0xff]  ;;  %v922_v56 = vld [vmem:[%s3367_s30 + $0x558] sm:$0xff] }
  0xde   : > { %v920_v37 = vld [vmem:[%s3367_s30 + $0x548] sm:$0xff]  ;;  %v921_v19 = vld [vmem:[%s3367_s30 + $0x550] sm:$0xff]  ;;  %8158 = vst [vmem:[#allocation148_spill] sm:$0xff] %v4252_v36  ;;  %8159 = vst [vmem:[#allocation149_spill] sm:$0xff] %v4254_v21  ;;  %v4270_v18 = vsub.f32 %v410_v12, %v922_v56 }
  0xdf   : > { %8157 = vst [vmem:[#allocation33_spill] sm:$0xff] %v4242_v34  ;;  %v8160_v40 = vld [vmem:[#allocation34_spill] sm:$0xff]  ;;  %v423_v9 = vld [vmem:[%s3361_s17 + $0x5c0] sm:$0xff]  ;;  %v424_v34 = vld [vmem:[%s3361_s17 + $0x5c8] sm:$0xff]  ;;  %v4266_v29 = vsub.f32 %v408_v47, %v920_v37  ;;  %v4268_v55 = vsub.f32 %v409_v30, %v921_v19  ;;  %v4282_v37 = vsub.f32 %v411_v51, %v923_v27 }
  0xe0   : > { %v4258_v45 = vmul.f32 %v8160_v40, %v8160_v40  ;;  %v425_v26 = vld [vmem:[%s3361_s17 + $0x5d0] sm:$0xff]  ;;  %v924_v44 = vld [vmem:[%s3367_s30 + $0x568] sm:$0xff]  ;;  %8164 = vst [vmem:[#allocation152_spill] sm:$0xff] %v4270_v18  ;;  %8165 = vst [vmem:[#allocation153_spill] sm:$0xff] %v4274_v48 }
  0xe1   : > { %v925_v6 = vld [vmem:[%s3367_s30 + $0x570] sm:$0xff]  ;;  %8162 = vst [vmem:[#allocation150_spill] sm:$0xff] %v4266_v29  ;;  %8163 = vst [vmem:[#allocation151_spill] sm:$0xff] %v4268_v55  ;;  %v426_v38 = vld [vmem:[%s3361_s17 + $0x5d8] sm:$0xff]  ;;  %v4284_v30 = vsub.f32 %v412_v50, %v924_v44 }
  0xe2   : > { %8161 = vst [vmem:[#allocation34_spill] sm:$0xff] %v4258_v45  ;;  %v427_v40 = vld [vmem:[%s3361_s17 + $0x5e0] sm:$0xff]  ;;  %v428_v45 = vld [vmem:[%s3361_s17 + $0x5e8] sm:$0xff]  ;;  %v926_v21 = vld [vmem:[%s3367_s30 + $0x578] sm:$0xff]  ;;  %v4286_v12 = vsub.f32 %v413_v46, %v925_v6 }
  0xe3   : > { %v927_v36 = vld [vmem:[%s3367_s30 + $0x580] sm:$0xff]  ;;  %v928_v47 = vld [vmem:[%s3367_s30 + $0x588] sm:$0xff]  ;;  %8166 = vst [vmem:[#allocation154_spill] sm:$0xff] %v4282_v37  ;;  %8167 = vst [vmem:[#allocation155_spill] sm:$0xff] %v4284_v30  ;;  %v4298_v27 = vsub.f32 %v414_v63, %v926_v21 }
  0xe4   : > { %8168 = vst [vmem:[#allocation156_spill] sm:$0xff] %v4286_v12  ;;  %v8169_v19 = vld [vmem:[#allocation36_spill] sm:$0xff]  ;;  %v429_v56 = vld [vmem:[%s3361_s17 + $0x5f0] sm:$0xff]  ;;  %v430_v48 = vld [vmem:[%s3361_s17 + $0x5f8] sm:$0xff]  ;;  %v4300_v50 = vsub.f32 %v415_v11, %v927_v36  ;;  %v4302_v46 = vsub.f32 %v416_v28, %v928_v47  ;;  %v4322_v36 = vmul.f32 %v3674_v0, %v3674_v0 }
  0xe5   : > { %v4290_v2 = vmul.f32 %v8169_v19, %v8169_v19  ;;  %v431_v18 = vld [vmem:[%s3361_s17 + $0x600] sm:$0xff]  ;;  %v929_v55 = vld [vmem:[%s3367_s30 + $0x590] sm:$0xff]  ;;  %v930_v29 = vld [vmem:[%s3367_s30 + $0x598] sm:$0xff] }
  0xe6   : > { %v931_v51 = vld [vmem:[%s3367_s30 + $0x5a0] sm:$0xff]  ;;  %8171 = vst [vmem:[#allocation157_spill] sm:$0xff] %v4300_v50  ;;  %8172 = vst [vmem:[#allocation158_spill] sm:$0xff] %v4302_v46  ;;  %v8173_v44 = vld [vmem:[#allocation37_spill] sm:$0xff]  ;;  %v4314_v21 = vsub.f32 %v417_v7, %v929_v55  ;;  %v4316_v11 = vsub.f32 %v418_v1, %v930_v29 }
  0xe7   : > { %8170 = vst [vmem:[#allocation36_spill] sm:$0xff] %v4290_v2  ;;  %v4306_v6 = vmul.f32 %v8173_v44, %v8173_v44  ;;  %v432_v19 = vld [vmem:[%s3361_s17 + $0x608] sm:$0xff]  ;;  %v433_v2 = vld [vmem:[%s3361_s17 + $0x610] sm:$0xff]  ;;  %v434_v12 = vld [vmem:[%s3361_s17 + $0x618] sm:$0xff]  ;;  %v4318_v28 = vsub.f32 %v419_v61, %v931_v51 }
  0xe8   : > { %v932_v30 = vld [vmem:[%s3367_s30 + $0x5a8] sm:$0xff]  ;;  %v933_v37 = vld [vmem:[%s3367_s30 + $0x5b0] sm:$0xff]  ;;  %v934_v63 = vld [vmem:[%s3367_s30 + $0x5b8] sm:$0xff]  ;;  %8175 = vst [vmem:[#allocation159_spill] sm:$0xff] %v4314_v21 }
  0xe9   : > { %8174 = vst [vmem:[#allocation37_spill] sm:$0xff] %v4306_v6  ;;  %8176 = vst [vmem:[#allocation160_spill] sm:$0xff] %v4316_v11  ;;  %v435_v47 = vld [vmem:[%s3361_s17 + $0x620] sm:$0xff]  ;;  %v436_v44 = vld [vmem:[%s3361_s17 + $0x628] sm:$0xff]  ;;  %v4330_v55 = vsub.f32 %v420_v17, %v932_v30  ;;  %v4332_v1 = vsub.f32 %v421_v54, %v933_v37  ;;  %v4334_v61 = vsub.f32 %v422_v8, %v934_v63 }
  0xea   : > { %8177 = vst [vmem:[#allocation161_spill] sm:$0xff] %v4318_v28  ;;  %8178 = vst [vmem:[#allocation162_spill] sm:$0xff] %v4322_v36  ;;  %v437_v6 = vld [vmem:[%s3361_s17 + $0x630] sm:$0xff]  ;;  %v935_v46 = vld [vmem:[%s3367_s30 + $0x5c0] sm:$0xff] }
  0xeb   : > { %v936_v50 = vld [vmem:[%s3367_s30 + $0x5c8] sm:$0xff]  ;;  %v937_v7 = vld [vmem:[%s3367_s30 + $0x5d0] sm:$0xff]  ;;  %8179 = vst [vmem:[#allocation163_spill] sm:$0xff] %v4330_v55  ;;  %8180 = vst [vmem:[#allocation164_spill] sm:$0xff] %v4332_v1  ;;  %v4346_v30 = vsub.f32 %v423_v9, %v935_v46 }
  0xec   : > { %8181 = vst [vmem:[#allocation165_spill] sm:$0xff] %v4334_v61  ;;  %v8182_v29 = vld [vmem:[#allocation39_spill] sm:$0xff]  ;;  %v440_v28 = vld [vmem:[%s3361_s17 + $0x648] sm:$0xff]  ;;  %v4348_v54 = vsub.f32 %v424_v34, %v936_v50  ;;  %v4350_v8 = vsub.f32 %v425_v26, %v937_v7  ;;  %v941_v1 = vld [vmem:[%s3367_s30 + $0x5f0] sm:$0xff]  ;;  %v4370_v50 = vmul.f32 %v3690_v20, %v3690_v20 }
  0xed   : > { %v4338_v0 = vmul.f32 %v8182_v29, %v8182_v29  ;;  %v438_v51 = vld [vmem:[%s3361_s17 + $0x638] sm:$0xff]  ;;  %v439_v36 = vld [vmem:[%s3361_s17 + $0x640] sm:$0xff]  ;;  %v940_v17 = vld [vmem:[%s3367_s30 + $0x5e8] sm:$0xff] }
  0xee   : > { %v938_v11 = vld [vmem:[%s3367_s30 + $0x5d8] sm:$0xff]  ;;  %v939_v21 = vld [vmem:[%s3367_s30 + $0x5e0] sm:$0xff]  ;;  %8184 = vst [vmem:[#allocation166_spill] sm:$0xff] %v4348_v54  ;;  %8185 = vst [vmem:[#allocation167_spill] sm:$0xff] %v4350_v8  ;;  %v4366_v26 = vsub.f32 %v428_v45, %v940_v17 }
  0xef   : > { %8183 = vst [vmem:[#allocation39_spill] sm:$0xff] %v4338_v0  ;;  %v8186_v37 = vld [vmem:[#allocation40_spill] sm:$0xff]  ;;  %v441_v29 = vld [vmem:[%s3361_s17 + $0x650] sm:$0xff]  ;;  %v442_v0 = vld [vmem:[%s3361_s17 + $0x658] sm:$0xff]  ;;  %v4362_v46 = vsub.f32 %v426_v38, %v938_v11  ;;  %v4364_v34 = vsub.f32 %v427_v40, %v939_v21  ;;  %v4378_v11 = vsub.f32 %v429_v56, %v941_v1 }
  0xf0   : > { %v4354_v63 = vmul.f32 %v8186_v37, %v8186_v37  ;;  %v443_v61 = vld [vmem:[%s3361_s17 + $0x660] sm:$0xff]  ;;  %v942_v55 = vld [vmem:[%s3367_s30 + $0x5f8] sm:$0xff]  ;;  %8190 = vst [vmem:[#allocation170_spill] sm:$0xff] %v4366_v26  ;;  %8191 = vst [vmem:[#allocation171_spill] sm:$0xff] %v4370_v50 }
  0xf1   : > { %v943_v9 = vld [vmem:[%s3367_s30 + $0x600] sm:$0xff]  ;;  %8188 = vst [vmem:[#allocation168_spill] sm:$0xff] %v4362_v46  ;;  %8189 = vst [vmem:[#allocation169_spill] sm:$0xff] %v4364_v34  ;;  %v444_v7 = vld [vmem:[%s3361_s17 + $0x668] sm:$0xff]  ;;  %v4380_v40 = vsub.f32 %v430_v48, %v942_v55 }
  0xf2   : > { %8187 = vst [vmem:[#allocation40_spill] sm:$0xff] %v4354_v63  ;;  %v445_v37 = vld [vmem:[%s3361_s17 + $0x670] sm:$0xff]  ;;  %v446_v63 = vld [vmem:[%s3361_s17 + $0x678] sm:$0xff]  ;;  %v944_v8 = vld [vmem:[%s3367_s30 + $0x608] sm:$0xff]  ;;  %v4382_v45 = vsub.f32 %v431_v18, %v943_v9 }
  0xf3   : > { %v945_v54 = vld [vmem:[%s3367_s30 + $0x610] sm:$0xff]  ;;  %v946_v38 = vld [vmem:[%s3367_s30 + $0x618] sm:$0xff]  ;;  %8192 = vst [vmem:[#allocation172_spill] sm:$0xff] %v4378_v11  ;;  %8193 = vst [vmem:[#allocation173_spill] sm:$0xff] %v4380_v40  ;;  %v4394_v1 = vsub.f32 %v432_v19, %v944_v8 }
  0xf4   : > { %8194 = vst [vmem:[#allocation174_spill] sm:$0xff] %v4382_v45  ;;  %v8195_v21 = vld [vmem:[#allocation42_spill] sm:$0xff]  ;;  %v447_v17 = vld [vmem:[%s3361_s17 + $0x680] sm:$0xff]  ;;  %v448_v50 = vld [vmem:[%s3361_s17 + $0x688] sm:$0xff]  ;;  %v4396_v48 = vsub.f32 %v433_v2, %v945_v54  ;;  %v4398_v18 = vsub.f32 %v434_v12, %v946_v38  ;;  %v4418_v54 = vmul.f32 %v3706_v35, %v3706_v35 }
  0xf5   : > { %v4386_v20 = vmul.f32 %v8195_v21, %v8195_v21  ;;  %v449_v26 = vld [vmem:[%s3361_s17 + $0x690] sm:$0xff]  ;;  %v947_v34 = vld [vmem:[%s3367_s30 + $0x620] sm:$0xff]  ;;  %v948_v46 = vld [vmem:[%s3367_s30 + $0x628] sm:$0xff] }
  0xf6   : > { %v949_v56 = vld [vmem:[%s3367_s30 + $0x630] sm:$0xff]  ;;  %8197 = vst [vmem:[#allocation175_spill] sm:$0xff] %v4396_v48  ;;  %8198 = vst [vmem:[#allocation176_spill] sm:$0xff] %v4398_v18  ;;  %v8199_v55 = vld [vmem:[#allocation43_spill] sm:$0xff]  ;;  %v4410_v8 = vsub.f32 %v435_v47, %v947_v34  ;;  %v4412_v2 = vsub.f32 %v436_v44, %v948_v46 }
  0xf7   : > { %8196 = vst [vmem:[#allocation42_spill] sm:$0xff] %v4386_v20  ;;  %v4402_v9 = vmul.f32 %v8199_v55, %v8199_v55  ;;  %v450_v21 = vld [vmem:[%s3361_s17 + $0x698] sm:$0xff]  ;;  %v451_v20 = vld [vmem:[%s3361_s17 + $0x6a0] sm:$0xff]  ;;  %v452_v45 = vld [vmem:[%s3361_s17 + $0x6a8] sm:$0xff]  ;;  %v4414_v12 = vsub.f32 %v437_v6, %v949_v56 }
  0xf8   : > { %v950_v40 = vld [vmem:[%s3367_s30 + $0x638] sm:$0xff]  ;;  %v951_v11 = vld [vmem:[%s3367_s30 + $0x640] sm:$0xff]  ;;  %v952_v19 = vld [vmem:[%s3367_s30 + $0x648] sm:$0xff]  ;;  %8201 = vst [vmem:[#allocation177_spill] sm:$0xff] %v4410_v8 }
  0xf9   : > { %8200 = vst [vmem:[#allocation43_spill] sm:$0xff] %v4402_v9  ;;  %8202 = vst [vmem:[#allocation178_spill] sm:$0xff] %v4412_v2  ;;  %v453_v38 = vld [vmem:[%s3361_s17 + $0x6b0] sm:$0xff]  ;;  %v454_v55 = vld [vmem:[%s3361_s17 + $0x6b8] sm:$0xff]  ;;  %v4426_v34 = vsub.f32 %v438_v51, %v950_v40  ;;  %v4428_v44 = vsub.f32 %v439_v36, %v951_v11  ;;  %v4430_v6 = vsub.f32 %v440_v28, %v952_v19 }
  0xfa   : > { %8203 = vst [vmem:[#allocation179_spill] sm:$0xff] %v4414_v12  ;;  %8204 = vst [vmem:[#allocation180_spill] sm:$0xff] %v4418_v54  ;;  %v455_v9 = vld [vmem:[%s3361_s17 + $0x6c0] sm:$0xff]  ;;  %v953_v18 = vld [vmem:[%s3367_s30 + $0x650] sm:$0xff] }
  0xfb   : > { %v954_v48 = vld [vmem:[%s3367_s30 + $0x658] sm:$0xff]  ;;  %v955_v47 = vld [vmem:[%s3367_s30 + $0x660] sm:$0xff]  ;;  %8205 = vst [vmem:[#allocation181_spill] sm:$0xff] %v4426_v34  ;;  %8206 = vst [vmem:[#allocation182_spill] sm:$0xff] %v4428_v44  ;;  %v4442_v40 = vsub.f32 %v441_v29, %v953_v18 }
  0xfc   : > { %8207 = vst [vmem:[#allocation183_spill] sm:$0xff] %v4430_v6  ;;  %v8208_v46 = vld [vmem:[#allocation45_spill] sm:$0xff]  ;;  %v458_v12 = vld [vmem:[%s3361_s17 + $0x6d8] sm:$0xff]  ;;  %v4444_v36 = vsub.f32 %v442_v0, %v954_v48  ;;  %v4446_v28 = vsub.f32 %v443_v61, %v955_v47  ;;  %v959_v44 = vld [vmem:[%s3367_s30 + $0x680] sm:$0xff]  ;;  %v4466_v48 = vmul.f32 %v3722_v39, %v3722_v39 }
  0xfd   : > { %v4434_v35 = vmul.f32 %v8208_v46, %v8208_v46  ;;  %v456_v56 = vld [vmem:[%s3361_s17 + $0x6c8] sm:$0xff]  ;;  %v457_v54 = vld [vmem:[%s3361_s17 + $0x6d0] sm:$0xff]  ;;  %v958_v51 = vld [vmem:[%s3367_s30 + $0x678] sm:$0xff] }
  0xfe   : > { %v956_v2 = vld [vmem:[%s3367_s30 + $0x668] sm:$0xff]  ;;  %v957_v8 = vld [vmem:[%s3367_s30 + $0x670] sm:$0xff]  ;;  %8210 = vst [vmem:[#allocation184_spill] sm:$0xff] %v4444_v36  ;;  %8211 = vst [vmem:[#allocation185_spill] sm:$0xff] %v4446_v28  ;;  %v4462_v61 = vsub.f32 %v446_v63, %v958_v51 }
  0xff   : > { %8209 = vst [vmem:[#allocation45_spill] sm:$0xff] %v4434_v35  ;;  %v8212_v11 = vld [vmem:[#allocation46_spill] sm:$0xff]  ;;  %v459_v46 = vld [vmem:[%s3361_s17 + $0x6e0] sm:$0xff]  ;;  %v460_v35 = vld [vmem:[%s3361_s17 + $0x6e8] sm:$0xff]  ;;  %v4458_v18 = vsub.f32 %v444_v7, %v956_v2  ;;  %v4460_v0 = vsub.f32 %v445_v37, %v957_v8  ;;  %v4474_v2 = vsub.f32 %v447_v17, %v959_v44 }
 0x100   : > { %v4450_v19 = vmul.f32 %v8212_v11, %v8212_v11  ;;  %v461_v6 = vld [vmem:[%s3361_s17 + $0x6f0] sm:$0xff]  ;;  %v960_v34 = vld [vmem:[%s3367_s30 + $0x688] sm:$0xff]  ;;  %8216 = vst [vmem:[#allocation188_spill] sm:$0xff] %v4462_v61  ;;  %8217 = vst [vmem:[#allocation189_spill] sm:$0xff] %v4466_v48 }
 0x101   : > { %v961_v29 = vld [vmem:[%s3367_s30 + $0x690] sm:$0xff]  ;;  %8214 = vst [vmem:[#allocation186_spill] sm:$0xff] %v4458_v18  ;;  %8215 = vst [vmem:[#allocation187_spill] sm:$0xff] %v4460_v0  ;;  %v462_v47 = vld [vmem:[%s3361_s17 + $0x6f8] sm:$0xff]  ;;  %v4476_v37 = vsub.f32 %v448_v50, %v960_v34 }
 0x102   : > { %8213 = vst [vmem:[#allocation46_spill] sm:$0xff] %v4450_v19  ;;  %v463_v11 = vld [vmem:[%s3361_s17 + $0x700] sm:$0xff]  ;;  %v464_v19 = vld [vmem:[%s3361_s17 + $0x708] sm:$0xff]  ;;  %v962_v28 = vld [vmem:[%s3367_s30 + $0x698] sm:$0xff]  ;;  %v4478_v63 = vsub.f32 %v449_v26, %v961_v29 }
 0x103   : > { %v963_v36 = vld [vmem:[%s3367_s30 + $0x6a0] sm:$0xff]  ;;  %v964_v7 = vld [vmem:[%s3367_s30 + $0x6a8] sm:$0xff]  ;;  %8218 = vst [vmem:[#allocation190_spill] sm:$0xff] %v4474_v2  ;;  %8219 = vst [vmem:[#allocation191_spill] sm:$0xff] %v4476_v37  ;;  %v4490_v44 = vsub.f32 %v450_v21, %v962_v28 }
 0x104   : > { %8220 = vst [vmem:[#allocation192_spill] sm:$0xff] %v4478_v63  ;;  %v8221_v8 = vld [vmem:[#allocation48_spill] sm:$0xff]  ;;  %v465_v51 = vld [vmem:[%s3361_s17 + $0x710] sm:$0xff]  ;;  %v466_v48 = vld [vmem:[%s3361_s17 + $0x718] sm:$0xff]  ;;  %v4492_v50 = vsub.f32 %v451_v20, %v963_v36  ;;  %v4494_v26 = vsub.f32 %v452_v45, %v964_v7  ;;  %v4514_v36 = vmul.f32 %v3738_v16, %v3738_v16 }
 0x105   : > { %v4482_v39 = vmul.f32 %v8221_v8, %v8221_v8  ;;  %v467_v61 = vld [vmem:[%s3361_s17 + $0x720] sm:$0xff]  ;;  %v965_v0 = vld [vmem:[%s3367_s30 + $0x6b0] sm:$0xff]  ;;  %v966_v18 = vld [vmem:[%s3367_s30 + $0x6b8] sm:$0xff] }
 0x106   : > { %v967_v17 = vld [vmem:[%s3367_s30 + $0x6c0] sm:$0xff]  ;;  %8223 = vst [vmem:[#allocation193_spill] sm:$0xff] %v4492_v50  ;;  %8224 = vst [vmem:[#allocation194_spill] sm:$0xff] %v4494_v26  ;;  %v8225_v34 = vld [vmem:[#allocation49_spill] sm:$0xff]  ;;  %v4506_v28 = vsub.f32 %v453_v38, %v965_v0  ;;  %v4508_v20 = vsub.f32 %v454_v55, %v966_v18 }
 0x107   : > { %8222 = vst [vmem:[#allocation48_spill] sm:$0xff] %v4482_v39  ;;  %v4498_v29 = vmul.f32 %v8225_v34, %v8225_v34  ;;  %v468_v8 = vld [vmem:[%s3361_s17 + $0x728] sm:$0xff]  ;;  %v469_v39 = vld [vmem:[%s3361_s17 + $0x730] sm:$0xff]  ;;  %v470_v63 = vld [vmem:[%s3361_s17 + $0x738] sm:$0xff]  ;;  %v4510_v45 = vsub.f32 %v455_v9, %v967_v17 }
 0x108   : > { %v968_v37 = vld [vmem:[%s3367_s30 + $0x6c8] sm:$0xff]  ;;  %v969_v2 = vld [vmem:[%s3367_s30 + $0x6d0] sm:$0xff]  ;;  %v970_v21 = vld [vmem:[%s3367_s30 + $0x6d8] sm:$0xff]  ;;  %8227 = vst [vmem:[#allocation195_spill] sm:$0xff] %v4506_v28 }
 0x109   : > { %8226 = vst [vmem:[#allocation49_spill] sm:$0xff] %v4498_v29  ;;  %8228 = vst [vmem:[#allocation196_spill] sm:$0xff] %v4508_v20  ;;  %v471_v7 = vld [vmem:[%s3361_s17 + $0x740] sm:$0xff]  ;;  %v472_v34 = vld [vmem:[%s3361_s17 + $0x748] sm:$0xff]  ;;  %v4522_v0 = vsub.f32 %v456_v56, %v968_v37  ;;  %v4524_v55 = vsub.f32 %v457_v54, %v969_v2  ;;  %v4526_v9 = vsub.f32 %v458_v12, %v970_v21 }
 0x10a   : > { %8229 = vst [vmem:[#allocation197_spill] sm:$0xff] %v4510_v45  ;;  %8230 = vst [vmem:[#allocation198_spill] sm:$0xff] %v4514_v36  ;;  %v473_v29 = vld [vmem:[%s3361_s17 + $0x750] sm:$0xff]  ;;  %v971_v26 = vld [vmem:[%s3367_s30 + $0x6e0] sm:$0xff] }
 0x10b   : > { %v972_v50 = vld [vmem:[%s3367_s30 + $0x6e8] sm:$0xff]  ;;  %v973_v38 = vld [vmem:[%s3367_s30 + $0x6f0] sm:$0xff]  ;;  %8231 = vst [vmem:[#allocation199_spill] sm:$0xff] %v4522_v0  ;;  %8232 = vst [vmem:[#allocation200_spill] sm:$0xff] %v4524_v55  ;;  %v4538_v37 = vsub.f32 %v459_v46, %v971_v26 }
 0x10c   : > { %8233 = vst [vmem:[#allocation201_spill] sm:$0xff] %v4526_v9  ;;  %v8234_v18 = vld [vmem:[#allocation51_spill] sm:$0xff]  ;;  %v476_v45 = vld [vmem:[%s3361_s17 + $0x768] sm:$0xff]  ;;  %v4540_v54 = vsub.f32 %v460_v35, %v972_v50  ;;  %v4542_v12 = vsub.f32 %v461_v6, %v973_v38  ;;  %v977_v55 = vld [vmem:[%s3367_s30 + $0x710] sm:$0xff]  ;;  %v4562_v50 = vmul.f32 %v3754_v57, %v3754_v57 }
 0x10d   : > { %v4530_v16 = vmul.f32 %v8234_v18, %v8234_v18  ;;  %v474_v17 = vld [vmem:[%s3361_s17 + $0x758] sm:$0xff]  ;;  %v475_v36 = vld [vmem:[%s3361_s17 + $0x760] sm:$0xff]  ;;  %v976_v56 = vld [vmem:[%s3367_s30 + $0x708] sm:$0xff] }
 0x10e   : > { %v974_v20 = vld [vmem:[%s3367_s30 + $0x6f8] sm:$0xff]  ;;  %v975_v28 = vld [vmem:[%s3367_s30 + $0x700] sm:$0xff]  ;;  %8236 = vst [vmem:[#allocation202_spill] sm:$0xff] %v4540_v54  ;;  %8237 = vst [vmem:[#allocation203_spill] sm:$0xff] %v4542_v12  ;;  %v4558_v6 = vsub.f32 %v464_v19, %v976_v56 }
 0x10f   : > { %8235 = vst [vmem:[#allocation51_spill] sm:$0xff] %v4530_v16  ;;  %v8238_v2 = vld [vmem:[#allocation52_spill] sm:$0xff]  ;;  %v477_v18 = vld [vmem:[%s3361_s17 + $0x770] sm:$0xff]  ;;  %v478_v16 = vld [vmem:[%s3361_s17 + $0x778] sm:$0xff]  ;;  %v4554_v26 = vsub.f32 %v462_v47, %v974_v20  ;;  %v4556_v35 = vsub.f32 %v463_v11, %v975_v28  ;;  %v4570_v20 = vsub.f32 %v465_v51, %v977_v55 }
 0x110   : > { %v4546_v21 = vmul.f32 %v8238_v2, %v8238_v2  ;;  %v479_v9 = vld [vmem:[%s3361_s17 + $0x780] sm:$0xff]  ;;  %v978_v0 = vld [vmem:[%s3367_s30 + $0x718] sm:$0xff]  ;;  %8242 = vst [vmem:[#allocation206_spill] sm:$0xff] %v4558_v6  ;;  %8243 = vst [vmem:[#allocation207_spill] sm:$0xff] %v4562_v50 }
 0x111   : > { %v979_v46 = vld [vmem:[%s3367_s30 + $0x720] sm:$0xff]  ;;  %8240 = vst [vmem:[#allocation204_spill] sm:$0xff] %v4554_v26  ;;  %8241 = vst [vmem:[#allocation205_spill] sm:$0xff] %v4556_v35  ;;  %v480_v38 = vld [vmem:[%s3361_s17 + $0x788] sm:$0xff]  ;;  %v4572_v11 = vsub.f32 %v466_v48, %v978_v0 }
 0x112   : > { %8239 = vst [vmem:[#allocation52_spill] sm:$0xff] %v4546_v21  ;;  %v481_v2 = vld [vmem:[%s3361_s17 + $0x790] sm:$0xff]  ;;  %v482_v21 = vld [vmem:[%s3361_s17 + $0x798] sm:$0xff]  ;;  %v980_v12 = vld [vmem:[%s3367_s30 + $0x728] sm:$0xff]  ;;  %v4574_v19 = vsub.f32 %v467_v61, %v979_v46 }
 0x113   : > { %v981_v54 = vld [vmem:[%s3367_s30 + $0x730] sm:$0xff]  ;;  %v982_v47 = vld [vmem:[%s3367_s30 + $0x738] sm:$0xff]  ;;  %8244 = vst [vmem:[#allocation208_spill] sm:$0xff] %v4570_v20  ;;  %8245 = vst [vmem:[#allocation209_spill] sm:$0xff] %v4572_v11  ;;  %v4586_v55 = vsub.f32 %v468_v8, %v980_v12 }
 0x114   : > { %8246 = vst [vmem:[#allocation210_spill] sm:$0xff] %v4574_v19  ;;  %v8247_v28 = vld [vmem:[#allocation54_spill] sm:$0xff]  ;;  %v483_v56 = vld [vmem:[%s3361_s17 + $0x7a0] sm:$0xff]  ;;  %v484_v50 = vld [vmem:[%s3361_s17 + $0x7a8] sm:$0xff]  ;;  %v4588_v48 = vsub.f32 %v469_v39, %v981_v54  ;;  %v4590_v61 = vsub.f32 %v470_v63, %v982_v47  ;;  %v4610_v54 = vmul.f32 %v3770_v58, %v3770_v58 }
 0x115   : > { %v4578_v57 = vmul.f32 %v8247_v28, %v8247_v28  ;;  %v485_v6 = vld [vmem:[%s3361_s17 + $0x7b0] sm:$0xff]  ;;  %v983_v35 = vld [vmem:[%s3367_s30 + $0x740] sm:$0xff]  ;;  %v984_v26 = vld [vmem:[%s3367_s30 + $0x748] sm:$0xff] }
 0x116   : > { %v985_v51 = vld [vmem:[%s3367_s30 + $0x750] sm:$0xff]  ;;  %8249 = vst [vmem:[#allocation211_spill] sm:$0xff] %v4588_v48  ;;  %8250 = vst [vmem:[#allocation212_spill] sm:$0xff] %v4590_v61  ;;  %v8251_v0 = vld [vmem:[#allocation55_spill] sm:$0xff]  ;;  %v4602_v12 = vsub.f32 %v471_v7, %v983_v35  ;;  %v4604_v39 = vsub.f32 %v472_v34, %v984_v26 }
 0x117   : > { %8248 = vst [vmem:[#allocation54_spill] sm:$0xff] %v4578_v57  ;;  %v4594_v46 = vmul.f32 %v8251_v0, %v8251_v0  ;;  %v486_v28 = vld [vmem:[%s3361_s17 + $0x7b8] sm:$0xff]  ;;  %v487_v57 = vld [vmem:[%s3361_s17 + $0x7c0] sm:$0xff]  ;;  %v488_v19 = vld [vmem:[%s3361_s17 + $0x7c8] sm:$0xff]  ;;  %v4606_v63 = vsub.f32 %v473_v29, %v985_v51 }
 0x118   : > { %v986_v11 = vld [vmem:[%s3367_s30 + $0x758] sm:$0xff]  ;;  %v987_v20 = vld [vmem:[%s3367_s30 + $0x760] sm:$0xff]  ;;  %v988_v8 = vld [vmem:[%s3367_s30 + $0x768] sm:$0xff]  ;;  %8253 = vst [vmem:[#allocation213_spill] sm:$0xff] %v4602_v12 }
 0x119   : > { %8252 = vst [vmem:[#allocation55_spill] sm:$0xff] %v4594_v46  ;;  %8254 = vst [vmem:[#allocation214_spill] sm:$0xff] %v4604_v39  ;;  %v489_v47 = vld [vmem:[%s3361_s17 + $0x7d0] sm:$0xff]  ;;  %v490_v0 = vld [vmem:[%s3361_s17 + $0x7d8] sm:$0xff]  ;;  %v4618_v35 = vsub.f32 %v474_v17, %v986_v11  ;;  %v4620_v34 = vsub.f32 %v475_v36, %v987_v20  ;;  %v4622_v29 = vsub.f32 %v476_v45, %v988_v8 }
 0x11a   : > { %8255 = vst [vmem:[#allocation215_spill] sm:$0xff] %v4606_v63  ;;  %8256 = vst [vmem:[#allocation216_spill] sm:$0xff] %v4610_v54  ;;  %v491_v46 = vld [vmem:[%s3361_s17 + $0x7e0] sm:$0xff]  ;;  %v989_v61 = vld [vmem:[%s3367_s30 + $0x770] sm:$0xff] }
 0x11b   : > { %v990_v48 = vld [vmem:[%s3367_s30 + $0x778] sm:$0xff]  ;;  %v991_v7 = vld [vmem:[%s3367_s30 + $0x780] sm:$0xff]  ;;  %8257 = vst [vmem:[#allocation217_spill] sm:$0xff] %v4618_v35  ;;  %8258 = vst [vmem:[#allocation218_spill] sm:$0xff] %v4620_v34  ;;  %v4634_v11 = vsub.f32 %v477_v18, %v989_v61 }
 0x11c   : > { %8259 = vst [vmem:[#allocation219_spill] sm:$0xff] %v4622_v29  ;;  %v8260_v26 = vld [vmem:[#allocation57_spill] sm:$0xff]  ;;  %v494_v63 = vld [vmem:[%s3361_s17 + $0x7f8] sm:$0xff]  ;;  %v4636_v36 = vsub.f32 %v478_v16, %v990_v48  ;;  %v4638_v45 = vsub.f32 %v479_v9, %v991_v7  ;;  %v995_v34 = vld [vmem:[%s3367_s30 + $0x7a0] sm:$0xff]  ;;  %v4658_v48 = vmul.f32 %v3786_v59, %v3786_v59 }
 0x11d   : > { %v4626_v58 = vmul.f32 %v8260_v26, %v8260_v26  ;;  %v492_v51 = vld [vmem:[%s3361_s17 + $0x7e8] sm:$0xff]  ;;  %v493_v54 = vld [vmem:[%s3361_s17 + $0x7f0] sm:$0xff]  ;;  %v994_v17 = vld [vmem:[%s3367_s30 + $0x798] sm:$0xff] }
 0x11e   : > { %v992_v39 = vld [vmem:[%s3367_s30 + $0x788] sm:$0xff]  ;;  %v993_v12 = vld [vmem:[%s3367_s30 + $0x790] sm:$0xff]  ;;  %8262 = vst [vmem:[#allocation220_spill] sm:$0xff] %v4636_v36  ;;  %8263 = vst [vmem:[#allocation221_spill] sm:$0xff] %v4638_v45  ;;  %v4654_v9 = vsub.f32 %v482_v21, %v994_v17 }
 0x11f   : > { %8261 = vst [vmem:[#allocation57_spill] sm:$0xff] %v4626_v58  ;;  %v8264_v20 = vld [vmem:[#allocation58_spill] sm:$0xff]  ;;  %v495_v26 = vld [vmem:[%s3361_s17 + $0x800] sm:$0xff]  ;;  %v496_v58 = vld [vmem:[%s3361_s17 + $0x808] sm:$0xff]  ;;  %v4650_v61 = vsub.f32 %v480_v38, %v992_v39  ;;  %v4652_v16 = vsub.f32 %v481_v2, %v993_v12  ;;  %v4666_v39 = vsub.f32 %v483_v56, %v995_v34 }
 0x120   : > { %v4642_v8 = vmul.f32 %v8264_v20, %v8264_v20  ;;  %v497_v29 = vld [vmem:[%s3361_s17 + $0x810] sm:$0xff]  ;;  %v996_v35 = vld [vmem:[%s3367_s30 + $0x7a8] sm:$0xff]  ;;  %8268 = vst [vmem:[#allocation224_spill] sm:$0xff] %v4654_v9  ;;  %8269 = vst [vmem:[#allocation225_spill] sm:$0xff] %v4658_v48 }
 0x121   : > { %v997_v18 = vld [vmem:[%s3367_s30 + $0x7b0] sm:$0xff]  ;;  %8266 = vst [vmem:[#allocation222_spill] sm:$0xff] %v4650_v61  ;;  %8267 = vst [vmem:[#allocation223_spill] sm:$0xff] %v4652_v16  ;;  %v498_v7 = vld [vmem:[%s3361_s17 + $0x818] sm:$0xff]  ;;  %v4668_v2 = vsub.f32 %v484_v50, %v996_v35 }
 0x122   : > { %8265 = vst [vmem:[#allocation58_spill] sm:$0xff] %v4642_v8  ;;  %v499_v20 = vld [vmem:[%s3361_s17 + $0x820] sm:$0xff]  ;;  %v500_v8 = vld [vmem:[%s3361_s17 + $0x828] sm:$0xff]  ;;  %v998_v45 = vld [vmem:[%s3367_s30 + $0x7b8] sm:$0xff]  ;;  %v4670_v21 = vsub.f32 %v485_v6, %v997_v18 }
 0x123   : > { %v999_v36 = vld [vmem:[%s3367_s30 + $0x7c0] sm:$0xff]  ;;  %v1000_v38 = vld [vmem:[%s3367_s30 + $0x7c8] sm:$0xff]  ;;  %8270 = vst [vmem:[#allocation226_spill] sm:$0xff] %v4666_v39  ;;  %8271 = vst [vmem:[#allocation227_spill] sm:$0xff] %v4668_v2  ;;  %v4682_v34 = vsub.f32 %v486_v28, %v998_v45 }
 0x124   : > { %8272 = vst [vmem:[#allocation228_spill] sm:$0xff] %v4670_v21  ;;  %v8273_v12 = vld [vmem:[#allocation60_spill] sm:$0xff]  ;;  %v501_v17 = vld [vmem:[%s3361_s17 + $0x830] sm:$0xff]  ;;  %v502_v48 = vld [vmem:[%s3361_s17 + $0x838] sm:$0xff]  ;;  %v4684_v50 = vsub.f32 %v487_v57, %v999_v36  ;;  %v4686_v6 = vsub.f32 %v488_v19, %v1000_v38  ;;  %v4706_v36 = vmul.f32 %v3802_v3, %v3802_v3 }
 0x125   : > { %v4674_v59 = vmul.f32 %v8273_v12, %v8273_v12  ;;  %v503_v9 = vld [vmem:[%s3361_s17 + $0x840] sm:$0xff]  ;;  %v1001_v16 = vld [vmem:[%s3367_s30 + $0x7d0] sm:$0xff]  ;;  %v1002_v61 = vld [vmem:[%s3367_s30 + $0x7d8] sm:$0xff] }
 0x126   : > { %v1003_v56 = vld [vmem:[%s3367_s30 + $0x7e0] sm:$0xff]  ;;  %8275 = vst [vmem:[#allocation229_spill] sm:$0xff] %v4684_v50  ;;  %8276 = vst [vmem:[#allocation230_spill] sm:$0xff] %v4686_v6  ;;  %v8277_v35 = vld [vmem:[#allocation61_spill] sm:$0xff]  ;;  %v4698_v45 = vsub.f32 %v489_v47, %v1001_v16  ;;  %v4700_v57 = vsub.f32 %v490_v0, %v1002_v61 }
 0x127   : > { %8274 = vst [vmem:[#allocation60_spill] sm:$0xff] %v4674_v59  ;;  %v4690_v18 = vmul.f32 %v8277_v35, %v8277_v35  ;;  %v504_v12 = vld [vmem:[%s3361_s17 + $0x848] sm:$0xff]  ;;  %v505_v59 = vld [vmem:[%s3361_s17 + $0x850] sm:$0xff]  ;;  %v506_v21 = vld [vmem:[%s3361_s17 + $0x858] sm:$0xff]  ;;  %v4702_v19 = vsub.f32 %v491_v46, %v1003_v56 }
 0x128   : > { %v1004_v2 = vld [vmem:[%s3367_s30 + $0x7e8] sm:$0xff]  ;;  %v1005_v39 = vld [vmem:[%s3367_s30 + $0x7f0] sm:$0xff]  ;;  %v1006_v28 = vld [vmem:[%s3367_s30 + $0x7f8] sm:$0xff]  ;;  %8279 = vst [vmem:[#allocation231_spill] sm:$0xff] %v4698_v45 }
 0x129   : > { %8278 = vst [vmem:[#allocation61_spill] sm:$0xff] %v4690_v18  ;;  %8280 = vst [vmem:[#allocation232_spill] sm:$0xff] %v4700_v57  ;;  %v507_v38 = vld [vmem:[%s3361_s17 + $0x860] sm:$0xff]  ;;  %v508_v35 = vld [vmem:[%s3361_s17 + $0x868] sm:$0xff]  ;;  %v4714_v16 = vsub.f32 %v492_v51, %v1004_v2  ;;  %v4716_v0 = vsub.f32 %v493_v54, %v1005_v39  ;;  %v4718_v46 = vsub.f32 %v494_v63, %v1006_v28 }
 0x12a   : > { %8281 = vst [vmem:[#allocation233_spill] sm:$0xff] %v4702_v19  ;;  %8282 = vst [vmem:[#allocation234_spill] sm:$0xff] %v4706_v36  ;;  %v509_v18 = vld [vmem:[%s3361_s17 + $0x870] sm:$0xff]  ;;  %v1007_v6 = vld [vmem:[%s3367_s30 + $0x800] sm:$0xff] }
 0x12b   : > { %v1008_v50 = vld [vmem:[%s3367_s30 + $0x808] sm:$0xff]  ;;  %v1009_v47 = vld [vmem:[%s3367_s30 + $0x810] sm:$0xff]  ;;  %8283 = vst [vmem:[#allocation235_spill] sm:$0xff] %v4714_v16  ;;  %8284 = vst [vmem:[#allocation236_spill] sm:$0xff] %v4716_v0  ;;  %v4730_v2 = vsub.f32 %v495_v26, %v1007_v6 }
 0x12c   : > { %8285 = vst [vmem:[#allocation237_spill] sm:$0xff] %v4718_v46  ;;  %v8286_v61 = vld [vmem:[#allocation63_spill] sm:$0xff]  ;;  %v512_v19 = vld [vmem:[%s3361_s17 + $0x888] sm:$0xff]  ;;  %v4732_v54 = vsub.f32 %v496_v58, %v1008_v50  ;;  %v4734_v63 = vsub.f32 %v497_v29, %v1009_v47  ;;  %v1013_v0 = vld [vmem:[%s3367_s30 + $0x830] sm:$0xff]  ;;  %v4754_v50 = vmul.f32 %v3818_v4, %v3818_v4 }
 0x12d   : > { %v4722_v3 = vmul.f32 %v8286_v61, %v8286_v61  ;;  %v510_v56 = vld [vmem:[%s3361_s17 + $0x878] sm:$0xff]  ;;  %v511_v36 = vld [vmem:[%s3361_s17 + $0x880] sm:$0xff]  ;;  %v1012_v51 = vld [vmem:[%s3367_s30 + $0x828] sm:$0xff] }
 0x12e   : > { %v1010_v57 = vld [vmem:[%s3367_s30 + $0x818] sm:$0xff]  ;;  %v1011_v45 = vld [vmem:[%s3367_s30 + $0x820] sm:$0xff]  ;;  %8288 = vst [vmem:[#allocation238_spill] sm:$0xff] %v4732_v54  ;;  %8289 = vst [vmem:[#allocation239_spill] sm:$0xff] %v4734_v63  ;;  %v4750_v29 = vsub.f32 %v500_v8, %v1012_v51 }
 0x12f   : > { %8287 = vst [vmem:[#allocation63_spill] sm:$0xff] %v4722_v3  ;;  %v8290_v39 = vld [vmem:[#allocation64_spill] sm:$0xff]  ;;  %v513_v61 = vld [vmem:[%s3361_s17 + $0x890] sm:$0xff]  ;;  %v514_v3 = vld [vmem:[%s3361_s17 + $0x898] sm:$0xff]  ;;  %v4746_v6 = vsub.f32 %v498_v7, %v1010_v57  ;;  %v4748_v58 = vsub.f32 %v499_v20, %v1011_v45  ;;  %v4762_v57 = vsub.f32 %v501_v17, %v1013_v0 }
 0x130   : > { %v4738_v28 = vmul.f32 %v8290_v39, %v8290_v39  ;;  %v515_v46 = vld [vmem:[%s3361_s17 + $0x8a0] sm:$0xff]  ;;  %v1014_v16 = vld [vmem:[%s3367_s30 + $0x838] sm:$0xff]  ;;  %8294 = vst [vmem:[#allocation242_spill] sm:$0xff] %v4750_v29  ;;  %8295 = vst [vmem:[#allocation243_spill] sm:$0xff] %v4754_v50 }
 0x131   : > { %v1015_v26 = vld [vmem:[%s3367_s30 + $0x840] sm:$0xff]  ;;  %8292 = vst [vmem:[#allocation240_spill] sm:$0xff] %v4746_v6  ;;  %8293 = vst [vmem:[#allocation241_spill] sm:$0xff] %v4748_v58  ;;  %v516_v47 = vld [vmem:[%s3361_s17 + $0x8a8] sm:$0xff]  ;;  %v4764_v20 = vsub.f32 %v502_v48, %v1014_v16 }
 0x132   : > { %8291 = vst [vmem:[#allocation64_spill] sm:$0xff] %v4738_v28  ;;  %v517_v39 = vld [vmem:[%s3361_s17 + $0x8b0] sm:$0xff]  ;;  %v518_v28 = vld [vmem:[%s3361_s17 + $0x8b8] sm:$0xff]  ;;  %v1016_v63 = vld [vmem:[%s3367_s30 + $0x848] sm:$0xff]  ;;  %v4766_v8 = vsub.f32 %v503_v9, %v1015_v26 }
 0x133   : > { %v1017_v54 = vld [vmem:[%s3367_s30 + $0x850] sm:$0xff]  ;;  %v1018_v7 = vld [vmem:[%s3367_s30 + $0x858] sm:$0xff]  ;;  %8296 = vst [vmem:[#allocation244_spill] sm:$0xff] %v4762_v57  ;;  %8297 = vst [vmem:[#allocation245_spill] sm:$0xff] %v4764_v20  ;;  %v4778_v0 = vsub.f32 %v504_v12, %v1016_v63 }
 0x134   : > { %8298 = vst [vmem:[#allocation246_spill] sm:$0xff] %v4766_v8  ;;  %v8299_v45 = vld [vmem:[#allocation66_spill] sm:$0xff]  ;;  %v519_v51 = vld [vmem:[%s3361_s17 + $0x8c0] sm:$0xff]  ;;  %v520_v50 = vld [vmem:[%s3361_s17 + $0x8c8] sm:$0xff]  ;;  %v4780_v48 = vsub.f32 %v505_v59, %v1017_v54  ;;  %v4782_v9 = vsub.f32 %v506_v21, %v1018_v7  ;;  %v4802_v54 = vmul.f32 %v3834_v5, %v3834_v5 }
 0x135   : > { %v4770_v4 = vmul.f32 %v8299_v45, %v8299_v45  ;;  %v521_v29 = vld [vmem:[%s3361_s17 + $0x8d0] sm:$0xff]  ;;  %v1019_v58 = vld [vmem:[%s3367_s30 + $0x860] sm:$0xff]  ;;  %v1020_v6 = vld [vmem:[%s3367_s30 + $0x868] sm:$0xff] }
 0x136   : > { %v1021_v17 = vld [vmem:[%s3367_s30 + $0x870] sm:$0xff]  ;;  %8301 = vst [vmem:[#allocation247_spill] sm:$0xff] %v4780_v48  ;;  %8302 = vst [vmem:[#allocation248_spill] sm:$0xff] %v4782_v9  ;;  %v8303_v16 = vld [vmem:[#allocation67_spill] sm:$0xff]  ;;  %v4794_v63 = vsub.f32 %v507_v38, %v1019_v58  ;;  %v4796_v59 = vsub.f32 %v508_v35, %v1020_v6 }
 0x137   : > { %8300 = vst [vmem:[#allocation66_spill] sm:$0xff] %v4770_v4  ;;  %v4786_v26 = vmul.f32 %v8303_v16, %v8303_v16  ;;  %v522_v45 = vld [vmem:[%s3361_s17 + $0x8d8] sm:$0xff]  ;;  %v523_v4 = vld [vmem:[%s3361_s17 + $0x8e0] sm:$0xff]  ;;  %v524_v8 = vld [vmem:[%s3361_s17 + $0x8e8] sm:$0xff]  ;;  %v4798_v21 = vsub.f32 %v509_v18, %v1021_v17 }
 0x138   : > { %v1022_v20 = vld [vmem:[%s3367_s30 + $0x878] sm:$0xff]  ;;  %v1023_v57 = vld [vmem:[%s3367_s30 + $0x880] sm:$0xff]  ;;  %v1024_v12 = vld [vmem:[%s3367_s30 + $0x888] sm:$0xff]  ;;  %8305 = vst [vmem:[#allocation249_spill] sm:$0xff] %v4794_v63 }
 0x139   : > { %8304 = vst [vmem:[#allocation67_spill] sm:$0xff] %v4786_v26  ;;  %8306 = vst [vmem:[#allocation250_spill] sm:$0xff] %v4796_v59  ;;  %v525_v7 = vld [vmem:[%s3361_s17 + $0x8f0] sm:$0xff]  ;;  %v526_v16 = vld [vmem:[%s3361_s17 + $0x8f8] sm:$0xff]  ;;  %v4810_v58 = vsub.f32 %v510_v56, %v1022_v20  ;;  %v4812_v35 = vsub.f32 %v511_v36, %v1023_v57  ;;  %v4814_v18 = vsub.f32 %v512_v19, %v1024_v12 }
 0x13a   : > { %8307 = vst [vmem:[#allocation251_spill] sm:$0xff] %v4798_v21  ;;  %8308 = vst [vmem:[#allocation252_spill] sm:$0xff] %v4802_v54  ;;  %v527_v26 = vld [vmem:[%s3361_s17 + $0x900] sm:$0xff]  ;;  %v1025_v9 = vld [vmem:[%s3367_s30 + $0x890] sm:$0xff] }
 0x13b   : > { %v1026_v48 = vld [vmem:[%s3367_s30 + $0x898] sm:$0xff]  ;;  %v1027_v38 = vld [vmem:[%s3367_s30 + $0x8a0] sm:$0xff]  ;;  %8309 = vst [vmem:[#allocation253_spill] sm:$0xff] %v4810_v58  ;;  %8310 = vst [vmem:[#allocation254_spill] sm:$0xff] %v4812_v35  ;;  %v4826_v20 = vsub.f32 %v513_v61, %v1025_v9 }
 0x13c   : > { %8311 = vst [vmem:[#allocation255_spill] sm:$0xff] %v4814_v18  ;;  %v8312_v6 = vld [vmem:[#allocation69_spill] sm:$0xff]  ;;  %v530_v21 = vld [vmem:[%s3361_s17 + $0x918] sm:$0xff]  ;;  %v4828_v36 = vsub.f32 %v514_v3, %v1026_v48  ;;  %v4830_v19 = vsub.f32 %v515_v46, %v1027_v38  ;;  %v1031_v35 = vld [vmem:[%s3367_s30 + $0x8c0] sm:$0xff]  ;;  %v4850_v48 = vmul.f32 %v3850_v13, %v3850_v13 }
 0x13d   : > { %v4818_v5 = vmul.f32 %v8312_v6, %v8312_v6  ;;  %v528_v17 = vld [vmem:[%s3361_s17 + $0x908] sm:$0xff]  ;;  %v529_v54 = vld [vmem:[%s3361_s17 + $0x910] sm:$0xff]  ;;  %v1030_v56 = vld [vmem:[%s3367_s30 + $0x8b8] sm:$0xff] }
 0x13e   : > { %v1028_v59 = vld [vmem:[%s3367_s30 + $0x8a8] sm:$0xff]  ;;  %v1029_v63 = vld [vmem:[%s3367_s30 + $0x8b0] sm:$0xff]  ;;  %8314 = vst [vmem:[#allocation256_spill] sm:$0xff] %v4828_v36  ;;  %8315 = vst [vmem:[#allocation257_spill] sm:$0xff] %v4830_v19  ;;  %v4846_v46 = vsub.f32 %v518_v28, %v1030_v56 }
 0x13f   : > { %8313 = vst [vmem:[#allocation69_spill] sm:$0xff] %v4818_v5  ;;  %v8316_v57 = vld [vmem:[#allocation70_spill] sm:$0xff]  ;;  %v531_v6 = vld [vmem:[%s3361_s17 + $0x920] sm:$0xff]  ;;  %v532_v5 = vld [vmem:[%s3361_s17 + $0x928] sm:$0xff]  ;;  %v4842_v9 = vsub.f32 %v516_v47, %v1028_v59  ;;  %v4844_v3 = vsub.f32 %v517_v39, %v1029_v63  ;;  %v4858_v59 = vsub.f32 %v519_v51, %v1031_v35 }
 0x140   : > { %v4834_v12 = vmul.f32 %v8316_v57, %v8316_v57  ;;  %v533_v18 = vld [vmem:[%s3361_s17 + $0x930] sm:$0xff]  ;;  %v1032_v58 = vld [vmem:[%s3367_s30 + $0x8c8] sm:$0xff]  ;;  %8320 = vst [vmem:[#allocation260_spill] sm:$0xff] %v4846_v46  ;;  %8321 = vst [vmem:[#allocation261_spill] sm:$0xff] %v4850_v48 }
 0x141   : > { %v1033_v61 = vld [vmem:[%s3367_s30 + $0x8d0] sm:$0xff]  ;;  %8318 = vst [vmem:[#allocation258_spill] sm:$0xff] %v4842_v9  ;;  %8319 = vst [vmem:[#allocation259_spill] sm:$0xff] %v4844_v3  ;;  %v534_v38 = vld [vmem:[%s3361_s17 + $0x938] sm:$0xff]  ;;  %v4860_v39 = vsub.f32 %v520_v50, %v1032_v58 }
 0x142   : > { %8317 = vst [vmem:[#allocation70_spill] sm:$0xff] %v4834_v12  ;;  %v535_v57 = vld [vmem:[%s3361_s17 + $0x940] sm:$0xff]  ;;  %v536_v12 = vld [vmem:[%s3361_s17 + $0x948] sm:$0xff]  ;;  %v1034_v19 = vld [vmem:[%s3367_s30 + $0x8d8] sm:$0xff]  ;;  %v4862_v28 = vsub.f32 %v521_v29, %v1033_v61 }
 0x143   : > { %v1035_v36 = vld [vmem:[%s3367_s30 + $0x8e0] sm:$0xff]  ;;  %v1036_v47 = vld [vmem:[%s3367_s30 + $0x8e8] sm:$0xff]  ;;  %8322 = vst [vmem:[#allocation262_spill] sm:$0xff] %v4858_v59  ;;  %8323 = vst [vmem:[#allocation263_spill] sm:$0xff] %v4860_v39  ;;  %v4874_v35 = vsub.f32 %v522_v45, %v1034_v19 }
 0x144   : > { %8324 = vst [vmem:[#allocation264_spill] sm:$0xff] %v4862_v28  ;;  %v8325_v63 = vld [vmem:[#allocation72_spill] sm:$0xff]  ;;  %v537_v56 = vld [vmem:[%s3361_s17 + $0x950] sm:$0xff]  ;;  %v538_v48 = vld [vmem:[%s3361_s17 + $0x958] sm:$0xff]  ;;  %v4876_v50 = vsub.f32 %v523_v4, %v1035_v36  ;;  %v4878_v29 = vsub.f32 %v524_v8, %v1036_v47  ;;  %v4898_v36 = vmul.f32 %v3866_v14, %v3866_v14 }
 0x145   : > { %v4866_v13 = vmul.f32 %v8325_v63, %v8325_v63  ;;  %v539_v46 = vld [vmem:[%s3361_s17 + $0x960] sm:$0xff]  ;;  %v1037_v3 = vld [vmem:[%s3367_s30 + $0x8f0] sm:$0xff]  ;;  %v1038_v9 = vld [vmem:[%s3367_s30 + $0x8f8] sm:$0xff] }
 0x146   : > { %v1039_v51 = vld [vmem:[%s3367_s30 + $0x900] sm:$0xff]  ;;  %8327 = vst [vmem:[#allocation265_spill] sm:$0xff] %v4876_v50  ;;  %8328 = vst [vmem:[#allocation266_spill] sm:$0xff] %v4878_v29  ;;  %v8329_v58 = vld [vmem:[#allocation73_spill] sm:$0xff]  ;;  %v4890_v19 = vsub.f32 %v525_v7, %v1037_v3  ;;  %v4892_v4 = vsub.f32 %v526_v16, %v1038_v9 }
 0x147   : > { %8326 = vst [vmem:[#allocation72_spill] sm:$0xff] %v4866_v13  ;;  %v4882_v61 = vmul.f32 %v8329_v58, %v8329_v58  ;;  %v540_v63 = vld [vmem:[%s3361_s17 + $0x968] sm:$0xff]  ;;  %v541_v13 = vld [vmem:[%s3361_s17 + $0x970] sm:$0xff]  ;;  %v542_v28 = vld [vmem:[%s3361_s17 + $0x978] sm:$0xff]  ;;  %v4894_v8 = vsub.f32 %v527_v26, %v1039_v51 }
 0x148   : > { %v1040_v39 = vld [vmem:[%s3367_s30 + $0x908] sm:$0xff]  ;;  %v1041_v59 = vld [vmem:[%s3367_s30 + $0x910] sm:$0xff]  ;;  %v1042_v45 = vld [vmem:[%s3367_s30 + $0x918] sm:$0xff]  ;;  %8331 = vst [vmem:[#allocation267_spill] sm:$0xff] %v4890_v19 }
 0x149   : > { %8330 = vst [vmem:[#allocation73_spill] sm:$0xff] %v4882_v61  ;;  %8332 = vst [vmem:[#allocation268_spill] sm:$0xff] %v4892_v4  ;;  %v543_v47 = vld [vmem:[%s3361_s17 + $0x980] sm:$0xff]  ;;  %v544_v58 = vld [vmem:[%s3361_s17 + $0x988] sm:$0xff]  ;;  %v4906_v3 = vsub.f32 %v528_v17, %v1040_v39  ;;  %v4908_v16 = vsub.f32 %v529_v54, %v1041_v59  ;;  %v4910_v26 = vsub.f32 %v530_v21, %v1042_v45 }
 0x14a   : > { %8333 = vst [vmem:[#allocation269_spill] sm:$0xff] %v4894_v8  ;;  %8334 = vst [vmem:[#allocation270_spill] sm:$0xff] %v4898_v36  ;;  %v545_v61 = vld [vmem:[%s3361_s17 + $0x990] sm:$0xff]  ;;  %v1043_v29 = vld [vmem:[%s3367_s30 + $0x920] sm:$0xff] }
 0x14b   : > { %v1044_v50 = vld [vmem:[%s3367_s30 + $0x928] sm:$0xff]  ;;  %v1045_v7 = vld [vmem:[%s3367_s30 + $0x930] sm:$0xff]  ;;  %8335 = vst [vmem:[#allocation271_spill] sm:$0xff] %v4906_v3  ;;  %8336 = vst [vmem:[#allocation272_spill] sm:$0xff] %v4908_v16  ;;  %v4922_v39 = vsub.f32 %v531_v6, %v1043_v29 }
 0x14c   : > { %8337 = vst [vmem:[#allocation273_spill] sm:$0xff] %v4910_v26  ;;  %v8338_v9 = vld [vmem:[#allocation75_spill] sm:$0xff]  ;;  %v548_v8 = vld [vmem:[%s3361_s17 + $0x9a8] sm:$0xff]  ;;  %v4924_v54 = vsub.f32 %v532_v5, %v1044_v50  ;;  %v4926_v21 = vsub.f32 %v533_v18, %v1045_v7  ;;  %v1049_v16 = vld [vmem:[%s3367_s30 + $0x950] sm:$0xff]  ;;  %v4946_v50 = vmul.f32 %v3882_v15, %v3882_v15 }
 0x14d   : > { %v4914_v14 = vmul.f32 %v8338_v9, %v8338_v9  ;;  %v546_v51 = vld [vmem:[%s3361_s17 + $0x998] sm:$0xff]  ;;  %v547_v36 = vld [vmem:[%s3361_s17 + $0x9a0] sm:$0xff]  ;;  %v1048_v17 = vld [vmem:[%s3367_s30 + $0x948] sm:$0xff] }
 0x14e   : > { %v1046_v4 = vld [vmem:[%s3367_s30 + $0x938] sm:$0xff]  ;;  %v1047_v19 = vld [vmem:[%s3367_s30 + $0x940] sm:$0xff]  ;;  %8340 = vst [vmem:[#allocation274_spill] sm:$0xff] %v4924_v54  ;;  %8341 = vst [vmem:[#allocation275_spill] sm:$0xff] %v4926_v21  ;;  %v4942_v18 = vsub.f32 %v536_v12, %v1048_v17 }
 0x14f   : > { %8339 = vst [vmem:[#allocation75_spill] sm:$0xff] %v4914_v14  ;;  %v8342_v59 = vld [vmem:[#allocation76_spill] sm:$0xff]  ;;  %v549_v9 = vld [vmem:[%s3361_s17 + $0x9b0] sm:$0xff]  ;;  %v550_v14 = vld [vmem:[%s3361_s17 + $0x9b8] sm:$0xff]  ;;  %v4938_v29 = vsub.f32 %v534_v38, %v1046_v4  ;;  %v4940_v5 = vsub.f32 %v535_v57, %v1047_v19  ;;  %v4954_v4 = vsub.f32 %v537_v56, %v1049_v16 }
 0x150   : > { %v4930_v45 = vmul.f32 %v8342_v59, %v8342_v59  ;;  %v551_v26 = vld [vmem:[%s3361_s17 + $0x9c0] sm:$0xff]  ;;  %v1050_v3 = vld [vmem:[%s3367_s30 + $0x958] sm:$0xff]  ;;  %8346 = vst [vmem:[#allocation278_spill] sm:$0xff] %v4942_v18  ;;  %8347 = vst [vmem:[#allocation279_spill] sm:$0xff] %v4946_v50 }
 0x151   : > { %v1051_v6 = vld [vmem:[%s3367_s30 + $0x960] sm:$0xff]  ;;  %8344 = vst [vmem:[#allocation276_spill] sm:$0xff] %v4938_v29  ;;  %8345 = vst [vmem:[#allocation277_spill] sm:$0xff] %v4940_v5  ;;  %v552_v7 = vld [vmem:[%s3361_s17 + $0x9c8] sm:$0xff]  ;;  %v4956_v57 = vsub.f32 %v538_v48, %v1050_v3 }
 0x152   : > { %8343 = vst [vmem:[#allocation76_spill] sm:$0xff] %v4930_v45  ;;  %v553_v59 = vld [vmem:[%s3361_s17 + $0x9d0] sm:$0xff]  ;;  %v554_v45 = vld [vmem:[%s3361_s17 + $0x9d8] sm:$0xff]  ;;  %v1052_v21 = vld [vmem:[%s3367_s30 + $0x968] sm:$0xff]  ;;  %v4958_v12 = vsub.f32 %v539_v46, %v1051_v6 }
 0x153   : > { %v1053_v54 = vld [vmem:[%s3367_s30 + $0x970] sm:$0xff]  ;;  %v1054_v38 = vld [vmem:[%s3367_s30 + $0x978] sm:$0xff]  ;;  %8348 = vst [vmem:[#allocation280_spill] sm:$0xff] %v4954_v4  ;;  %8349 = vst [vmem:[#allocation281_spill] sm:$0xff] %v4956_v57  ;;  %v4970_v16 = vsub.f32 %v540_v63, %v1052_v21 }
 0x154   : > { %8350 = vst [vmem:[#allocation282_spill] sm:$0xff] %v4958_v12  ;;  %v8351_v19 = vld [vmem:[#allocation78_spill] sm:$0xff]  ;;  %v555_v17 = vld [vmem:[%s3361_s17 + $0x9e0] sm:$0xff]  ;;  %v556_v50 = vld [vmem:[%s3361_s17 + $0x9e8] sm:$0xff]  ;;  %v4972_v48 = vsub.f32 %v541_v13, %v1053_v54  ;;  %v4974_v46 = vsub.f32 %v542_v28, %v1054_v38  ;;  %v4994_v54 = vmul.f32 %v3898_v22, %v3898_v22 }
 0x155   : > { %v4962_v15 = vmul.f32 %v8351_v19, %v8351_v19  ;;  %v557_v18 = vld [vmem:[%s3361_s17 + $0x9f0] sm:$0xff]  ;;  %v1055_v5 = vld [vmem:[%s3367_s30 + $0x980] sm:$0xff]  ;;  %v1056_v29 = vld [vmem:[%s3367_s30 + $0x988] sm:$0xff] }
 0x156   : > { %v1057_v56 = vld [vmem:[%s3367_s30 + $0x990] sm:$0xff]  ;;  %8353 = vst [vmem:[#allocation283_spill] sm:$0xff] %v4972_v48  ;;  %8354 = vst [vmem:[#allocation284_spill] sm:$0xff] %v4974_v46  ;;  %v8355_v3 = vld [vmem:[#allocation79_spill] sm:$0xff]  ;;  %v4986_v21 = vsub.f32 %v543_v47, %v1055_v5  ;;  %v4988_v13 = vsub.f32 %v544_v58, %v1056_v29 }
 0x157   : > { %8352 = vst [vmem:[#allocation78_spill] sm:$0xff] %v4962_v15  ;;  %v4978_v6 = vmul.f32 %v8355_v3, %v8355_v3  ;;  %v558_v19 = vld [vmem:[%s3361_s17 + $0x9f8] sm:$0xff]  ;;  %v559_v15 = vld [vmem:[%s3361_s17 + $0xa00] sm:$0xff]  ;;  %v560_v12 = vld [vmem:[%s3361_s17 + $0xa08] sm:$0xff]  ;;  %v4990_v28 = vsub.f32 %v545_v61, %v1057_v56 }
 0x158   : > { %v1058_v57 = vld [vmem:[%s3367_s30 + $0x998] sm:$0xff]  ;;  %v1059_v4 = vld [vmem:[%s3367_s30 + $0x9a0] sm:$0xff]  ;;  %v1060_v63 = vld [vmem:[%s3367_s30 + $0x9a8] sm:$0xff]  ;;  %8357 = vst [vmem:[#allocation285_spill] sm:$0xff] %v4986_v21 }
 0x159   : > { %8356 = vst [vmem:[#allocation79_spill] sm:$0xff] %v4978_v6  ;;  %8358 = vst [vmem:[#allocation286_spill] sm:$0xff] %v4988_v13  ;;  %v561_v38 = vld [vmem:[%s3361_s17 + $0xa10] sm:$0xff]  ;;  %v562_v3 = vld [vmem:[%s3361_s17 + $0xa18] sm:$0xff]  ;;  %v5002_v5 = vsub.f32 %v546_v51, %v1058_v57  ;;  %v5004_v58 = vsub.f32 %v547_v36, %v1059_v4  ;;  %v5006_v61 = vsub.f32 %v548_v8, %v1060_v63 }
 0x15a   : > { %8359 = vst [vmem:[#allocation287_spill] sm:$0xff] %v4990_v28  ;;  %8360 = vst [vmem:[#allocation288_spill] sm:$0xff] %v4994_v54  ;;  %v563_v6 = vld [vmem:[%s3361_s17 + $0xa20] sm:$0xff]  ;;  %v1061_v46 = vld [vmem:[%s3367_s30 + $0x9b0] sm:$0xff] }
 0x15b   : > { %v1062_v48 = vld [vmem:[%s3367_s30 + $0x9b8] sm:$0xff]  ;;  %v1063_v47 = vld [vmem:[%s3367_s30 + $0x9c0] sm:$0xff]  ;;  %8361 = vst [vmem:[#allocation289_spill] sm:$0xff] %v5002_v5  ;;  %8362 = vst [vmem:[#allocation290_spill] sm:$0xff] %v5004_v58  ;;  %v5018_v57 = vsub.f32 %v549_v9, %v1061_v46 }
 0x15c   : > { %8363 = vst [vmem:[#allocation291_spill] sm:$0xff] %v5006_v61  ;;  %v8364_v29 = vld [vmem:[#allocation81_spill] sm:$0xff]  ;;  %v566_v28 = vld [vmem:[%s3361_s17 + $0xa38] sm:$0xff]  ;;  %v5020_v36 = vsub.f32 %v550_v14, %v1062_v48  ;;  %v5022_v8 = vsub.f32 %v551_v26, %v1063_v47  ;;  %v1067_v58 = vld [vmem:[%s3367_s30 + $0x9e0] sm:$0xff]  ;;  %v5042_v48 = vmul.f32 %v3914_v23, %v3914_v23 }
 0x15d   : > { %v5010_v22 = vmul.f32 %v8364_v29, %v8364_v29  ;;  %v564_v56 = vld [vmem:[%s3361_s17 + $0xa28] sm:$0xff]  ;;  %v565_v54 = vld [vmem:[%s3361_s17 + $0xa30] sm:$0xff]  ;;  %v1066_v51 = vld [vmem:[%s3367_s30 + $0x9d8] sm:$0xff] }
 0x15e   : > { %v1064_v13 = vld [vmem:[%s3367_s30 + $0x9c8] sm:$0xff]  ;;  %v1065_v21 = vld [vmem:[%s3367_s30 + $0x9d0] sm:$0xff]  ;;  %8366 = vst [vmem:[#allocation292_spill] sm:$0xff] %v5020_v36  ;;  %8367 = vst [vmem:[#allocation293_spill] sm:$0xff] %v5022_v8  ;;  %v5038_v26 = vsub.f32 %v554_v45, %v1066_v51 }
 0x15f   : > { %8365 = vst [vmem:[#allocation81_spill] sm:$0xff] %v5010_v22  ;;  %v8368_v4 = vld [vmem:[#allocation82_spill] sm:$0xff]  ;;  %v567_v29 = vld [vmem:[%s3361_s17 + $0xa40] sm:$0xff]  ;;  %v568_v22 = vld [vmem:[%s3361_s17 + $0xa48] sm:$0xff]  ;;  %v5034_v46 = vsub.f32 %v552_v7, %v1064_v13  ;;  %v5036_v14 = vsub.f32 %v553_v59, %v1065_v21  ;;  %v5050_v13 = vsub.f32 %v555_v17, %v1067_v58 }
 0x160   : > { %v5026_v63 = vmul.f32 %v8368_v4, %v8368_v4  ;;  %v569_v61 = vld [vmem:[%s3361_s17 + $0xa50] sm:$0xff]  ;;  %v1068_v5 = vld [vmem:[%s3367_s30 + $0x9e8] sm:$0xff]  ;;  %8372 = vst [vmem:[#allocation296_spill] sm:$0xff] %v5038_v26  ;;  %8373 = vst [vmem:[#allocation297_spill] sm:$0xff] %v5042_v48 }
 0x161   : > { %v1069_v9 = vld [vmem:[%s3367_s30 + $0x9f0] sm:$0xff]  ;;  %8370 = vst [vmem:[#allocation294_spill] sm:$0xff] %v5034_v46  ;;  %8371 = vst [vmem:[#allocation295_spill] sm:$0xff] %v5036_v14  ;;  %v570_v47 = vld [vmem:[%s3361_s17 + $0xa58] sm:$0xff]  ;;  %v5052_v59 = vsub.f32 %v556_v50, %v1068_v5 }
 0x162   : > { %8369 = vst [vmem:[#allocation82_spill] sm:$0xff] %v5026_v63  ;;  %v571_v4 = vld [vmem:[%s3361_s17 + $0xa60] sm:$0xff]  ;;  %v572_v63 = vld [vmem:[%s3361_s17 + $0xa68] sm:$0xff]  ;;  %v1070_v8 = vld [vmem:[%s3367_s30 + $0x9f8] sm:$0xff]  ;;  %v5054_v45 = vsub.f32 %v557_v18, %v1069_v9 }
 0x163   : > { %v1071_v36 = vld [vmem:[%s3367_s30 + $0xa00] sm:$0xff]  ;;  %v1072_v7 = vld [vmem:[%s3367_s30 + $0xa08] sm:$0xff]  ;;  %8374 = vst [vmem:[#allocation298_spill] sm:$0xff] %v5050_v13  ;;  %8375 = vst [vmem:[#allocation299_spill] sm:$0xff] %v5052_v59  ;;  %v5066_v58 = vsub.f32 %v558_v19, %v1070_v8 }
 0x164   : > { %8376 = vst [vmem:[#allocation300_spill] sm:$0xff] %v5054_v45  ;;  %v8377_v21 = vld [vmem:[#allocation84_spill] sm:$0xff]  ;;  %v573_v51 = vld [vmem:[%s3361_s17 + $0xa70] sm:$0xff]  ;;  %v574_v48 = vld [vmem:[%s3361_s17 + $0xa78] sm:$0xff]  ;;  %v5068_v50 = vsub.f32 %v559_v15, %v1071_v36  ;;  %v5070_v18 = vsub.f32 %v560_v12, %v1072_v7  ;;  %v5090_v36 = vmul.f32 %v3930_v24, %v3930_v24 }
 0x165   : > { %v5058_v23 = vmul.f32 %v8377_v21, %v8377_v21  ;;  %v575_v26 = vld [vmem:[%s3361_s17 + $0xa80] sm:$0xff]  ;;  %v1073_v14 = vld [vmem:[%s3367_s30 + $0xa10] sm:$0xff]  ;;  %v1074_v46 = vld [vmem:[%s3367_s30 + $0xa18] sm:$0xff] }
 0x166   : > { %v1075_v17 = vld [vmem:[%s3367_s30 + $0xa20] sm:$0xff]  ;;  %8379 = vst [vmem:[#allocation301_spill] sm:$0xff] %v5068_v50  ;;  %8380 = vst [vmem:[#allocation302_spill] sm:$0xff] %v5070_v18  ;;  %v8381_v5 = vld [vmem:[#allocation85_spill] sm:$0xff]  ;;  %v5082_v8 = vsub.f32 %v561_v38, %v1073_v14  ;;  %v5084_v15 = vsub.f32 %v562_v3, %v1074_v46 }
 0x167   : > { %8378 = vst [vmem:[#allocation84_spill] sm:$0xff] %v5058_v23  ;;  %v5074_v9 = vmul.f32 %v8381_v5, %v8381_v5  ;;  %v576_v21 = vld [vmem:[%s3361_s17 + $0xa88] sm:$0xff]  ;;  %v577_v23 = vld [vmem:[%s3361_s17 + $0xa90] sm:$0xff]  ;;  %v578_v45 = vld [vmem:[%s3361_s17 + $0xa98] sm:$0xff]  ;;  %v5086_v12 = vsub.f32 %v563_v6, %v1075_v17 }
 0x168   : > { %v1076_v59 = vld [vmem:[%s3367_s30 + $0xa28] sm:$0xff]  ;;  %v1077_v13 = vld [vmem:[%s3367_s30 + $0xa30] sm:$0xff]  ;;  %v1078_v19 = vld [vmem:[%s3367_s30 + $0xa38] sm:$0xff]  ;;  %8383 = vst [vmem:[#allocation303_spill] sm:$0xff] %v5082_v8 }
 0x169   : > { %8382 = vst [vmem:[#allocation85_spill] sm:$0xff] %v5074_v9  ;;  %8384 = vst [vmem:[#allocation304_spill] sm:$0xff] %v5084_v15  ;;  %v579_v7 = vld [vmem:[%s3361_s17 + $0xaa0] sm:$0xff]  ;;  %v580_v5 = vld [vmem:[%s3361_s17 + $0xaa8] sm:$0xff]  ;;  %v5098_v14 = vsub.f32 %v564_v56, %v1076_v59  ;;  %v5100_v3 = vsub.f32 %v565_v54, %v1077_v13  ;;  %v5102_v6 = vsub.f32 %v566_v28, %v1078_v19 }
 0x16a   : > { %8385 = vst [vmem:[#allocation305_spill] sm:$0xff] %v5086_v12  ;;  %8386 = vst [vmem:[#allocation306_spill] sm:$0xff] %v5090_v36  ;;  %v581_v9 = vld [vmem:[%s3361_s17 + $0xab0] sm:$0xff]  ;;  %v1079_v18 = vld [vmem:[%s3367_s30 + $0xa40] sm:$0xff] }
 0x16b   : > { %v1080_v50 = vld [vmem:[%s3367_s30 + $0xa48] sm:$0xff]  ;;  %v1081_v38 = vld [vmem:[%s3367_s30 + $0xa50] sm:$0xff]  ;;  %8387 = vst [vmem:[#allocation307_spill] sm:$0xff] %v5098_v14  ;;  %8388 = vst [vmem:[#allocation308_spill] sm:$0xff] %v5100_v3  ;;  %v5114_v59 = vsub.f32 %v567_v29, %v1079_v18 }
 0x16c   : > { %8389 = vst [vmem:[#allocation309_spill] sm:$0xff] %v5102_v6  ;;  %v8390_v46 = vld [vmem:[#allocation87_spill] sm:$0xff]  ;;  %v584_v12 = vld [vmem:[%s3361_s17 + $0xac8] sm:$0xff]  ;;  %v5116_v54 = vsub.f32 %v568_v22, %v1080_v50  ;;  %v5118_v28 = vsub.f32 %v569_v61, %v1081_v38  ;;  %v1085_v3 = vld [vmem:[%s3367_s30 + $0xa70] sm:$0xff]  ;;  %v5138_v50 = vmul.f32 %v3946_v31, %v3946_v31 }
 0x16d   : > { %v5106_v24 = vmul.f32 %v8390_v46, %v8390_v46  ;;  %v582_v17 = vld [vmem:[%s3361_s17 + $0xab8] sm:$0xff]  ;;  %v583_v36 = vld [vmem:[%s3361_s17 + $0xac0] sm:$0xff]  ;;  %v1084_v56 = vld [vmem:[%s3367_s30 + $0xa68] sm:$0xff] }
 0x16e   : > { %v1082_v15 = vld [vmem:[%s3367_s30 + $0xa58] sm:$0xff]  ;;  %v1083_v8 = vld [vmem:[%s3367_s30 + $0xa60] sm:$0xff]  ;;  %8392 = vst [vmem:[#allocation310_spill] sm:$0xff] %v5116_v54  ;;  %8393 = vst [vmem:[#allocation311_spill] sm:$0xff] %v5118_v28  ;;  %v5134_v61 = vsub.f32 %v572_v63, %v1084_v56 }
 0x16f   : > { %8391 = vst [vmem:[#allocation87_spill] sm:$0xff] %v5106_v24  ;;  %v8394_v13 = vld [vmem:[#allocation88_spill] sm:$0xff]  ;;  %v585_v46 = vld [vmem:[%s3361_s17 + $0xad0] sm:$0xff]  ;;  %v586_v24 = vld [vmem:[%s3361_s17 + $0xad8] sm:$0xff]  ;;  %v5130_v18 = vsub.f32 %v570_v47, %v1082_v15  ;;  %v5132_v22 = vsub.f32 %v571_v4, %v1083_v8  ;;  %v5146_v15 = vsub.f32 %v573_v51, %v1085_v3 }
 0x170   : > { %v5122_v19 = vmul.f32 %v8394_v13, %v8394_v13  ;;  %v587_v6 = vld [vmem:[%s3361_s17 + $0xae0] sm:$0xff]  ;;  %v1086_v14 = vld [vmem:[%s3367_s30 + $0xa78] sm:$0xff]  ;;  %8398 = vst [vmem:[#allocation314_spill] sm:$0xff] %v5134_v61  ;;  %8399 = vst [vmem:[#allocation315_spill] sm:$0xff] %v5138_v50 }
 0x171   : > { %v1087_v29 = vld [vmem:[%s3367_s30 + $0xa80] sm:$0xff]  ;;  %8396 = vst [vmem:[#allocation312_spill] sm:$0xff] %v5130_v18  ;;  %8397 = vst [vmem:[#allocation313_spill] sm:$0xff] %v5132_v22  ;;  %v588_v38 = vld [vmem:[%s3361_s17 + $0xae8] sm:$0xff]  ;;  %v5148_v4 = vsub.f32 %v574_v48, %v1086_v14 }
 0x172   : > { %8395 = vst [vmem:[#allocation88_spill] sm:$0xff] %v5122_v19  ;;  %v589_v13 = vld [vmem:[%s3361_s17 + $0xaf0] sm:$0xff]  ;;  %v590_v19 = vld [vmem:[%s3361_s17 + $0xaf8] sm:$0xff]  ;;  %v1088_v28 = vld [vmem:[%s3367_s30 + $0xa88] sm:$0xff]  ;;  %v5150_v63 = vsub.f32 %v575_v26, %v1087_v29 }
 0x173   : > { %v1089_v54 = vld [vmem:[%s3367_s30 + $0xa90] sm:$0xff]  ;;  %v1090_v47 = vld [vmem:[%s3367_s30 + $0xa98] sm:$0xff]  ;;  %8400 = vst [vmem:[#allocation316_spill] sm:$0xff] %v5146_v15  ;;  %8401 = vst [vmem:[#allocation317_spill] sm:$0xff] %v5148_v4  ;;  %v5162_v3 = vsub.f32 %v576_v21, %v1088_v28 }
 0x174   : > { %8402 = vst [vmem:[#allocation318_spill] sm:$0xff] %v5150_v63  ;;  %v8403_v8 = vld [vmem:[#allocation90_spill] sm:$0xff]  ;;  %v591_v56 = vld [vmem:[%s3361_s17 + $0xb00] sm:$0xff]  ;;  %v592_v50 = vld [vmem:[%s3361_s17 + $0xb08] sm:$0xff]  ;;  %v5164_v48 = vsub.f32 %v577_v23, %v1089_v54  ;;  %v5166_v26 = vsub.f32 %v578_v45, %v1090_v47  ;;  %v5186_v54 = vmul.f32 %v3962_v32, %v3962_v32 }
 0x175   : > { %v5154_v31 = vmul.f32 %v8403_v8, %v8403_v8  ;;  %v593_v61 = vld [vmem:[%s3361_s17 + $0xb10] sm:$0xff]  ;;  %v1091_v22 = vld [vmem:[%s3367_s30 + $0xaa0] sm:$0xff]  ;;  %v1092_v18 = vld [vmem:[%s3367_s30 + $0xaa8] sm:$0xff] }
 0x176   : > { %v1093_v51 = vld [vmem:[%s3367_s30 + $0xab0] sm:$0xff]  ;;  %8405 = vst [vmem:[#allocation319_spill] sm:$0xff] %v5164_v48  ;;  %8406 = vst [vmem:[#allocation320_spill] sm:$0xff] %v5166_v26  ;;  %v8407_v14 = vld [vmem:[#allocation91_spill] sm:$0xff]  ;;  %v5178_v28 = vsub.f32 %v579_v7, %v1091_v22  ;;  %v5180_v23 = vsub.f32 %v580_v5, %v1092_v18 }
 0x177   : > { %8404 = vst [vmem:[#allocation90_spill] sm:$0xff] %v5154_v31  ;;  %v5170_v29 = vmul.f32 %v8407_v14, %v8407_v14  ;;  %v594_v8 = vld [vmem:[%s3361_s17 + $0xb18] sm:$0xff]  ;;  %v595_v31 = vld [vmem:[%s3361_s17 + $0xb20] sm:$0xff]  ;;  %v596_v63 = vld [vmem:[%s3361_s17 + $0xb28] sm:$0xff]  ;;  %v5182_v45 = vsub.f32 %v581_v9, %v1093_v51 }
 0x178   : > { %v1094_v4 = vld [vmem:[%s3367_s30 + $0xab8] sm:$0xff]  ;;  %v1095_v15 = vld [vmem:[%s3367_s30 + $0xac0] sm:$0xff]  ;;  %v1096_v21 = vld [vmem:[%s3367_s30 + $0xac8] sm:$0xff]  ;;  %8409 = vst [vmem:[#allocation321_spill] sm:$0xff] %v5178_v28 }
 0x179   : > { %8408 = vst [vmem:[#allocation91_spill] sm:$0xff] %v5170_v29  ;;  %8410 = vst [vmem:[#allocation322_spill] sm:$0xff] %v5180_v23  ;;  %v597_v47 = vld [vmem:[%s3361_s17 + $0xb30] sm:$0xff]  ;;  %v598_v14 = vld [vmem:[%s3361_s17 + $0xb38] sm:$0xff]  ;;  %v5194_v22 = vsub.f32 %v582_v17, %v1094_v4  ;;  %v5196_v5 = vsub.f32 %v583_v36, %v1095_v15  ;;  %v5198_v9 = vsub.f32 %v584_v12, %v1096_v21 }
 0x17a   : > { %8411 = vst [vmem:[#allocation323_spill] sm:$0xff] %v5182_v45  ;;  %8412 = vst [vmem:[#allocation324_spill] sm:$0xff] %v5186_v54  ;;  %v599_v29 = vld [vmem:[%s3361_s17 + $0xb40] sm:$0xff]  ;;  %v1097_v26 = vld [vmem:[%s3367_s30 + $0xad0] sm:$0xff] }
 0x17b   : > { %v1098_v48 = vld [vmem:[%s3367_s30 + $0xad8] sm:$0xff]  ;;  %v1099_v7 = vld [vmem:[%s3367_s30 + $0xae0] sm:$0xff]  ;;  %8413 = vst [vmem:[#allocation325_spill] sm:$0xff] %v5194_v22  ;;  %8414 = vst [vmem:[#allocation326_spill] sm:$0xff] %v5196_v5  ;;  %v5210_v4 = vsub.f32 %v585_v46, %v1097_v26 }
 0x17c   : > { %8415 = vst [vmem:[#allocation327_spill] sm:$0xff] %v5198_v9  ;;  %v8416_v18 = vld [vmem:[#allocation93_spill] sm:$0xff]  ;;  %v602_v45 = vld [vmem:[%s3361_s17 + $0xb58] sm:$0xff]  ;;  %v5212_v36 = vsub.f32 %v586_v24, %v1098_v48  ;;  %v5214_v12 = vsub.f32 %v587_v6, %v1099_v7  ;;  %v1103_v5 = vld [vmem:[%s3367_s30 + $0xb00] sm:$0xff]  ;;  %v5234_v48 = vmul.f32 %v3978_v33, %v3978_v33 }
 0x17d   : > { %v5202_v32 = vmul.f32 %v8416_v18, %v8416_v18  ;;  %v600_v51 = vld [vmem:[%s3361_s17 + $0xb48] sm:$0xff]  ;;  %v601_v54 = vld [vmem:[%s3361_s17 + $0xb50] sm:$0xff]  ;;  %v1102_v17 = vld [vmem:[%s3367_s30 + $0xaf8] sm:$0xff] }
 0x17e   : > { %v1100_v23 = vld [vmem:[%s3367_s30 + $0xae8] sm:$0xff]  ;;  %v1101_v28 = vld [vmem:[%s3367_s30 + $0xaf0] sm:$0xff]  ;;  %8418 = vst [vmem:[#allocation328_spill] sm:$0xff] %v5212_v36  ;;  %8419 = vst [vmem:[#allocation329_spill] sm:$0xff] %v5214_v12  ;;  %v5230_v6 = vsub.f32 %v590_v19, %v1102_v17 }
 0x17f   : > { %8417 = vst [vmem:[#allocation93_spill] sm:$0xff] %v5202_v32  ;;  %v8420_v15 = vld [vmem:[#allocation94_spill] sm:$0xff]  ;;  %v603_v18 = vld [vmem:[%s3361_s17 + $0xb60] sm:$0xff]  ;;  %v604_v32 = vld [vmem:[%s3361_s17 + $0xb68] sm:$0xff]  ;;  %v5226_v26 = vsub.f32 %v588_v38, %v1100_v23  ;;  %v5228_v24 = vsub.f32 %v589_v13, %v1101_v28  ;;  %v5242_v23 = vsub.f32 %v591_v56, %v1103_v5 }
 0x180   : > { %v5218_v21 = vmul.f32 %v8420_v15, %v8420_v15  ;;  %v605_v9 = vld [vmem:[%s3361_s17 + $0xb70] sm:$0xff]  ;;  %v1104_v22 = vld [vmem:[%s3367_s30 + $0xb08] sm:$0xff]  ;;  %8424 = vst [vmem:[#allocation332_spill] sm:$0xff] %v5230_v6  ;;  %8425 = vst [vmem:[#allocation333_spill] sm:$0xff] %v5234_v48 }
 0x181   : > { %v1105_v46 = vld [vmem:[%s3367_s30 + $0xb10] sm:$0xff]  ;;  %8422 = vst [vmem:[#allocation330_spill] sm:$0xff] %v5226_v26  ;;  %8423 = vst [vmem:[#allocation331_spill] sm:$0xff] %v5228_v24  ;;  %v606_v7 = vld [vmem:[%s3361_s17 + $0xb78] sm:$0xff]  ;;  %v5244_v13 = vsub.f32 %v592_v50, %v1104_v22 }
 0x182   : > { %8421 = vst [vmem:[#allocation94_spill] sm:$0xff] %v5218_v21  ;;  %v607_v15 = vld [vmem:[%s3361_s17 + $0xb80] sm:$0xff]  ;;  %v608_v21 = vld [vmem:[%s3361_s17 + $0xb88] sm:$0xff]  ;;  %v1106_v12 = vld [vmem:[%s3367_s30 + $0xb18] sm:$0xff]  ;;  %v5246_v19 = vsub.f32 %v593_v61, %v1105_v46 }
 0x183   : > { %v1107_v36 = vld [vmem:[%s3367_s30 + $0xb20] sm:$0xff]  ;;  %v1108_v38 = vld [vmem:[%s3367_s30 + $0xb28] sm:$0xff]  ;;  %8426 = vst [vmem:[#allocation334_spill] sm:$0xff] %v5242_v23  ;;  %8427 = vst [vmem:[#allocation335_spill] sm:$0xff] %v5244_v13  ;;  %v5258_v5 = vsub.f32 %v594_v8, %v1106_v12 }
 0x184   : > { %8428 = vst [vmem:[#allocation336_spill] sm:$0xff] %v5246_v19  ;;  %v8429_v28 = vld [vmem:[#allocation96_spill] sm:$0xff]  ;;  %v609_v17 = vld [vmem:[%s3361_s17 + $0xb90] sm:$0xff]  ;;  %v610_v48 = vld [vmem:[%s3361_s17 + $0xb98] sm:$0xff]  ;;  %v5260_v50 = vsub.f32 %v595_v31, %v1107_v36  ;;  %v5262_v61 = vsub.f32 %v596_v63, %v1108_v38  ;;  %v5282_v36 = vmul.f32 %v3994_v41, %v3994_v41 }
 0x185   : > { %v5250_v33 = vmul.f32 %v8429_v28, %v8429_v28  ;;  %v611_v6 = vld [vmem:[%s3361_s17 + $0xba0] sm:$0xff]  ;;  %v1109_v24 = vld [vmem:[%s3367_s30 + $0xb30] sm:$0xff]  ;;  %v1110_v26 = vld [vmem:[%s3367_s30 + $0xb38] sm:$0xff] }
 0x186   : > { %v1111_v56 = vld [vmem:[%s3367_s30 + $0xb40] sm:$0xff]  ;;  %8431 = vst [vmem:[#allocation337_spill] sm:$0xff] %v5260_v50  ;;  %8432 = vst [vmem:[#allocation338_spill] sm:$0xff] %v5262_v61  ;;  %v8433_v22 = vld [vmem:[#allocation97_spill] sm:$0xff]  ;;  %v5274_v12 = vsub.f32 %v597_v47, %v1109_v24  ;;  %v5276_v31 = vsub.f32 %v598_v14, %v1110_v26 }
 0x187   : > { %8430 = vst [vmem:[#allocation96_spill] sm:$0xff] %v5250_v33  ;;  %v5266_v46 = vmul.f32 %v8433_v22, %v8433_v22  ;;  %v612_v28 = vld [vmem:[%s3361_s17 + $0xba8] sm:$0xff]  ;;  %v613_v33 = vld [vmem:[%s3361_s17 + $0xbb0] sm:$0xff]  ;;  %v614_v19 = vld [vmem:[%s3361_s17 + $0xbb8] sm:$0xff]  ;;  %v5278_v63 = vsub.f32 %v599_v29, %v1111_v56 }
 0x188   : > { %v1112_v13 = vld [vmem:[%s3367_s30 + $0xb48] sm:$0xff]  ;;  %v1113_v23 = vld [vmem:[%s3367_s30 + $0xb50] sm:$0xff]  ;;  %v1114_v8 = vld [vmem:[%s3367_s30 + $0xb58] sm:$0xff]  ;;  %8435 = vst [vmem:[#allocation339_spill] sm:$0xff] %v5274_v12 }
 0x189   : > { %8434 = vst [vmem:[#allocation97_spill] sm:$0xff] %v5266_v46  ;;  %8436 = vst [vmem:[#allocation340_spill] sm:$0xff] %v5276_v31  ;;  %v615_v38 = vld [vmem:[%s3361_s17 + $0xbc0] sm:$0xff]  ;;  %v616_v22 = vld [vmem:[%s3361_s17 + $0xbc8] sm:$0xff]  ;;  %v5290_v24 = vsub.f32 %v600_v51, %v1112_v13  ;;  %v5292_v14 = vsub.f32 %v601_v54, %v1113_v23  ;;  %v5294_v29 = vsub.f32 %v602_v45, %v1114_v8 }
 0x18a   : > { %8437 = vst [vmem:[#allocation341_spill] sm:$0xff] %v5278_v63  ;;  %8438 = vst [vmem:[#allocation342_spill] sm:$0xff] %v5282_v36  ;;  %v617_v46 = vld [vmem:[%s3361_s17 + $0xbd0] sm:$0xff]  ;;  %v1115_v61 = vld [vmem:[%s3367_s30 + $0xb60] sm:$0xff] }
 0x18b   : > { %v1116_v50 = vld [vmem:[%s3367_s30 + $0xb68] sm:$0xff]  ;;  %v1117_v47 = vld [vmem:[%s3367_s30 + $0xb70] sm:$0xff]  ;;  %8439 = vst [vmem:[#allocation343_spill] sm:$0xff] %v5290_v24  ;;  %8440 = vst [vmem:[#allocation344_spill] sm:$0xff] %v5292_v14  ;;  %v5306_v13 = vsub.f32 %v603_v18, %v1115_v61 }
 0x18c   : > { %8441 = vst [vmem:[#allocation345_spill] sm:$0xff] %v5294_v29  ;;  %v8442_v26 = vld [vmem:[#allocation99_spill] sm:$0xff]  ;;  %v620_v63 = vld [vmem:[%s3361_s17 + $0xbe8] sm:$0xff]  ;;  %v5308_v54 = vsub.f32 %v604_v32, %v1116_v50  ;;  %v5310_v45 = vsub.f32 %v605_v9, %v1117_v47  ;;  %v1121_v14 = vld [vmem:[%s3367_s30 + $0xb90] sm:$0xff]  ;;  %v5330_v50 = vmul.f32 %v4010_v42, %v4010_v42 }
 0x18d   : > { %v5298_v41 = vmul.f32 %v8442_v26, %v8442_v26  ;;  %v618_v56 = vld [vmem:[%s3361_s17 + $0xbd8] sm:$0xff]  ;;  %v619_v36 = vld [vmem:[%s3361_s17 + $0xbe0] sm:$0xff]  ;;  %v1120_v51 = vld [vmem:[%s3367_s30 + $0xb88] sm:$0xff] }
 0x18e   : > { %v1118_v31 = vld [vmem:[%s3367_s30 + $0xb78] sm:$0xff]  ;;  %v1119_v12 = vld [vmem:[%s3367_s30 + $0xb80] sm:$0xff]  ;;  %8444 = vst [vmem:[#allocation346_spill] sm:$0xff] %v5308_v54  ;;  %8445 = vst [vmem:[#allocation347_spill] sm:$0xff] %v5310_v45  ;;  %v5326_v9 = vsub.f32 %v608_v21, %v1120_v51 }
 0x18f   : > { %8443 = vst [vmem:[#allocation99_spill] sm:$0xff] %v5298_v41  ;;  %v8446_v23 = vld [vmem:[#allocation100_spill] sm:$0xff]  ;;  %v621_v26 = vld [vmem:[%s3361_s17 + $0xbf0] sm:$0xff]  ;;  %v622_v41 = vld [vmem:[%s3361_s17 + $0xbf8] sm:$0xff]  ;;  %v5322_v61 = vsub.f32 %v606_v7, %v1118_v31  ;;  %v5324_v32 = vsub.f32 %v607_v15, %v1119_v12  ;;  %v5338_v31 = vsub.f32 %v609_v17, %v1121_v14 }
 0x190   : > { %v5314_v8 = vmul.f32 %v8446_v23, %v8446_v23  ;;  %v623_v29 = vld [vmem:[%s3361_s17 + $0xc00] sm:$0xff]  ;;  %v1122_v24 = vld [vmem:[%s3367_s30 + $0xb98] sm:$0xff]  ;;  %8450 = vst [vmem:[#allocation350_spill] sm:$0xff] %v5326_v9  ;;  %8451 = vst [vmem:[#allocation351_spill] sm:$0xff] %v5330_v50 }
 0x191   : > { %v1123_v18 = vld [vmem:[%s3367_s30 + $0xba0] sm:$0xff]  ;;  %8448 = vst [vmem:[#allocation348_spill] sm:$0xff] %v5322_v61  ;;  %8449 = vst [vmem:[#allocation349_spill] sm:$0xff] %v5324_v32  ;;  %v624_v47 = vld [vmem:[%s3361_s17 + $0xc08] sm:$0xff]  ;;  %v5340_v15 = vsub.f32 %v610_v48, %v1122_v24 }
 0x192   : > { %8447 = vst [vmem:[#allocation100_spill] sm:$0xff] %v5314_v8  ;;  %v625_v23 = vld [vmem:[%s3361_s17 + $0xc10] sm:$0xff]  ;;  %v626_v8 = vld [vmem:[%s3361_s17 + $0xc18] sm:$0xff]  ;;  %v1124_v45 = vld [vmem:[%s3367_s30 + $0xba8] sm:$0xff]  ;;  %v5342_v21 = vsub.f32 %v611_v6, %v1123_v18 }
 0x193   : > { %v1125_v54 = vld [vmem:[%s3367_s30 + $0xbb0] sm:$0xff]  ;;  %v1126_v7 = vld [vmem:[%s3367_s30 + $0xbb8] sm:$0xff]  ;;  %8452 = vst [vmem:[#allocation352_spill] sm:$0xff] %v5338_v31  ;;  %8453 = vst [vmem:[#allocation353_spill] sm:$0xff] %v5340_v15  ;;  %v5354_v14 = vsub.f32 %v612_v28, %v1124_v45 }
 0x194   : > { %8454 = vst [vmem:[#allocation354_spill] sm:$0xff] %v5342_v21  ;;  %v8455_v12 = vld [vmem:[#allocation102_spill] sm:$0xff]  ;;  %v627_v51 = vld [vmem:[%s3361_s17 + $0xc20] sm:$0xff]  ;;  %v628_v50 = vld [vmem:[%s3361_s17 + $0xc28] sm:$0xff]  ;;  %v5356_v48 = vsub.f32 %v613_v33, %v1125_v54  ;;  %v5358_v6 = vsub.f32 %v614_v19, %v1126_v7  ;;  %v5378_v54 = vmul.f32 %v4026_v43, %v4026_v43 }
 0x195   : > { %v5346_v42 = vmul.f32 %v8455_v12, %v8455_v12  ;;  %v629_v9 = vld [vmem:[%s3361_s17 + $0xc30] sm:$0xff]  ;;  %v1127_v32 = vld [vmem:[%s3367_s30 + $0xbc0] sm:$0xff]  ;;  %v1128_v61 = vld [vmem:[%s3367_s30 + $0xbc8] sm:$0xff] }
 0x196   : > { %v1129_v17 = vld [vmem:[%s3367_s30 + $0xbd0] sm:$0xff]  ;;  %8457 = vst [vmem:[#allocation355_spill] sm:$0xff] %v5356_v48  ;;  %8458 = vst [vmem:[#allocation356_spill] sm:$0xff] %v5358_v6  ;;  %v8459_v24 = vld [vmem:[#allocation103_spill] sm:$0xff]  ;;  %v5370_v45 = vsub.f32 %v615_v38, %v1127_v32  ;;  %v5372_v33 = vsub.f32 %v616_v22, %v1128_v61 }
 0x197   : > { %8456 = vst [vmem:[#allocation102_spill] sm:$0xff] %v5346_v42  ;;  %v5362_v18 = vmul.f32 %v8459_v24, %v8459_v24  ;;  %v630_v12 = vld [vmem:[%s3361_s17 + $0xc38] sm:$0xff]  ;;  %v631_v42 = vld [vmem:[%s3361_s17 + $0xc40] sm:$0xff]  ;;  %v632_v21 = vld [vmem:[%s3361_s17 + $0xc48] sm:$0xff]  ;;  %v5374_v19 = vsub.f32 %v617_v46, %v1129_v17 }
 0x198   : > { %v1130_v15 = vld [vmem:[%s3367_s30 + $0xbd8] sm:$0xff]  ;;  %v1131_v31 = vld [vmem:[%s3367_s30 + $0xbe0] sm:$0xff]  ;;  %v1132_v28 = vld [vmem:[%s3367_s30 + $0xbe8] sm:$0xff]  ;;  %8461 = vst [vmem:[#allocation357_spill] sm:$0xff] %v5370_v45 }
 0x199   : > { %8460 = vst [vmem:[#allocation103_spill] sm:$0xff] %v5362_v18  ;;  %8462 = vst [vmem:[#allocation358_spill] sm:$0xff] %v5372_v33  ;;  %v633_v7 = vld [vmem:[%s3361_s17 + $0xc50] sm:$0xff]  ;;  %v634_v24 = vld [vmem:[%s3361_s17 + $0xc58] sm:$0xff]  ;;  %v5386_v32 = vsub.f32 %v618_v56, %v1130_v15  ;;  %v5388_v22 = vsub.f32 %v619_v36, %v1131_v31  ;;  %v5390_v46 = vsub.f32 %v620_v63, %v1132_v28 }
 0x19a   : > { %8463 = vst [vmem:[#allocation359_spill] sm:$0xff] %v5374_v19  ;;  %8464 = vst [vmem:[#allocation360_spill] sm:$0xff] %v5378_v54  ;;  %v635_v18 = vld [vmem:[%s3361_s17 + $0xc60] sm:$0xff]  ;;  %v1133_v6 = vld [vmem:[%s3367_s30 + $0xbf0] sm:$0xff] }
 0x19b   : > { %v1134_v48 = vld [vmem:[%s3367_s30 + $0xbf8] sm:$0xff]  ;;  %v1135_v38 = vld [vmem:[%s3367_s30 + $0xc00] sm:$0xff]  ;;  %8465 = vst [vmem:[#allocation361_spill] sm:$0xff] %v5386_v32  ;;  %8466 = vst [vmem:[#allocation362_spill] sm:$0xff] %v5388_v22  ;;  %v5402_v15 = vsub.f32 %v621_v26, %v1133_v6 }
 0x19c   : > { %8467 = vst [vmem:[#allocation363_spill] sm:$0xff] %v5390_v46  ;;  %v8468_v61 = vld [vmem:[#allocation105_spill] sm:$0xff]  ;;  %v638_v19 = vld [vmem:[%s3361_s17 + $0xc78] sm:$0xff]  ;;  %v5404_v36 = vsub.f32 %v622_v41, %v1134_v48  ;;  %v5406_v63 = vsub.f32 %v623_v29, %v1135_v38  ;;  %v1139_v22 = vld [vmem:[%s3367_s30 + $0xc20] sm:$0xff]  ;;  %v5426_v48 = vmul.f32 %v4042_v10, %v4042_v10 }
 0x19d   : > { %v5394_v43 = vmul.f32 %v8468_v61, %v8468_v61  ;;  %v636_v17 = vld [vmem:[%s3361_s17 + $0xc68] sm:$0xff]  ;;  %v637_v54 = vld [vmem:[%s3361_s17 + $0xc70] sm:$0xff]  ;;  %v1138_v56 = vld [vmem:[%s3367_s30 + $0xc18] sm:$0xff] }
 0x19e   : > { %v1136_v33 = vld [vmem:[%s3367_s30 + $0xc08] sm:$0xff]  ;;  %v1137_v45 = vld [vmem:[%s3367_s30 + $0xc10] sm:$0xff]  ;;  %8470 = vst [vmem:[#allocation364_spill] sm:$0xff] %v5404_v36  ;;  %8471 = vst [vmem:[#allocation365_spill] sm:$0xff] %v5406_v63  ;;  %v5422_v29 = vsub.f32 %v626_v8, %v1138_v56 }
 0x19f   : > { %8469 = vst [vmem:[#allocation105_spill] sm:$0xff] %v5394_v43  ;;  %v8472_v31 = vld [vmem:[#allocation106_spill] sm:$0xff]  ;;  %v639_v61 = vld [vmem:[%s3361_s17 + $0xc80] sm:$0xff]  ;;  %v640_v43 = vld [vmem:[%s3361_s17 + $0xc88] sm:$0xff]  ;;  %v5418_v6 = vsub.f32 %v624_v47, %v1136_v33  ;;  %v5420_v41 = vsub.f32 %v625_v23, %v1137_v45  ;;  %v5434_v33 = vsub.f32 %v627_v51, %v1139_v22 }
 0x1a0   : > { %v5410_v28 = vmul.f32 %v8472_v31, %v8472_v31  ;;  %v641_v46 = vld [vmem:[%s3361_s17 + $0xc90] sm:$0xff]  ;;  %v1140_v32 = vld [vmem:[%s3367_s30 + $0xc28] sm:$0xff]  ;;  %8476 = vst [vmem:[#allocation368_spill] sm:$0xff] %v5422_v29  ;;  %8477 = vst [vmem:[#allocation369_spill] sm:$0xff] %v5426_v48 }
 0x1a1   : > { %v1141_v26 = vld [vmem:[%s3367_s30 + $0xc30] sm:$0xff]  ;;  %8474 = vst [vmem:[#allocation366_spill] sm:$0xff] %v5418_v6  ;;  %8475 = vst [vmem:[#allocation367_spill] sm:$0xff] %v5420_v41  ;;  %v642_v38 = vld [vmem:[%s3361_s17 + $0xc98] sm:$0xff]  ;;  %v5436_v23 = vsub.f32 %v628_v50, %v1140_v32 }
 0x1a2   : > { %8473 = vst [vmem:[#allocation106_spill] sm:$0xff] %v5410_v28  ;;  %v643_v31 = vld [vmem:[%s3361_s17 + $0xca0] sm:$0xff]  ;;  %v644_v28 = vld [vmem:[%s3361_s17 + $0xca8] sm:$0xff]  ;;  %v1142_v63 = vld [vmem:[%s3367_s30 + $0xc38] sm:$0xff]  ;;  %v5438_v8 = vsub.f32 %v629_v9, %v1141_v26 }
 0x1a3   : > { %v1143_v36 = vld [vmem:[%s3367_s30 + $0xc40] sm:$0xff]  ;;  %v1144_v47 = vld [vmem:[%s3367_s30 + $0xc48] sm:$0xff]  ;;  %8478 = vst [vmem:[#allocation370_spill] sm:$0xff] %v5434_v33  ;;  %8479 = vst [vmem:[#allocation371_spill] sm:$0xff] %v5436_v23  ;;  %v5450_v22 = vsub.f32 %v630_v12, %v1142_v63 }
 0x1a4   : > { %8480 = vst [vmem:[#allocation372_spill] sm:$0xff] %v5438_v8  ;;  %v8481_v45 = vld [vmem:[#allocation108_spill] sm:$0xff]  ;;  %v645_v56 = vld [vmem:[%s3361_s17 + $0xcb0] sm:$0xff]  ;;  %v646_v48 = vld [vmem:[%s3361_s17 + $0xcb8] sm:$0xff]  ;;  %v5452_v50 = vsub.f32 %v631_v42, %v1143_v36  ;;  %v5454_v9 = vsub.f32 %v632_v21, %v1144_v47  ;;  %v5474_v36 = vmul.f32 %v4058_v52, %v4058_v52 }
 0x1a5   : > { %v5442_v10 = vmul.f32 %v8481_v45, %v8481_v45  ;;  %v647_v29 = vld [vmem:[%s3361_s17 + $0xcc0] sm:$0xff]  ;;  %v1145_v41 = vld [vmem:[%s3367_s30 + $0xc50] sm:$0xff]  ;;  %v1146_v6 = vld [vmem:[%s3367_s30 + $0xc58] sm:$0xff] }
 0x1a6   : > { %v1147_v51 = vld [vmem:[%s3367_s30 + $0xc60] sm:$0xff]  ;;  %8483 = vst [vmem:[#allocation373_spill] sm:$0xff] %v5452_v50  ;;  %8484 = vst [vmem:[#allocation374_spill] sm:$0xff] %v5454_v9  ;;  %v8485_v32 = vld [vmem:[#allocation109_spill] sm:$0xff]  ;;  %v5466_v63 = vsub.f32 %v633_v7, %v1145_v41  ;;  %v5468_v42 = vsub.f32 %v634_v24, %v1146_v6 }
 0x1a7   : > { %8482 = vst [vmem:[#allocation108_spill] sm:$0xff] %v5442_v10  ;;  %v5458_v26 = vmul.f32 %v8485_v32, %v8485_v32  ;;  %v648_v45 = vld [vmem:[%s3361_s17 + $0xcc8] sm:$0xff]  ;;  %v649_v10 = vld [vmem:[%s3361_s17 + $0xcd0] sm:$0xff]  ;;  %v650_v8 = vld [vmem:[%s3361_s17 + $0xcd8] sm:$0xff]  ;;  %v5470_v21 = vsub.f32 %v635_v18, %v1147_v51 }
 0x1a8   : > { %v1148_v23 = vld [vmem:[%s3367_s30 + $0xc68] sm:$0xff]  ;;  %v1149_v33 = vld [vmem:[%s3367_s30 + $0xc70] sm:$0xff]  ;;  %v1150_v12 = vld [vmem:[%s3367_s30 + $0xc78] sm:$0xff]  ;;  %8487 = vst [vmem:[#allocation375_spill] sm:$0xff] %v5466_v63 }
 0x1a9   : > { %8486 = vst [vmem:[#allocation109_spill] sm:$0xff] %v5458_v26  ;;  %8488 = vst [vmem:[#allocation376_spill] sm:$0xff] %v5468_v42  ;;  %v651_v47 = vld [vmem:[%s3361_s17 + $0xce0] sm:$0xff]  ;;  %v652_v32 = vld [vmem:[%s3361_s17 + $0xce8] sm:$0xff]  ;;  %v5482_v41 = vsub.f32 %v636_v17, %v1148_v23  ;;  %v5484_v24 = vsub.f32 %v637_v54, %v1149_v33  ;;  %v5486_v18 = vsub.f32 %v638_v19, %v1150_v12 }
 0x1aa   : > { %8489 = vst [vmem:[#allocation377_spill] sm:$0xff] %v5470_v21  ;;  %8490 = vst [vmem:[#allocation378_spill] sm:$0xff] %v5474_v36  ;;  %v653_v26 = vld [vmem:[%s3361_s17 + $0xcf0] sm:$0xff]  ;;  %v1151_v9 = vld [vmem:[%s3367_s30 + $0xc80] sm:$0xff] }
 0x1ab   : > { %v1152_v50 = vld [vmem:[%s3367_s30 + $0xc88] sm:$0xff]  ;;  %v1153_v7 = vld [vmem:[%s3367_s30 + $0xc90] sm:$0xff]  ;;  %8491 = vst [vmem:[#allocation379_spill] sm:$0xff] %v5482_v41  ;;  %8492 = vst [vmem:[#allocation380_spill] sm:$0xff] %v5484_v24  ;;  %v5498_v23 = vsub.f32 %v639_v61, %v1151_v9 }
 0x1ac   : > { %8493 = vst [vmem:[#allocation381_spill] sm:$0xff] %v5486_v18  ;;  %v8494_v6 = vld [vmem:[#allocation111_spill] sm:$0xff]  ;;  %v656_v21 = vld [vmem:[%s3361_s17 + $0xd08] sm:$0xff]  ;;  %v5500_v54 = vsub.f32 %v640_v43, %v1152_v50  ;;  %v5502_v19 = vsub.f32 %v641_v46, %v1153_v7  ;;  %v1157_v24 = vld [vmem:[%s3367_s30 + $0xcb0] sm:$0xff]  ;;  %v5522_v50 = vmul.f32 %v4074_v53, %v4074_v53 }
 0x1ad   : > { %v5490_v52 = vmul.f32 %v8494_v6, %v8494_v6  ;;  %v654_v51 = vld [vmem:[%s3361_s17 + $0xcf8] sm:$0xff]  ;;  %v655_v36 = vld [vmem:[%s3361_s17 + $0xd00] sm:$0xff]  ;;  %v1156_v17 = vld [vmem:[%s3367_s30 + $0xca8] sm:$0xff] }
 0x1ae   : > { %v1154_v42 = vld [vmem:[%s3367_s30 + $0xc98] sm:$0xff]  ;;  %v1155_v63 = vld [vmem:[%s3367_s30 + $0xca0] sm:$0xff]  ;;  %8496 = vst [vmem:[#allocation382_spill] sm:$0xff] %v5500_v54  ;;  %8497 = vst [vmem:[#allocation383_spill] sm:$0xff] %v5502_v19  ;;  %v5518_v46 = vsub.f32 %v644_v28, %v1156_v17 }
 0x1af   : > { %8495 = vst [vmem:[#allocation111_spill] sm:$0xff] %v5490_v52  ;;  %v8498_v33 = vld [vmem:[#allocation112_spill] sm:$0xff]  ;;  %v657_v6 = vld [vmem:[%s3361_s17 + $0xd10] sm:$0xff]  ;;  %v658_v52 = vld [vmem:[%s3361_s17 + $0xd18] sm:$0xff]  ;;  %v5514_v9 = vsub.f32 %v642_v38, %v1154_v42  ;;  %v5516_v43 = vsub.f32 %v643_v31, %v1155_v63  ;;  %v5530_v42 = vsub.f32 %v645_v56, %v1157_v24 }
 0x1b0   : > { %v5506_v12 = vmul.f32 %v8498_v33, %v8498_v33  ;;  %v659_v18 = vld [vmem:[%s3361_s17 + $0xd20] sm:$0xff]  ;;  %v1158_v41 = vld [vmem:[%s3367_s30 + $0xcb8] sm:$0xff]  ;;  %8502 = vst [vmem:[#allocation386_spill] sm:$0xff] %v5518_v46  ;;  %8503 = vst [vmem:[#allocation387_spill] sm:$0xff] %v5522_v50 }
 0x1b1   : > { %v1159_v61 = vld [vmem:[%s3367_s30 + $0xcc0] sm:$0xff]  ;;  %8500 = vst [vmem:[#allocation384_spill] sm:$0xff] %v5514_v9  ;;  %8501 = vst [vmem:[#allocation385_spill] sm:$0xff] %v5516_v43  ;;  %v660_v7 = vld [vmem:[%s3361_s17 + $0xd28] sm:$0xff]  ;;  %v5532_v31 = vsub.f32 %v646_v48, %v1158_v41 }
 0x1b2   : > { %8499 = vst [vmem:[#allocation112_spill] sm:$0xff] %v5506_v12  ;;  %v661_v33 = vld [vmem:[%s3361_s17 + $0xd30] sm:$0xff]  ;;  %v662_v12 = vld [vmem:[%s3361_s17 + $0xd38] sm:$0xff]  ;;  %v1160_v19 = vld [vmem:[%s3367_s30 + $0xcc8] sm:$0xff]  ;;  %v5534_v28 = vsub.f32 %v647_v29, %v1159_v61 }
 0x1b3   : > { %v1161_v54 = vld [vmem:[%s3367_s30 + $0xcd0] sm:$0xff]  ;;  %v1162_v38 = vld [vmem:[%s3367_s30 + $0xcd8] sm:$0xff]  ;;  %8504 = vst [vmem:[#allocation388_spill] sm:$0xff] %v5530_v42  ;;  %8505 = vst [vmem:[#allocation389_spill] sm:$0xff] %v5532_v31  ;;  %v5546_v24 = vsub.f32 %v648_v45, %v1160_v19 }
 0x1b4   : > { %8506 = vst [vmem:[#allocation390_spill] sm:$0xff] %v5534_v28  ;;  %v8507_v63 = vld [vmem:[#allocation114_spill] sm:$0xff]  ;;  %v663_v17 = vld [vmem:[%s3361_s17 + $0xd40] sm:$0xff]  ;;  %v664_v50 = vld [vmem:[%s3361_s17 + $0xd48] sm:$0xff]  ;;  %v5548_v48 = vsub.f32 %v649_v10, %v1161_v54  ;;  %v5550_v29 = vsub.f32 %v650_v8, %v1162_v38 }
 0x1b5   : > { %v5538_v53 = vmul.f32 %v8507_v63, %v8507_v63  ;;  %v665_v46 = vld [vmem:[%s3361_s17 + $0xd50] sm:$0xff]  ;;  %v1163_v43 = vld [vmem:[%s3367_s30 + $0xce0] sm:$0xff]  ;;  %v1164_v9 = vld [vmem:[%s3367_s30 + $0xce8] sm:$0xff]  ;;  %8509 = vst [vmem:[#allocation391_spill] sm:$0xff] %v5546_v24 }
 0x1b6   : > { %v1165_v56 = vld [vmem:[%s3367_s30 + $0xcf0] sm:$0xff]  ;;  %8510 = vst [vmem:[#allocation392_spill] sm:$0xff] %v5548_v48  ;;  %8511 = vst [vmem:[#allocation393_spill] sm:$0xff] %v5550_v29  ;;  %v8512_v41 = vld [vmem:[#allocation115_spill] sm:$0xff]  ;;  %v5562_v19 = vsub.f32 %v651_v47, %v1163_v43  ;;  %v5564_v10 = vsub.f32 %v652_v32, %v1164_v9 }
 0x1b7   : > { %8508 = vst [vmem:[#allocation114_spill] sm:$0xff] %v5538_v53  ;;  %v5554_v61 = vmul.f32 %v8512_v41, %v8512_v41  ;;  %v666_v63 = vld [vmem:[%s3361_s17 + $0xd58] sm:$0xff]  ;;  %v667_v53 = vld [vmem:[%s3361_s17 + $0xd60] sm:$0xff]  ;;  %v668_v28 = vld [vmem:[%s3361_s17 + $0xd68] sm:$0xff]  ;;  %v5566_v8 = vsub.f32 %v653_v26, %v1165_v56 }
 0x1b8   : > { %v1166_v31 = vld [vmem:[%s3367_s30 + $0xcf8] sm:$0xff]  ;;  %v1167_v42 = vld [vmem:[%s3367_s30 + $0xd00] sm:$0xff]  ;;  %v1168_v45 = vld [vmem:[%s3367_s30 + $0xd08] sm:$0xff]  ;;  %8514 = vst [vmem:[#allocation394_spill] sm:$0xff] %v5562_v19 }
 0x1b9   : > { %8513 = vst [vmem:[#allocation115_spill] sm:$0xff] %v5554_v61  ;;  %8515 = vst [vmem:[#allocation395_spill] sm:$0xff] %v5564_v10  ;;  %v8517_v54 = vld [vmem:[#allocation117_spill] sm:$0xff]  ;;  %v670_v61 = vld [vmem:[%s3361_s17 + $0xd78] sm:$0xff]  ;;  %v5578_v43 = vsub.f32 %v654_v51, %v1166_v31  ;;  %v5580_v32 = vsub.f32 %v655_v36, %v1167_v42  ;;  %v5582_v26 = vsub.f32 %v656_v21, %v1168_v45 }
 0x1ba   : > { %8516 = vst [vmem:[#allocation396_spill] sm:$0xff] %v5566_v8  ;;  %v5570_v38 = vmul.f32 %v8517_v54, %v8517_v54  ;;  %v669_v41 = vld [vmem:[%s3361_s17 + $0xd70] sm:$0xff]  ;;  %v671_v29 = vld [vmem:[%s3361_s17 + $0xd80] sm:$0xff]  ;;  %v1170_v24 = vld [vmem:[%s3367_s30 + $0xd18] sm:$0xff] }
 0x1bb   : > { %v1169_v48 = vld [vmem:[%s3367_s30 + $0xd10] sm:$0xff]  ;;  %v1171_v47 = vld [vmem:[%s3367_s30 + $0xd20] sm:$0xff]  ;;  %8519 = vst [vmem:[#allocation397_spill] sm:$0xff] %v5578_v43  ;;  %8520 = vst [vmem:[#allocation398_spill] sm:$0xff] %v5580_v32  ;;  %v5596_v36 = vsub.f32 %v658_v52, %v1170_v24  ;;  %v5618_v24 = vmul.f32 %v4106_v62, %v4106_v62 }
 0x1bc   : > { %8518 = vst [vmem:[#allocation117_spill] sm:$0xff] %v5570_v38  ;;  %8521 = vst [vmem:[#allocation399_spill] sm:$0xff] %v5582_v26  ;;  %v8522_v9 = vld [vmem:[#allocation118_spill] sm:$0xff]  ;;  %v672_v54 = vld [vmem:[%s3361_s17 + $0xd88] sm:$0xff]  ;;  %v5594_v31 = vsub.f32 %v657_v6, %v1169_v48  ;;  %v5598_v21 = vsub.f32 %v659_v18, %v1171_v47 }
 0x1bd   : > { %v5586_v56 = vmul.f32 %v8522_v9, %v8522_v9  ;;  %v673_v38 = vld [vmem:[%s3361_s17 + $0xd90] sm:$0xff]  ;;  %v674_v8 = vld [vmem:[%s3361_s17 + $0xd98] sm:$0xff]  ;;  %v1172_v10 = vld [vmem:[%s3367_s30 + $0xd28] sm:$0xff]  ;;  %8524 = vst [vmem:[#allocation400_spill] sm:$0xff] %v5596_v36 }
 0x1be   : > { %v1173_v19 = vld [vmem:[%s3367_s30 + $0xd30] sm:$0xff]  ;;  %v1174_v51 = vld [vmem:[%s3367_s30 + $0xd38] sm:$0xff]  ;;  %8525 = vst [vmem:[#allocation401_spill] sm:$0xff] %v5598_v21  ;;  %v675_v9 = vld [vmem:[%s3361_s17 + $0xda0] sm:$0xff]  ;;  %v5610_v48 = vsub.f32 %v660_v7, %v1172_v10 }
 0x1bf   : > { %8523 = vst [vmem:[#allocation118_spill] sm:$0xff] %v5586_v56  ;;  %v8526_v42 = vld [vmem:[#allocation119_spill] sm:$0xff]  ;;  %v676_v56 = vld [vmem:[%s3361_s17 + $0xda8] sm:$0xff]  ;;  %v677_v26 = vld [vmem:[%s3361_s17 + $0xdb0] sm:$0xff]  ;;  %v5612_v52 = vsub.f32 %v661_v33, %v1173_v19  ;;  %v5614_v18 = vsub.f32 %v662_v12, %v1174_v51 }
 0x1c0   : > { %v5602_v45 = vmul.f32 %v8526_v42, %v8526_v42  ;;  %v1175_v32 = vld [vmem:[%s3367_s30 + $0xd40] sm:$0xff]  ;;  %v1176_v43 = vld [vmem:[%s3367_s30 + $0xd48] sm:$0xff]  ;;  %v1177_v6 = vld [vmem:[%s3367_s30 + $0xd50] sm:$0xff]  ;;  %8528 = vst [vmem:[#allocation402_spill] sm:$0xff] %v5610_v48 }
 0x1c1   : > { %8529 = vst [vmem:[#allocation403_spill] sm:$0xff] %v5612_v52  ;;  %8530 = vst [vmem:[#allocation404_spill] sm:$0xff] %v5614_v18  ;;  %v678_v47 = vld [vmem:[%s3361_s17 + $0xdb8] sm:$0xff]  ;;  %v679_v42 = vld [vmem:[%s3361_s17 + $0xdc0] sm:$0xff]  ;;  %v5626_v10 = vsub.f32 %v663_v17, %v1175_v32  ;;  %v5628_v33 = vsub.f32 %v664_v50, %v1176_v43  ;;  %v5630_v12 = vsub.f32 %v665_v46, %v1177_v6 }
 0x1c2   : > { %8527 = vst [vmem:[#allocation119_spill] sm:$0xff] %v5602_v45  ;;  %8531 = vst [vmem:[#allocation405_spill] sm:$0xff] %v5618_v24  ;;  %v680_v45 = vld [vmem:[%s3361_s17 + $0xdc8] sm:$0xff]  ;;  %v1178_v21 = vld [vmem:[%s3367_s30 + $0xd58] sm:$0xff] }
 0x1c3   : > { %v1179_v36 = vld [vmem:[%s3367_s30 + $0xd60] sm:$0xff]  ;;  %v1180_v7 = vld [vmem:[%s3367_s30 + $0xd68] sm:$0xff]  ;;  %8532 = vst [vmem:[#allocation406_spill] sm:$0xff] %v5626_v10  ;;  %8533 = vst [vmem:[#allocation407_spill] sm:$0xff] %v5628_v33  ;;  %v5642_v32 = vsub.f32 %v666_v63, %v1178_v21 }
 0x1c4   : > { %8534 = vst [vmem:[#allocation408_spill] sm:$0xff] %v5630_v12  ;;  %v8535_v19 = vld [vmem:[#allocation121_spill] sm:$0xff]  ;;  %v682_v24 = vld [vmem:[%s3361_s17 + $0xdd8] sm:$0xff]  ;;  %v683_v18 = vld [vmem:[%s3361_s17 + $0xde0] sm:$0xff]  ;;  %v5644_v50 = vsub.f32 %v667_v53, %v1179_v36  ;;  %v5646_v46 = vsub.f32 %v668_v28, %v1180_v7 }
 0x1c5   : > { %v5634_v62 = vmul.f32 %v8535_v19, %v8535_v19  ;;  %v681_v51 = vld [vmem:[%s3361_s17 + $0xdd0] sm:$0xff]  ;;  %v1182_v48 = vld [vmem:[%s3367_s30 + $0xd78] sm:$0xff]  ;;  %v1183_v17 = vld [vmem:[%s3367_s30 + $0xd80] sm:$0xff]  ;;  %8537 = vst [vmem:[#allocation409_spill] sm:$0xff] %v5642_v32 }
 0x1c6   : > { %v1181_v52 = vld [vmem:[%s3367_s30 + $0xd70] sm:$0xff]  ;;  %8538 = vst [vmem:[#allocation410_spill] sm:$0xff] %v5644_v50  ;;  %8539 = vst [vmem:[#allocation411_spill] sm:$0xff] %v5646_v46  ;;  %v684_v19 = vld [vmem:[%s3361_s17 + $0xde8] sm:$0xff]  ;;  %v5660_v53 = vsub.f32 %v670_v61, %v1182_v48  ;;  %v5662_v28 = vsub.f32 %v671_v29, %v1183_v17 }
 0x1c7   : > { %8536 = vst [vmem:[#allocation121_spill] sm:$0xff] %v5634_v62  ;;  %v8540_v43 = vld [vmem:[#allocation122_spill] sm:$0xff]  ;;  %v1184_v33 = vld [vmem:[%s3367_s30 + $0xd88] sm:$0xff]  ;;  %v5658_v21 = vsub.f32 %v669_v41, %v1181_v52  ;;  %v8545_v36 = vld [vmem:[#allocation123_spill] sm:$0xff] }
 0x1c8   : > { %v5650_v6 = vmul.f32 %v8540_v43, %v8540_v43  ;;  %v685_v62 = vld [vmem:[%s3361_s17 + $0xdf0] sm:$0xff]  ;;  %v686_v12 = vld [vmem:[%s3361_s17 + $0xdf8] sm:$0xff]  ;;  %8543 = vst [vmem:[#allocation413_spill] sm:$0xff] %v5660_v53  ;;  %8544 = vst [vmem:[#allocation414_spill] sm:$0xff] %v5662_v28  ;;  %v5666_v7 = vmul.f32 %v8545_v36, %v8545_v36  ;;  %v5674_v52 = vsub.f32 %v672_v54, %v1184_v33 }
 0x1c9   : > { %v1185_v10 = vld [vmem:[%s3367_s30 + $0xd90] sm:$0xff]  ;;  %v1186_v63 = vld [vmem:[%s3367_s30 + $0xd98] sm:$0xff]  ;;  %8542 = vst [vmem:[#allocation412_spill] sm:$0xff] %v5658_v21  ;;  %v687_v43 = vld [vmem:[%s3361_s17 + $0xe00] sm:$0xff] }
 0x1ca   : > { %8541 = vst [vmem:[#allocation122_spill] sm:$0xff] %v5650_v6  ;;  %8546 = vst [vmem:[#allocation123_spill] sm:$0xff] %v5666_v7  ;;  %v688_v6 = vld [vmem:[%s3361_s17 + $0xe08] sm:$0xff]  ;;  %v689_v46 = vld [vmem:[%s3361_s17 + $0xe10] sm:$0xff]  ;;  %v5676_v61 = vsub.f32 %v673_v38, %v1185_v10  ;;  %v5678_v29 = vsub.f32 %v674_v8, %v1186_v63 }
 0x1cb   : > { %v1187_v50 = vld [vmem:[%s3367_s30 + $0xda0] sm:$0xff]  ;;  %v1188_v32 = vld [vmem:[%s3367_s30 + $0xda8] sm:$0xff]  ;;  %v1189_v41 = vld [vmem:[%s3367_s30 + $0xdb0] sm:$0xff]  ;;  %8547 = vst [vmem:[#allocation415_spill] sm:$0xff] %v5674_v52 }
 0x1cc   : > { %8548 = vst [vmem:[#allocation416_spill] sm:$0xff] %v5676_v61  ;;  %8549 = vst [vmem:[#allocation417_spill] sm:$0xff] %v5678_v29  ;;  %v8550_v48 = vld [vmem:[#allocation124_spill] sm:$0xff]  ;;  %v690_v36 = vld [vmem:[%s3361_s17 + $0xe18] sm:$0xff]  ;;  %v5690_v33 = vsub.f32 %v675_v9, %v1187_v50  ;;  %v5692_v38 = vsub.f32 %v676_v56, %v1188_v32  ;;  %v5694_v8 = vsub.f32 %v677_v26, %v1189_v41 }
 0x1cd   : > { %v5682_v17 = vmul.f32 %v8550_v48, %v8550_v48  ;;  %v691_v7 = vld [vmem:[%s3361_s17 + $0xe20] sm:$0xff]  ;;  %v692_v28 = vld [vmem:[%s3361_s17 + $0xe28] sm:$0xff]  ;;  %v1190_v53 = vld [vmem:[%s3367_s30 + $0xdb8] sm:$0xff] }
 0x1ce   : > { %v1191_v21 = vld [vmem:[%s3367_s30 + $0xdc0] sm:$0xff]  ;;  %v1192_v54 = vld [vmem:[%s3367_s30 + $0xdc8] sm:$0xff]  ;;  %8552 = vst [vmem:[#allocation418_spill] sm:$0xff] %v5690_v33  ;;  %8553 = vst [vmem:[#allocation419_spill] sm:$0xff] %v5692_v38  ;;  %v5706_v50 = vsub.f32 %v678_v47, %v1190_v53 }
 0x1cf   : > { %8551 = vst [vmem:[#allocation124_spill] sm:$0xff] %v5682_v17  ;;  %8554 = vst [vmem:[#allocation420_spill] sm:$0xff] %v5694_v8  ;;  %v8555_v10 = vld [vmem:[#allocation125_spill] sm:$0xff]  ;;  %v694_v17 = vld [vmem:[%s3361_s17 + $0xe38] sm:$0xff]  ;;  %v5708_v56 = vsub.f32 %v679_v42, %v1191_v21  ;;  %v5710_v26 = vsub.f32 %v680_v45, %v1192_v54 }
 0x1d0   : > { %v5698_v63 = vmul.f32 %v8555_v10, %v8555_v10  ;;  %v693_v48 = vld [vmem:[%s3361_s17 + $0xe30] sm:$0xff]  ;;  %v695_v29 = vld [vmem:[%s3361_s17 + $0xe40] sm:$0xff]  ;;  %v1194_v52 = vld [vmem:[%s3367_s30 + $0xdd8] sm:$0xff]  ;;  %8557 = vst [vmem:[#allocation421_spill] sm:$0xff] %v5706_v50 }
 0x1d1   : > { %v1193_v61 = vld [vmem:[%s3367_s30 + $0xdd0] sm:$0xff]  ;;  %v1195_v9 = vld [vmem:[%s3367_s30 + $0xde0] sm:$0xff]  ;;  %8558 = vst [vmem:[#allocation422_spill] sm:$0xff] %v5708_v56  ;;  %8559 = vst [vmem:[#allocation423_spill] sm:$0xff] %v5710_v26  ;;  %v5724_v42 = vsub.f32 %v682_v24, %v1194_v52 }
 0x1d2   : > { %8556 = vst [vmem:[#allocation125_spill] sm:$0xff] %v5698_v63  ;;  %v8560_v32 = vld [vmem:[#allocation127_spill] sm:$0xff]  ;;  %v696_v10 = vld [vmem:[%s3361_s17 + $0xe48] sm:$0xff]  ;;  %v697_v63 = vld [vmem:[%s3361_s17 + $0xe50] sm:$0xff]  ;;  %v5722_v53 = vsub.f32 %v681_v51, %v1193_v61  ;;  %v5726_v45 = vsub.f32 %v683_v18, %v1195_v9 }
 0x1d3   : > { %v5714_v41 = vmul.f32 %v8560_v32, %v8560_v32  ;;  %v698_v8 = vld [vmem:[%s3361_s17 + $0xe58] sm:$0xff]  ;;  %v1196_v38 = vld [vmem:[%s3367_s30 + $0xde8] sm:$0xff]  ;;  %v1197_v33 = vld [vmem:[%s3367_s30 + $0xdf0] sm:$0xff]  ;;  %8563 = vst [vmem:[#allocation425_spill] sm:$0xff] %v5724_v42 }
 0x1d4   : > { %v1198_v47 = vld [vmem:[%s3367_s30 + $0xdf8] sm:$0xff]  ;;  %8562 = vst [vmem:[#allocation424_spill] sm:$0xff] %v5722_v53  ;;  %8564 = vst [vmem:[#allocation426_spill] sm:$0xff] %v5726_v45  ;;  %v8565_v21 = vld [vmem:[#allocation128_spill] sm:$0xff]  ;;  %v5738_v61 = vsub.f32 %v684_v19, %v1196_v38  ;;  %v5740_v24 = vsub.f32 %v685_v62, %v1197_v33  ;;  %v5762_v33 = vmul.f32 %v4154_v60, %v4154_v60 }
 0x1d5   : > { %8561 = vst [vmem:[#allocation127_spill] sm:$0xff] %v5714_v41  ;;  %v5730_v54 = vmul.f32 %v8565_v21, %v8565_v21  ;;  %v699_v32 = vld [vmem:[%s3361_s17 + $0xe60] sm:$0xff]  ;;  %v700_v41 = vld [vmem:[%s3361_s17 + $0xe68] sm:$0xff]  ;;  %v701_v26 = vld [vmem:[%s3361_s17 + $0xe70] sm:$0xff]  ;;  %v5742_v18 = vsub.f32 %v686_v12, %v1198_v47 }
 0x1d6   : > { %v1199_v56 = vld [vmem:[%s3367_s30 + $0xe00] sm:$0xff]  ;;  %v1200_v50 = vld [vmem:[%s3367_s30 + $0xe08] sm:$0xff]  ;;  %v1201_v51 = vld [vmem:[%s3367_s30 + $0xe10] sm:$0xff]  ;;  %8567 = vst [vmem:[#allocation427_spill] sm:$0xff] %v5740_v24 }
 0x1d7   : > { %8566 = vst [vmem:[#allocation128_spill] sm:$0xff] %v5730_v54  ;;  %8568 = vst [vmem:[#allocation428_spill] sm:$0xff] %v5742_v18  ;;  %v8569_v52 = vld [vmem:[#allocation129_spill] sm:$0xff]  ;;  %v702_v21 = vld [vmem:[%s3361_s17 + $0xe78] sm:$0xff]  ;;  %v5754_v38 = vsub.f32 %v687_v43, %v1199_v56  ;;  %v5756_v62 = vsub.f32 %v688_v6, %v1200_v50  ;;  %v5758_v12 = vsub.f32 %v689_v46, %v1201_v51 }
 0x1d8   : > { %v5746_v9 = vmul.f32 %v8569_v52, %v8569_v52  ;;  %v703_v54 = vld [vmem:[%s3361_s17 + $0xe80] sm:$0xff]  ;;  %v704_v45 = vld [vmem:[%s3361_s17 + $0xe88] sm:$0xff]  ;;  %v1202_v42 = vld [vmem:[%s3367_s30 + $0xe18] sm:$0xff]  ;;  %8574 = vst [vmem:[#allocation432_spill] sm:$0xff] %v5762_v33 }
 0x1d9   : > { %v1203_v53 = vld [vmem:[%s3367_s30 + $0xe20] sm:$0xff]  ;;  %v1204_v19 = vld [vmem:[%s3367_s30 + $0xe28] sm:$0xff]  ;;  %8571 = vst [vmem:[#allocation429_spill] sm:$0xff] %v5754_v38  ;;  %8572 = vst [vmem:[#allocation430_spill] sm:$0xff] %v5756_v62  ;;  %v5770_v56 = vsub.f32 %v690_v36, %v1202_v42 }
 0x1da   : > { %8570 = vst [vmem:[#allocation129_spill] sm:$0xff] %v5746_v9  ;;  %8573 = vst [vmem:[#allocation431_spill] sm:$0xff] %v5758_v12  ;;  %v705_v47 = vld [vmem:[%s3361_s17 + $0xe90] sm:$0xff]  ;;  %v706_v52 = vld [vmem:[%s3361_s17 + $0xe98] sm:$0xff]  ;;  %v5772_v6 = vsub.f32 %v691_v7, %v1203_v53  ;;  %v5774_v46 = vsub.f32 %v692_v28, %v1204_v19 }
 0x1db   : > { %v707_v9 = vld [vmem:[%s3361_s17 + $0xea0] sm:$0xff]  ;;  %v1205_v18 = vld [vmem:[%s3367_s30 + $0xe30] sm:$0xff]  ;;  %v1206_v24 = vld [vmem:[%s3367_s30 + $0xe38] sm:$0xff]  ;;  %8575 = vst [vmem:[#allocation433_spill] sm:$0xff] %v5770_v56 }
 0x1dc   : > { %v1207_v43 = vld [vmem:[%s3367_s30 + $0xe40] sm:$0xff]  ;;  %8576 = vst [vmem:[#allocation434_spill] sm:$0xff] %v5772_v6  ;;  %8577 = vst [vmem:[#allocation435_spill] sm:$0xff] %v5774_v46  ;;  %v8578_v50 = vld [vmem:[#allocation130_spill] sm:$0xff]  ;;  %v5786_v42 = vsub.f32 %v693_v48, %v1205_v18  ;;  %v5788_v7 = vsub.f32 %v694_v17, %v1206_v24 }
 0x1dd   : > { %v5778_v60 = vmul.f32 %v8578_v50, %v8578_v50  ;;  %v708_v51 = vld [vmem:[%s3361_s17 + $0xea8] sm:$0xff]  ;;  %v709_v33 = vld [vmem:[%s3361_s17 + $0xeb0] sm:$0xff]  ;;  %v710_v12 = vld [vmem:[%s3361_s17 + $0xeb8] sm:$0xff]  ;;  %v5790_v28 = vsub.f32 %v695_v29, %v1207_v43 }
 0x1de   : > { %v1208_v62 = vld [vmem:[%s3367_s30 + $0xe48] sm:$0xff]  ;;  %v1209_v38 = vld [vmem:[%s3367_s30 + $0xe50] sm:$0xff]  ;;  %v1210_v36 = vld [vmem:[%s3367_s30 + $0xe58] sm:$0xff]  ;;  %8580 = vst [vmem:[#allocation436_spill] sm:$0xff] %v5786_v42 }
 0x1df   : > { %8579 = vst [vmem:[#allocation130_spill] sm:$0xff] %v5778_v60  ;;  %8581 = vst [vmem:[#allocation437_spill] sm:$0xff] %v5788_v7  ;;  %v8583_v53 = vld [vmem:[#allocation131_spill] sm:$0xff]  ;;  %v712_v60 = vld [vmem:[%s3361_s17 + $0xec8] sm:$0xff]  ;;  %v5802_v18 = vsub.f32 %v696_v10, %v1208_v62  ;;  %v5804_v17 = vsub.f32 %v697_v63, %v1209_v38  ;;  %v5806_v29 = vsub.f32 %v698_v8, %v1210_v36 }
 0x1e0   : > { %8582 = vst [vmem:[#allocation438_spill] sm:$0xff] %v5790_v28  ;;  %v5794_v19 = vmul.f32 %v8583_v53, %v8583_v53  ;;  %v711_v50 = vld [vmem:[%s3361_s17 + $0xec0] sm:$0xff]  ;;  %v713_v46 = vld [vmem:[%s3361_s17 + $0xed0] sm:$0xff]  ;;  %v1212_v56 = vld [vmem:[%s3367_s30 + $0xe68] sm:$0xff] }
 0x1e1   : > { %v1211_v6 = vld [vmem:[%s3367_s30 + $0xe60] sm:$0xff]  ;;  %v1213_v48 = vld [vmem:[%s3367_s30 + $0xe70] sm:$0xff]  ;;  %8585 = vst [vmem:[#allocation439_spill] sm:$0xff] %v5802_v18  ;;  %8586 = vst [vmem:[#allocation440_spill] sm:$0xff] %v5804_v17  ;;  %v5820_v63 = vsub.f32 %v700_v41, %v1212_v56 }
 0x1e2   : > { %8584 = vst [vmem:[#allocation131_spill] sm:$0xff] %v5794_v19  ;;  %8587 = vst [vmem:[#allocation441_spill] sm:$0xff] %v5806_v29  ;;  %v8588_v24 = vld [vmem:[#allocation132_spill] sm:$0xff]  ;;  %v714_v53 = vld [vmem:[%s3361_s17 + $0xed8] sm:$0xff]  ;;  %v5818_v62 = vsub.f32 %v699_v32, %v1211_v6  ;;  %v5822_v8 = vsub.f32 %v701_v26, %v1213_v48 }
 0x1e3   : > { %v5810_v43 = vmul.f32 %v8588_v24, %v8588_v24  ;;  %v715_v19 = vld [vmem:[%s3361_s17 + $0xee0] sm:$0xff]  ;;  %v716_v28 = vld [vmem:[%s3361_s17 + $0xee8] sm:$0xff]  ;;  %v1214_v7 = vld [vmem:[%s3367_s30 + $0xe78] sm:$0xff]  ;;  %8591 = vst [vmem:[#allocation443_spill] sm:$0xff] %v5820_v63 }
 0x1e4   : > { %v1215_v42 = vld [vmem:[%s3367_s30 + $0xe80] sm:$0xff]  ;;  %v1216_v10 = vld [vmem:[%s3367_s30 + $0xe88] sm:$0xff]  ;;  %8590 = vst [vmem:[#allocation442_spill] sm:$0xff] %v5818_v62  ;;  %8592 = vst [vmem:[#allocation444_spill] sm:$0xff] %v5822_v8  ;;  %v5834_v6 = vsub.f32 %v702_v21, %v1214_v7 }
 0x1e5   : > { %8589 = vst [vmem:[#allocation132_spill] sm:$0xff] %v5810_v43  ;;  %v8593_v38 = vld [vmem:[#allocation133_spill] sm:$0xff]  ;;  %v718_v43 = vld [vmem:[%s3361_s17 + $0xef8] sm:$0xff]  ;;  %v719_v29 = vld [vmem:[%s3361_s17 + $0xf00] sm:$0xff]  ;;  %v5836_v41 = vsub.f32 %v703_v54, %v1215_v42  ;;  %v5838_v26 = vsub.f32 %v704_v45, %v1216_v10 }
 0x1e6   : > { %v5826_v36 = vmul.f32 %v8593_v38, %v8593_v38  ;;  %v717_v24 = vld [vmem:[%s3361_s17 + $0xef0] sm:$0xff]  ;;  %v1218_v18 = vld [vmem:[%s3367_s30 + $0xe98] sm:$0xff]  ;;  %v1219_v32 = vld [vmem:[%s3367_s30 + $0xea0] sm:$0xff]  ;;  %8595 = vst [vmem:[#allocation445_spill] sm:$0xff] %v5834_v6 }
 0x1e7   : > { %v1217_v17 = vld [vmem:[%s3367_s30 + $0xe90] sm:$0xff]  ;;  %8596 = vst [vmem:[#allocation446_spill] sm:$0xff] %v5836_v41  ;;  %8597 = vst [vmem:[#allocation447_spill] sm:$0xff] %v5838_v26  ;;  %v720_v38 = vld [vmem:[%s3361_s17 + $0xf08] sm:$0xff]  ;;  %v5852_v54 = vsub.f32 %v706_v52, %v1218_v18  ;;  %v5854_v45 = vsub.f32 %v707_v9, %v1219_v32 }
 0x1e8   : > { %8594 = vst [vmem:[#allocation133_spill] sm:$0xff] %v5826_v36  ;;  %v8598_v56 = vld [vmem:[#allocation134_spill] sm:$0xff]  ;;  %v1220_v63 = vld [vmem:[%s3367_s30 + $0xea8] sm:$0xff]  ;;  %v5850_v7 = vsub.f32 %v705_v47, %v1217_v17  ;;  %v1223_v41 = vld [vmem:[%s3367_s30 + $0xec0] sm:$0xff] }
 0x1e9   : > { %v5842_v48 = vmul.f32 %v8598_v56, %v8598_v56  ;;  %v721_v36 = vld [vmem:[%s3361_s17 + $0xf10] sm:$0xff]  ;;  %v722_v8 = vld [vmem:[%s3361_s17 + $0xf18] sm:$0xff]  ;;  %8601 = vst [vmem:[#allocation449_spill] sm:$0xff] %v5852_v54  ;;  %8602 = vst [vmem:[#allocation450_spill] sm:$0xff] %v5854_v45  ;;  %v5866_v17 = vsub.f32 %v708_v51, %v1220_v63  ;;  %v5882_v63 = vsub.f32 %v711_v50, %v1223_v41 }
 0x1ea   : > { %v1221_v62 = vld [vmem:[%s3367_s30 + $0xeb0] sm:$0xff]  ;;  %v1222_v21 = vld [vmem:[%s3367_s30 + $0xeb8] sm:$0xff]  ;;  %8600 = vst [vmem:[#allocation448_spill] sm:$0xff] %v5850_v7  ;;  %v8603_v42 = vld [vmem:[#allocation136_spill] sm:$0xff] }
 0x1eb   : > { %8599 = vst [vmem:[#allocation134_spill] sm:$0xff] %v5842_v48  ;;  %v5858_v10 = vmul.f32 %v8603_v42, %v8603_v42  ;;  %v723_v56 = vld [vmem:[%s3361_s17 + $0xf20] sm:$0xff]  ;;  %v724_v48 = vld [vmem:[%s3361_s17 + $0xf28] sm:$0xff]  ;;  %v725_v26 = vld [vmem:[%s3361_s17 + $0xf30] sm:$0xff]  ;;  %v5868_v52 = vsub.f32 %v709_v33, %v1221_v62  ;;  %v5870_v9 = vsub.f32 %v710_v12, %v1222_v21 }
 0x1ec   : > { %v1224_v6 = vld [vmem:[%s3367_s30 + $0xec8] sm:$0xff]  ;;  %v1225_v47 = vld [vmem:[%s3367_s30 + $0xed0] sm:$0xff]  ;;  %8605 = vst [vmem:[#allocation451_spill] sm:$0xff] %v5866_v17  ;;  %v726_v42 = vld [vmem:[%s3361_s17 + $0xf38] sm:$0xff] }
 0x1ed   : > { %8604 = vst [vmem:[#allocation136_spill] sm:$0xff] %v5858_v10  ;;  %8606 = vst [vmem:[#allocation452_spill] sm:$0xff] %v5868_v52  ;;  %v8608_v18 = vld [vmem:[#allocation137_spill] sm:$0xff]  ;;  %v727_v10 = vld [vmem:[%s3361_s17 + $0xf40] sm:$0xff]  ;;  %v5884_v33 = vsub.f32 %v712_v60, %v1224_v6  ;;  %v5886_v12 = vsub.f32 %v713_v46, %v1225_v47  ;;  %v5906_v6 = vmul.f32 %v4202_v25, %v4202_v25 }
 0x1ee   : > { %8607 = vst [vmem:[#allocation453_spill] sm:$0xff] %v5870_v9  ;;  %v5874_v32 = vmul.f32 %v8608_v18, %v8608_v18  ;;  %v728_v45 = vld [vmem:[%s3361_s17 + $0xf48] sm:$0xff]  ;;  %v1226_v54 = vld [vmem:[%s3367_s30 + $0xed8] sm:$0xff]  ;;  %v1227_v7 = vld [vmem:[%s3367_s30 + $0xee0] sm:$0xff] }
 0x1ef   : > { %v1228_v51 = vld [vmem:[%s3367_s30 + $0xee8] sm:$0xff]  ;;  %8610 = vst [vmem:[#allocation454_spill] sm:$0xff] %v5882_v63  ;;  %8611 = vst [vmem:[#allocation455_spill] sm:$0xff] %v5884_v33  ;;  %v8613_v62 = vld [vmem:[#allocation138_spill] sm:$0xff]  ;;  %v5898_v41 = vsub.f32 %v714_v53, %v1226_v54  ;;  %v5900_v60 = vsub.f32 %v715_v19, %v1227_v7 }
 0x1f0   : > { %8609 = vst [vmem:[#allocation137_spill] sm:$0xff] %v5874_v32  ;;  %8612 = vst [vmem:[#allocation456_spill] sm:$0xff] %v5886_v12  ;;  %v5890_v21 = vmul.f32 %v8613_v62, %v8613_v62  ;;  %v729_v18 = vld [vmem:[%s3361_s17 + $0xf50] sm:$0xff]  ;;  %v730_v32 = vld [vmem:[%s3361_s17 + $0xf58] sm:$0xff]  ;;  %v5902_v46 = vsub.f32 %v716_v28, %v1228_v51 }
 0x1f1   : > { %v731_v9 = vld [vmem:[%s3361_s17 + $0xf60] sm:$0xff]  ;;  %v1229_v52 = vld [vmem:[%s3367_s30 + $0xef0] sm:$0xff]  ;;  %v1230_v17 = vld [vmem:[%s3367_s30 + $0xef8] sm:$0xff]  ;;  %8615 = vst [vmem:[#allocation457_spill] sm:$0xff] %v5898_v41 }
 0x1f2   : > { %8614 = vst [vmem:[#allocation138_spill] sm:$0xff] %v5890_v21  ;;  %v1231_v50 = vld [vmem:[%s3367_s30 + $0xf00] sm:$0xff]  ;;  %8616 = vst [vmem:[#allocation458_spill] sm:$0xff] %v5900_v60  ;;  %v732_v47 = vld [vmem:[%s3361_s17 + $0xf68] sm:$0xff]  ;;  %v5914_v54 = vsub.f32 %v717_v24, %v1229_v52  ;;  %v5916_v19 = vsub.f32 %v718_v43, %v1230_v17 }
 0x1f3   : > { %8617 = vst [vmem:[#allocation459_spill] sm:$0xff] %v5902_v46  ;;  %8618 = vst [vmem:[#allocation460_spill] sm:$0xff] %v5906_v6  ;;  %v733_v62 = vld [vmem:[%s3361_s17 + $0xf70] sm:$0xff]  ;;  %v734_v21 = vld [vmem:[%s3361_s17 + $0xf78] sm:$0xff]  ;;  %v5918_v28 = vsub.f32 %v719_v29, %v1231_v50 }
 0x1f4   : > { %v1232_v12 = vld [vmem:[%s3367_s30 + $0xf08] sm:$0xff]  ;;  %v1233_v33 = vld [vmem:[%s3367_s30 + $0xf10] sm:$0xff]  ;;  %v1234_v53 = vld [vmem:[%s3367_s30 + $0xf18] sm:$0xff]  ;;  %8619 = vst [vmem:[#allocation461_spill] sm:$0xff] %v5914_v54 }
 0x1f5   : > { %8620 = vst [vmem:[#allocation462_spill] sm:$0xff] %v5916_v19  ;;  %8621 = vst [vmem:[#allocation463_spill] sm:$0xff] %v5918_v28  ;;  %v8622_v7 = vld [vmem:[#allocation139_spill] sm:$0xff]  ;;  %v736_v6 = vld [vmem:[%s3361_s17 + $0xf88] sm:$0xff]  ;;  %v5930_v52 = vsub.f32 %v720_v38, %v1232_v12  ;;  %v5932_v43 = vsub.f32 %v721_v36, %v1233_v33  ;;  %v5934_v29 = vsub.f32 %v722_v8, %v1234_v53 }
 0x1f6   : > { %v5922_v25 = vmul.f32 %v8622_v7, %v8622_v7  ;;  %v735_v51 = vld [vmem:[%s3361_s17 + $0xf80] sm:$0xff]  ;;  %v737_v46 = vld [vmem:[%s3361_s17 + $0xf90] sm:$0xff]  ;;  %v1236_v41 = vld [vmem:[%s3367_s30 + $0xf28] sm:$0xff] }
 0x1f7   : > { %v1235_v60 = vld [vmem:[%s3367_s30 + $0xf20] sm:$0xff]  ;;  %v1237_v24 = vld [vmem:[%s3367_s30 + $0xf30] sm:$0xff]  ;;  %8624 = vst [vmem:[#allocation464_spill] sm:$0xff] %v5930_v52  ;;  %8625 = vst [vmem:[#allocation465_spill] sm:$0xff] %v5932_v43  ;;  %v5948_v36 = vsub.f32 %v724_v48, %v1236_v41 }
 0x1f8   : > { %8623 = vst [vmem:[#allocation139_spill] sm:$0xff] %v5922_v25  ;;  %8626 = vst [vmem:[#allocation466_spill] sm:$0xff] %v5934_v29  ;;  %v8627_v17 = vld [vmem:[#allocation140_spill] sm:$0xff]  ;;  %v738_v7 = vld [vmem:[%s3361_s17 + $0xf98] sm:$0xff]  ;;  %v5946_v12 = vsub.f32 %v723_v56, %v1235_v60  ;;  %v5950_v8 = vsub.f32 %v725_v26, %v1237_v24 }
 0x1f9   : > { %v5938_v50 = vmul.f32 %v8627_v17, %v8627_v17  ;;  %v739_v25 = vld [vmem:[%s3361_s17 + $0xfa0] sm:$0xff]  ;;  %v740_v28 = vld [vmem:[%s3361_s17 + $0xfa8] sm:$0xff]  ;;  %v1238_v19 = vld [vmem:[%s3367_s30 + $0xf38] sm:$0xff]  ;;  %8630 = vst [vmem:[#allocation468_spill] sm:$0xff] %v5948_v36 }
 0x1fa   : > { %v1239_v54 = vld [vmem:[%s3367_s30 + $0xf40] sm:$0xff]  ;;  %v1240_v38 = vld [vmem:[%s3367_s30 + $0xf48] sm:$0xff]  ;;  %8629 = vst [vmem:[#allocation467_spill] sm:$0xff] %v5946_v12  ;;  %8631 = vst [vmem:[#allocation469_spill] sm:$0xff] %v5950_v8  ;;  %v5962_v60 = vsub.f32 %v726_v42, %v1238_v19 }
 0x1fb   : > { %8628 = vst [vmem:[#allocation140_spill] sm:$0xff] %v5938_v50  ;;  %v8632_v33 = vld [vmem:[#allocation141_spill] sm:$0xff]  ;;  %v742_v50 = vld [vmem:[%s3361_s17 + $0xfb8] sm:$0xff]  ;;  %v743_v29 = vld [vmem:[%s3361_s17 + $0xfc0] sm:$0xff]  ;;  %v5964_v48 = vsub.f32 %v727_v10, %v1239_v54  ;;  %v5966_v26 = vsub.f32 %v728_v45, %v1240_v38 }
 0x1fc   : > { %v5954_v53 = vmul.f32 %v8632_v33, %v8632_v33  ;;  %v741_v17 = vld [vmem:[%s3361_s17 + $0xfb0] sm:$0xff]  ;;  %v1242_v52 = vld [vmem:[%s3367_s30 + $0xf58] sm:$0xff]  ;;  %v1243_v56 = vld [vmem:[%s3367_s30 + $0xf60] sm:$0xff]  ;;  %8634 = vst [vmem:[#allocation470_spill] sm:$0xff] %v5962_v60 }
 0x1fd   : > { %v1241_v43 = vld [vmem:[%s3367_s30 + $0xf50] sm:$0xff]  ;;  %8635 = vst [vmem:[#allocation471_spill] sm:$0xff] %v5964_v48  ;;  %8636 = vst [vmem:[#allocation472_spill] sm:$0xff] %v5966_v26  ;;  %v744_v33 = vld [vmem:[%s3361_s17 + $0xfc8] sm:$0xff]  ;;  %v5980_v10 = vsub.f32 %v730_v32, %v1242_v52  ;;  %v5982_v45 = vsub.f32 %v731_v9, %v1243_v56 }
 0x1fe   : > { %8633 = vst [vmem:[#allocation141_spill] sm:$0xff] %v5954_v53  ;;  %v8637_v41 = vld [vmem:[#allocation142_spill] sm:$0xff]  ;;  %v1244_v36 = vld [vmem:[%s3367_s30 + $0xf68] sm:$0xff]  ;;  %v5978_v19 = vsub.f32 %v729_v18, %v1241_v43  ;;  %v8642_v54 = vld [vmem:[#allocation143_spill] sm:$0xff] }
 0x1ff   : > { %v5970_v24 = vmul.f32 %v8637_v41, %v8637_v41  ;;  %v745_v53 = vld [vmem:[%s3361_s17 + $0xfd0] sm:$0xff]  ;;  %v746_v8 = vld [vmem:[%s3361_s17 + $0xfd8] sm:$0xff]  ;;  %8640 = vst [vmem:[#allocation474_spill] sm:$0xff] %v5980_v10  ;;  %8641 = vst [vmem:[#allocation475_spill] sm:$0xff] %v5982_v45  ;;  %v5986_v38 = vmul.f32 %v8642_v54, %v8642_v54  ;;  %v5994_v43 = vsub.f32 %v732_v47, %v1244_v36 }
 0x200   : > { %v1245_v12 = vld [vmem:[%s3367_s30 + $0xf70] sm:$0xff]  ;;  %v1246_v42 = vld [vmem:[%s3367_s30 + $0xf78] sm:$0xff]  ;;  %8639 = vst [vmem:[#allocation473_spill] sm:$0xff] %v5978_v19  ;;  %v747_v41 = vld [vmem:[%s3361_s17 + $0xfe0] sm:$0xff] }
 0x201   : > { %8638 = vst [vmem:[#allocation142_spill] sm:$0xff] %v5970_v24  ;;  %8643 = vst [vmem:[#allocation143_spill] sm:$0xff] %v5986_v38  ;;  %v748_v24 = vld [vmem:[%s3361_s17 + $0xfe8] sm:$0xff]  ;;  %v749_v26 = vld [vmem:[%s3361_s17 + $0xff0] sm:$0xff]  ;;  %v5996_v32 = vsub.f32 %v733_v62, %v1245_v12  ;;  %v5998_v52 = vsub.f32 %v734_v21, %v1246_v42 }
 0x202   : > { %v1247_v48 = vld [vmem:[%s3367_s30 + $0xf80] sm:$0xff]  ;;  %v1248_v60 = vld [vmem:[%s3367_s30 + $0xf88] sm:$0xff]  ;;  %v1249_v18 = vld [vmem:[%s3367_s30 + $0xf90] sm:$0xff] }
 0x203   : > { %v8644_v9 = vld [vmem:[#allocation145_spill] sm:$0xff]  ;;  %v750_v54 = vld [vmem:[%s3361_s17 + $0xff8] sm:$0xff]  ;;  %v1251_v45 = vld [vmem:[%s3367_s30 + $0xfa0] sm:$0xff]  ;;  %v6008_v19 = vsub.f32 %v735_v51, %v1247_v48  ;;  %v6010_v63 = vsub.f32 %v736_v6, %v1248_v60  ;;  %v6012_v47 = vsub.f32 %v737_v46, %v1249_v18 }
 0x204   : > { %v6002_v56 = vmul.f32 %v8644_v9, %v8644_v9  ;;  %v1250_v38 = vld [vmem:[%s3367_s30 + $0xf98] sm:$0xff]  ;;  %v1252_v10 = vld [vmem:[%s3367_s30 + $0xfa8] sm:$0xff]  ;;  %v1253_v12 = vld [vmem:[%s3367_s30 + $0xfb0] sm:$0xff] }
 0x205   : > { %8646 = vst [vmem:[#allocation476_spill] sm:$0xff] %v6012_v47  ;;  %v8647_v62 = vld [vmem:[#allocation146_spill] sm:$0xff]  ;;  %v1255_v42 = vld [vmem:[%s3367_s30 + $0xfc0] sm:$0xff]  ;;  %v6021_v9 = vsub.f32 %v738_v7, %v1250_v38  ;;  %v6025_v51 = vsub.f32 %v740_v28, %v1252_v10  ;;  %v1256_v60 = vld [vmem:[%s3367_s30 + $0xfc8] sm:$0xff] }
 0x206   : > { %8645 = vst [vmem:[#allocation145_spill] sm:$0xff] %v6002_v56  ;;  %v6016_v21 = vmul.f32 %v8647_v62, %v8647_v62  ;;  %v1254_v36 = vld [vmem:[%s3367_s30 + $0xfb8] sm:$0xff]  ;;  %v6023_v56 = vsub.f32 %v739_v25, %v1251_v45  ;;  %v1257_v48 = vld [vmem:[%s3367_s30 + $0xfd0] sm:$0xff]  ;;  %v6034_v62 = vsub.f32 %v741_v17, %v1253_v12  ;;  %v6038_v47 = vsub.f32 %v743_v29, %v1255_v42  ;;  %v1259_v28 = vld [vmem:[%s3367_s30 + $0xfe0] sm:$0xff] }
 0x207   : > { %v8649_v6 = vld [vmem:[#allocation147_spill] sm:$0xff]  ;;  %v6042_v25 = vmul.f32 %v4250_v49, %v4250_v49  ;;  %v1260_v7 = vld [vmem:[%s3367_s30 + $0xfe8] sm:$0xff]  ;;  %v1261_v10 = vld [vmem:[%s3367_s30 + $0xff0] sm:$0xff]  ;;  %v6047_v45 = vsub.f32 %v744_v33, %v1256_v60  ;;  %v6049_v38 = vsub.f32 %v745_v53, %v1257_v48  ;;  %v6058_v29 = vsub.f32 %v747_v41, %v1259_v28 }
 0x208   : > { %8648 = vst [vmem:[#allocation146_spill] sm:$0xff] %v6016_v21  ;;  %v6029_v46 = vmul.f32 %v8649_v6, %v8649_v6  ;;  %v1258_v18 = vld [vmem:[%s3367_s30 + $0xfd8] sm:$0xff]  ;;  %v6036_v21 = vsub.f32 %v742_v50, %v1254_v36  ;;  %v6060_v12 = vsub.f32 %v748_v24, %v1260_v7  ;;  %v6062_v49 = vsub.f32 %v749_v26, %v1261_v10  ;;  %v8652_v36 = vld [vmem:[#allocation149_spill] sm:$0xff]  ;;  %v8655_v41 = vld [vmem:[#allocation152_spill] sm:$0xff] }
 0x209   : > { %v6051_v6 = vsub.f32 %v746_v8, %v1258_v18  ;;  %v1262_v50 = vld [vmem:[%s3367_s30 + $0xff8] sm:$0xff]  ;;  %v6066_v42 = vmul.f32 %v8652_v36, %v8652_v36  ;;  %v6080_v24 = vmul.f32 %v8655_v41, %v8655_v41  ;;  %v8658_v28 = vld [vmem:[#allocation156_spill] sm:$0xff]  ;;  %v6096_v10 = vmul.f32 %v4298_v27, %v4298_v27 }
 0x20a   : > { %8650 = vst [vmem:[#allocation147_spill] sm:$0xff] %v6029_v46  ;;  %v8651_v46 = vld [vmem:[#allocation148_spill] sm:$0xff]  ;;  %v6068_v33 = vsub.f32 %v750_v54, %v1262_v50  ;;  %v8653_v53 = vld [vmem:[#allocation150_spill] sm:$0xff]  ;;  %v8654_v60 = vld [vmem:[#allocation151_spill] sm:$0xff]  ;;  %v6092_v7 = vmul.f32 %v8658_v28, %v8658_v28 }
 0x20b   : > { %v6055_v17 = vmul.f32 %v8651_v46, %v8651_v46  ;;  %v6072_v8 = vmul.f32 %v8653_v53, %v8653_v53  ;;  %v6076_v46 = vmul.f32 %v8654_v60, %v8654_v60  ;;  %v8656_v26 = vld [vmem:[#allocation154_spill] sm:$0xff]  ;;  %v8657_v18 = vld [vmem:[#allocation155_spill] sm:$0xff]  ;;  %8660 = vst [vmem:[#allocation149_spill] sm:$0xff] %v6096_v10  ;;  %v8661_v50 = vld [vmem:[#allocation157_spill] sm:$0xff] }
 0x20c   : > { %v6084_v48 = vmul.f32 %v8656_v26, %v8656_v26  ;;  %v6088_v54 = vmul.f32 %v8657_v18, %v8657_v18  ;;  %8659 = vst [vmem:[#allocation148_spill] sm:$0xff] %v6092_v7  ;;  %v6100_v36 = vmul.f32 %v8661_v50, %v8661_v50  ;;  %v8663_v53 = vld [vmem:[#allocation158_spill] sm:$0xff]  ;;  %v8665_v41 = vld [vmem:[#allocation159_spill] sm:$0xff]  ;;  %v8666_v18 = vld [vmem:[#allocation160_spill] sm:$0xff] }
 0x20d   : > { %v6104_v60 = vmul.f32 %v8663_v53, %v8663_v53  ;;  %v6108_v26 = vmul.f32 %v8665_v41, %v8665_v41  ;;  %v6112_v28 = vmul.f32 %v8666_v18, %v8666_v18  ;;  %v8668_v7 = vld [vmem:[#allocation161_spill] sm:$0xff]  ;;  %v8670_v10 = vld [vmem:[#allocation163_spill] sm:$0xff]  ;;  %v6132_v18 = vmul.f32 %v4346_v30, %v4346_v30 }
 0x20e   : > { %8662 = vst [vmem:[#allocation150_spill] sm:$0xff] %v6100_v36  ;;  %v6116_v27 = vmul.f32 %v8668_v7, %v8668_v7  ;;  %v6120_v50 = vmul.f32 %v8670_v10, %v8670_v10  ;;  %v8672_v36 = vld [vmem:[#allocation164_spill] sm:$0xff] }
 0x20f   : > { %8664 = vst [vmem:[#allocation151_spill] sm:$0xff] %v6104_v60  ;;  %8667 = vst [vmem:[#allocation152_spill] sm:$0xff] %v6112_v28  ;;  %v6124_v53 = vmul.f32 %v8672_v36, %v8672_v36  ;;  %v8674_v60 = vld [vmem:[#allocation165_spill] sm:$0xff]  ;;  %v8677_v28 = vld [vmem:[#allocation166_spill] sm:$0xff] }
 0x210   : > { %8669 = vst [vmem:[#allocation154_spill] sm:$0xff] %v6116_v27  ;;  %8671 = vst [vmem:[#allocation155_spill] sm:$0xff] %v6120_v50  ;;  %v6128_v41 = vmul.f32 %v8674_v60, %v8674_v60  ;;  %v6136_v7 = vmul.f32 %v8677_v28, %v8677_v28  ;;  %v8679_v27 = vld [vmem:[#allocation167_spill] sm:$0xff]  ;;  %v8681_v50 = vld [vmem:[#allocation168_spill] sm:$0xff] }
 0x211   : > { %8673 = vst [vmem:[#allocation156_spill] sm:$0xff] %v6124_v53  ;;  %8676 = vst [vmem:[#allocation158_spill] sm:$0xff] %v6132_v18  ;;  %v6140_v10 = vmul.f32 %v8679_v27, %v8679_v27  ;;  %v6144_v36 = vmul.f32 %v8681_v50, %v8681_v50  ;;  %v8682_v53 = vld [vmem:[#allocation169_spill] sm:$0xff]  ;;  %v8686_v18 = vld [vmem:[#allocation172_spill] sm:$0xff] }
 0x212   : > { %8675 = vst [vmem:[#allocation157_spill] sm:$0xff] %v6128_v41  ;;  %8678 = vst [vmem:[#allocation159_spill] sm:$0xff] %v6136_v7  ;;  %v6148_v60 = vmul.f32 %v8682_v53, %v8682_v53  ;;  %v8684_v41 = vld [vmem:[#allocation170_spill] sm:$0xff]  ;;  %v6156_v28 = vmul.f32 %v8686_v18, %v8686_v18  ;;  %v8688_v7 = vld [vmem:[#allocation173_spill] sm:$0xff]  ;;  %v6168_v53 = vmul.f32 %v4394_v1, %v4394_v1 }
 0x213   : > { %8680 = vst [vmem:[#allocation160_spill] sm:$0xff] %v6140_v10  ;;  %v6152_v30 = vmul.f32 %v8684_v41, %v8684_v41  ;;  %v6160_v27 = vmul.f32 %v8688_v7, %v8688_v7  ;;  %v8690_v10 = vld [vmem:[#allocation174_spill] sm:$0xff] }
 0x214   : > { %8683 = vst [vmem:[#allocation161_spill] sm:$0xff] %v6148_v60  ;;  %8687 = vst [vmem:[#allocation164_spill] sm:$0xff] %v6156_v28  ;;  %v6164_v50 = vmul.f32 %v8690_v10, %v8690_v10  ;;  %v8693_v60 = vld [vmem:[#allocation175_spill] sm:$0xff]  ;;  %v8697_v28 = vld [vmem:[#allocation177_spill] sm:$0xff] }
 0x215   : > { %8685 = vst [vmem:[#allocation163_spill] sm:$0xff] %v6152_v30  ;;  %8689 = vst [vmem:[#allocation165_spill] sm:$0xff] %v6160_v27  ;;  %v6172_v41 = vmul.f32 %v8693_v60, %v8693_v60  ;;  %v8695_v30 = vld [vmem:[#allocation176_spill] sm:$0xff]  ;;  %v6180_v7 = vmul.f32 %v8697_v28, %v8697_v28  ;;  %v8698_v27 = vld [vmem:[#allocation178_spill] sm:$0xff] }
 0x216   : > { %8691 = vst [vmem:[#allocation166_spill] sm:$0xff] %v6164_v50  ;;  %8692 = vst [vmem:[#allocation167_spill] sm:$0xff] %v6168_v53  ;;  %v6176_v18 = vmul.f32 %v8695_v30, %v8695_v30  ;;  %v6184_v10 = vmul.f32 %v8698_v27, %v8698_v27  ;;  %v8700_v50 = vld [vmem:[#allocation179_spill] sm:$0xff]  ;;  %v8702_v53 = vld [vmem:[#allocation181_spill] sm:$0xff]  ;;  %v6204_v27 = vmul.f32 %v4442_v40, %v4442_v40 }
 0x217   : > { %8694 = vst [vmem:[#allocation168_spill] sm:$0xff] %v6172_v41  ;;  %v6188_v1 = vmul.f32 %v8700_v50, %v8700_v50  ;;  %v6192_v60 = vmul.f32 %v8702_v53, %v8702_v53  ;;  %v8704_v41 = vld [vmem:[#allocation182_spill] sm:$0xff] }
 0x218   : > { %8696 = vst [vmem:[#allocation169_spill] sm:$0xff] %v6176_v18  ;;  %8699 = vst [vmem:[#allocation170_spill] sm:$0xff] %v6184_v10  ;;  %v6196_v30 = vmul.f32 %v8704_v41, %v8704_v41  ;;  %v8706_v18 = vld [vmem:[#allocation183_spill] sm:$0xff]  ;;  %v8709_v10 = vld [vmem:[#allocation184_spill] sm:$0xff] }
 0x219   : > { %8701 = vst [vmem:[#allocation172_spill] sm:$0xff] %v6188_v1  ;;  %8703 = vst [vmem:[#allocation173_spill] sm:$0xff] %v6192_v60  ;;  %v6200_v28 = vmul.f32 %v8706_v18, %v8706_v18  ;;  %v6208_v50 = vmul.f32 %v8709_v10, %v8709_v10  ;;  %v8711_v1 = vld [vmem:[#allocation185_spill] sm:$0xff]  ;;  %v8713_v60 = vld [vmem:[#allocation186_spill] sm:$0xff] }
 0x21a   : > { %8705 = vst [vmem:[#allocation174_spill] sm:$0xff] %v6196_v30  ;;  %8708 = vst [vmem:[#allocation176_spill] sm:$0xff] %v6204_v27  ;;  %v6212_v53 = vmul.f32 %v8711_v1, %v8711_v1  ;;  %v6216_v41 = vmul.f32 %v8713_v60, %v8713_v60  ;;  %v8714_v30 = vld [vmem:[#allocation187_spill] sm:$0xff]  ;;  %v8718_v27 = vld [vmem:[#allocation190_spill] sm:$0xff] }
 0x21b   : > { %8707 = vst [vmem:[#allocation175_spill] sm:$0xff] %v6200_v28  ;;  %8710 = vst [vmem:[#allocation177_spill] sm:$0xff] %v6208_v50  ;;  %v6220_v18 = vmul.f32 %v8714_v30, %v8714_v30  ;;  %v8716_v28 = vld [vmem:[#allocation188_spill] sm:$0xff]  ;;  %v6228_v10 = vmul.f32 %v8718_v27, %v8718_v27  ;;  %v8720_v50 = vld [vmem:[#allocation191_spill] sm:$0xff]  ;;  %v6240_v30 = vmul.f32 %v4490_v44, %v4490_v44 }
 0x21c   : > { %8712 = vst [vmem:[#allocation178_spill] sm:$0xff] %v6212_v53  ;;  %v6224_v40 = vmul.f32 %v8716_v28, %v8716_v28  ;;  %v6232_v1 = vmul.f32 %v8720_v50, %v8720_v50  ;;  %v8722_v53 = vld [vmem:[#allocation192_spill] sm:$0xff] }
 0x21d   : > { %8715 = vst [vmem:[#allocation179_spill] sm:$0xff] %v6220_v18  ;;  %8719 = vst [vmem:[#allocation182_spill] sm:$0xff] %v6228_v10  ;;  %v6236_v60 = vmul.f32 %v8722_v53, %v8722_v53  ;;  %v8725_v18 = vld [vmem:[#allocation193_spill] sm:$0xff]  ;;  %v8729_v10 = vld [vmem:[#allocation195_spill] sm:$0xff] }
 0x21e   : > { %8717 = vst [vmem:[#allocation181_spill] sm:$0xff] %v6224_v40  ;;  %8721 = vst [vmem:[#allocation183_spill] sm:$0xff] %v6232_v1  ;;  %v6244_v28 = vmul.f32 %v8725_v18, %v8725_v18  ;;  %v8727_v40 = vld [vmem:[#allocation194_spill] sm:$0xff]  ;;  %v6252_v50 = vmul.f32 %v8729_v10, %v8729_v10  ;;  %v8730_v1 = vld [vmem:[#allocation196_spill] sm:$0xff] }
 0x21f   : > { %8723 = vst [vmem:[#allocation184_spill] sm:$0xff] %v6236_v60  ;;  %8724 = vst [vmem:[#allocation185_spill] sm:$0xff] %v6240_v30  ;;  %v6248_v27 = vmul.f32 %v8727_v40, %v8727_v40  ;;  %v6256_v53 = vmul.f32 %v8730_v1, %v8730_v1  ;;  %v8732_v60 = vld [vmem:[#allocation197_spill] sm:$0xff]  ;;  %v8734_v30 = vld [vmem:[#allocation199_spill] sm:$0xff]  ;;  %v6276_v1 = vmul.f32 %v4538_v37, %v4538_v37 }
 0x220   : > { %8726 = vst [vmem:[#allocation186_spill] sm:$0xff] %v6244_v28  ;;  %v6260_v44 = vmul.f32 %v8732_v60, %v8732_v60  ;;  %v6264_v18 = vmul.f32 %v8734_v30, %v8734_v30  ;;  %v8736_v28 = vld [vmem:[#allocation200_spill] sm:$0xff] }
 0x221   : > { %8728 = vst [vmem:[#allocation187_spill] sm:$0xff] %v6248_v27  ;;  %8731 = vst [vmem:[#allocation188_spill] sm:$0xff] %v6256_v53  ;;  %v6268_v40 = vmul.f32 %v8736_v28, %v8736_v28  ;;  %v8738_v27 = vld [vmem:[#allocation201_spill] sm:$0xff]  ;;  %v8741_v53 = vld [vmem:[#allocation202_spill] sm:$0xff] }
 0x222   : > { %8733 = vst [vmem:[#allocation190_spill] sm:$0xff] %v6260_v44  ;;  %8735 = vst [vmem:[#allocation191_spill] sm:$0xff] %v6264_v18  ;;  %v6272_v10 = vmul.f32 %v8738_v27, %v8738_v27  ;;  %v6280_v60 = vmul.f32 %v8741_v53, %v8741_v53  ;;  %v8743_v44 = vld [vmem:[#allocation203_spill] sm:$0xff]  ;;  %v8745_v18 = vld [vmem:[#allocation204_spill] sm:$0xff] }
 0x223   : > { %8737 = vst [vmem:[#allocation192_spill] sm:$0xff] %v6268_v40  ;;  %8740 = vst [vmem:[#allocation194_spill] sm:$0xff] %v6276_v1  ;;  %v6284_v30 = vmul.f32 %v8743_v44, %v8743_v44  ;;  %v6288_v28 = vmul.f32 %v8745_v18, %v8745_v18  ;;  %v8746_v40 = vld [vmem:[#allocation205_spill] sm:$0xff]  ;;  %v8750_v1 = vld [vmem:[#allocation208_spill] sm:$0xff] }
 0x224   : > { %8739 = vst [vmem:[#allocation193_spill] sm:$0xff] %v6272_v10  ;;  %8742 = vst [vmem:[#allocation195_spill] sm:$0xff] %v6280_v60  ;;  %v6292_v27 = vmul.f32 %v8746_v40, %v8746_v40  ;;  %v8748_v10 = vld [vmem:[#allocation206_spill] sm:$0xff]  ;;  %v6300_v53 = vmul.f32 %v8750_v1, %v8750_v1  ;;  %v8752_v60 = vld [vmem:[#allocation209_spill] sm:$0xff]  ;;  %v6312_v40 = vmul.f32 %v4586_v55, %v4586_v55 }
 0x225   : > { %8744 = vst [vmem:[#allocation196_spill] sm:$0xff] %v6284_v30  ;;  %v6296_v37 = vmul.f32 %v8748_v10, %v8748_v10  ;;  %v6304_v44 = vmul.f32 %v8752_v60, %v8752_v60  ;;  %v8754_v30 = vld [vmem:[#allocation210_spill] sm:$0xff] }
 0x226   : > { %8747 = vst [vmem:[#allocation197_spill] sm:$0xff] %v6292_v27  ;;  %8751 = vst [vmem:[#allocation200_spill] sm:$0xff] %v6300_v53  ;;  %v6308_v18 = vmul.f32 %v8754_v30, %v8754_v30  ;;  %v8757_v27 = vld [vmem:[#allocation211_spill] sm:$0xff]  ;;  %v8761_v53 = vld [vmem:[#allocation213_spill] sm:$0xff] }
 0x227   : > { %8749 = vst [vmem:[#allocation199_spill] sm:$0xff] %v6296_v37  ;;  %8753 = vst [vmem:[#allocation201_spill] sm:$0xff] %v6304_v44  ;;  %v6316_v10 = vmul.f32 %v8757_v27, %v8757_v27  ;;  %v8759_v37 = vld [vmem:[#allocation212_spill] sm:$0xff]  ;;  %v6324_v60 = vmul.f32 %v8761_v53, %v8761_v53  ;;  %v8762_v44 = vld [vmem:[#allocation214_spill] sm:$0xff] }
 0x228   : > { %8755 = vst [vmem:[#allocation202_spill] sm:$0xff] %v6308_v18  ;;  %8756 = vst [vmem:[#allocation203_spill] sm:$0xff] %v6312_v40  ;;  %v6320_v1 = vmul.f32 %v8759_v37, %v8759_v37  ;;  %v6328_v30 = vmul.f32 %v8762_v44, %v8762_v44  ;;  %v8764_v18 = vld [vmem:[#allocation215_spill] sm:$0xff]  ;;  %v8766_v40 = vld [vmem:[#allocation217_spill] sm:$0xff]  ;;  %v6348_v44 = vmul.f32 %v4634_v11, %v4634_v11 }
 0x229   : > { %8758 = vst [vmem:[#allocation204_spill] sm:$0xff] %v6316_v10  ;;  %v6332_v55 = vmul.f32 %v8764_v18, %v8764_v18  ;;  %v6336_v27 = vmul.f32 %v8766_v40, %v8766_v40  ;;  %v8768_v10 = vld [vmem:[#allocation218_spill] sm:$0xff] }
 0x22a   : > { %8760 = vst [vmem:[#allocation205_spill] sm:$0xff] %v6320_v1  ;;  %8763 = vst [vmem:[#allocation206_spill] sm:$0xff] %v6328_v30  ;;  %v6340_v37 = vmul.f32 %v8768_v10, %v8768_v10  ;;  %v8770_v1 = vld [vmem:[#allocation219_spill] sm:$0xff]  ;;  %v8773_v30 = vld [vmem:[#allocation220_spill] sm:$0xff] }
 0x22b   : > { %8765 = vst [vmem:[#allocation208_spill] sm:$0xff] %v6332_v55  ;;  %8767 = vst [vmem:[#allocation209_spill] sm:$0xff] %v6336_v27  ;;  %v6344_v53 = vmul.f32 %v8770_v1, %v8770_v1  ;;  %v6352_v18 = vmul.f32 %v8773_v30, %v8773_v30  ;;  %v8775_v55 = vld [vmem:[#allocation221_spill] sm:$0xff]  ;;  %v8777_v27 = vld [vmem:[#allocation222_spill] sm:$0xff] }
 0x22c   : > { %8769 = vst [vmem:[#allocation210_spill] sm:$0xff] %v6340_v37  ;;  %8772 = vst [vmem:[#allocation212_spill] sm:$0xff] %v6348_v44  ;;  %v6356_v40 = vmul.f32 %v8775_v55, %v8775_v55  ;;  %v6360_v10 = vmul.f32 %v8777_v27, %v8777_v27  ;;  %v8778_v37 = vld [vmem:[#allocation223_spill] sm:$0xff]  ;;  %v8782_v44 = vld [vmem:[#allocation226_spill] sm:$0xff] }
 0x22d   : > { %8771 = vst [vmem:[#allocation211_spill] sm:$0xff] %v6344_v53  ;;  %8774 = vst [vmem:[#allocation213_spill] sm:$0xff] %v6352_v18  ;;  %v6364_v1 = vmul.f32 %v8778_v37, %v8778_v37  ;;  %v8780_v53 = vld [vmem:[#allocation224_spill] sm:$0xff]  ;;  %v6372_v30 = vmul.f32 %v8782_v44, %v8782_v44  ;;  %v8784_v18 = vld [vmem:[#allocation227_spill] sm:$0xff]  ;;  %v6384_v37 = vmul.f32 %v4682_v34, %v4682_v34 }
 0x22e   : > { %8776 = vst [vmem:[#allocation214_spill] sm:$0xff] %v6356_v40  ;;  %v6368_v11 = vmul.f32 %v8780_v53, %v8780_v53  ;;  %v6376_v55 = vmul.f32 %v8784_v18, %v8784_v18  ;;  %v8786_v40 = vld [vmem:[#allocation228_spill] sm:$0xff] }
 0x22f   : > { %8779 = vst [vmem:[#allocation215_spill] sm:$0xff] %v6364_v1  ;;  %8783 = vst [vmem:[#allocation218_spill] sm:$0xff] %v6372_v30  ;;  %v6380_v27 = vmul.f32 %v8786_v40, %v8786_v40  ;;  %v8789_v1 = vld [vmem:[#allocation229_spill] sm:$0xff]  ;;  %v8793_v30 = vld [vmem:[#allocation231_spill] sm:$0xff] }
 0x230   : > { %8781 = vst [vmem:[#allocation217_spill] sm:$0xff] %v6368_v11  ;;  %8785 = vst [vmem:[#allocation219_spill] sm:$0xff] %v6376_v55  ;;  %v6388_v53 = vmul.f32 %v8789_v1, %v8789_v1  ;;  %v8791_v11 = vld [vmem:[#allocation230_spill] sm:$0xff]  ;;  %v6396_v18 = vmul.f32 %v8793_v30, %v8793_v30  ;;  %v8794_v55 = vld [vmem:[#allocation232_spill] sm:$0xff] }
 0x231   : > { %8787 = vst [vmem:[#allocation220_spill] sm:$0xff] %v6380_v27  ;;  %8788 = vst [vmem:[#allocation221_spill] sm:$0xff] %v6384_v37  ;;  %v6392_v44 = vmul.f32 %v8791_v11, %v8791_v11  ;;  %v6400_v40 = vmul.f32 %v8794_v55, %v8794_v55  ;;  %v8796_v27 = vld [vmem:[#allocation233_spill] sm:$0xff]  ;;  %v8798_v37 = vld [vmem:[#allocation235_spill] sm:$0xff]  ;;  %v6420_v55 = vmul.f32 %v4730_v2, %v4730_v2 }
 0x232   : > { %8790 = vst [vmem:[#allocation222_spill] sm:$0xff] %v6388_v53  ;;  %v6404_v34 = vmul.f32 %v8796_v27, %v8796_v27  ;;  %v6408_v1 = vmul.f32 %v8798_v37, %v8798_v37  ;;  %v8800_v53 = vld [vmem:[#allocation236_spill] sm:$0xff] }
 0x233   : > { %8792 = vst [vmem:[#allocation223_spill] sm:$0xff] %v6392_v44  ;;  %8795 = vst [vmem:[#allocation224_spill] sm:$0xff] %v6400_v40  ;;  %v6412_v11 = vmul.f32 %v8800_v53, %v8800_v53  ;;  %v8802_v44 = vld [vmem:[#allocation237_spill] sm:$0xff]  ;;  %v8805_v40 = vld [vmem:[#allocation238_spill] sm:$0xff] }
 0x234   : > { %8797 = vst [vmem:[#allocation226_spill] sm:$0xff] %v6404_v34  ;;  %8799 = vst [vmem:[#allocation227_spill] sm:$0xff] %v6408_v1  ;;  %v6416_v30 = vmul.f32 %v8802_v44, %v8802_v44  ;;  %v6424_v27 = vmul.f32 %v8805_v40, %v8805_v40  ;;  %v8807_v34 = vld [vmem:[#allocation239_spill] sm:$0xff]  ;;  %v8809_v1 = vld [vmem:[#allocation240_spill] sm:$0xff] }
 0x235   : > { %8801 = vst [vmem:[#allocation228_spill] sm:$0xff] %v6412_v11  ;;  %8804 = vst [vmem:[#allocation230_spill] sm:$0xff] %v6420_v55  ;;  %v6428_v37 = vmul.f32 %v8807_v34, %v8807_v34  ;;  %v6432_v53 = vmul.f32 %v8809_v1, %v8809_v1  ;;  %v8810_v11 = vld [vmem:[#allocation241_spill] sm:$0xff]  ;;  %v8814_v55 = vld [vmem:[#allocation244_spill] sm:$0xff] }
 0x236   : > { %8803 = vst [vmem:[#allocation229_spill] sm:$0xff] %v6416_v30  ;;  %8806 = vst [vmem:[#allocation231_spill] sm:$0xff] %v6424_v27  ;;  %v6436_v44 = vmul.f32 %v8810_v11, %v8810_v11  ;;  %v8812_v30 = vld [vmem:[#allocation242_spill] sm:$0xff]  ;;  %v6444_v40 = vmul.f32 %v8814_v55, %v8814_v55  ;;  %v8816_v27 = vld [vmem:[#allocation245_spill] sm:$0xff]  ;;  %v6456_v11 = vmul.f32 %v4778_v0, %v4778_v0 }
 0x237   : > { %8808 = vst [vmem:[#allocation232_spill] sm:$0xff] %v6428_v37  ;;  %v6440_v2 = vmul.f32 %v8812_v30, %v8812_v30  ;;  %v6448_v34 = vmul.f32 %v8816_v27, %v8816_v27  ;;  %v8818_v37 = vld [vmem:[#allocation246_spill] sm:$0xff] }
 0x238   : > { %8811 = vst [vmem:[#allocation233_spill] sm:$0xff] %v6436_v44  ;;  %8815 = vst [vmem:[#allocation236_spill] sm:$0xff] %v6444_v40  ;;  %v6452_v1 = vmul.f32 %v8818_v37, %v8818_v37  ;;  %v8821_v44 = vld [vmem:[#allocation247_spill] sm:$0xff]  ;;  %v8825_v40 = vld [vmem:[#allocation249_spill] sm:$0xff] }
 0x239   : > { %8813 = vst [vmem:[#allocation235_spill] sm:$0xff] %v6440_v2  ;;  %8817 = vst [vmem:[#allocation237_spill] sm:$0xff] %v6448_v34  ;;  %v6460_v30 = vmul.f32 %v8821_v44, %v8821_v44  ;;  %v8823_v2 = vld [vmem:[#allocation248_spill] sm:$0xff]  ;;  %v6468_v27 = vmul.f32 %v8825_v40, %v8825_v40  ;;  %v8826_v34 = vld [vmem:[#allocation250_spill] sm:$0xff] }
 0x23a   : > { %8819 = vst [vmem:[#allocation238_spill] sm:$0xff] %v6452_v1  ;;  %8820 = vst [vmem:[#allocation239_spill] sm:$0xff] %v6456_v11  ;;  %v6464_v55 = vmul.f32 %v8823_v2, %v8823_v2  ;;  %v6472_v37 = vmul.f32 %v8826_v34, %v8826_v34  ;;  %v8828_v1 = vld [vmem:[#allocation251_spill] sm:$0xff]  ;;  %v8830_v11 = vld [vmem:[#allocation253_spill] sm:$0xff]  ;;  %v6492_v34 = vmul.f32 %v4826_v20, %v4826_v20 }
 0x23b   : > { %8822 = vst [vmem:[#allocation240_spill] sm:$0xff] %v6460_v30  ;;  %v6476_v0 = vmul.f32 %v8828_v1, %v8828_v1  ;;  %v6480_v44 = vmul.f32 %v8830_v11, %v8830_v11  ;;  %v8832_v30 = vld [vmem:[#allocation254_spill] sm:$0xff] }
 0x23c   : > { %8824 = vst [vmem:[#allocation241_spill] sm:$0xff] %v6464_v55  ;;  %8827 = vst [vmem:[#allocation242_spill] sm:$0xff] %v6472_v37  ;;  %v6484_v2 = vmul.f32 %v8832_v30, %v8832_v30  ;;  %v8834_v55 = vld [vmem:[#allocation255_spill] sm:$0xff]  ;;  %v8837_v37 = vld [vmem:[#allocation256_spill] sm:$0xff] }
 0x23d   : > { %8829 = vst [vmem:[#allocation244_spill] sm:$0xff] %v6476_v0  ;;  %8831 = vst [vmem:[#allocation245_spill] sm:$0xff] %v6480_v44  ;;  %v6488_v40 = vmul.f32 %v8834_v55, %v8834_v55  ;;  %v6496_v1 = vmul.f32 %v8837_v37, %v8837_v37  ;;  %v8839_v0 = vld [vmem:[#allocation257_spill] sm:$0xff]  ;;  %v8841_v44 = vld [vmem:[#allocation258_spill] sm:$0xff] }
 0x23e   : > { %8833 = vst [vmem:[#allocation246_spill] sm:$0xff] %v6484_v2  ;;  %8836 = vst [vmem:[#allocation248_spill] sm:$0xff] %v6492_v34  ;;  %v6500_v11 = vmul.f32 %v8839_v0, %v8839_v0  ;;  %v6504_v30 = vmul.f32 %v8841_v44, %v8841_v44  ;;  %v8842_v2 = vld [vmem:[#allocation259_spill] sm:$0xff]  ;;  %v8846_v34 = vld [vmem:[#allocation262_spill] sm:$0xff] }
 0x23f   : > { %8835 = vst [vmem:[#allocation247_spill] sm:$0xff] %v6488_v40  ;;  %8838 = vst [vmem:[#allocation249_spill] sm:$0xff] %v6496_v1  ;;  %v6508_v55 = vmul.f32 %v8842_v2, %v8842_v2  ;;  %v8844_v40 = vld [vmem:[#allocation260_spill] sm:$0xff]  ;;  %v6516_v37 = vmul.f32 %v8846_v34, %v8846_v34  ;;  %v8848_v1 = vld [vmem:[#allocation263_spill] sm:$0xff]  ;;  %v6528_v2 = vmul.f32 %v4874_v35, %v4874_v35 }
 0x240   : > { %8840 = vst [vmem:[#allocation250_spill] sm:$0xff] %v6500_v11  ;;  %v6512_v20 = vmul.f32 %v8844_v40, %v8844_v40  ;;  %v6520_v0 = vmul.f32 %v8848_v1, %v8848_v1  ;;  %v8850_v11 = vld [vmem:[#allocation264_spill] sm:$0xff] }
 0x241   : > { %8843 = vst [vmem:[#allocation251_spill] sm:$0xff] %v6508_v55  ;;  %8847 = vst [vmem:[#allocation254_spill] sm:$0xff] %v6516_v37  ;;  %v6524_v44 = vmul.f32 %v8850_v11, %v8850_v11  ;;  %v8853_v55 = vld [vmem:[#allocation265_spill] sm:$0xff]  ;;  %v8857_v37 = vld [vmem:[#allocation267_spill] sm:$0xff] }
 0x242   : > { %8845 = vst [vmem:[#allocation253_spill] sm:$0xff] %v6512_v20  ;;  %8849 = vst [vmem:[#allocation255_spill] sm:$0xff] %v6520_v0  ;;  %v6532_v40 = vmul.f32 %v8853_v55, %v8853_v55  ;;  %v8855_v20 = vld [vmem:[#allocation266_spill] sm:$0xff]  ;;  %v6540_v1 = vmul.f32 %v8857_v37, %v8857_v37  ;;  %v8858_v0 = vld [vmem:[#allocation268_spill] sm:$0xff] }
 0x243   : > { %8851 = vst [vmem:[#allocation256_spill] sm:$0xff] %v6524_v44  ;;  %8852 = vst [vmem:[#allocation257_spill] sm:$0xff] %v6528_v2  ;;  %v6536_v34 = vmul.f32 %v8855_v20, %v8855_v20  ;;  %v6544_v11 = vmul.f32 %v8858_v0, %v8858_v0  ;;  %v8860_v44 = vld [vmem:[#allocation269_spill] sm:$0xff]  ;;  %v8862_v2 = vld [vmem:[#allocation271_spill] sm:$0xff]  ;;  %v6564_v0 = vmul.f32 %v4922_v39, %v4922_v39 }
 0x244   : > { %8854 = vst [vmem:[#allocation258_spill] sm:$0xff] %v6532_v40  ;;  %v6548_v35 = vmul.f32 %v8860_v44, %v8860_v44  ;;  %v6552_v55 = vmul.f32 %v8862_v2, %v8862_v2  ;;  %v8864_v40 = vld [vmem:[#allocation272_spill] sm:$0xff] }
 0x245   : > { %8856 = vst [vmem:[#allocation259_spill] sm:$0xff] %v6536_v34  ;;  %8859 = vst [vmem:[#allocation260_spill] sm:$0xff] %v6544_v11  ;;  %v6556_v20 = vmul.f32 %v8864_v40, %v8864_v40  ;;  %v8866_v34 = vld [vmem:[#allocation273_spill] sm:$0xff]  ;;  %v8869_v11 = vld [vmem:[#allocation274_spill] sm:$0xff] }
 0x246   : > { %8861 = vst [vmem:[#allocation262_spill] sm:$0xff] %v6548_v35  ;;  %8863 = vst [vmem:[#allocation263_spill] sm:$0xff] %v6552_v55  ;;  %v6560_v37 = vmul.f32 %v8866_v34, %v8866_v34  ;;  %v6568_v44 = vmul.f32 %v8869_v11, %v8869_v11  ;;  %v8871_v35 = vld [vmem:[#allocation275_spill] sm:$0xff]  ;;  %v8873_v55 = vld [vmem:[#allocation276_spill] sm:$0xff] }
 0x247   : > { %8865 = vst [vmem:[#allocation264_spill] sm:$0xff] %v6556_v20  ;;  %8868 = vst [vmem:[#allocation266_spill] sm:$0xff] %v6564_v0  ;;  %v6572_v2 = vmul.f32 %v8871_v35, %v8871_v35  ;;  %v6576_v40 = vmul.f32 %v8873_v55, %v8873_v55  ;;  %v8874_v20 = vld [vmem:[#allocation277_spill] sm:$0xff]  ;;  %v8878_v0 = vld [vmem:[#allocation280_spill] sm:$0xff] }
 0x248   : > { %8867 = vst [vmem:[#allocation265_spill] sm:$0xff] %v6560_v37  ;;  %8870 = vst [vmem:[#allocation267_spill] sm:$0xff] %v6568_v44  ;;  %v6580_v34 = vmul.f32 %v8874_v20, %v8874_v20  ;;  %v8876_v37 = vld [vmem:[#allocation278_spill] sm:$0xff]  ;;  %v6588_v11 = vmul.f32 %v8878_v0, %v8878_v0  ;;  %v8880_v44 = vld [vmem:[#allocation281_spill] sm:$0xff]  ;;  %v6600_v20 = vmul.f32 %v4970_v16, %v4970_v16 }
 0x249   : > { %8872 = vst [vmem:[#allocation268_spill] sm:$0xff] %v6572_v2  ;;  %v6584_v39 = vmul.f32 %v8876_v37, %v8876_v37  ;;  %v6592_v35 = vmul.f32 %v8880_v44, %v8880_v44  ;;  %v8882_v2 = vld [vmem:[#allocation282_spill] sm:$0xff] }
 0x24a   : > { %8875 = vst [vmem:[#allocation269_spill] sm:$0xff] %v6580_v34  ;;  %8879 = vst [vmem:[#allocation272_spill] sm:$0xff] %v6588_v11  ;;  %v6596_v55 = vmul.f32 %v8882_v2, %v8882_v2  ;;  %v8885_v34 = vld [vmem:[#allocation283_spill] sm:$0xff]  ;;  %v8889_v11 = vld [vmem:[#allocation285_spill] sm:$0xff] }
 0x24b   : > { %8877 = vst [vmem:[#allocation271_spill] sm:$0xff] %v6584_v39  ;;  %8881 = vst [vmem:[#allocation273_spill] sm:$0xff] %v6592_v35  ;;  %v6604_v37 = vmul.f32 %v8885_v34, %v8885_v34  ;;  %v8887_v39 = vld [vmem:[#allocation284_spill] sm:$0xff]  ;;  %v6612_v44 = vmul.f32 %v8889_v11, %v8889_v11  ;;  %v8890_v35 = vld [vmem:[#allocation286_spill] sm:$0xff] }
 0x24c   : > { %8883 = vst [vmem:[#allocation274_spill] sm:$0xff] %v6596_v55  ;;  %8884 = vst [vmem:[#allocation275_spill] sm:$0xff] %v6600_v20  ;;  %v6608_v0 = vmul.f32 %v8887_v39, %v8887_v39  ;;  %v6616_v2 = vmul.f32 %v8890_v35, %v8890_v35  ;;  %v8892_v55 = vld [vmem:[#allocation287_spill] sm:$0xff]  ;;  %v8894_v20 = vld [vmem:[#allocation289_spill] sm:$0xff]  ;;  %v6636_v35 = vmul.f32 %v5018_v57, %v5018_v57 }
 0x24d   : > { %8886 = vst [vmem:[#allocation276_spill] sm:$0xff] %v6604_v37  ;;  %v6620_v16 = vmul.f32 %v8892_v55, %v8892_v55  ;;  %v6624_v34 = vmul.f32 %v8894_v20, %v8894_v20  ;;  %v8896_v37 = vld [vmem:[#allocation290_spill] sm:$0xff] }
 0x24e   : > { %8888 = vst [vmem:[#allocation277_spill] sm:$0xff] %v6608_v0  ;;  %8891 = vst [vmem:[#allocation278_spill] sm:$0xff] %v6616_v2  ;;  %v6628_v39 = vmul.f32 %v8896_v37, %v8896_v37  ;;  %v8898_v0 = vld [vmem:[#allocation291_spill] sm:$0xff]  ;;  %v8901_v2 = vld [vmem:[#allocation292_spill] sm:$0xff] }
 0x24f   : > { %8893 = vst [vmem:[#allocation280_spill] sm:$0xff] %v6620_v16  ;;  %8895 = vst [vmem:[#allocation281_spill] sm:$0xff] %v6624_v34  ;;  %v6632_v11 = vmul.f32 %v8898_v0, %v8898_v0  ;;  %v6640_v55 = vmul.f32 %v8901_v2, %v8901_v2  ;;  %v8903_v16 = vld [vmem:[#allocation293_spill] sm:$0xff]  ;;  %v8905_v34 = vld [vmem:[#allocation294_spill] sm:$0xff] }
 0x250   : > { %8897 = vst [vmem:[#allocation282_spill] sm:$0xff] %v6628_v39  ;;  %8900 = vst [vmem:[#allocation284_spill] sm:$0xff] %v6636_v35  ;;  %v6644_v20 = vmul.f32 %v8903_v16, %v8903_v16  ;;  %v6648_v37 = vmul.f32 %v8905_v34, %v8905_v34  ;;  %v8906_v39 = vld [vmem:[#allocation295_spill] sm:$0xff]  ;;  %v8910_v35 = vld [vmem:[#allocation298_spill] sm:$0xff] }
 0x251   : > { %8899 = vst [vmem:[#allocation283_spill] sm:$0xff] %v6632_v11  ;;  %8902 = vst [vmem:[#allocation285_spill] sm:$0xff] %v6640_v55  ;;  %v6652_v0 = vmul.f32 %v8906_v39, %v8906_v39  ;;  %v8908_v11 = vld [vmem:[#allocation296_spill] sm:$0xff]  ;;  %v6660_v2 = vmul.f32 %v8910_v35, %v8910_v35  ;;  %v8912_v55 = vld [vmem:[#allocation299_spill] sm:$0xff]  ;;  %v6672_v39 = vmul.f32 %v5066_v58, %v5066_v58 }
 0x252   : > { %8904 = vst [vmem:[#allocation286_spill] sm:$0xff] %v6644_v20  ;;  %v6656_v57 = vmul.f32 %v8908_v11, %v8908_v11  ;;  %v6664_v16 = vmul.f32 %v8912_v55, %v8912_v55  ;;  %v8914_v20 = vld [vmem:[#allocation300_spill] sm:$0xff] }
 0x253   : > { %8907 = vst [vmem:[#allocation287_spill] sm:$0xff] %v6652_v0  ;;  %8911 = vst [vmem:[#allocation290_spill] sm:$0xff] %v6660_v2  ;;  %v6668_v34 = vmul.f32 %v8914_v20, %v8914_v20  ;;  %v8917_v0 = vld [vmem:[#allocation301_spill] sm:$0xff]  ;;  %v8921_v2 = vld [vmem:[#allocation303_spill] sm:$0xff] }
 0x254   : > { %8909 = vst [vmem:[#allocation289_spill] sm:$0xff] %v6656_v57  ;;  %8913 = vst [vmem:[#allocation291_spill] sm:$0xff] %v6664_v16  ;;  %v6676_v11 = vmul.f32 %v8917_v0, %v8917_v0  ;;  %v8919_v57 = vld [vmem:[#allocation302_spill] sm:$0xff]  ;;  %v6684_v55 = vmul.f32 %v8921_v2, %v8921_v2  ;;  %v8922_v16 = vld [vmem:[#allocation304_spill] sm:$0xff] }
 0x255   : > { %8915 = vst [vmem:[#allocation292_spill] sm:$0xff] %v6668_v34  ;;  %8916 = vst [vmem:[#allocation293_spill] sm:$0xff] %v6672_v39  ;;  %v6680_v35 = vmul.f32 %v8919_v57, %v8919_v57  ;;  %v6688_v20 = vmul.f32 %v8922_v16, %v8922_v16  ;;  %v8924_v34 = vld [vmem:[#allocation305_spill] sm:$0xff]  ;;  %v8926_v39 = vld [vmem:[#allocation307_spill] sm:$0xff]  ;;  %v6708_v16 = vmul.f32 %v5114_v59, %v5114_v59 }
 0x256   : > { %8918 = vst [vmem:[#allocation294_spill] sm:$0xff] %v6676_v11  ;;  %v6692_v58 = vmul.f32 %v8924_v34, %v8924_v34  ;;  %v6696_v0 = vmul.f32 %v8926_v39, %v8926_v39  ;;  %v8928_v11 = vld [vmem:[#allocation308_spill] sm:$0xff] }
 0x257   : > { %8920 = vst [vmem:[#allocation295_spill] sm:$0xff] %v6680_v35  ;;  %8923 = vst [vmem:[#allocation296_spill] sm:$0xff] %v6688_v20  ;;  %v6700_v57 = vmul.f32 %v8928_v11, %v8928_v11  ;;  %v8930_v35 = vld [vmem:[#allocation309_spill] sm:$0xff]  ;;  %v8933_v20 = vld [vmem:[#allocation310_spill] sm:$0xff] }
 0x258   : > { %8925 = vst [vmem:[#allocation298_spill] sm:$0xff] %v6692_v58  ;;  %8927 = vst [vmem:[#allocation299_spill] sm:$0xff] %v6696_v0  ;;  %v6704_v2 = vmul.f32 %v8930_v35, %v8930_v35  ;;  %v6712_v34 = vmul.f32 %v8933_v20, %v8933_v20  ;;  %v8935_v58 = vld [vmem:[#allocation311_spill] sm:$0xff]  ;;  %v8937_v0 = vld [vmem:[#allocation312_spill] sm:$0xff] }
 0x259   : > { %8929 = vst [vmem:[#allocation300_spill] sm:$0xff] %v6700_v57  ;;  %8932 = vst [vmem:[#allocation302_spill] sm:$0xff] %v6708_v16  ;;  %v6716_v39 = vmul.f32 %v8935_v58, %v8935_v58  ;;  %v6720_v11 = vmul.f32 %v8937_v0, %v8937_v0  ;;  %v8938_v57 = vld [vmem:[#allocation313_spill] sm:$0xff]  ;;  %v8942_v16 = vld [vmem:[#allocation316_spill] sm:$0xff] }
 0x25a   : > { %8931 = vst [vmem:[#allocation301_spill] sm:$0xff] %v6704_v2  ;;  %8934 = vst [vmem:[#allocation303_spill] sm:$0xff] %v6712_v34  ;;  %v6724_v35 = vmul.f32 %v8938_v57, %v8938_v57  ;;  %v8940_v2 = vld [vmem:[#allocation314_spill] sm:$0xff]  ;;  %v6732_v20 = vmul.f32 %v8942_v16, %v8942_v16  ;;  %v8944_v34 = vld [vmem:[#allocation317_spill] sm:$0xff]  ;;  %v6744_v57 = vmul.f32 %v5162_v3, %v5162_v3 }
 0x25b   : > { %8936 = vst [vmem:[#allocation304_spill] sm:$0xff] %v6716_v39  ;;  %v6728_v59 = vmul.f32 %v8940_v2, %v8940_v2  ;;  %v6736_v58 = vmul.f32 %v8944_v34, %v8944_v34  ;;  %v8946_v39 = vld [vmem:[#allocation318_spill] sm:$0xff] }
 0x25c   : > { %8939 = vst [vmem:[#allocation305_spill] sm:$0xff] %v6724_v35  ;;  %8943 = vst [vmem:[#allocation308_spill] sm:$0xff] %v6732_v20  ;;  %v6740_v0 = vmul.f32 %v8946_v39, %v8946_v39  ;;  %v8949_v35 = vld [vmem:[#allocation319_spill] sm:$0xff]  ;;  %v8953_v20 = vld [vmem:[#allocation321_spill] sm:$0xff] }
 0x25d   : > { %8941 = vst [vmem:[#allocation307_spill] sm:$0xff] %v6728_v59  ;;  %8945 = vst [vmem:[#allocation309_spill] sm:$0xff] %v6736_v58  ;;  %v6748_v2 = vmul.f32 %v8949_v35, %v8949_v35  ;;  %v8951_v59 = vld [vmem:[#allocation320_spill] sm:$0xff]  ;;  %v6756_v34 = vmul.f32 %v8953_v20, %v8953_v20  ;;  %v8954_v58 = vld [vmem:[#allocation322_spill] sm:$0xff] }
 0x25e   : > { %8947 = vst [vmem:[#allocation310_spill] sm:$0xff] %v6740_v0  ;;  %8948 = vst [vmem:[#allocation311_spill] sm:$0xff] %v6744_v57  ;;  %v6752_v16 = vmul.f32 %v8951_v59, %v8951_v59  ;;  %v6760_v39 = vmul.f32 %v8954_v58, %v8954_v58  ;;  %v8956_v0 = vld [vmem:[#allocation323_spill] sm:$0xff]  ;;  %v8958_v57 = vld [vmem:[#allocation325_spill] sm:$0xff]  ;;  %v6780_v58 = vmul.f32 %v5210_v4, %v5210_v4 }
 0x25f   : > { %8950 = vst [vmem:[#allocation312_spill] sm:$0xff] %v6748_v2  ;;  %v6764_v3 = vmul.f32 %v8956_v0, %v8956_v0  ;;  %v6768_v35 = vmul.f32 %v8958_v57, %v8958_v57  ;;  %v8960_v2 = vld [vmem:[#allocation326_spill] sm:$0xff] }
 0x260   : > { %8952 = vst [vmem:[#allocation313_spill] sm:$0xff] %v6752_v16  ;;  %8955 = vst [vmem:[#allocation314_spill] sm:$0xff] %v6760_v39  ;;  %v6772_v59 = vmul.f32 %v8960_v2, %v8960_v2  ;;  %v8962_v16 = vld [vmem:[#allocation327_spill] sm:$0xff]  ;;  %v8965_v39 = vld [vmem:[#allocation328_spill] sm:$0xff] }
 0x261   : > { %8957 = vst [vmem:[#allocation316_spill] sm:$0xff] %v6764_v3  ;;  %8959 = vst [vmem:[#allocation317_spill] sm:$0xff] %v6768_v35  ;;  %v6776_v20 = vmul.f32 %v8962_v16, %v8962_v16  ;;  %v6784_v0 = vmul.f32 %v8965_v39, %v8965_v39  ;;  %v8967_v3 = vld [vmem:[#allocation329_spill] sm:$0xff]  ;;  %v8969_v35 = vld [vmem:[#allocation330_spill] sm:$0xff] }
 0x262   : > { %8961 = vst [vmem:[#allocation318_spill] sm:$0xff] %v6772_v59  ;;  %8964 = vst [vmem:[#allocation320_spill] sm:$0xff] %v6780_v58  ;;  %v6788_v57 = vmul.f32 %v8967_v3, %v8967_v3  ;;  %v6792_v2 = vmul.f32 %v8969_v35, %v8969_v35  ;;  %v8970_v59 = vld [vmem:[#allocation331_spill] sm:$0xff]  ;;  %v8974_v58 = vld [vmem:[#allocation334_spill] sm:$0xff] }
 0x263   : > { %8963 = vst [vmem:[#allocation319_spill] sm:$0xff] %v6776_v20  ;;  %8966 = vst [vmem:[#allocation321_spill] sm:$0xff] %v6784_v0  ;;  %v6796_v16 = vmul.f32 %v8970_v59, %v8970_v59  ;;  %v8972_v20 = vld [vmem:[#allocation332_spill] sm:$0xff]  ;;  %v6804_v39 = vmul.f32 %v8974_v58, %v8974_v58  ;;  %v8976_v0 = vld [vmem:[#allocation335_spill] sm:$0xff]  ;;  %v6816_v59 = vmul.f32 %v5258_v5, %v5258_v5 }
 0x264   : > { %8968 = vst [vmem:[#allocation322_spill] sm:$0xff] %v6788_v57  ;;  %v6800_v4 = vmul.f32 %v8972_v20, %v8972_v20  ;;  %v6808_v3 = vmul.f32 %v8976_v0, %v8976_v0  ;;  %v8978_v57 = vld [vmem:[#allocation336_spill] sm:$0xff] }
 0x265   : > { %8971 = vst [vmem:[#allocation323_spill] sm:$0xff] %v6796_v16  ;;  %8975 = vst [vmem:[#allocation326_spill] sm:$0xff] %v6804_v39  ;;  %v6812_v35 = vmul.f32 %v8978_v57, %v8978_v57  ;;  %v8981_v16 = vld [vmem:[#allocation337_spill] sm:$0xff]  ;;  %v8985_v39 = vld [vmem:[#allocation339_spill] sm:$0xff] }
 0x266   : > { %8973 = vst [vmem:[#allocation325_spill] sm:$0xff] %v6800_v4  ;;  %8977 = vst [vmem:[#allocation327_spill] sm:$0xff] %v6808_v3  ;;  %v6820_v20 = vmul.f32 %v8981_v16, %v8981_v16  ;;  %v8983_v4 = vld [vmem:[#allocation338_spill] sm:$0xff]  ;;  %v6828_v0 = vmul.f32 %v8985_v39, %v8985_v39  ;;  %v8986_v3 = vld [vmem:[#allocation340_spill] sm:$0xff] }
 0x267   : > { %8979 = vst [vmem:[#allocation328_spill] sm:$0xff] %v6812_v35  ;;  %8980 = vst [vmem:[#allocation329_spill] sm:$0xff] %v6816_v59  ;;  %v6824_v58 = vmul.f32 %v8983_v4, %v8983_v4  ;;  %v6832_v57 = vmul.f32 %v8986_v3, %v8986_v3  ;;  %v8988_v35 = vld [vmem:[#allocation341_spill] sm:$0xff]  ;;  %v8990_v59 = vld [vmem:[#allocation343_spill] sm:$0xff]  ;;  %v6852_v3 = vmul.f32 %v5306_v13, %v5306_v13 }
 0x268   : > { %8982 = vst [vmem:[#allocation330_spill] sm:$0xff] %v6820_v20  ;;  %v6836_v5 = vmul.f32 %v8988_v35, %v8988_v35  ;;  %v6840_v16 = vmul.f32 %v8990_v59, %v8990_v59  ;;  %v8992_v20 = vld [vmem:[#allocation344_spill] sm:$0xff] }
 0x269   : > { %8984 = vst [vmem:[#allocation331_spill] sm:$0xff] %v6824_v58  ;;  %8987 = vst [vmem:[#allocation332_spill] sm:$0xff] %v6832_v57  ;;  %v6844_v4 = vmul.f32 %v8992_v20, %v8992_v20  ;;  %v8994_v58 = vld [vmem:[#allocation345_spill] sm:$0xff]  ;;  %v8997_v57 = vld [vmem:[#allocation346_spill] sm:$0xff] }
 0x26a   : > { %8989 = vst [vmem:[#allocation334_spill] sm:$0xff] %v6836_v5  ;;  %8991 = vst [vmem:[#allocation335_spill] sm:$0xff] %v6840_v16  ;;  %v6848_v39 = vmul.f32 %v8994_v58, %v8994_v58  ;;  %v6856_v35 = vmul.f32 %v8997_v57, %v8997_v57  ;;  %v8999_v5 = vld [vmem:[#allocation347_spill] sm:$0xff]  ;;  %v9001_v16 = vld [vmem:[#allocation348_spill] sm:$0xff] }
 0x26b   : > { %8993 = vst [vmem:[#allocation336_spill] sm:$0xff] %v6844_v4  ;;  %8996 = vst [vmem:[#allocation338_spill] sm:$0xff] %v6852_v3  ;;  %v6860_v59 = vmul.f32 %v8999_v5, %v8999_v5  ;;  %v6864_v20 = vmul.f32 %v9001_v16, %v9001_v16  ;;  %v9002_v4 = vld [vmem:[#allocation349_spill] sm:$0xff]  ;;  %v9006_v3 = vld [vmem:[#allocation352_spill] sm:$0xff] }
 0x26c   : > { %8995 = vst [vmem:[#allocation337_spill] sm:$0xff] %v6848_v39  ;;  %8998 = vst [vmem:[#allocation339_spill] sm:$0xff] %v6856_v35  ;;  %v6868_v58 = vmul.f32 %v9002_v4, %v9002_v4  ;;  %v9004_v39 = vld [vmem:[#allocation350_spill] sm:$0xff]  ;;  %v6876_v57 = vmul.f32 %v9006_v3, %v9006_v3  ;;  %v9008_v35 = vld [vmem:[#allocation353_spill] sm:$0xff]  ;;  %v6888_v4 = vmul.f32 %v5354_v14, %v5354_v14 }
 0x26d   : > { %9000 = vst [vmem:[#allocation340_spill] sm:$0xff] %v6860_v59  ;;  %v6872_v13 = vmul.f32 %v9004_v39, %v9004_v39  ;;  %v6880_v5 = vmul.f32 %v9008_v35, %v9008_v35  ;;  %v9010_v59 = vld [vmem:[#allocation354_spill] sm:$0xff] }
 0x26e   : > { %9003 = vst [vmem:[#allocation341_spill] sm:$0xff] %v6868_v58  ;;  %9007 = vst [vmem:[#allocation344_spill] sm:$0xff] %v6876_v57  ;;  %v6884_v16 = vmul.f32 %v9010_v59, %v9010_v59  ;;  %v9013_v58 = vld [vmem:[#allocation355_spill] sm:$0xff]  ;;  %v9017_v57 = vld [vmem:[#allocation357_spill] sm:$0xff] }
 0x26f   : > { %9005 = vst [vmem:[#allocation343_spill] sm:$0xff] %v6872_v13  ;;  %9009 = vst [vmem:[#allocation345_spill] sm:$0xff] %v6880_v5  ;;  %v6892_v39 = vmul.f32 %v9013_v58, %v9013_v58  ;;  %v9015_v13 = vld [vmem:[#allocation356_spill] sm:$0xff]  ;;  %v6900_v35 = vmul.f32 %v9017_v57, %v9017_v57  ;;  %v9018_v5 = vld [vmem:[#allocation358_spill] sm:$0xff] }
 0x270   : > { %9011 = vst [vmem:[#allocation346_spill] sm:$0xff] %v6884_v16  ;;  %9012 = vst [vmem:[#allocation347_spill] sm:$0xff] %v6888_v4  ;;  %v6896_v3 = vmul.f32 %v9015_v13, %v9015_v13  ;;  %v6904_v59 = vmul.f32 %v9018_v5, %v9018_v5  ;;  %v9020_v16 = vld [vmem:[#allocation359_spill] sm:$0xff]  ;;  %v9022_v4 = vld [vmem:[#allocation361_spill] sm:$0xff]  ;;  %v6924_v5 = vmul.f32 %v5402_v15, %v5402_v15 }
 0x271   : > { %9014 = vst [vmem:[#allocation348_spill] sm:$0xff] %v6892_v39  ;;  %v6908_v14 = vmul.f32 %v9020_v16, %v9020_v16  ;;  %v6912_v58 = vmul.f32 %v9022_v4, %v9022_v4  ;;  %v9024_v39 = vld [vmem:[#allocation362_spill] sm:$0xff] }
 0x272   : > { %9016 = vst [vmem:[#allocation349_spill] sm:$0xff] %v6896_v3  ;;  %9019 = vst [vmem:[#allocation350_spill] sm:$0xff] %v6904_v59  ;;  %v6916_v13 = vmul.f32 %v9024_v39, %v9024_v39  ;;  %v9026_v3 = vld [vmem:[#allocation363_spill] sm:$0xff]  ;;  %v9029_v59 = vld [vmem:[#allocation364_spill] sm:$0xff] }
 0x273   : > { %9021 = vst [vmem:[#allocation352_spill] sm:$0xff] %v6908_v14  ;;  %9023 = vst [vmem:[#allocation353_spill] sm:$0xff] %v6912_v58  ;;  %v6920_v57 = vmul.f32 %v9026_v3, %v9026_v3  ;;  %v6928_v16 = vmul.f32 %v9029_v59, %v9029_v59  ;;  %v9031_v14 = vld [vmem:[#allocation365_spill] sm:$0xff]  ;;  %v9033_v58 = vld [vmem:[#allocation366_spill] sm:$0xff] }
 0x274   : > { %9025 = vst [vmem:[#allocation354_spill] sm:$0xff] %v6916_v13  ;;  %9028 = vst [vmem:[#allocation356_spill] sm:$0xff] %v6924_v5  ;;  %v6932_v4 = vmul.f32 %v9031_v14, %v9031_v14  ;;  %v6936_v39 = vmul.f32 %v9033_v58, %v9033_v58  ;;  %v9034_v13 = vld [vmem:[#allocation367_spill] sm:$0xff]  ;;  %v9038_v5 = vld [vmem:[#allocation370_spill] sm:$0xff] }
 0x275   : > { %9027 = vst [vmem:[#allocation355_spill] sm:$0xff] %v6920_v57  ;;  %9030 = vst [vmem:[#allocation357_spill] sm:$0xff] %v6928_v16  ;;  %v6940_v3 = vmul.f32 %v9034_v13, %v9034_v13  ;;  %v9036_v57 = vld [vmem:[#allocation368_spill] sm:$0xff]  ;;  %v6948_v59 = vmul.f32 %v9038_v5, %v9038_v5  ;;  %v9040_v16 = vld [vmem:[#allocation371_spill] sm:$0xff]  ;;  %v6960_v13 = vmul.f32 %v5450_v22, %v5450_v22 }
 0x276   : > { %9032 = vst [vmem:[#allocation358_spill] sm:$0xff] %v6932_v4  ;;  %v6944_v15 = vmul.f32 %v9036_v57, %v9036_v57  ;;  %v6952_v14 = vmul.f32 %v9040_v16, %v9040_v16  ;;  %v9042_v4 = vld [vmem:[#allocation372_spill] sm:$0xff] }
 0x277   : > { %9035 = vst [vmem:[#allocation359_spill] sm:$0xff] %v6940_v3  ;;  %9039 = vst [vmem:[#allocation362_spill] sm:$0xff] %v6948_v59  ;;  %v6956_v58 = vmul.f32 %v9042_v4, %v9042_v4  ;;  %v9045_v3 = vld [vmem:[#allocation373_spill] sm:$0xff]  ;;  %v9049_v59 = vld [vmem:[#allocation375_spill] sm:$0xff] }
 0x278   : > { %9037 = vst [vmem:[#allocation361_spill] sm:$0xff] %v6944_v15  ;;  %9041 = vst [vmem:[#allocation363_spill] sm:$0xff] %v6952_v14  ;;  %v6964_v57 = vmul.f32 %v9045_v3, %v9045_v3  ;;  %v9047_v15 = vld [vmem:[#allocation374_spill] sm:$0xff]  ;;  %v6972_v16 = vmul.f32 %v9049_v59, %v9049_v59  ;;  %v9050_v14 = vld [vmem:[#allocation376_spill] sm:$0xff] }
 0x279   : > { %9043 = vst [vmem:[#allocation364_spill] sm:$0xff] %v6956_v58  ;;  %9044 = vst [vmem:[#allocation365_spill] sm:$0xff] %v6960_v13  ;;  %v6968_v5 = vmul.f32 %v9047_v15, %v9047_v15  ;;  %v6976_v4 = vmul.f32 %v9050_v14, %v9050_v14  ;;  %v9052_v58 = vld [vmem:[#allocation377_spill] sm:$0xff]  ;;  %v9054_v13 = vld [vmem:[#allocation379_spill] sm:$0xff]  ;;  %v6996_v14 = vmul.f32 %v5498_v23, %v5498_v23 }
 0x27a   : > { %9046 = vst [vmem:[#allocation366_spill] sm:$0xff] %v6964_v57  ;;  %v6980_v22 = vmul.f32 %v9052_v58, %v9052_v58  ;;  %v6984_v3 = vmul.f32 %v9054_v13, %v9054_v13  ;;  %v9056_v57 = vld [vmem:[#allocation380_spill] sm:$0xff] }
 0x27b   : > { %9048 = vst [vmem:[#allocation367_spill] sm:$0xff] %v6968_v5  ;;  %9051 = vst [vmem:[#allocation368_spill] sm:$0xff] %v6976_v4  ;;  %v6988_v15 = vmul.f32 %v9056_v57, %v9056_v57  ;;  %v9058_v5 = vld [vmem:[#allocation381_spill] sm:$0xff]  ;;  %v9061_v4 = vld [vmem:[#allocation382_spill] sm:$0xff] }
 0x27c   : > { %9053 = vst [vmem:[#allocation370_spill] sm:$0xff] %v6980_v22  ;;  %9055 = vst [vmem:[#allocation371_spill] sm:$0xff] %v6984_v3  ;;  %v6992_v59 = vmul.f32 %v9058_v5, %v9058_v5  ;;  %v7000_v58 = vmul.f32 %v9061_v4, %v9061_v4  ;;  %v9063_v22 = vld [vmem:[#allocation383_spill] sm:$0xff]  ;;  %v9065_v3 = vld [vmem:[#allocation384_spill] sm:$0xff] }
 0x27d   : > { %9057 = vst [vmem:[#allocation372_spill] sm:$0xff] %v6988_v15  ;;  %9060 = vst [vmem:[#allocation374_spill] sm:$0xff] %v6996_v14  ;;  %v7004_v13 = vmul.f32 %v9063_v22, %v9063_v22  ;;  %v7008_v57 = vmul.f32 %v9065_v3, %v9065_v3  ;;  %v9067_v15 = vld [vmem:[#allocation385_spill] sm:$0xff]  ;;  %v9071_v14 = vld [vmem:[#allocation388_spill] sm:$0xff] }
 0x27e   : > { %9059 = vst [vmem:[#allocation373_spill] sm:$0xff] %v6992_v59  ;;  %9062 = vst [vmem:[#allocation375_spill] sm:$0xff] %v7000_v58  ;;  %v7012_v5 = vmul.f32 %v9067_v15, %v9067_v15  ;;  %v9069_v59 = vld [vmem:[#allocation386_spill] sm:$0xff]  ;;  %v7020_v4 = vmul.f32 %v9071_v14, %v9071_v14  ;;  %v9073_v58 = vld [vmem:[#allocation389_spill] sm:$0xff] }
 0x27f   : > { %9064 = vst [vmem:[#allocation376_spill] sm:$0xff] %v7004_v13  ;;  %9066 = vst [vmem:[#allocation377_spill] sm:$0xff] %v7008_v57  ;;  %v7016_v23 = vmul.f32 %v9069_v59, %v9069_v59  ;;  %v7024_v22 = vmul.f32 %v9073_v58, %v9073_v58  ;;  %v9075_v13 = vld [vmem:[#allocation390_spill] sm:$0xff]  ;;  %v9077_v57 = vld [vmem:[#allocation391_spill] sm:$0xff] }
 0x280   : > { %9068 = vst [vmem:[#allocation379_spill] sm:$0xff] %v7012_v5  ;;  %9072 = vst [vmem:[#allocation381_spill] sm:$0xff] %v7020_v4  ;;  %v7028_v3 = vmul.f32 %v9075_v13, %v9075_v13  ;;  %v7032_v15 = vmul.f32 %v9077_v57, %v9077_v57  ;;  %v9079_v5 = vld [vmem:[#allocation392_spill] sm:$0xff]  ;;  %v9083_v4 = vld [vmem:[#allocation394_spill] sm:$0xff] }
 0x281   : > { %9070 = vst [vmem:[#allocation380_spill] sm:$0xff] %v7016_v23  ;;  %9074 = vst [vmem:[#allocation382_spill] sm:$0xff] %v7024_v22  ;;  %v7036_v59 = vmul.f32 %v9079_v5, %v9079_v5  ;;  %v9081_v23 = vld [vmem:[#allocation393_spill] sm:$0xff]  ;;  %v7044_v58 = vmul.f32 %v9083_v4, %v9083_v4  ;;  %v9084_v22 = vld [vmem:[#allocation395_spill] sm:$0xff] }
 0x282   : > { %9076 = vst [vmem:[#allocation383_spill] sm:$0xff] %v7028_v3  ;;  %9078 = vst [vmem:[#allocation384_spill] sm:$0xff] %v7032_v15  ;;  %v7040_v14 = vmul.f32 %v9081_v23, %v9081_v23  ;;  %v7048_v13 = vmul.f32 %v9084_v22, %v9084_v22  ;;  %v9086_v3 = vld [vmem:[#allocation396_spill] sm:$0xff]  ;;  %v9088_v15 = vld [vmem:[#allocation397_spill] sm:$0xff]  ;;  %v7068_v22 = vmul.f32 %v5594_v31, %v5594_v31 }
 0x283   : > { %9080 = vst [vmem:[#allocation385_spill] sm:$0xff] %v7036_v59  ;;  %v7052_v57 = vmul.f32 %v9086_v3, %v9086_v3  ;;  %v7056_v5 = vmul.f32 %v9088_v15, %v9088_v15  ;;  %v9090_v59 = vld [vmem:[#allocation398_spill] sm:$0xff] }
 0x284   : > { %9082 = vst [vmem:[#allocation386_spill] sm:$0xff] %v7040_v14  ;;  %9085 = vst [vmem:[#allocation388_spill] sm:$0xff] %v7048_v13  ;;  %v7060_v23 = vmul.f32 %v9090_v59, %v9090_v59  ;;  %v9092_v14 = vld [vmem:[#allocation399_spill] sm:$0xff]  ;;  %v9095_v13 = vld [vmem:[#allocation400_spill] sm:$0xff] }
 0x285   : > { %9087 = vst [vmem:[#allocation389_spill] sm:$0xff] %v7052_v57  ;;  %9089 = vst [vmem:[#allocation390_spill] sm:$0xff] %v7056_v5  ;;  %v7064_v4 = vmul.f32 %v9092_v14, %v9092_v14  ;;  %v7072_v3 = vmul.f32 %v9095_v13, %v9095_v13  ;;  %v9097_v57 = vld [vmem:[#allocation401_spill] sm:$0xff]  ;;  %v9099_v5 = vld [vmem:[#allocation402_spill] sm:$0xff] }
 0x286   : > { %9091 = vst [vmem:[#allocation391_spill] sm:$0xff] %v7060_v23  ;;  %9094 = vst [vmem:[#allocation393_spill] sm:$0xff] %v7068_v22  ;;  %v7076_v15 = vmul.f32 %v9097_v57, %v9097_v57  ;;  %v7080_v59 = vmul.f32 %v9099_v5, %v9099_v5  ;;  %v9101_v23 = vld [vmem:[#allocation403_spill] sm:$0xff]  ;;  %v9105_v22 = vld [vmem:[#allocation406_spill] sm:$0xff] }
 0x287   : > { %9093 = vst [vmem:[#allocation392_spill] sm:$0xff] %v7064_v4  ;;  %9096 = vst [vmem:[#allocation394_spill] sm:$0xff] %v7072_v3  ;;  %v7084_v14 = vmul.f32 %v9101_v23, %v9101_v23  ;;  %v9103_v4 = vld [vmem:[#allocation404_spill] sm:$0xff]  ;;  %v7092_v13 = vmul.f32 %v9105_v22, %v9105_v22  ;;  %v9107_v3 = vld [vmem:[#allocation407_spill] sm:$0xff] }
 0x288   : > { %9098 = vst [vmem:[#allocation395_spill] sm:$0xff] %v7076_v15  ;;  %9100 = vst [vmem:[#allocation396_spill] sm:$0xff] %v7080_v59  ;;  %v7088_v31 = vmul.f32 %v9103_v4, %v9103_v4  ;;  %v7096_v57 = vmul.f32 %v9107_v3, %v9107_v3  ;;  %v9109_v15 = vld [vmem:[#allocation408_spill] sm:$0xff]  ;;  %v9111_v59 = vld [vmem:[#allocation409_spill] sm:$0xff] }
 0x289   : > { %9102 = vst [vmem:[#allocation397_spill] sm:$0xff] %v7084_v14  ;;  %9106 = vst [vmem:[#allocation399_spill] sm:$0xff] %v7092_v13  ;;  %v7100_v5 = vmul.f32 %v9109_v15, %v9109_v15  ;;  %v7104_v23 = vmul.f32 %v9111_v59, %v9111_v59  ;;  %v9113_v14 = vld [vmem:[#allocation410_spill] sm:$0xff]  ;;  %v9117_v13 = vld [vmem:[#allocation412_spill] sm:$0xff] }
 0x28a   : > { %9104 = vst [vmem:[#allocation398_spill] sm:$0xff] %v7088_v31  ;;  %9108 = vst [vmem:[#allocation400_spill] sm:$0xff] %v7096_v57  ;;  %v7108_v4 = vmul.f32 %v9113_v14, %v9113_v14  ;;  %v9115_v31 = vld [vmem:[#allocation411_spill] sm:$0xff]  ;;  %v7116_v3 = vmul.f32 %v9117_v13, %v9117_v13  ;;  %v9119_v57 = vld [vmem:[#allocation413_spill] sm:$0xff] }
 0x28b   : > { %9110 = vst [vmem:[#allocation401_spill] sm:$0xff] %v7100_v5  ;;  %9112 = vst [vmem:[#allocation402_spill] sm:$0xff] %v7104_v23  ;;  %v7112_v22 = vmul.f32 %v9115_v31, %v9115_v31  ;;  %v7120_v15 = vmul.f32 %v9119_v57, %v9119_v57  ;;  %v9121_v5 = vld [vmem:[#allocation414_spill] sm:$0xff]  ;;  %v9123_v23 = vld [vmem:[#allocation415_spill] sm:$0xff] }
 0x28c   : > { %9114 = vst [vmem:[#allocation403_spill] sm:$0xff] %v7108_v4  ;;  %9118 = vst [vmem:[#allocation406_spill] sm:$0xff] %v7116_v3  ;;  %v7124_v59 = vmul.f32 %v9121_v5, %v9121_v5  ;;  %v7128_v14 = vmul.f32 %v9123_v23, %v9123_v23  ;;  %v9125_v4 = vld [vmem:[#allocation416_spill] sm:$0xff]  ;;  %v9129_v3 = vld [vmem:[#allocation418_spill] sm:$0xff] }
 0x28d   : > { %9116 = vst [vmem:[#allocation404_spill] sm:$0xff] %v7112_v22  ;;  %9120 = vst [vmem:[#allocation407_spill] sm:$0xff] %v7120_v15  ;;  %v7132_v31 = vmul.f32 %v9125_v4, %v9125_v4  ;;  %v9127_v22 = vld [vmem:[#allocation417_spill] sm:$0xff]  ;;  %v7140_v57 = vmul.f32 %v9129_v3, %v9129_v3  ;;  %v9131_v15 = vld [vmem:[#allocation419_spill] sm:$0xff] }
 0x28e   : > { %9122 = vst [vmem:[#allocation408_spill] sm:$0xff] %v7124_v59  ;;  %9124 = vst [vmem:[#allocation409_spill] sm:$0xff] %v7128_v14  ;;  %v7136_v13 = vmul.f32 %v9127_v22, %v9127_v22  ;;  %v7144_v5 = vmul.f32 %v9131_v15, %v9131_v15  ;;  %v9133_v59 = vld [vmem:[#allocation420_spill] sm:$0xff]  ;;  %v9135_v14 = vld [vmem:[#allocation421_spill] sm:$0xff] }
 0x28f   : > { %9126 = vst [vmem:[#allocation410_spill] sm:$0xff] %v7132_v31  ;;  %9130 = vst [vmem:[#allocation412_spill] sm:$0xff] %v7140_v57  ;;  %v7148_v23 = vmul.f32 %v9133_v59, %v9133_v59  ;;  %v7152_v4 = vmul.f32 %v9135_v14, %v9135_v14  ;;  %v9136_v31 = vld [vmem:[#allocation422_spill] sm:$0xff]  ;;  %v9140_v57 = vld [vmem:[#allocation424_spill] sm:$0xff] }
 0x290   : > { %9128 = vst [vmem:[#allocation411_spill] sm:$0xff] %v7136_v13  ;;  %9132 = vst [vmem:[#allocation413_spill] sm:$0xff] %v7144_v5  ;;  %v7156_v22 = vmul.f32 %v9136_v31, %v9136_v31  ;;  %v9138_v13 = vld [vmem:[#allocation423_spill] sm:$0xff]  ;;  %v7164_v15 = vmul.f32 %v9140_v57, %v9140_v57  ;;  %v9142_v5 = vld [vmem:[#allocation425_spill] sm:$0xff]  ;;  %v7176_v31 = vmul.f32 %v5738_v61, %v5738_v61 }
 0x291   : > { %9134 = vst [vmem:[#allocation414_spill] sm:$0xff] %v7148_v23  ;;  %v7160_v3 = vmul.f32 %v9138_v13, %v9138_v13  ;;  %v7168_v59 = vmul.f32 %v9142_v5, %v9142_v5  ;;  %v9144_v23 = vld [vmem:[#allocation426_spill] sm:$0xff] }
 0x292   : > { %9137 = vst [vmem:[#allocation415_spill] sm:$0xff] %v7156_v22  ;;  %9141 = vst [vmem:[#allocation417_spill] sm:$0xff] %v7164_v15  ;;  %v7172_v14 = vmul.f32 %v9144_v23, %v9144_v23  ;;  %v9147_v22 = vld [vmem:[#allocation427_spill] sm:$0xff]  ;;  %v9151_v15 = vld [vmem:[#allocation429_spill] sm:$0xff] }
 0x293   : > { %9139 = vst [vmem:[#allocation416_spill] sm:$0xff] %v7160_v3  ;;  %9143 = vst [vmem:[#allocation418_spill] sm:$0xff] %v7168_v59  ;;  %v7180_v13 = vmul.f32 %v9147_v22, %v9147_v22  ;;  %v9149_v3 = vld [vmem:[#allocation428_spill] sm:$0xff]  ;;  %v7188_v5 = vmul.f32 %v9151_v15, %v9151_v15  ;;  %v9153_v59 = vld [vmem:[#allocation430_spill] sm:$0xff] }
 0x294   : > { %9145 = vst [vmem:[#allocation419_spill] sm:$0xff] %v7172_v14  ;;  %9146 = vst [vmem:[#allocation420_spill] sm:$0xff] %v7176_v31  ;;  %v7184_v57 = vmul.f32 %v9149_v3, %v9149_v3  ;;  %v7192_v23 = vmul.f32 %v9153_v59, %v9153_v59  ;;  %v9155_v14 = vld [vmem:[#allocation431_spill] sm:$0xff]  ;;  %v9157_v31 = vld [vmem:[#allocation433_spill] sm:$0xff] }
 0x295   : > { %9148 = vst [vmem:[#allocation421_spill] sm:$0xff] %v7180_v13  ;;  %9152 = vst [vmem:[#allocation423_spill] sm:$0xff] %v7188_v5  ;;  %v7196_v61 = vmul.f32 %v9155_v14, %v9155_v14  ;;  %v7200_v22 = vmul.f32 %v9157_v31, %v9157_v31  ;;  %v9159_v13 = vld [vmem:[#allocation434_spill] sm:$0xff]  ;;  %v9163_v5 = vld [vmem:[#allocation436_spill] sm:$0xff] }
 0x296   : > { %9150 = vst [vmem:[#allocation422_spill] sm:$0xff] %v7184_v57  ;;  %9154 = vst [vmem:[#allocation424_spill] sm:$0xff] %v7192_v23  ;;  %v7204_v3 = vmul.f32 %v9159_v13, %v9159_v13  ;;  %v9161_v57 = vld [vmem:[#allocation435_spill] sm:$0xff]  ;;  %v7212_v59 = vmul.f32 %v9163_v5, %v9163_v5  ;;  %v9165_v23 = vld [vmem:[#allocation437_spill] sm:$0xff] }
 0x297   : > { %9156 = vst [vmem:[#allocation425_spill] sm:$0xff] %v7196_v61  ;;  %9158 = vst [vmem:[#allocation426_spill] sm:$0xff] %v7200_v22  ;;  %v7208_v15 = vmul.f32 %v9161_v57, %v9161_v57  ;;  %v7216_v14 = vmul.f32 %v9165_v23, %v9165_v23  ;;  %v9167_v61 = vld [vmem:[#allocation438_spill] sm:$0xff]  ;;  %v9169_v22 = vld [vmem:[#allocation439_spill] sm:$0xff] }
 0x298   : > { %9160 = vst [vmem:[#allocation427_spill] sm:$0xff] %v7204_v3  ;;  %9164 = vst [vmem:[#allocation429_spill] sm:$0xff] %v7212_v59  ;;  %v7220_v31 = vmul.f32 %v9167_v61, %v9167_v61  ;;  %v7224_v13 = vmul.f32 %v9169_v22, %v9169_v22  ;;  %v9171_v3 = vld [vmem:[#allocation440_spill] sm:$0xff]  ;;  %v9175_v59 = vld [vmem:[#allocation442_spill] sm:$0xff] }
 0x299   : > { %9162 = vst [vmem:[#allocation428_spill] sm:$0xff] %v7208_v15  ;;  %9166 = vst [vmem:[#allocation430_spill] sm:$0xff] %v7216_v14  ;;  %v7228_v57 = vmul.f32 %v9171_v3, %v9171_v3  ;;  %v9173_v15 = vld [vmem:[#allocation441_spill] sm:$0xff]  ;;  %v7236_v23 = vmul.f32 %v9175_v59, %v9175_v59  ;;  %v9177_v14 = vld [vmem:[#allocation443_spill] sm:$0xff] }
 0x29a   : > { %9168 = vst [vmem:[#allocation431_spill] sm:$0xff] %v7220_v31  ;;  %9170 = vst [vmem:[#allocation433_spill] sm:$0xff] %v7224_v13  ;;  %v7232_v5 = vmul.f32 %v9173_v15, %v9173_v15  ;;  %v7240_v61 = vmul.f32 %v9177_v14, %v9177_v14  ;;  %v9179_v31 = vld [vmem:[#allocation444_spill] sm:$0xff]  ;;  %v9181_v13 = vld [vmem:[#allocation445_spill] sm:$0xff] }
 0x29b   : > { %9172 = vst [vmem:[#allocation434_spill] sm:$0xff] %v7228_v57  ;;  %9176 = vst [vmem:[#allocation436_spill] sm:$0xff] %v7236_v23  ;;  %v7244_v22 = vmul.f32 %v9179_v31, %v9179_v31  ;;  %v7248_v3 = vmul.f32 %v9181_v13, %v9181_v13  ;;  %v9183_v57 = vld [vmem:[#allocation446_spill] sm:$0xff]  ;;  %v9187_v23 = vld [vmem:[#allocation448_spill] sm:$0xff] }
 0x29c   : > { %9174 = vst [vmem:[#allocation435_spill] sm:$0xff] %v7232_v5  ;;  %9178 = vst [vmem:[#allocation437_spill] sm:$0xff] %v7240_v61  ;;  %v7252_v15 = vmul.f32 %v9183_v57, %v9183_v57  ;;  %v9185_v5 = vld [vmem:[#allocation447_spill] sm:$0xff]  ;;  %v7260_v14 = vmul.f32 %v9187_v23, %v9187_v23  ;;  %v9189_v61 = vld [vmem:[#allocation449_spill] sm:$0xff] }
 0x29d   : > { %9180 = vst [vmem:[#allocation438_spill] sm:$0xff] %v7244_v22  ;;  %9182 = vst [vmem:[#allocation439_spill] sm:$0xff] %v7248_v3  ;;  %v7256_v59 = vmul.f32 %v9185_v5, %v9185_v5  ;;  %v7264_v31 = vmul.f32 %v9189_v61, %v9189_v61  ;;  %v9191_v22 = vld [vmem:[#allocation450_spill] sm:$0xff]  ;;  %v9193_v3 = vld [vmem:[#allocation451_spill] sm:$0xff] }
 0x29e   : > { %9184 = vst [vmem:[#allocation440_spill] sm:$0xff] %v7252_v15  ;;  %9188 = vst [vmem:[#allocation442_spill] sm:$0xff] %v7260_v14  ;;  %v7268_v13 = vmul.f32 %v9191_v22, %v9191_v22  ;;  %v7272_v57 = vmul.f32 %v9193_v3, %v9193_v3  ;;  %v9195_v15 = vld [vmem:[#allocation452_spill] sm:$0xff]  ;;  %v9199_v14 = vld [vmem:[#allocation454_spill] sm:$0xff] }
 0x29f   : > { %9186 = vst [vmem:[#allocation441_spill] sm:$0xff] %v7256_v59  ;;  %9190 = vst [vmem:[#allocation443_spill] sm:$0xff] %v7264_v31  ;;  %v7276_v5 = vmul.f32 %v9195_v15, %v9195_v15  ;;  %v9197_v59 = vld [vmem:[#allocation453_spill] sm:$0xff]  ;;  %v7284_v61 = vmul.f32 %v9199_v14, %v9199_v14  ;;  %v9201_v31 = vld [vmem:[#allocation455_spill] sm:$0xff] }
 0x2a0   : > { %9192 = vst [vmem:[#allocation444_spill] sm:$0xff] %v7268_v13  ;;  %9194 = vst [vmem:[#allocation445_spill] sm:$0xff] %v7272_v57  ;;  %v7280_v23 = vmul.f32 %v9197_v59, %v9197_v59  ;;  %v7288_v22 = vmul.f32 %v9201_v31, %v9201_v31  ;;  %v9203_v13 = vld [vmem:[#allocation456_spill] sm:$0xff]  ;;  %v9205_v57 = vld [vmem:[#allocation457_spill] sm:$0xff] }
 0x2a1   : > { %9196 = vst [vmem:[#allocation446_spill] sm:$0xff] %v7276_v5  ;;  %9200 = vst [vmem:[#allocation448_spill] sm:$0xff] %v7284_v61  ;;  %v7292_v3 = vmul.f32 %v9203_v13, %v9203_v13  ;;  %v7296_v15 = vmul.f32 %v9205_v57, %v9205_v57  ;;  %v9207_v5 = vld [vmem:[#allocation458_spill] sm:$0xff]  ;;  %v9211_v61 = vld [vmem:[#allocation461_spill] sm:$0xff] }
 0x2a2   : > { %9198 = vst [vmem:[#allocation447_spill] sm:$0xff] %v7280_v23  ;;  %9202 = vst [vmem:[#allocation449_spill] sm:$0xff] %v7288_v22  ;;  %v7300_v59 = vmul.f32 %v9207_v5, %v9207_v5  ;;  %v9209_v23 = vld [vmem:[#allocation459_spill] sm:$0xff]  ;;  %v7308_v31 = vmul.f32 %v9211_v61, %v9211_v61  ;;  %v9213_v22 = vld [vmem:[#allocation462_spill] sm:$0xff] }
 0x2a3   : > { %9204 = vst [vmem:[#allocation450_spill] sm:$0xff] %v7292_v3  ;;  %9206 = vst [vmem:[#allocation451_spill] sm:$0xff] %v7296_v15  ;;  %v7304_v14 = vmul.f32 %v9209_v23, %v9209_v23  ;;  %v7312_v13 = vmul.f32 %v9213_v22, %v9213_v22  ;;  %v9215_v3 = vld [vmem:[#allocation463_spill] sm:$0xff]  ;;  %v9217_v15 = vld [vmem:[#allocation464_spill] sm:$0xff] }
 0x2a4   : > { %9208 = vst [vmem:[#allocation452_spill] sm:$0xff] %v7300_v59  ;;  %9212 = vst [vmem:[#allocation454_spill] sm:$0xff] %v7308_v31  ;;  %v7316_v57 = vmul.f32 %v9215_v3, %v9215_v3  ;;  %v7320_v5 = vmul.f32 %v9217_v15, %v9217_v15  ;;  %v9219_v59 = vld [vmem:[#allocation465_spill] sm:$0xff]  ;;  %v9223_v31 = vld [vmem:[#allocation467_spill] sm:$0xff] }
 0x2a5   : > { %9210 = vst [vmem:[#allocation453_spill] sm:$0xff] %v7304_v14  ;;  %9214 = vst [vmem:[#allocation455_spill] sm:$0xff] %v7312_v13  ;;  %v7324_v23 = vmul.f32 %v9219_v59, %v9219_v59  ;;  %v9221_v14 = vld [vmem:[#allocation466_spill] sm:$0xff]  ;;  %v7332_v22 = vmul.f32 %v9223_v31, %v9223_v31  ;;  %v9225_v13 = vld [vmem:[#allocation468_spill] sm:$0xff] }
 0x2a6   : > { %9216 = vst [vmem:[#allocation456_spill] sm:$0xff] %v7316_v57  ;;  %9218 = vst [vmem:[#allocation457_spill] sm:$0xff] %v7320_v5  ;;  %v7328_v61 = vmul.f32 %v9221_v14, %v9221_v14  ;;  %v7336_v3 = vmul.f32 %v9225_v13, %v9225_v13  ;;  %v9227_v57 = vld [vmem:[#allocation469_spill] sm:$0xff]  ;;  %v9229_v5 = vld [vmem:[#allocation470_spill] sm:$0xff] }
 0x2a7   : > { %9220 = vst [vmem:[#allocation458_spill] sm:$0xff] %v7324_v23  ;;  %9224 = vst [vmem:[#allocation461_spill] sm:$0xff] %v7332_v22  ;;  %v7340_v15 = vmul.f32 %v9227_v57, %v9227_v57  ;;  %v7344_v59 = vmul.f32 %v9229_v5, %v9229_v5  ;;  %v9231_v23 = vld [vmem:[#allocation471_spill] sm:$0xff]  ;;  %v9235_v22 = vld [vmem:[#allocation473_spill] sm:$0xff] }
 0x2a8   : > { %9222 = vst [vmem:[#allocation459_spill] sm:$0xff] %v7328_v61  ;;  %9226 = vst [vmem:[#allocation462_spill] sm:$0xff] %v7336_v3  ;;  %v7348_v14 = vmul.f32 %v9231_v23, %v9231_v23  ;;  %v9233_v61 = vld [vmem:[#allocation472_spill] sm:$0xff]  ;;  %v7356_v13 = vmul.f32 %v9235_v22, %v9235_v22  ;;  %v9237_v3 = vld [vmem:[#allocation474_spill] sm:$0xff]  ;;  %v7368_v23 = vmul.f32 %v5994_v43, %v5994_v43 }
 0x2a9   : > { %9228 = vst [vmem:[#allocation463_spill] sm:$0xff] %v7340_v15  ;;  %9230 = vst [vmem:[#allocation464_spill] sm:$0xff] %v7344_v59  ;;  %v7352_v31 = vmul.f32 %v9233_v61, %v9233_v61  ;;  %v7360_v57 = vmul.f32 %v9237_v3, %v9237_v3  ;;  %v9239_v15 = vld [vmem:[#allocation475_spill] sm:$0xff]  ;;  %v7372_v61 = vmul.f32 %v5996_v32, %v5996_v32  ;;  %v9286_v59 = vld [vmem:[#allocation62_spill] sm:$0xff] }
 0x2aa   : > { %9232 = vst [vmem:[#allocation465_spill] sm:$0xff] %v7348_v14  ;;  %9236 = vst [vmem:[#allocation467_spill] sm:$0xff] %v7356_v13  ;;  %v7364_v5 = vmul.f32 %v9239_v15, %v9239_v15  ;;  %v7376_v22 = vmul.f32 %v5998_v52, %v5998_v52  ;;  %v7380_v3 = vmul.f32 %v6008_v19, %v6008_v19 }
 0x2ab   : > { %9234 = vst [vmem:[#allocation466_spill] sm:$0xff] %v7352_v31  ;;  %9238 = vst [vmem:[#allocation468_spill] sm:$0xff] %v7360_v57  ;;  %v7384_v15 = vmul.f32 %v6010_v63, %v6010_v63  ;;  %v7392_v32 = vmul.f32 %v6021_v9, %v6021_v9  ;;  %v7396_v52 = vmul.f32 %v6023_v56, %v6023_v56  ;;  %v9280_v57 = vld [vmem:[#allocation44_spill] sm:$0xff]  ;;  %v9283_v31 = vld [vmem:[#allocation53_spill] sm:$0xff] }
 0x2ac   : > { %9240 = vst [vmem:[#allocation469_spill] sm:$0xff] %v7364_v5  ;;  %9241 = vst [vmem:[#allocation470_spill] sm:$0xff] %v7368_v23  ;;  %v9246_v5 = vld [vmem:[#allocation476_spill] sm:$0xff]  ;;  %v7400_v19 = vmul.f32 %v6025_v51, %v6025_v51  ;;  %v7404_v63 = vmul.f32 %v6034_v62, %v6034_v62  ;;  %v7412_v9 = vmul.f32 %v6038_v47, %v6038_v47 }
 0x2ad   : > { %9242 = vst [vmem:[#allocation471_spill] sm:$0xff] %v7372_v61  ;;  %9243 = vst [vmem:[#allocation472_spill] sm:$0xff] %v7376_v22  ;;  %v7388_v43 = vmul.f32 %v9246_v5, %v9246_v5  ;;  %v7408_v5 = vmul.f32 %v6036_v21, %v6036_v21  ;;  %v7416_v56 = vmul.f32 %v6047_v45, %v6047_v45  ;;  %v9275_v22 = vld [vmem:[#allocation19_spill] sm:$0xff] }
 0x2ae   : > { %9244 = vst [vmem:[#allocation473_spill] sm:$0xff] %v7380_v3  ;;  %9245 = vst [vmem:[#allocation474_spill] sm:$0xff] %v7384_v15  ;;  %v7420_v51 = vmul.f32 %v6049_v38, %v6049_v38  ;;  %v7424_v62 = vmul.f32 %v6051_v6, %v6051_v6  ;;  %v7428_v21 = vmul.f32 %v6058_v29, %v6058_v29  ;;  %v9265_v29 = vld [vmem:[#allocation14_spill] sm:$0xff]  ;;  %v9277_v61 = vld [vmem:[#allocation35_spill] sm:$0xff] }
 0x2af   : > { %9247 = vst [vmem:[#allocation475_spill] sm:$0xff] %v7388_v43  ;;  %9248 = vst [vmem:[#allocation476_spill] sm:$0xff] %v7392_v32  ;;  %v7432_v47 = vmul.f32 %v6060_v12, %v6060_v12  ;;  %v7436_v45 = vmul.f32 %v6062_v49, %v6062_v49  ;;  %v7440_v38 = vmul.f32 %v6068_v33, %v6068_v33  ;;  %v9268_v12 = vld [vmem:[#allocation23_spill] sm:$0xff]  ;;  %v9270_v32 = vld [vmem:[#allocation24_spill] sm:$0xff] }
 0x2b0   : > { %9249 = vst [vmem:[#allocation477_spill] sm:$0xff] %v7396_v52  ;;  %9250 = vst [vmem:[#allocation478_spill] sm:$0xff] %v7400_v19  ;;  %v9267_v19 = vld [vmem:[#allocation15_spill] sm:$0xff]  ;;  %v9269_v52 = vld [vmem:[#allocation16_spill] sm:$0xff] }
 0x2b1   : > { %9251 = vst [vmem:[#allocation479_spill] sm:$0xff] %v7404_v63  ;;  %9252 = vst [vmem:[#allocation480_spill] sm:$0xff] %v7408_v5  ;;  %v2547_v49 = vadd.f32 %v9270_v32, %v9269_v52  ;;  %v9272_v43 = vld [vmem:[#allocation26_spill] sm:$0xff] }
 0x2b2   : > { %9253 = vst [vmem:[#allocation481_spill] sm:$0xff] %v7412_v9  ;;  %9254 = vst [vmem:[#allocation482_spill] sm:$0xff] %v7416_v56  ;;  %v9262_v56 = vld [vmem:[#allocation20_spill] sm:$0xff]  ;;  %v9264_v9 = vld [vmem:[#allocation21_spill] sm:$0xff] }
 0x2b3   : > { %9255 = vst [vmem:[#allocation483_spill] sm:$0xff] %v7420_v51  ;;  %9256 = vst [vmem:[#allocation484_spill] sm:$0xff] %v7424_v62  ;;  %v9261_v51 = vld [vmem:[#allocation12_spill] sm:$0xff]  ;;  %v9263_v62 = vld [vmem:[#allocation13_spill] sm:$0xff] }
 0x2b4   : > { %9257 = vst [vmem:[#allocation485_spill] sm:$0xff] %v7428_v21  ;;  %9258 = vst [vmem:[#allocation486_spill] sm:$0xff] %v7432_v47  ;;  %v2295_v6 = vadd.f32 %v9262_v56, %v9261_v51  ;;  %v2358_v5 = vadd.f32 %v9264_v9, %v9263_v62  ;;  %v9266_v21 = vld [vmem:[#allocation22_spill] sm:$0xff]  ;;  %v2484_v47 = vadd.f32 %v9268_v12, %v9267_v19  ;;  %v9276_v56 = vld [vmem:[#allocation32_spill] sm:$0xff] }
 0x2b5   : > { %9259 = vst [vmem:[#allocation487_spill] sm:$0xff] %v7436_v45  ;;  %9260 = vst [vmem:[#allocation488_spill] sm:$0xff] %v7440_v38  ;;  %v2421_v63 = vadd.f32 %v9266_v21, %v9265_v29  ;;  %v9271_v45 = vld [vmem:[#allocation17_spill] sm:$0xff]  ;;  %v9273_v33 = vld [vmem:[#allocation18_spill] sm:$0xff]  ;;  %v2736_v51 = vadd.f32 %v9276_v56, %v9275_v22 }
 0x2b6   : > { %v2610_v15 = vadd.f32 %v9272_v43, %v9271_v45  ;;  %v9274_v38 = vld [vmem:[#allocation29_spill] sm:$0xff]  ;;  %v2296_v9 = vadd.f32 %v2295_v6, %v9277_v61  ;;  %v9278_v62 = vld [vmem:[#allocation38_spill] sm:$0xff]  ;;  %v2485_v19 = vadd.f32 %v2484_v47, %v9280_v57  ;;  %v9281_v12 = vld [vmem:[#allocation47_spill] sm:$0xff] }
 0x2b7   : > { %v2673_v3 = vadd.f32 %v9274_v38, %v9273_v33  ;;  %v2359_v23 = vadd.f32 %v2358_v5, %v9278_v62  ;;  %v9279_v21 = vld [vmem:[#allocation41_spill] sm:$0xff]  ;;  %v2548_v13 = vadd.f32 %v2547_v49, %v9281_v12  ;;  %v9282_v32 = vld [vmem:[#allocation50_spill] sm:$0xff]  ;;  %v9284_v45 = vld [vmem:[#allocation56_spill] sm:$0xff] }
 0x2b8   : > { %v2422_v29 = vadd.f32 %v2421_v63, %v9279_v21  ;;  %v2611_v52 = vadd.f32 %v2610_v15, %v9282_v32  ;;  %v2737_v14 = vadd.f32 %v2736_v51, %v9284_v45  ;;  %v9285_v38 = vld [vmem:[#allocation59_spill] sm:$0xff]  ;;  %v9287_v56 = vld [vmem:[#allocation65_spill] sm:$0xff]  ;;  %v9288_v6 = vld [vmem:[#allocation68_spill] sm:$0xff] }
 0x2b9   : > { %v2674_v43 = vadd.f32 %v2673_v3, %v9283_v31  ;;  %v2297_v33 = vadd.f32 %v2296_v9, %v9285_v38  ;;  %v2360_v22 = vadd.f32 %v2359_v23, %v9286_v59  ;;  %v2486_v5 = vadd.f32 %v2485_v19, %v9288_v6  ;;  %v9289_v62 = vld [vmem:[#allocation71_spill] sm:$0xff]  ;;  %v9290_v21 = vld [vmem:[#allocation74_spill] sm:$0xff]  ;;  %v9291_v47 = vld [vmem:[#allocation77_spill] sm:$0xff] }
 0x2ba   : > { %v2423_v61 = vadd.f32 %v2422_v29, %v9287_v56  ;;  %v2549_v63 = vadd.f32 %v2548_v13, %v9289_v62  ;;  %v2612_v57 = vadd.f32 %v2611_v52, %v9290_v21  ;;  %v9292_v12 = vld [vmem:[#allocation80_spill] sm:$0xff]  ;;  %v9293_v32 = vld [vmem:[#allocation83_spill] sm:$0xff]  ;;  %v9294_v3 = vld [vmem:[#allocation86_spill] sm:$0xff] }
 0x2bb   : > { %v2675_v49 = vadd.f32 %v2674_v43, %v9291_v47  ;;  %v2738_v15 = vadd.f32 %v2737_v14, %v9292_v12  ;;  %v2298_v31 = vadd.f32 %v2297_v33, %v9293_v32  ;;  %v2361_v51 = vadd.f32 %v2360_v22, %v9294_v3  ;;  %v9295_v45 = vld [vmem:[#allocation89_spill] sm:$0xff]  ;;  %v9296_v38 = vld [vmem:[#allocation92_spill] sm:$0xff]  ;;  %v9297_v23 = vld [vmem:[#allocation95_spill] sm:$0xff] }
 0x2bc   : > { %v2424_v9 = vadd.f32 %v2423_v61, %v9295_v45  ;;  %v2487_v59 = vadd.f32 %v2486_v5, %v9296_v38  ;;  %v2550_v29 = vadd.f32 %v2549_v63, %v9297_v23  ;;  %v9298_v56 = vld [vmem:[#allocation98_spill] sm:$0xff]  ;;  %v9299_v6 = vld [vmem:[#allocation101_spill] sm:$0xff]  ;;  %v9300_v62 = vld [vmem:[#allocation104_spill] sm:$0xff] }
 0x2bd   : > { %v2613_v19 = vadd.f32 %v2612_v57, %v9298_v56  ;;  %v2676_v13 = vadd.f32 %v2675_v49, %v9299_v6  ;;  %v2739_v52 = vadd.f32 %v2738_v15, %v9300_v62  ;;  %v9301_v21 = vld [vmem:[#allocation107_spill] sm:$0xff]  ;;  %v9302_v47 = vld [vmem:[#allocation110_spill] sm:$0xff]  ;;  %v9303_v12 = vld [vmem:[#allocation113_spill] sm:$0xff] }
 0x2be   : > { %v2299_v43 = vadd.f32 %v2298_v31, %v9301_v21  ;;  %v2362_v14 = vadd.f32 %v2361_v51, %v9302_v47  ;;  %v2425_v33 = vadd.f32 %v2424_v9, %v9303_v12  ;;  %v9304_v32 = vld [vmem:[#allocation116_spill] sm:$0xff]  ;;  %v9306_v45 = vld [vmem:[#allocation25_spill] sm:$0xff]  ;;  %v9307_v38 = vld [vmem:[#allocation126_spill] sm:$0xff] }
 0x2bf   : > { %v2488_v22 = vadd.f32 %v2487_v59, %v9304_v32  ;;  %v9305_v3 = vld [vmem:[#allocation120_spill] sm:$0xff]  ;;  %v2614_v5 = vadd.f32 %v2613_v19, %v9306_v45  ;;  %v2677_v63 = vadd.f32 %v2676_v13, %v9307_v38  ;;  %v9308_v23 = vld [vmem:[#allocation27_spill] sm:$0xff]  ;;  %v9311_v62 = vld [vmem:[#allocation30_spill] sm:$0xff] }
 0x2c0   : > { %v2551_v61 = vadd.f32 %v2550_v29, %v9305_v3  ;;  %v2740_v57 = vadd.f32 %v2739_v52, %v9308_v23  ;;  %v9309_v56 = vld [vmem:[#allocation28_spill] sm:$0xff]  ;;  %v9310_v6 = vld [vmem:[#allocation135_spill] sm:$0xff]  ;;  %v2426_v31 = vadd.f32 %v2425_v33, %v9311_v62  ;;  %v9314_v12 = vld [vmem:[#allocation33_spill] sm:$0xff] }
 0x2c1   : > { %v2300_v49 = vadd.f32 %v2299_v43, %v9309_v56  ;;  %v2363_v15 = vadd.f32 %v2362_v14, %v9310_v6  ;;  %v9312_v21 = vld [vmem:[#allocation31_spill] sm:$0xff]  ;;  %v9313_v47 = vld [vmem:[#allocation144_spill] sm:$0xff]  ;;  %v2615_v59 = vadd.f32 %v2614_v5, %v9314_v12  ;;  %v9315_v32 = vld [vmem:[#allocation34_spill] sm:$0xff] }
 0x2c2   : > { %v2489_v51 = vadd.f32 %v2488_v22, %v9312_v21  ;;  %v2552_v9 = vadd.f32 %v2551_v61, %v9313_v47  ;;  %v2678_v29 = vadd.f32 %v2677_v63, %v9315_v32  ;;  %v9316_v3 = vld [vmem:[#allocation153_spill] sm:$0xff]  ;;  %v9317_v45 = vld [vmem:[#allocation36_spill] sm:$0xff]  ;;  %v9319_v23 = vld [vmem:[#allocation162_spill] sm:$0xff] }
 0x2c3   : > { %v2741_v19 = vadd.f32 %v2740_v57, %v9316_v3  ;;  %v2301_v13 = vadd.f32 %v2300_v49, %v9317_v45  ;;  %v9318_v38 = vld [vmem:[#allocation37_spill] sm:$0xff]  ;;  %v2427_v43 = vadd.f32 %v2426_v31, %v9319_v23  ;;  %v9320_v56 = vld [vmem:[#allocation39_spill] sm:$0xff]  ;;  %v9321_v6 = vld [vmem:[#allocation40_spill] sm:$0xff] }
 0x2c4   : > { %v2364_v52 = vadd.f32 %v2363_v15, %v9318_v38  ;;  %v2490_v14 = vadd.f32 %v2489_v51, %v9320_v56  ;;  %v2553_v33 = vadd.f32 %v2552_v9, %v9321_v6  ;;  %v9322_v62 = vld [vmem:[#allocation171_spill] sm:$0xff]  ;;  %v9323_v21 = vld [vmem:[#allocation42_spill] sm:$0xff]  ;;  %v9325_v12 = vld [vmem:[#allocation180_spill] sm:$0xff] }
 0x2c5   : > { %v2616_v22 = vadd.f32 %v2615_v59, %v9322_v62  ;;  %v2679_v61 = vadd.f32 %v2678_v29, %v9323_v21  ;;  %v9324_v47 = vld [vmem:[#allocation43_spill] sm:$0xff]  ;;  %v2302_v63 = vadd.f32 %v2301_v13, %v9325_v12  ;;  %v9326_v32 = vld [vmem:[#allocation45_spill] sm:$0xff]  ;;  %v9327_v3 = vld [vmem:[#allocation46_spill] sm:$0xff] }
 0x2c6   : > { %v2742_v5 = vadd.f32 %v2741_v19, %v9324_v47  ;;  %v2365_v57 = vadd.f32 %v2364_v52, %v9326_v32  ;;  %v2428_v49 = vadd.f32 %v2427_v43, %v9327_v3  ;;  %v9328_v45 = vld [vmem:[#allocation189_spill] sm:$0xff]  ;;  %v9329_v38 = vld [vmem:[#allocation48_spill] sm:$0xff]  ;;  %v9331_v56 = vld [vmem:[#allocation198_spill] sm:$0xff] }
 0x2c7   : > { %v2491_v15 = vadd.f32 %v2490_v14, %v9328_v45  ;;  %v2554_v31 = vadd.f32 %v2553_v33, %v9329_v38  ;;  %v9330_v23 = vld [vmem:[#allocation49_spill] sm:$0xff]  ;;  %v2680_v9 = vadd.f32 %v2679_v61, %v9331_v56  ;;  %v9332_v6 = vld [vmem:[#allocation51_spill] sm:$0xff]  ;;  %v9333_v62 = vld [vmem:[#allocation52_spill] sm:$0xff] }
 0x2c8   : > { %v2617_v51 = vadd.f32 %v2616_v22, %v9330_v23  ;;  %v2743_v59 = vadd.f32 %v2742_v5, %v9332_v6  ;;  %v2303_v29 = vadd.f32 %v2302_v63, %v9333_v62  ;;  %v9334_v21 = vld [vmem:[#allocation207_spill] sm:$0xff]  ;;  %v9335_v47 = vld [vmem:[#allocation54_spill] sm:$0xff]  ;;  %v9337_v32 = vld [vmem:[#allocation216_spill] sm:$0xff] }
 0x2c9   : > { %v2366_v19 = vadd.f32 %v2365_v57, %v9334_v21  ;;  %v2429_v13 = vadd.f32 %v2428_v49, %v9335_v47  ;;  %v9336_v12 = vld [vmem:[#allocation55_spill] sm:$0xff]  ;;  %v2555_v43 = vadd.f32 %v2554_v31, %v9337_v32  ;;  %v9338_v3 = vld [vmem:[#allocation57_spill] sm:$0xff]  ;;  %v9339_v45 = vld [vmem:[#allocation58_spill] sm:$0xff] }
 0x2ca   : > { %v2492_v52 = vadd.f32 %v2491_v15, %v9336_v12  ;;  %v2618_v14 = vadd.f32 %v2617_v51, %v9338_v3  ;;  %v2681_v33 = vadd.f32 %v2680_v9, %v9339_v45  ;;  %v9340_v38 = vld [vmem:[#allocation225_spill] sm:$0xff]  ;;  %v9341_v23 = vld [vmem:[#allocation60_spill] sm:$0xff]  ;;  %v9343_v6 = vld [vmem:[#allocation234_spill] sm:$0xff] }
 0x2cb   : > { %v2744_v22 = vadd.f32 %v2743_v59, %v9340_v38  ;;  %v2304_v61 = vadd.f32 %v2303_v29, %v9341_v23  ;;  %v9342_v56 = vld [vmem:[#allocation61_spill] sm:$0xff]  ;;  %v2430_v63 = vadd.f32 %v2429_v13, %v9343_v6  ;;  %v9344_v62 = vld [vmem:[#allocation63_spill] sm:$0xff]  ;;  %v9345_v21 = vld [vmem:[#allocation64_spill] sm:$0xff] }
 0x2cc   : > { %v2367_v5 = vadd.f32 %v2366_v19, %v9342_v56  ;;  %v2493_v57 = vadd.f32 %v2492_v52, %v9344_v62  ;;  %v2556_v49 = vadd.f32 %v2555_v43, %v9345_v21  ;;  %v9346_v47 = vld [vmem:[#allocation243_spill] sm:$0xff]  ;;  %v9347_v12 = vld [vmem:[#allocation66_spill] sm:$0xff]  ;;  %v9349_v3 = vld [vmem:[#allocation252_spill] sm:$0xff] }
 0x2cd   : > { %v2619_v15 = vadd.f32 %v2618_v14, %v9346_v47  ;;  %v2682_v31 = vadd.f32 %v2681_v33, %v9347_v12  ;;  %v9348_v32 = vld [vmem:[#allocation67_spill] sm:$0xff]  ;;  %v2305_v9 = vadd.f32 %v2304_v61, %v9349_v3  ;;  %v9350_v45 = vld [vmem:[#allocation69_spill] sm:$0xff]  ;;  %v9351_v38 = vld [vmem:[#allocation70_spill] sm:$0xff] }
 0x2ce   : > { %v2745_v51 = vadd.f32 %v2744_v22, %v9348_v32  ;;  %v2368_v59 = vadd.f32 %v2367_v5, %v9350_v45  ;;  %v2431_v29 = vadd.f32 %v2430_v63, %v9351_v38  ;;  %v9352_v23 = vld [vmem:[#allocation261_spill] sm:$0xff]  ;;  %v9353_v56 = vld [vmem:[#allocation72_spill] sm:$0xff]  ;;  %v9355_v62 = vld [vmem:[#allocation270_spill] sm:$0xff] }
 0x2cf   : > { %v2494_v19 = vadd.f32 %v2493_v57, %v9352_v23  ;;  %v2557_v13 = vadd.f32 %v2556_v49, %v9353_v56  ;;  %v9354_v6 = vld [vmem:[#allocation73_spill] sm:$0xff]  ;;  %v2683_v43 = vadd.f32 %v2682_v31, %v9355_v62  ;;  %v9356_v21 = vld [vmem:[#allocation75_spill] sm:$0xff]  ;;  %v9357_v47 = vld [vmem:[#allocation76_spill] sm:$0xff] }
 0x2d0   : > { %v2620_v52 = vadd.f32 %v2619_v15, %v9354_v6  ;;  %v2746_v14 = vadd.f32 %v2745_v51, %v9356_v21  ;;  %v2306_v33 = vadd.f32 %v2305_v9, %v9357_v47  ;;  %v9358_v12 = vld [vmem:[#allocation279_spill] sm:$0xff]  ;;  %v9359_v32 = vld [vmem:[#allocation78_spill] sm:$0xff]  ;;  %v9361_v45 = vld [vmem:[#allocation288_spill] sm:$0xff] }
 0x2d1   : > { %v2369_v22 = vadd.f32 %v2368_v59, %v9358_v12  ;;  %v2432_v61 = vadd.f32 %v2431_v29, %v9359_v32  ;;  %v9360_v3 = vld [vmem:[#allocation79_spill] sm:$0xff]  ;;  %v2558_v63 = vadd.f32 %v2557_v13, %v9361_v45  ;;  %v9362_v38 = vld [vmem:[#allocation81_spill] sm:$0xff]  ;;  %v9363_v23 = vld [vmem:[#allocation82_spill] sm:$0xff] }
 0x2d2   : > { %v2495_v5 = vadd.f32 %v2494_v19, %v9360_v3  ;;  %v2621_v57 = vadd.f32 %v2620_v52, %v9362_v38  ;;  %v2684_v49 = vadd.f32 %v2683_v43, %v9363_v23  ;;  %v9364_v56 = vld [vmem:[#allocation297_spill] sm:$0xff]  ;;  %v9365_v6 = vld [vmem:[#allocation84_spill] sm:$0xff]  ;;  %v9367_v21 = vld [vmem:[#allocation306_spill] sm:$0xff] }
 0x2d3   : > { %v2747_v15 = vadd.f32 %v2746_v14, %v9364_v56  ;;  %v2307_v31 = vadd.f32 %v2306_v33, %v9365_v6  ;;  %v9366_v62 = vld [vmem:[#allocation85_spill] sm:$0xff]  ;;  %v2433_v9 = vadd.f32 %v2432_v61, %v9367_v21  ;;  %v9368_v47 = vld [vmem:[#allocation87_spill] sm:$0xff]  ;;  %v9369_v12 = vld [vmem:[#allocation88_spill] sm:$0xff] }
 0x2d4   : > { %v2370_v51 = vadd.f32 %v2369_v22, %v9366_v62  ;;  %v2496_v59 = vadd.f32 %v2495_v5, %v9368_v47  ;;  %v2559_v29 = vadd.f32 %v2558_v63, %v9369_v12  ;;  %v9370_v32 = vld [vmem:[#allocation315_spill] sm:$0xff]  ;;  %v9371_v3 = vld [vmem:[#allocation90_spill] sm:$0xff]  ;;  %v9373_v38 = vld [vmem:[#allocation324_spill] sm:$0xff] }
 0x2d5   : > { %v2622_v19 = vadd.f32 %v2621_v57, %v9370_v32  ;;  %v2685_v13 = vadd.f32 %v2684_v49, %v9371_v3  ;;  %v9372_v45 = vld [vmem:[#allocation91_spill] sm:$0xff]  ;;  %v2308_v43 = vadd.f32 %v2307_v31, %v9373_v38  ;;  %v9374_v23 = vld [vmem:[#allocation93_spill] sm:$0xff]  ;;  %v9375_v56 = vld [vmem:[#allocation94_spill] sm:$0xff] }
 0x2d6   : > { %v2748_v52 = vadd.f32 %v2747_v15, %v9372_v45  ;;  %v2371_v14 = vadd.f32 %v2370_v51, %v9374_v23  ;;  %v2434_v33 = vadd.f32 %v2433_v9, %v9375_v56  ;;  %v9376_v6 = vld [vmem:[#allocation333_spill] sm:$0xff]  ;;  %v9377_v62 = vld [vmem:[#allocation96_spill] sm:$0xff]  ;;  %v9379_v47 = vld [vmem:[#allocation342_spill] sm:$0xff] }
 0x2d7   : > { %v2497_v22 = vadd.f32 %v2496_v59, %v9376_v6  ;;  %v2560_v61 = vadd.f32 %v2559_v29, %v9377_v62  ;;  %v9378_v21 = vld [vmem:[#allocation97_spill] sm:$0xff]  ;;  %v2686_v63 = vadd.f32 %v2685_v13, %v9379_v47  ;;  %v9380_v12 = vld [vmem:[#allocation99_spill] sm:$0xff]  ;;  %v9381_v32 = vld [vmem:[#allocation100_spill] sm:$0xff] }
 0x2d8   : > { %v2623_v5 = vadd.f32 %v2622_v19, %v9378_v21  ;;  %v2749_v57 = vadd.f32 %v2748_v52, %v9380_v12  ;;  %v2309_v49 = vadd.f32 %v2308_v43, %v9381_v32  ;;  %v9382_v3 = vld [vmem:[#allocation351_spill] sm:$0xff]  ;;  %v9383_v45 = vld [vmem:[#allocation102_spill] sm:$0xff]  ;;  %v9385_v23 = vld [vmem:[#allocation360_spill] sm:$0xff] }
 0x2d9   : > { %v2372_v15 = vadd.f32 %v2371_v14, %v9382_v3  ;;  %v2435_v31 = vadd.f32 %v2434_v33, %v9383_v45  ;;  %v9384_v38 = vld [vmem:[#allocation103_spill] sm:$0xff]  ;;  %v2561_v9 = vadd.f32 %v2560_v61, %v9385_v23  ;;  %v9386_v56 = vld [vmem:[#allocation105_spill] sm:$0xff]  ;;  %v9387_v6 = vld [vmem:[#allocation106_spill] sm:$0xff] }
 0x2da   : > { %v2498_v51 = vadd.f32 %v2497_v22, %v9384_v38  ;;  %v2624_v59 = vadd.f32 %v2623_v5, %v9386_v56  ;;  %v2687_v29 = vadd.f32 %v2686_v63, %v9387_v6  ;;  %v9388_v62 = vld [vmem:[#allocation369_spill] sm:$0xff]  ;;  %v9389_v21 = vld [vmem:[#allocation108_spill] sm:$0xff]  ;;  %v9391_v12 = vld [vmem:[#allocation378_spill] sm:$0xff] }
 0x2db   : > { %v2750_v19 = vadd.f32 %v2749_v57, %v9388_v62  ;;  %v2310_v13 = vadd.f32 %v2309_v49, %v9389_v21  ;;  %v9390_v47 = vld [vmem:[#allocation109_spill] sm:$0xff]  ;;  %v2436_v43 = vadd.f32 %v2435_v31, %v9391_v12  ;;  %v9392_v32 = vld [vmem:[#allocation111_spill] sm:$0xff]  ;;  %v9393_v3 = vld [vmem:[#allocation112_spill] sm:$0xff] }
 0x2dc   : > { %v2373_v52 = vadd.f32 %v2372_v15, %v9390_v47  ;;  %v2499_v14 = vadd.f32 %v2498_v51, %v9392_v32  ;;  %v2562_v33 = vadd.f32 %v2561_v9, %v9393_v3  ;;  %v9394_v45 = vld [vmem:[#allocation387_spill] sm:$0xff]  ;;  %v9395_v38 = vld [vmem:[#allocation114_spill] sm:$0xff]  ;;  %v9397_v56 = vld [vmem:[#allocation117_spill] sm:$0xff] }
 0x2dd   : > { %v2625_v22 = vadd.f32 %v2624_v59, %v9394_v45  ;;  %v2688_v61 = vadd.f32 %v2687_v29, %v9395_v38  ;;  %v9396_v23 = vld [vmem:[#allocation115_spill] sm:$0xff]  ;;  %v2311_v63 = vadd.f32 %v2310_v13, %v9397_v56  ;;  %v9398_v6 = vld [vmem:[#allocation118_spill] sm:$0xff]  ;;  %v9400_v21 = vld [vmem:[#allocation405_spill] sm:$0xff] }
 0x2de   : > { %v2751_v5 = vadd.f32 %v2750_v19, %v9396_v23  ;;  %v2374_v57 = vadd.f32 %v2373_v52, %v9398_v6  ;;  %v9399_v62 = vld [vmem:[#allocation119_spill] sm:$0xff]  ;;  %v2500_v15 = vadd.f32 %v2499_v14, %v9400_v21  ;;  %v9401_v47 = vld [vmem:[#allocation121_spill] sm:$0xff]  ;;  %v9402_v12 = vld [vmem:[#allocation122_spill] sm:$0xff] }
 0x2df   : > { %v2437_v49 = vadd.f32 %v2436_v43, %v9399_v62  ;;  %v2563_v31 = vadd.f32 %v2562_v33, %v9401_v47  ;;  %v2626_v51 = vadd.f32 %v2625_v22, %v9402_v12  ;;  %v9403_v32 = vld [vmem:[#allocation123_spill] sm:$0xff]  ;;  %v9404_v3 = vld [vmem:[#allocation124_spill] sm:$0xff]  ;;  %v9405_v45 = vld [vmem:[#allocation125_spill] sm:$0xff] }
 0x2e0   : > { %v2689_v9 = vadd.f32 %v2688_v61, %v9403_v32  ;;  %v2752_v59 = vadd.f32 %v2751_v5, %v9404_v3  ;;  %v2312_v29 = vadd.f32 %v2311_v63, %v9405_v45  ;;  %v9406_v38 = vld [vmem:[#allocation127_spill] sm:$0xff]  ;;  %v9407_v23 = vld [vmem:[#allocation128_spill] sm:$0xff]  ;;  %v9408_v56 = vld [vmem:[#allocation129_spill] sm:$0xff] }
 0x2e1   : > { %v2375_v19 = vadd.f32 %v2374_v57, %v9406_v38  ;;  %v2438_v13 = vadd.f32 %v2437_v49, %v9407_v23  ;;  %v2501_v52 = vadd.f32 %v2500_v15, %v9408_v56  ;;  %v9409_v6 = vld [vmem:[#allocation432_spill] sm:$0xff]  ;;  %v9410_v62 = vld [vmem:[#allocation130_spill] sm:$0xff]  ;;  %v9411_v21 = vld [vmem:[#allocation131_spill] sm:$0xff] }
 0x2e2   : > { %v2564_v43 = vadd.f32 %v2563_v31, %v9409_v6  ;;  %v2627_v14 = vadd.f32 %v2626_v51, %v9410_v62  ;;  %v2690_v33 = vadd.f32 %v2689_v9, %v9411_v21  ;;  %v9412_v47 = vld [vmem:[#allocation132_spill] sm:$0xff]  ;;  %v9413_v12 = vld [vmem:[#allocation133_spill] sm:$0xff]  ;;  %v9414_v32 = vld [vmem:[#allocation134_spill] sm:$0xff] }
 0x2e3   : > { %v2753_v22 = vadd.f32 %v2752_v59, %v9412_v47  ;;  %v2313_v61 = vadd.f32 %v2312_v29, %v9413_v12  ;;  %v2376_v5 = vadd.f32 %v2375_v19, %v9414_v32  ;;  %v9415_v3 = vld [vmem:[#allocation136_spill] sm:$0xff]  ;;  %v9416_v45 = vld [vmem:[#allocation137_spill] sm:$0xff]  ;;  %v9417_v38 = vld [vmem:[#allocation138_spill] sm:$0xff] }
 0x2e4   : > { %v2439_v63 = vadd.f32 %v2438_v13, %v9415_v3  ;;  %v2502_v57 = vadd.f32 %v2501_v52, %v9416_v45  ;;  %v2565_v49 = vadd.f32 %v2564_v43, %v9417_v38  ;;  %v9418_v23 = vld [vmem:[#allocation460_spill] sm:$0xff]  ;;  %v9419_v56 = vld [vmem:[#allocation139_spill] sm:$0xff]  ;;  %v9421_v62 = vld [vmem:[#allocation141_spill] sm:$0xff] }
 0x2e5   : > { %v2628_v15 = vadd.f32 %v2627_v14, %v9418_v23  ;;  %v2691_v31 = vadd.f32 %v2690_v33, %v9419_v56  ;;  %v9420_v6 = vld [vmem:[#allocation140_spill] sm:$0xff]  ;;  %v2314_v9 = vadd.f32 %v2313_v61, %v9421_v62  ;;  %v9422_v21 = vld [vmem:[#allocation142_spill] sm:$0xff]  ;;  %v9423_v47 = vld [vmem:[#allocation143_spill] sm:$0xff] }
 0x2e6   : > { %v2754_v51 = vadd.f32 %v2753_v22, %v9420_v6  ;;  %v2377_v59 = vadd.f32 %v2376_v5, %v9422_v21  ;;  %v2440_v29 = vadd.f32 %v2439_v63, %v9423_v47  ;;  %v9424_v12 = vld [vmem:[#allocation145_spill] sm:$0xff]  ;;  %v9425_v32 = vld [vmem:[#allocation146_spill] sm:$0xff]  ;;  %v9426_v3 = vld [vmem:[#allocation147_spill] sm:$0xff] }
 0x2e7   : > { %v2503_v19 = vadd.f32 %v2502_v57, %v9424_v12  ;;  %v2566_v13 = vadd.f32 %v2565_v49, %v9425_v32  ;;  %v2629_v52 = vadd.f32 %v2628_v15, %v9426_v3  ;;  %v2692_v43 = vadd.f32 %v2691_v31, %v6042_v25  ;;  %v9427_v57 = vld [vmem:[#allocation148_spill] sm:$0xff]  ;;  %v9428_v49 = vld [vmem:[#allocation149_spill] sm:$0xff]  ;;  %v9429_v15 = vld [vmem:[#allocation150_spill] sm:$0xff] }
 0x2e8   : > { %v2755_v14 = vadd.f32 %v2754_v51, %v6055_v17  ;;  %v2315_v33 = vadd.f32 %v2314_v9, %v6066_v42  ;;  %v2378_v22 = vadd.f32 %v2377_v59, %v6072_v8  ;;  %v2441_v61 = vadd.f32 %v2440_v29, %v6076_v46  ;;  %v9430_v56 = vld [vmem:[#allocation151_spill] sm:$0xff]  ;;  %v9431_v31 = vld [vmem:[#allocation152_spill] sm:$0xff]  ;;  %v9432_v6 = vld [vmem:[#allocation154_spill] sm:$0xff] }
 0x2e9   : > { %v2504_v5 = vadd.f32 %v2503_v19, %v6080_v24  ;;  %v2567_v63 = vadd.f32 %v2566_v13, %v6084_v48  ;;  %v2630_v45 = vadd.f32 %v2629_v52, %v6088_v54  ;;  %v2693_v38 = vadd.f32 %v2692_v43, %v9427_v57  ;;  %v9433_v51 = vld [vmem:[#allocation155_spill] sm:$0xff]  ;;  %v9434_v62 = vld [vmem:[#allocation156_spill] sm:$0xff]  ;;  %v9435_v9 = vld [vmem:[#allocation157_spill] sm:$0xff] }
 0x2ea   : > { %v2756_v23 = vadd.f32 %v2755_v14, %v9428_v49  ;;  %v2316_v25 = vadd.f32 %v2315_v33, %v9429_v15  ;;  %v2379_v17 = vadd.f32 %v2378_v22, %v9430_v56  ;;  %v2442_v42 = vadd.f32 %v2441_v61, %v6108_v26  ;;  %v9436_v21 = vld [vmem:[#allocation158_spill] sm:$0xff]  ;;  %v9437_v47 = vld [vmem:[#allocation159_spill] sm:$0xff]  ;;  %v9438_v12 = vld [vmem:[#allocation160_spill] sm:$0xff] }
 0x2eb   : > { %v2505_v8 = vadd.f32 %v2504_v5, %v9431_v31  ;;  %v2568_v46 = vadd.f32 %v2567_v63, %v9432_v6  ;;  %v2631_v24 = vadd.f32 %v2630_v45, %v9433_v51  ;;  %v2694_v48 = vadd.f32 %v2693_v38, %v9434_v62  ;;  %v9439_v13 = vld [vmem:[#allocation161_spill] sm:$0xff]  ;;  %v9440_v3 = vld [vmem:[#allocation163_spill] sm:$0xff]  ;;  %v9441_v43 = vld [vmem:[#allocation164_spill] sm:$0xff] }
 0x2ec   : > { %v2757_v54 = vadd.f32 %v2756_v23, %v9435_v9  ;;  %v2317_v59 = vadd.f32 %v2316_v25, %v9436_v21  ;;  %v2380_v29 = vadd.f32 %v2379_v17, %v9437_v47  ;;  %v2443_v19 = vadd.f32 %v2442_v42, %v9438_v12  ;;  %v9442_v33 = vld [vmem:[#allocation165_spill] sm:$0xff]  ;;  %v9443_v61 = vld [vmem:[#allocation166_spill] sm:$0xff]  ;;  %v9444_v63 = vld [vmem:[#allocation167_spill] sm:$0xff] }
 0x2ed   : > { %v2506_v32 = vadd.f32 %v2505_v8, %v6144_v36  ;;  %v2569_v26 = vadd.f32 %v2568_v46, %v9439_v13  ;;  %v2632_v52 = vadd.f32 %v2631_v24, %v9440_v3  ;;  %v2695_v14 = vadd.f32 %v2694_v48, %v9441_v43  ;;  %v9445_v57 = vld [vmem:[#allocation168_spill] sm:$0xff]  ;;  %v9446_v49 = vld [vmem:[#allocation169_spill] sm:$0xff]  ;;  %v9447_v25 = vld [vmem:[#allocation170_spill] sm:$0xff] }
 0x2ee   : > { %v2758_v22 = vadd.f32 %v2757_v54, %v9442_v33  ;;  %v2318_v5 = vadd.f32 %v2317_v59, %v9443_v61  ;;  %v2381_v45 = vadd.f32 %v2380_v29, %v9444_v63  ;;  %v2444_v38 = vadd.f32 %v2443_v19, %v9445_v57  ;;  %v9448_v56 = vld [vmem:[#allocation172_spill] sm:$0xff]  ;;  %v9449_v42 = vld [vmem:[#allocation173_spill] sm:$0xff]  ;;  %v9450_v8 = vld [vmem:[#allocation174_spill] sm:$0xff] }
 0x2ef   : > { %v2507_v23 = vadd.f32 %v2506_v32, %v9446_v49  ;;  %v2570_v15 = vadd.f32 %v2569_v26, %v6180_v7  ;;  %v2633_v36 = vadd.f32 %v2632_v52, %v9447_v25  ;;  %v2696_v17 = vadd.f32 %v2695_v14, %v9448_v56  ;;  %v9451_v46 = vld [vmem:[#allocation175_spill] sm:$0xff]  ;;  %v9452_v24 = vld [vmem:[#allocation176_spill] sm:$0xff]  ;;  %v9453_v48 = vld [vmem:[#allocation177_spill] sm:$0xff] }
 0x2f0   : > { %v2759_v31 = vadd.f32 %v2758_v22, %v9449_v42  ;;  %v2319_v6 = vadd.f32 %v2318_v5, %v9450_v8  ;;  %v2382_v51 = vadd.f32 %v2381_v45, %v9451_v46  ;;  %v2445_v62 = vadd.f32 %v2444_v38, %v9452_v24  ;;  %v9454_v54 = vld [vmem:[#allocation178_spill] sm:$0xff]  ;;  %v9455_v47 = vld [vmem:[#allocation179_spill] sm:$0xff]  ;;  %v9456_v29 = vld [vmem:[#allocation181_spill] sm:$0xff] }
 0x2f1   : > { %v2508_v9 = vadd.f32 %v2507_v23, %v9453_v48  ;;  %v2571_v21 = vadd.f32 %v2570_v15, %v9454_v54  ;;  %v2634_v59 = vadd.f32 %v2633_v36, %v6216_v41  ;;  %v2697_v7 = vadd.f32 %v2696_v17, %v9455_v47  ;;  %v9457_v19 = vld [vmem:[#allocation182_spill] sm:$0xff]  ;;  %v9458_v13 = vld [vmem:[#allocation183_spill] sm:$0xff]  ;;  %v9459_v3 = vld [vmem:[#allocation184_spill] sm:$0xff] }
 0x2f2   : > { %v2760_v12 = vadd.f32 %v2759_v31, %v9456_v29  ;;  %v2320_v32 = vadd.f32 %v2319_v6, %v9457_v19  ;;  %v2383_v26 = vadd.f32 %v2382_v51, %v9458_v13  ;;  %v2446_v52 = vadd.f32 %v2445_v62, %v9459_v3  ;;  %v9460_v43 = vld [vmem:[#allocation185_spill] sm:$0xff]  ;;  %v9461_v33 = vld [vmem:[#allocation186_spill] sm:$0xff]  ;;  %v9462_v61 = vld [vmem:[#allocation187_spill] sm:$0xff] }
 0x2f3   : > { %v2509_v14 = vadd.f32 %v2508_v9, %v9460_v43  ;;  %v2572_v22 = vadd.f32 %v2571_v21, %v9461_v33  ;;  %v2635_v5 = vadd.f32 %v2634_v59, %v9462_v61  ;;  %v2698_v63 = vadd.f32 %v2697_v7, %v6252_v50  ;;  %v9463_v45 = vld [vmem:[#allocation188_spill] sm:$0xff]  ;;  %v9464_v57 = vld [vmem:[#allocation190_spill] sm:$0xff]  ;;  %v9465_v49 = vld [vmem:[#allocation191_spill] sm:$0xff] }
 0x2f4   : > { %v2761_v41 = vadd.f32 %v2760_v12, %v9463_v45  ;;  %v2321_v38 = vadd.f32 %v2320_v32, %v9464_v57  ;;  %v2384_v23 = vadd.f32 %v2383_v26, %v9465_v49  ;;  %v9466_v15 = vld [vmem:[#allocation192_spill] sm:$0xff]  ;;  %v9467_v36 = vld [vmem:[#allocation193_spill] sm:$0xff]  ;;  %v9468_v17 = vld [vmem:[#allocation194_spill] sm:$0xff] }
 0x2f5   : > { %v2447_v25 = vadd.f32 %v2446_v52, %v9466_v15  ;;  %v2510_v56 = vadd.f32 %v2509_v14, %v9467_v36  ;;  %v2573_v42 = vadd.f32 %v2572_v22, %v9468_v17  ;;  %v9469_v31 = vld [vmem:[#allocation195_spill] sm:$0xff]  ;;  %v9470_v6 = vld [vmem:[#allocation196_spill] sm:$0xff]  ;;  %v9471_v24 = vld [vmem:[#allocation197_spill] sm:$0xff] }
 0x2f6   : > { %v2636_v8 = vadd.f32 %v2635_v5, %v9469_v31  ;;  %v2699_v46 = vadd.f32 %v2698_v63, %v9470_v6  ;;  %v2762_v51 = vadd.f32 %v2761_v41, %v6288_v28  ;;  %v2322_v50 = vadd.f32 %v2321_v38, %v9471_v24  ;;  %v9472_v62 = vld [vmem:[#allocation199_spill] sm:$0xff]  ;;  %v9473_v9 = vld [vmem:[#allocation200_spill] sm:$0xff]  ;;  %v9474_v21 = vld [vmem:[#allocation201_spill] sm:$0xff] }
 0x2f7   : > { %v2385_v48 = vadd.f32 %v2384_v23, %v9472_v62  ;;  %v2448_v54 = vadd.f32 %v2447_v25, %v9473_v9  ;;  %v2511_v59 = vadd.f32 %v2510_v56, %v9474_v21  ;;  %v9475_v47 = vld [vmem:[#allocation202_spill] sm:$0xff]  ;;  %v9476_v29 = vld [vmem:[#allocation203_spill] sm:$0xff]  ;;  %v9477_v19 = vld [vmem:[#allocation204_spill] sm:$0xff] }
 0x2f8   : > { %v2574_v7 = vadd.f32 %v2573_v42, %v9475_v47  ;;  %v2637_v12 = vadd.f32 %v2636_v8, %v9476_v29  ;;  %v2700_v32 = vadd.f32 %v2699_v46, %v9477_v19  ;;  %v9478_v13 = vld [vmem:[#allocation205_spill] sm:$0xff]  ;;  %v2323_v3 = vadd.f32 %v2322_v50, %v6324_v60  ;;  %v9479_v52 = vld [vmem:[#allocation206_spill] sm:$0xff]  ;;  %v9480_v43 = vld [vmem:[#allocation208_spill] sm:$0xff] }
 0x2f9   : > { %v2763_v26 = vadd.f32 %v2762_v51, %v9478_v13  ;;  %v2386_v28 = vadd.f32 %v2385_v48, %v9479_v52  ;;  %v2449_v14 = vadd.f32 %v2448_v54, %v9480_v43  ;;  %v9481_v33 = vld [vmem:[#allocation209_spill] sm:$0xff]  ;;  %v9482_v61 = vld [vmem:[#allocation210_spill] sm:$0xff]  ;;  %v9483_v63 = vld [vmem:[#allocation211_spill] sm:$0xff] }
 0x2fa   : > { %v2512_v22 = vadd.f32 %v2511_v59, %v9481_v33  ;;  %v2575_v5 = vadd.f32 %v2574_v7, %v9482_v61  ;;  %v2638_v45 = vadd.f32 %v2637_v12, %v9483_v63  ;;  %v9484_v41 = vld [vmem:[#allocation212_spill] sm:$0xff]  ;;  %v9485_v38 = vld [vmem:[#allocation213_spill] sm:$0xff]  ;;  %v9486_v23 = vld [vmem:[#allocation214_spill] sm:$0xff] }
 0x2fb   : > { %v2701_v57 = vadd.f32 %v2700_v32, %v9484_v41  ;;  %v2764_v49 = vadd.f32 %v2763_v26, %v9485_v38  ;;  %v2324_v15 = vadd.f32 %v2323_v3, %v9486_v23  ;;  %v2387_v25 = vadd.f32 %v2386_v28, %v6360_v10  ;;  %v9487_v36 = vld [vmem:[#allocation215_spill] sm:$0xff]  ;;  %v9488_v56 = vld [vmem:[#allocation217_spill] sm:$0xff]  ;;  %v9489_v42 = vld [vmem:[#allocation218_spill] sm:$0xff] }
 0x2fc   : > { %v2450_v60 = vadd.f32 %v2449_v14, %v9487_v36  ;;  %v2513_v17 = vadd.f32 %v2512_v22, %v9488_v56  ;;  %v2576_v31 = vadd.f32 %v2575_v5, %v9489_v42  ;;  %v9490_v8 = vld [vmem:[#allocation219_spill] sm:$0xff]  ;;  %v9491_v46 = vld [vmem:[#allocation220_spill] sm:$0xff]  ;;  %v9492_v24 = vld [vmem:[#allocation221_spill] sm:$0xff] }
 0x2fd   : > { %v2639_v6 = vadd.f32 %v2638_v45, %v9490_v8  ;;  %v2702_v51 = vadd.f32 %v2701_v57, %v9491_v46  ;;  %v2765_v50 = vadd.f32 %v2764_v49, %v9492_v24  ;;  %v9493_v62 = vld [vmem:[#allocation222_spill] sm:$0xff]  ;;  %v9494_v9 = vld [vmem:[#allocation223_spill] sm:$0xff]  ;;  %v9495_v59 = vld [vmem:[#allocation224_spill] sm:$0xff] }
 0x2fe   : > { %v2325_v48 = vadd.f32 %v2324_v15, %v9493_v62  ;;  %v2388_v54 = vadd.f32 %v2387_v25, %v9494_v9  ;;  %v2451_v21 = vadd.f32 %v2450_v60, %v6396_v18  ;;  %v2514_v10 = vadd.f32 %v2513_v17, %v9495_v59  ;;  %v9496_v47 = vld [vmem:[#allocation226_spill] sm:$0xff]  ;;  %v9497_v29 = vld [vmem:[#allocation227_spill] sm:$0xff]  ;;  %v9498_v19 = vld [vmem:[#allocation228_spill] sm:$0xff] }
 0x2ff   : > { %v2577_v7 = vadd.f32 %v2576_v31, %v9496_v47  ;;  %v2640_v12 = vadd.f32 %v2639_v6, %v9497_v29  ;;  %v2703_v32 = vadd.f32 %v2702_v51, %v9498_v19  ;;  %v9499_v13 = vld [vmem:[#allocation229_spill] sm:$0xff]  ;;  %v9500_v3 = vld [vmem:[#allocation230_spill] sm:$0xff]  ;;  %v9501_v28 = vld [vmem:[#allocation231_spill] sm:$0xff] }
 0x300   : > { %v2766_v26 = vadd.f32 %v2765_v50, %v9499_v13  ;;  %v2326_v52 = vadd.f32 %v2325_v48, %v9500_v3  ;;  %v2389_v43 = vadd.f32 %v2388_v54, %v9501_v28  ;;  %v9502_v14 = vld [vmem:[#allocation232_spill] sm:$0xff]  ;;  %v2515_v22 = vadd.f32 %v2514_v10, %v6432_v53  ;;  %v9503_v61 = vld [vmem:[#allocation233_spill] sm:$0xff]  ;;  %v9504_v5 = vld [vmem:[#allocation235_spill] sm:$0xff] }
 0x301   : > { %v2452_v33 = vadd.f32 %v2451_v21, %v9502_v14  ;;  %v2578_v18 = vadd.f32 %v2577_v7, %v9503_v61  ;;  %v2641_v63 = vadd.f32 %v2640_v12, %v9504_v5  ;;  %v9505_v45 = vld [vmem:[#allocation236_spill] sm:$0xff]  ;;  %v9506_v57 = vld [vmem:[#allocation237_spill] sm:$0xff]  ;;  %v9507_v49 = vld [vmem:[#allocation238_spill] sm:$0xff] }
 0x302   : > { %v2704_v41 = vadd.f32 %v2703_v32, %v9505_v45  ;;  %v2767_v38 = vadd.f32 %v2766_v26, %v9506_v57  ;;  %v2327_v23 = vadd.f32 %v2326_v52, %v9507_v49  ;;  %v9508_v15 = vld [vmem:[#allocation239_spill] sm:$0xff]  ;;  %v9509_v36 = vld [vmem:[#allocation240_spill] sm:$0xff]  ;;  %v9510_v56 = vld [vmem:[#allocation241_spill] sm:$0xff] }
 0x303   : > { %v2390_v25 = vadd.f32 %v2389_v43, %v9508_v15  ;;  %v2453_v60 = vadd.f32 %v2452_v33, %v9509_v36  ;;  %v2516_v17 = vadd.f32 %v2515_v22, %v9510_v56  ;;  %v2579_v42 = vadd.f32 %v2578_v18, %v6468_v27  ;;  %v9511_v31 = vld [vmem:[#allocation242_spill] sm:$0xff]  ;;  %v9512_v8 = vld [vmem:[#allocation244_spill] sm:$0xff]  ;;  %v9513_v46 = vld [vmem:[#allocation245_spill] sm:$0xff] }
 0x304   : > { %v2642_v53 = vadd.f32 %v2641_v63, %v9511_v31  ;;  %v2705_v6 = vadd.f32 %v2704_v41, %v9512_v8  ;;  %v2768_v51 = vadd.f32 %v2767_v38, %v9513_v46  ;;  %v9514_v24 = vld [vmem:[#allocation246_spill] sm:$0xff]  ;;  %v9515_v62 = vld [vmem:[#allocation247_spill] sm:$0xff]  ;;  %v9516_v9 = vld [vmem:[#allocation248_spill] sm:$0xff] }
 0x305   : > { %v2328_v50 = vadd.f32 %v2327_v23, %v9514_v24  ;;  %v2391_v48 = vadd.f32 %v2390_v25, %v9515_v62  ;;  %v2454_v54 = vadd.f32 %v2453_v60, %v9516_v9  ;;  %v9517_v21 = vld [vmem:[#allocation249_spill] sm:$0xff]  ;;  %v9518_v10 = vld [vmem:[#allocation250_spill] sm:$0xff]  ;;  %v9519_v29 = vld [vmem:[#allocation251_spill] sm:$0xff] }
 0x306   : > { %v2517_v59 = vadd.f32 %v2516_v17, %v9517_v21  ;;  %v2580_v47 = vadd.f32 %v2579_v42, %v9518_v10  ;;  %v2643_v7 = vadd.f32 %v2642_v53, %v6504_v30  ;;  %v2706_v27 = vadd.f32 %v2705_v6, %v9519_v29  ;;  %v9520_v12 = vld [vmem:[#allocation253_spill] sm:$0xff]  ;;  %v9521_v32 = vld [vmem:[#allocation254_spill] sm:$0xff]  ;;  %v9522_v26 = vld [vmem:[#allocation255_spill] sm:$0xff] }
 0x307   : > { %v2769_v19 = vadd.f32 %v2768_v51, %v9520_v12  ;;  %v2329_v13 = vadd.f32 %v2328_v50, %v9521_v32  ;;  %v2392_v3 = vadd.f32 %v2391_v48, %v9522_v26  ;;  %v9523_v52 = vld [vmem:[#allocation256_spill] sm:$0xff]  ;;  %v9524_v43 = vld [vmem:[#allocation257_spill] sm:$0xff]  ;;  %v9525_v33 = vld [vmem:[#allocation258_spill] sm:$0xff] }
 0x308   : > { %v2455_v28 = vadd.f32 %v2454_v54, %v9523_v52  ;;  %v2518_v14 = vadd.f32 %v2517_v59, %v9524_v43  ;;  %v2581_v22 = vadd.f32 %v2580_v47, %v9525_v33  ;;  %v9526_v61 = vld [vmem:[#allocation259_spill] sm:$0xff]  ;;  %v2707_v5 = vadd.f32 %v2706_v27, %v6540_v1  ;;  %v9527_v63 = vld [vmem:[#allocation260_spill] sm:$0xff]  ;;  %v9528_v45 = vld [vmem:[#allocation262_spill] sm:$0xff] }
 0x309   : > { %v2644_v18 = vadd.f32 %v2643_v7, %v9526_v61  ;;  %v2770_v30 = vadd.f32 %v2769_v19, %v9527_v63  ;;  %v2330_v41 = vadd.f32 %v2329_v13, %v9528_v45  ;;  %v9529_v57 = vld [vmem:[#allocation263_spill] sm:$0xff]  ;;  %v9530_v49 = vld [vmem:[#allocation264_spill] sm:$0xff]  ;;  %v9531_v15 = vld [vmem:[#allocation265_spill] sm:$0xff] }
 0x30a   : > { %v2393_v38 = vadd.f32 %v2392_v3, %v9529_v57  ;;  %v2456_v23 = vadd.f32 %v2455_v28, %v9530_v49  ;;  %v2519_v25 = vadd.f32 %v2518_v14, %v9531_v15  ;;  %v9532_v36 = vld [vmem:[#allocation266_spill] sm:$0xff]  ;;  %v9533_v56 = vld [vmem:[#allocation267_spill] sm:$0xff]  ;;  %v9534_v42 = vld [vmem:[#allocation268_spill] sm:$0xff] }
 0x30b   : > { %v2582_v60 = vadd.f32 %v2581_v22, %v9532_v36  ;;  %v2645_v17 = vadd.f32 %v2644_v18, %v9533_v56  ;;  %v2708_v31 = vadd.f32 %v2707_v5, %v9534_v42  ;;  %v2771_v53 = vadd.f32 %v2770_v30, %v6576_v40  ;;  %v9535_v8 = vld [vmem:[#allocation269_spill] sm:$0xff]  ;;  %v9536_v6 = vld [vmem:[#allocation271_spill] sm:$0xff]  ;;  %v9537_v51 = vld [vmem:[#allocation272_spill] sm:$0xff] }
 0x30c   : > { %v2331_v1 = vadd.f32 %v2330_v41, %v9535_v8  ;;  %v2394_v46 = vadd.f32 %v2393_v38, %v9536_v6  ;;  %v2457_v24 = vadd.f32 %v2456_v23, %v9537_v51  ;;  %v9538_v50 = vld [vmem:[#allocation273_spill] sm:$0xff]  ;;  %v9539_v48 = vld [vmem:[#allocation274_spill] sm:$0xff]  ;;  %v9540_v54 = vld [vmem:[#allocation275_spill] sm:$0xff] }
 0x30d   : > { %v2520_v62 = vadd.f32 %v2519_v25, %v9538_v50  ;;  %v2583_v9 = vadd.f32 %v2582_v60, %v9539_v48  ;;  %v2646_v21 = vadd.f32 %v2645_v17, %v9540_v54  ;;  %v9541_v59 = vld [vmem:[#allocation276_spill] sm:$0xff]  ;;  %v9542_v47 = vld [vmem:[#allocation277_spill] sm:$0xff]  ;;  %v9543_v27 = vld [vmem:[#allocation278_spill] sm:$0xff] }
 0x30e   : > { %v2709_v10 = vadd.f32 %v2708_v31, %v9541_v59  ;;  %v2772_v7 = vadd.f32 %v2771_v53, %v9542_v47  ;;  %v2332_v29 = vadd.f32 %v2331_v1, %v6612_v44  ;;  %v2395_v40 = vadd.f32 %v2394_v46, %v9543_v27  ;;  %v9544_v12 = vld [vmem:[#allocation280_spill] sm:$0xff]  ;;  %v9545_v32 = vld [vmem:[#allocation281_spill] sm:$0xff]  ;;  %v9546_v26 = vld [vmem:[#allocation282_spill] sm:$0xff] }
 0x30f   : > { %v2458_v19 = vadd.f32 %v2457_v24, %v9544_v12  ;;  %v2521_v13 = vadd.f32 %v2520_v62, %v9545_v32  ;;  %v2584_v3 = vadd.f32 %v2583_v9, %v9546_v26  ;;  %v9547_v52 = vld [vmem:[#allocation283_spill] sm:$0xff]  ;;  %v9548_v43 = vld [vmem:[#allocation284_spill] sm:$0xff]  ;;  %v9549_v33 = vld [vmem:[#allocation285_spill] sm:$0xff] }
 0x310   : > { %v2647_v28 = vadd.f32 %v2646_v21, %v9547_v52  ;;  %v2710_v14 = vadd.f32 %v2709_v10, %v9548_v43  ;;  %v2773_v22 = vadd.f32 %v2772_v7, %v9549_v33  ;;  %v9550_v61 = vld [vmem:[#allocation286_spill] sm:$0xff]  ;;  %v2396_v5 = vadd.f32 %v2395_v40, %v6648_v37  ;;  %v9551_v63 = vld [vmem:[#allocation287_spill] sm:$0xff]  ;;  %v9552_v30 = vld [vmem:[#allocation289_spill] sm:$0xff] }
 0x311   : > { %v2333_v18 = vadd.f32 %v2332_v29, %v9550_v61  ;;  %v2459_v44 = vadd.f32 %v2458_v19, %v9551_v63  ;;  %v2522_v45 = vadd.f32 %v2521_v13, %v9552_v30  ;;  %v9553_v41 = vld [vmem:[#allocation290_spill] sm:$0xff]  ;;  %v9554_v38 = vld [vmem:[#allocation291_spill] sm:$0xff]  ;;  %v9555_v23 = vld [vmem:[#allocation292_spill] sm:$0xff] }
 0x312   : > { %v2585_v57 = vadd.f32 %v2584_v3, %v9553_v41  ;;  %v2648_v49 = vadd.f32 %v2647_v28, %v9554_v38  ;;  %v2711_v15 = vadd.f32 %v2710_v14, %v9555_v23  ;;  %v9556_v25 = vld [vmem:[#allocation293_spill] sm:$0xff]  ;;  %v9557_v60 = vld [vmem:[#allocation294_spill] sm:$0xff]  ;;  %v9558_v17 = vld [vmem:[#allocation295_spill] sm:$0xff] }
 0x313   : > { %v2774_v36 = vadd.f32 %v2773_v22, %v9556_v25  ;;  %v2334_v56 = vadd.f32 %v2333_v18, %v9557_v60  ;;  %v2397_v42 = vadd.f32 %v2396_v5, %v9558_v17  ;;  %v2460_v31 = vadd.f32 %v2459_v44, %v6684_v55  ;;  %v9559_v53 = vld [vmem:[#allocation296_spill] sm:$0xff]  ;;  %v9560_v8 = vld [vmem:[#allocation298_spill] sm:$0xff]  ;;  %v9561_v6 = vld [vmem:[#allocation299_spill] sm:$0xff] }
 0x314   : > { %v2523_v37 = vadd.f32 %v2522_v45, %v9559_v53  ;;  %v2586_v1 = vadd.f32 %v2585_v57, %v9560_v8  ;;  %v2649_v46 = vadd.f32 %v2648_v49, %v9561_v6  ;;  %v9562_v51 = vld [vmem:[#allocation300_spill] sm:$0xff]  ;;  %v9563_v50 = vld [vmem:[#allocation301_spill] sm:$0xff]  ;;  %v9564_v48 = vld [vmem:[#allocation302_spill] sm:$0xff] }
 0x315   : > { %v2712_v24 = vadd.f32 %v2711_v15, %v9562_v51  ;;  %v2775_v62 = vadd.f32 %v2774_v36, %v9563_v50  ;;  %v2335_v9 = vadd.f32 %v2334_v56, %v9564_v48  ;;  %v9565_v54 = vld [vmem:[#allocation303_spill] sm:$0xff]  ;;  %v9566_v59 = vld [vmem:[#allocation304_spill] sm:$0xff]  ;;  %v9567_v7 = vld [vmem:[#allocation305_spill] sm:$0xff] }
 0x316   : > { %v2398_v21 = vadd.f32 %v2397_v42, %v9565_v54  ;;  %v2461_v10 = vadd.f32 %v2460_v31, %v9566_v59  ;;  %v2524_v47 = vadd.f32 %v2523_v37, %v6720_v11  ;;  %v2587_v55 = vadd.f32 %v2586_v1, %v9567_v7  ;;  %v9568_v29 = vld [vmem:[#allocation307_spill] sm:$0xff]  ;;  %v9569_v40 = vld [vmem:[#allocation308_spill] sm:$0xff]  ;;  %v9570_v19 = vld [vmem:[#allocation309_spill] sm:$0xff] }
 0x317   : > { %v2650_v27 = vadd.f32 %v2649_v46, %v9568_v29  ;;  %v2713_v12 = vadd.f32 %v2712_v24, %v9569_v40  ;;  %v2776_v32 = vadd.f32 %v2775_v62, %v9570_v19  ;;  %v9571_v13 = vld [vmem:[#allocation310_spill] sm:$0xff]  ;;  %v9572_v3 = vld [vmem:[#allocation311_spill] sm:$0xff]  ;;  %v9573_v28 = vld [vmem:[#allocation312_spill] sm:$0xff] }
 0x318   : > { %v2336_v26 = vadd.f32 %v2335_v9, %v9571_v13  ;;  %v2399_v52 = vadd.f32 %v2398_v21, %v9572_v3  ;;  %v2462_v43 = vadd.f32 %v2461_v10, %v9573_v28  ;;  %v9574_v14 = vld [vmem:[#allocation313_spill] sm:$0xff]  ;;  %v2588_v22 = vadd.f32 %v2587_v55, %v6756_v34  ;;  %v9575_v61 = vld [vmem:[#allocation314_spill] sm:$0xff]  ;;  %v9576_v18 = vld [vmem:[#allocation316_spill] sm:$0xff] }
 0x319   : > { %v2525_v33 = vadd.f32 %v2524_v47, %v9574_v14  ;;  %v2651_v11 = vadd.f32 %v2650_v27, %v9575_v61  ;;  %v2714_v5 = vadd.f32 %v2713_v12, %v9576_v18  ;;  %v9577_v63 = vld [vmem:[#allocation317_spill] sm:$0xff]  ;;  %v9578_v30 = vld [vmem:[#allocation318_spill] sm:$0xff]  ;;  %v9579_v41 = vld [vmem:[#allocation319_spill] sm:$0xff] }
 0x31a   : > { %v2777_v44 = vadd.f32 %v2776_v32, %v9577_v63  ;;  %v2337_v45 = vadd.f32 %v2336_v26, %v9578_v30  ;;  %v2400_v57 = vadd.f32 %v2399_v52, %v9579_v41  ;;  %v9580_v38 = vld [vmem:[#allocation320_spill] sm:$0xff]  ;;  %v9581_v23 = vld [vmem:[#allocation321_spill] sm:$0xff]  ;;  %v9582_v25 = vld [vmem:[#allocation322_spill] sm:$0xff] }
 0x31b   : > { %v2463_v49 = vadd.f32 %v2462_v43, %v9580_v38  ;;  %v2526_v15 = vadd.f32 %v2525_v33, %v9581_v23  ;;  %v2589_v36 = vadd.f32 %v2588_v22, %v9582_v25  ;;  %v2652_v60 = vadd.f32 %v2651_v11, %v6792_v2  ;;  %v9583_v56 = vld [vmem:[#allocation323_spill] sm:$0xff]  ;;  %v9584_v17 = vld [vmem:[#allocation325_spill] sm:$0xff]  ;;  %v9585_v31 = vld [vmem:[#allocation326_spill] sm:$0xff] }
 0x31c   : > { %v2715_v34 = vadd.f32 %v2714_v5, %v9583_v56  ;;  %v2778_v42 = vadd.f32 %v2777_v44, %v9584_v17  ;;  %v2338_v53 = vadd.f32 %v2337_v45, %v9585_v31  ;;  %v9586_v37 = vld [vmem:[#allocation327_spill] sm:$0xff]  ;;  %v9587_v1 = vld [vmem:[#allocation328_spill] sm:$0xff]  ;;  %v9588_v46 = vld [vmem:[#allocation329_spill] sm:$0xff] }
 0x31d   : > { %v2401_v8 = vadd.f32 %v2400_v57, %v9586_v37  ;;  %v2464_v6 = vadd.f32 %v2463_v49, %v9587_v1  ;;  %v2527_v51 = vadd.f32 %v2526_v15, %v9588_v46  ;;  %v9589_v24 = vld [vmem:[#allocation330_spill] sm:$0xff]  ;;  %v9590_v62 = vld [vmem:[#allocation331_spill] sm:$0xff]  ;;  %v9591_v54 = vld [vmem:[#allocation332_spill] sm:$0xff] }
 0x31e   : > { %v2590_v50 = vadd.f32 %v2589_v36, %v9589_v24  ;;  %v2653_v48 = vadd.f32 %v2652_v60, %v9590_v62  ;;  %v2716_v9 = vadd.f32 %v2715_v34, %v6828_v0  ;;  %v2779_v2 = vadd.f32 %v2778_v42, %v9591_v54  ;;  %v9592_v21 = vld [vmem:[#allocation334_spill] sm:$0xff]  ;;  %v9593_v10 = vld [vmem:[#allocation335_spill] sm:$0xff]  ;;  %v9594_v7 = vld [vmem:[#allocation336_spill] sm:$0xff] }
 0x31f   : > { %v2339_v59 = vadd.f32 %v2338_v53, %v9592_v21  ;;  %v2402_v47 = vadd.f32 %v2401_v8, %v9593_v10  ;;  %v2465_v55 = vadd.f32 %v2464_v6, %v9594_v7  ;;  %v9595_v29 = vld [vmem:[#allocation337_spill] sm:$0xff]  ;;  %v9596_v40 = vld [vmem:[#allocation338_spill] sm:$0xff]  ;;  %v9597_v19 = vld [vmem:[#allocation339_spill] sm:$0xff] }
 0x320   : > { %v2528_v27 = vadd.f32 %v2527_v51, %v9595_v29  ;;  %v2591_v12 = vadd.f32 %v2590_v50, %v9596_v40  ;;  %v2654_v32 = vadd.f32 %v2653_v48, %v9597_v19  ;;  %v9598_v13 = vld [vmem:[#allocation340_spill] sm:$0xff]  ;;  %v2780_v3 = vadd.f32 %v2779_v2, %v6864_v20  ;;  %v9599_v52 = vld [vmem:[#allocation341_spill] sm:$0xff]  ;;  %v9600_v28 = vld [vmem:[#allocation343_spill] sm:$0xff] }
 0x321   : > { %v2717_v26 = vadd.f32 %v2716_v9, %v9598_v13  ;;  %v2340_v0 = vadd.f32 %v2339_v59, %v9599_v52  ;;  %v2403_v43 = vadd.f32 %v2402_v47, %v9600_v28  ;;  %v9601_v14 = vld [vmem:[#allocation344_spill] sm:$0xff]  ;;  %v9602_v22 = vld [vmem:[#allocation345_spill] sm:$0xff]  ;;  %v9603_v11 = vld [vmem:[#allocation346_spill] sm:$0xff] }
 0x322   : > { %v2466_v33 = vadd.f32 %v2465_v55, %v9601_v14  ;;  %v2529_v61 = vadd.f32 %v2528_v27, %v9602_v22  ;;  %v2592_v18 = vadd.f32 %v2591_v12, %v9603_v11  ;;  %v9604_v5 = vld [vmem:[#allocation347_spill] sm:$0xff]  ;;  %v9605_v44 = vld [vmem:[#allocation348_spill] sm:$0xff]  ;;  %v9606_v45 = vld [vmem:[#allocation349_spill] sm:$0xff] }
 0x323   : > { %v2655_v63 = vadd.f32 %v2654_v32, %v9604_v5  ;;  %v2718_v30 = vadd.f32 %v2717_v26, %v9605_v44  ;;  %v2781_v41 = vadd.f32 %v2780_v3, %v9606_v45  ;;  %v2341_v57 = vadd.f32 %v2340_v0, %v6900_v35  ;;  %v9607_v38 = vld [vmem:[#allocation350_spill] sm:$0xff]  ;;  %v9608_v49 = vld [vmem:[#allocation352_spill] sm:$0xff]  ;;  %v9609_v15 = vld [vmem:[#allocation353_spill] sm:$0xff] }
 0x324   : > { %v2404_v20 = vadd.f32 %v2403_v43, %v9607_v38  ;;  %v2467_v23 = vadd.f32 %v2466_v33, %v9608_v49  ;;  %v2530_v25 = vadd.f32 %v2529_v61, %v9609_v15  ;;  %v9610_v36 = vld [vmem:[#allocation354_spill] sm:$0xff]  ;;  %v9611_v56 = vld [vmem:[#allocation355_spill] sm:$0xff]  ;;  %v9612_v17 = vld [vmem:[#allocation356_spill] sm:$0xff] }
 0x325   : > { %v2593_v60 = vadd.f32 %v2592_v18, %v9610_v36  ;;  %v2656_v34 = vadd.f32 %v2655_v63, %v9611_v56  ;;  %v2719_v42 = vadd.f32 %v2718_v30, %v9612_v17  ;;  %v9613_v31 = vld [vmem:[#allocation357_spill] sm:$0xff]  ;;  %v9614_v37 = vld [vmem:[#allocation358_spill] sm:$0xff]  ;;  %v9615_v6 = vld [vmem:[#allocation359_spill] sm:$0xff] }
 0x326   : > { %v2782_v53 = vadd.f32 %v2781_v41, %v9613_v31  ;;  %v2342_v8 = vadd.f32 %v2341_v57, %v9614_v37  ;;  %v2405_v1 = vadd.f32 %v2404_v20, %v6936_v39  ;;  %v2468_v35 = vadd.f32 %v2467_v23, %v9615_v6  ;;  %v9616_v46 = vld [vmem:[#allocation361_spill] sm:$0xff]  ;;  %v9617_v24 = vld [vmem:[#allocation362_spill] sm:$0xff]  ;;  %v9618_v62 = vld [vmem:[#allocation363_spill] sm:$0xff] }
 0x327   : > { %v2531_v51 = vadd.f32 %v2530_v25, %v9616_v46  ;;  %v2594_v50 = vadd.f32 %v2593_v60, %v9617_v24  ;;  %v2657_v48 = vadd.f32 %v2656_v34, %v9618_v62  ;;  %v9619_v9 = vld [vmem:[#allocation364_spill] sm:$0xff]  ;;  %v9620_v2 = vld [vmem:[#allocation365_spill] sm:$0xff]  ;;  %v9621_v59 = vld [vmem:[#allocation366_spill] sm:$0xff] }
 0x328   : > { %v2720_v54 = vadd.f32 %v2719_v42, %v9619_v9  ;;  %v2783_v21 = vadd.f32 %v2782_v53, %v9620_v2  ;;  %v2343_v10 = vadd.f32 %v2342_v8, %v9621_v59  ;;  %v9622_v47 = vld [vmem:[#allocation367_spill] sm:$0xff]  ;;  %v2469_v55 = vadd.f32 %v2468_v35, %v6972_v16  ;;  %v9623_v29 = vld [vmem:[#allocation368_spill] sm:$0xff]  ;;  %v9624_v27 = vld [vmem:[#allocation370_spill] sm:$0xff] }
 0x329   : > { %v2406_v7 = vadd.f32 %v2405_v1, %v9622_v47  ;;  %v2532_v39 = vadd.f32 %v2531_v51, %v9623_v29  ;;  %v2595_v40 = vadd.f32 %v2594_v50, %v9624_v27  ;;  %v9625_v12 = vld [vmem:[#allocation371_spill] sm:$0xff]  ;;  %v9626_v32 = vld [vmem:[#allocation372_spill] sm:$0xff]  ;;  %v9627_v26 = vld [vmem:[#allocation373_spill] sm:$0xff] }
 0x32a   : > { %v2658_v19 = vadd.f32 %v2657_v48, %v9625_v12  ;;  %v2721_v13 = vadd.f32 %v2720_v54, %v9626_v32  ;;  %v2784_v3 = vadd.f32 %v2783_v21, %v9627_v26  ;;  %v9628_v52 = vld [vmem:[#allocation374_spill] sm:$0xff]  ;;  %v9629_v28 = vld [vmem:[#allocation375_spill] sm:$0xff]  ;;  %v9630_v14 = vld [vmem:[#allocation376_spill] sm:$0xff] }
 0x32b   : > { %v2344_v0 = vadd.f32 %v2343_v10, %v9628_v52  ;;  %v2407_v43 = vadd.f32 %v2406_v7, %v9629_v28  ;;  %v2470_v33 = vadd.f32 %v2469_v55, %v9630_v14  ;;  %v9631_v22 = vld [vmem:[#allocation377_spill] sm:$0xff]  ;;  %v9632_v11 = vld [vmem:[#allocation379_spill] sm:$0xff]  ;;  %v9633_v18 = vld [vmem:[#allocation380_spill] sm:$0xff] }
 0x32c   : > { %v2533_v61 = vadd.f32 %v2532_v39, %v9631_v22  ;;  %v2596_v16 = vadd.f32 %v2595_v40, %v9632_v11  ;;  %v2659_v5 = vadd.f32 %v2658_v19, %v9633_v18  ;;  %v9634_v63 = vld [vmem:[#allocation381_spill] sm:$0xff]  ;;  %v9635_v30 = vld [vmem:[#allocation382_spill] sm:$0xff]  ;;  %v9636_v41 = vld [vmem:[#allocation383_spill] sm:$0xff] }
 0x32d   : > { %v2722_v44 = vadd.f32 %v2721_v13, %v9634_v63  ;;  %v2785_v45 = vadd.f32 %v2784_v3, %v9635_v30  ;;  %v2345_v57 = vadd.f32 %v2344_v0, %v9636_v41  ;;  %v9637_v38 = vld [vmem:[#allocation384_spill] sm:$0xff]  ;;  %v9638_v49 = vld [vmem:[#allocation385_spill] sm:$0xff]  ;;  %v9639_v15 = vld [vmem:[#allocation386_spill] sm:$0xff] }
 0x32e   : > { %v2408_v20 = vadd.f32 %v2407_v43, %v9637_v38  ;;  %v2471_v23 = vadd.f32 %v2470_v33, %v9638_v49  ;;  %v2534_v25 = vadd.f32 %v2533_v61, %v9639_v15  ;;  %v2597_v36 = vadd.f32 %v2596_v16, %v7044_v58  ;;  %v9640_v60 = vld [vmem:[#allocation388_spill] sm:$0xff]  ;;  %v9641_v34 = vld [vmem:[#allocation389_spill] sm:$0xff]  ;;  %v9642_v42 = vld [vmem:[#allocation390_spill] sm:$0xff] }
 0x32f   : > { %v2660_v56 = vadd.f32 %v2659_v5, %v9640_v60  ;;  %v2723_v17 = vadd.f32 %v2722_v44, %v9641_v34  ;;  %v2786_v31 = vadd.f32 %v2785_v45, %v9642_v42  ;;  %v9643_v53 = vld [vmem:[#allocation391_spill] sm:$0xff]  ;;  %v9644_v8 = vld [vmem:[#allocation392_spill] sm:$0xff]  ;;  %v9645_v6 = vld [vmem:[#allocation393_spill] sm:$0xff] }
 0x330   : > { %v2346_v37 = vadd.f32 %v2345_v57, %v9643_v53  ;;  %v2409_v1 = vadd.f32 %v2408_v20, %v9644_v8  ;;  %v2472_v35 = vadd.f32 %v2471_v23, %v9645_v6  ;;  %v9646_v46 = vld [vmem:[#allocation394_spill] sm:$0xff]  ;;  %v9647_v24 = vld [vmem:[#allocation395_spill] sm:$0xff]  ;;  %v9648_v62 = vld [vmem:[#allocation396_spill] sm:$0xff] }
 0x331   : > { %v2535_v51 = vadd.f32 %v2534_v25, %v9646_v46  ;;  %v2598_v50 = vadd.f32 %v2597_v36, %v9647_v24  ;;  %v2661_v48 = vadd.f32 %v2660_v56, %v9648_v62  ;;  %v9649_v9 = vld [vmem:[#allocation397_spill] sm:$0xff]  ;;  %v9650_v54 = vld [vmem:[#allocation398_spill] sm:$0xff]  ;;  %v9651_v21 = vld [vmem:[#allocation399_spill] sm:$0xff] }
 0x332   : > { %v2724_v58 = vadd.f32 %v2723_v17, %v9649_v9  ;;  %v2787_v2 = vadd.f32 %v2786_v31, %v9650_v54  ;;  %v2347_v59 = vadd.f32 %v2346_v37, %v9651_v21  ;;  %v9652_v10 = vld [vmem:[#allocation400_spill] sm:$0xff]  ;;  %v9653_v7 = vld [vmem:[#allocation401_spill] sm:$0xff]  ;;  %v9654_v29 = vld [vmem:[#allocation402_spill] sm:$0xff] }
 0x333   : > { %v2410_v47 = vadd.f32 %v2409_v1, %v9652_v10  ;;  %v2473_v55 = vadd.f32 %v2472_v35, %v9653_v7  ;;  %v2536_v39 = vadd.f32 %v2535_v51, %v9654_v29  ;;  %v9655_v27 = vld [vmem:[#allocation403_spill] sm:$0xff]  ;;  %v9656_v12 = vld [vmem:[#allocation404_spill] sm:$0xff]  ;;  %v9657_v32 = vld [vmem:[#allocation406_spill] sm:$0xff] }
 0x334   : > { %v2599_v40 = vadd.f32 %v2598_v50, %v9655_v27  ;;  %v2662_v19 = vadd.f32 %v2661_v48, %v9656_v12  ;;  %v2725_v13 = vadd.f32 %v2724_v58, %v9657_v32  ;;  %v9658_v26 = vld [vmem:[#allocation407_spill] sm:$0xff]  ;;  %v9659_v52 = vld [vmem:[#allocation408_spill] sm:$0xff]  ;;  %v9660_v28 = vld [vmem:[#allocation409_spill] sm:$0xff] }
 0x335   : > { %v2788_v3 = vadd.f32 %v2787_v2, %v9658_v26  ;;  %v2348_v0 = vadd.f32 %v2347_v59, %v9659_v52  ;;  %v2411_v43 = vadd.f32 %v2410_v47, %v9660_v28  ;;  %v9661_v14 = vld [vmem:[#allocation410_spill] sm:$0xff]  ;;  %v9662_v22 = vld [vmem:[#allocation411_spill] sm:$0xff]  ;;  %v9663_v11 = vld [vmem:[#allocation412_spill] sm:$0xff] }
 0x336   : > { %v2474_v33 = vadd.f32 %v2473_v55, %v9661_v14  ;;  %v2537_v61 = vadd.f32 %v2536_v39, %v9662_v22  ;;  %v2600_v16 = vadd.f32 %v2599_v40, %v9663_v11  ;;  %v9664_v18 = vld [vmem:[#allocation413_spill] sm:$0xff]  ;;  %v9665_v63 = vld [vmem:[#allocation414_spill] sm:$0xff]  ;;  %v9666_v45 = vld [vmem:[#allocation415_spill] sm:$0xff] }
 0x337   : > { %v2663_v5 = vadd.f32 %v2662_v19, %v9664_v18  ;;  %v2726_v44 = vadd.f32 %v2725_v13, %v9665_v63  ;;  %v2789_v30 = vadd.f32 %v2788_v3, %v7152_v4  ;;  %v2349_v41 = vadd.f32 %v2348_v0, %v9666_v45  ;;  %v9667_v57 = vld [vmem:[#allocation416_spill] sm:$0xff]  ;;  %v9668_v20 = vld [vmem:[#allocation417_spill] sm:$0xff]  ;;  %v9669_v23 = vld [vmem:[#allocation418_spill] sm:$0xff] }
 0x338   : > { %v2412_v38 = vadd.f32 %v2411_v43, %v9667_v57  ;;  %v2475_v49 = vadd.f32 %v2474_v33, %v9668_v20  ;;  %v2538_v15 = vadd.f32 %v2537_v61, %v9669_v23  ;;  %v9670_v25 = vld [vmem:[#allocation419_spill] sm:$0xff]  ;;  %v9671_v60 = vld [vmem:[#allocation420_spill] sm:$0xff]  ;;  %v9672_v34 = vld [vmem:[#allocation421_spill] sm:$0xff] }
 0x339   : > { %v2601_v36 = vadd.f32 %v2600_v16, %v9670_v25  ;;  %v2664_v56 = vadd.f32 %v2663_v5, %v9671_v60  ;;  %v2727_v17 = vadd.f32 %v2726_v44, %v9672_v34  ;;  %v9673_v42 = vld [vmem:[#allocation422_spill] sm:$0xff]  ;;  %v9674_v53 = vld [vmem:[#allocation423_spill] sm:$0xff]  ;;  %v9675_v8 = vld [vmem:[#allocation424_spill] sm:$0xff] }
 0x33a   : > { %v2790_v31 = vadd.f32 %v2789_v30, %v9673_v42  ;;  %v2350_v37 = vadd.f32 %v2349_v41, %v9674_v53  ;;  %v2413_v4 = vadd.f32 %v2412_v38, %v9675_v8  ;;  %v9676_v1 = vld [vmem:[#allocation425_spill] sm:$0xff]  ;;  %v9677_v35 = vld [vmem:[#allocation426_spill] sm:$0xff]  ;;  %v9678_v51 = vld [vmem:[#allocation427_spill] sm:$0xff] }
 0x33b   : > { %v2476_v6 = vadd.f32 %v2475_v49, %v9676_v1  ;;  %v2539_v46 = vadd.f32 %v2538_v15, %v9677_v35  ;;  %v2602_v24 = vadd.f32 %v2601_v36, %v9678_v51  ;;  %v9679_v50 = vld [vmem:[#allocation428_spill] sm:$0xff]  ;;  %v9680_v48 = vld [vmem:[#allocation429_spill] sm:$0xff]  ;;  %v9681_v58 = vld [vmem:[#allocation430_spill] sm:$0xff] }
 0x33c   : > { %v2665_v62 = vadd.f32 %v2664_v56, %v9679_v50  ;;  %v2728_v9 = vadd.f32 %v2727_v17, %v9680_v48  ;;  %v2791_v54 = vadd.f32 %v2790_v31, %v9681_v58  ;;  %v9682_v2 = vld [vmem:[#allocation431_spill] sm:$0xff]  ;;  %v9683_v59 = vld [vmem:[#allocation433_spill] sm:$0xff]  ;;  %v9684_v47 = vld [vmem:[#allocation434_spill] sm:$0xff] }
 0x33d   : > { %v2351_v21 = vadd.f32 %v2350_v37, %v9682_v2  ;;  %v2414_v10 = vadd.f32 %v2413_v4, %v9683_v59  ;;  %v2477_v7 = vadd.f32 %v2476_v6, %v9684_v47  ;;  %v9685_v55 = vld [vmem:[#allocation435_spill] sm:$0xff]  ;;  %v9686_v39 = vld [vmem:[#allocation436_spill] sm:$0xff]  ;;  %v9687_v40 = vld [vmem:[#allocation437_spill] sm:$0xff] }
 0x33e   : > { %v2540_v29 = vadd.f32 %v2539_v46, %v9685_v55  ;;  %v2603_v27 = vadd.f32 %v2602_v24, %v9686_v39  ;;  %v2666_v12 = vadd.f32 %v2665_v62, %v9687_v40  ;;  %v9688_v19 = vld [vmem:[#allocation438_spill] sm:$0xff]  ;;  %v9689_v13 = vld [vmem:[#allocation439_spill] sm:$0xff]  ;;  %v9690_v3 = vld [vmem:[#allocation440_spill] sm:$0xff] }
 0x33f   : > { %v2729_v32 = vadd.f32 %v2728_v9, %v9688_v19  ;;  %v2792_v26 = vadd.f32 %v2791_v54, %v9689_v13  ;;  %v2352_v52 = vadd.f32 %v2351_v21, %v9690_v3  ;;  %v9691_v0 = vld [vmem:[#allocation441_spill] sm:$0xff]  ;;  %v9692_v43 = vld [vmem:[#allocation442_spill] sm:$0xff]  ;;  %v9693_v33 = vld [vmem:[#allocation443_spill] sm:$0xff] }
 0x340   : > { %v2415_v28 = vadd.f32 %v2414_v10, %v9691_v0  ;;  %v2478_v14 = vadd.f32 %v2477_v7, %v9692_v43  ;;  %v2541_v22 = vadd.f32 %v2540_v29, %v9693_v33  ;;  %v9694_v61 = vld [vmem:[#allocation444_spill] sm:$0xff]  ;;  %v9695_v16 = vld [vmem:[#allocation445_spill] sm:$0xff]  ;;  %v9696_v5 = vld [vmem:[#allocation446_spill] sm:$0xff] }
 0x341   : > { %v2604_v11 = vadd.f32 %v2603_v27, %v9694_v61  ;;  %v2667_v18 = vadd.f32 %v2666_v12, %v9695_v16  ;;  %v2730_v63 = vadd.f32 %v2729_v32, %v9696_v5  ;;  %v9697_v44 = vld [vmem:[#allocation447_spill] sm:$0xff]  ;;  %v9698_v45 = vld [vmem:[#allocation448_spill] sm:$0xff]  ;;  %v9699_v57 = vld [vmem:[#allocation449_spill] sm:$0xff] }
 0x342   : > { %v2793_v30 = vadd.f32 %v2792_v26, %v9697_v44  ;;  %v2353_v41 = vadd.f32 %v2352_v52, %v9698_v45  ;;  %v2416_v38 = vadd.f32 %v2415_v28, %v9699_v57  ;;  %v9700_v20 = vld [vmem:[#allocation450_spill] sm:$0xff]  ;;  %v9701_v23 = vld [vmem:[#allocation451_spill] sm:$0xff]  ;;  %v9702_v25 = vld [vmem:[#allocation452_spill] sm:$0xff] }
 0x343   : > { %v2479_v49 = vadd.f32 %v2478_v14, %v9700_v20  ;;  %v2542_v15 = vadd.f32 %v2541_v22, %v9701_v23  ;;  %v2605_v36 = vadd.f32 %v2604_v11, %v9702_v25  ;;  %v9703_v60 = vld [vmem:[#allocation453_spill] sm:$0xff]  ;;  %v9704_v34 = vld [vmem:[#allocation454_spill] sm:$0xff]  ;;  %v9705_v42 = vld [vmem:[#allocation455_spill] sm:$0xff] }
 0x344   : > { %v2668_v56 = vadd.f32 %v2667_v18, %v9703_v60  ;;  %v2731_v17 = vadd.f32 %v2730_v63, %v9704_v34  ;;  %v2794_v31 = vadd.f32 %v2793_v30, %v9705_v42  ;;  %v9706_v53 = vld [vmem:[#allocation456_spill] sm:$0xff]  ;;  %v9707_v8 = vld [vmem:[#allocation457_spill] sm:$0xff]  ;;  %v9708_v1 = vld [vmem:[#allocation458_spill] sm:$0xff] }
 0x345   : > { %v2354_v37 = vadd.f32 %v2353_v41, %v9706_v53  ;;  %v2417_v4 = vadd.f32 %v2416_v38, %v9707_v8  ;;  %v2480_v6 = vadd.f32 %v2479_v49, %v9708_v1  ;;  %v9709_v35 = vld [vmem:[#allocation459_spill] sm:$0xff]  ;;  %v9710_v51 = vld [vmem:[#allocation461_spill] sm:$0xff]  ;;  %v9711_v50 = vld [vmem:[#allocation462_spill] sm:$0xff] }
 0x346   : > { %v2543_v46 = vadd.f32 %v2542_v15, %v9709_v35  ;;  %v2606_v24 = vadd.f32 %v2605_v36, %v9710_v51  ;;  %v2669_v62 = vadd.f32 %v2668_v56, %v9711_v50  ;;  %v9712_v48 = vld [vmem:[#allocation463_spill] sm:$0xff]  ;;  %v9713_v58 = vld [vmem:[#allocation464_spill] sm:$0xff]  ;;  %v9714_v2 = vld [vmem:[#allocation465_spill] sm:$0xff] }
 0x347   : > { %v2732_v9 = vadd.f32 %v2731_v17, %v9712_v48  ;;  %v2795_v54 = vadd.f32 %v2794_v31, %v9713_v58  ;;  %v2355_v21 = vadd.f32 %v2354_v37, %v9714_v2  ;;  %v9715_v59 = vld [vmem:[#allocation466_spill] sm:$0xff]  ;;  %v9716_v47 = vld [vmem:[#allocation467_spill] sm:$0xff]  ;;  %v9717_v55 = vld [vmem:[#allocation468_spill] sm:$0xff] }
 0x348   : > { %v2418_v10 = vadd.f32 %v2417_v4, %v9715_v59  ;;  %v2481_v7 = vadd.f32 %v2480_v6, %v9716_v47  ;;  %v2544_v29 = vadd.f32 %v2543_v46, %v9717_v55  ;;  %v9718_v39 = vld [vmem:[#allocation469_spill] sm:$0xff]  ;;  %v9719_v40 = vld [vmem:[#allocation470_spill] sm:$0xff]  ;;  %v9720_v19 = vld [vmem:[#allocation471_spill] sm:$0xff] }
 0x349   : > { %v2607_v27 = vadd.f32 %v2606_v24, %v9718_v39  ;;  %v2670_v12 = vadd.f32 %v2669_v62, %v9719_v40  ;;  %v2733_v32 = vadd.f32 %v2732_v9, %v9720_v19  ;;  %v9721_v13 = vld [vmem:[#allocation472_spill] sm:$0xff]  ;;  %v9722_v0 = vld [vmem:[#allocation473_spill] sm:$0xff]  ;;  %v9723_v43 = vld [vmem:[#allocation474_spill] sm:$0xff] }
 0x34a   : > { %v2796_v26 = vadd.f32 %v2795_v54, %v9721_v13  ;;  %v2287_v3 = vld [vmem:[#allocation2] sm:$0xff]  ;;  %v2288_v52 = vld [vmem:[#allocation2 + $0x8] sm:$0xff]  ;;  %v2356_v28 = vadd.f32 %v2355_v21, %v9722_v0  ;;  %v2419_v14 = vadd.f32 %v2418_v10, %v9723_v43  ;;  %v2289_v16 = vld [vmem:[#allocation2 + $0x10] sm:$0xff] }
 0x34b   : > { %v9724_v33 = vld [vmem:[#allocation475_spill] sm:$0xff]  ;;  %v9725_v61 = vld [vmem:[#allocation476_spill] sm:$0xff]  ;;  %v9726_v63 = vld [vmem:[#allocation477_spill] sm:$0xff] }
 0x34c   : > { %v2482_v22 = vadd.f32 %v2481_v7, %v9724_v33  ;;  %v2545_v11 = vadd.f32 %v2544_v29, %v9725_v61  ;;  %v2290_v18 = vld [vmem:[#allocation2 + $0x18] sm:$0xff]  ;;  %v2291_v5 = vld [vmem:[#allocation2 + $0x20] sm:$0xff]  ;;  %v2608_v44 = vadd.f32 %v2607_v27, %v9726_v63  ;;  %v2292_v49 = vld [vmem:[#allocation2 + $0x28] sm:$0xff] }
 0x34d   : > { %v9727_v30 = vld [vmem:[#allocation478_spill] sm:$0xff]  ;;  %v9728_v41 = vld [vmem:[#allocation479_spill] sm:$0xff]  ;;  %v9729_v38 = vld [vmem:[#allocation480_spill] sm:$0xff] }
 0x34e   : > { %v2671_v45 = vadd.f32 %v2670_v12, %v9727_v30  ;;  %v2734_v57 = vadd.f32 %v2733_v32, %v9728_v41  ;;  %v2797_v20 = vadd.f32 %v2796_v26, %v9729_v38  ;;  %v2293_v23 = vld [vmem:[#allocation2 + $0x30] sm:$0xff]  ;;  %v2294_v15 = vld [vmem:[#allocation2 + $0x38] sm:$0xff]  ;;  %v9733_v42 = vld [vmem:[#allocation484_spill] sm:$0xff] }
 0x34f   : > { %v9730_v25 = vld [vmem:[#allocation481_spill] sm:$0xff]  ;;  %v9731_v60 = vld [vmem:[#allocation482_spill] sm:$0xff]  ;;  %v9732_v34 = vld [vmem:[#allocation483_spill] sm:$0xff]  ;;  %v2546_v31 = vadd.f32 %v2545_v11, %v9733_v42 }
 0x350   : > { %v2357_v36 = vadd.f32 %v2356_v28, %v9730_v25  ;;  %v2420_v56 = vadd.f32 %v2419_v14, %v9731_v60  ;;  %v2483_v17 = vadd.f32 %v2482_v22, %v9732_v34  ;;  %v9734_v53 = vld [vmem:[#allocation485_spill] sm:$0xff]  ;;  %v9735_v8 = vld [vmem:[#allocation486_spill] sm:$0xff]  ;;  %v9736_v1 = vld [vmem:[#allocation487_spill] sm:$0xff] }
 0x351   : > { %v2609_v37 = vadd.f32 %v2608_v44, %v9734_v53  ;;  %v2672_v4 = vadd.f32 %v2671_v45, %v9735_v8  ;;  %v2735_v6 = vadd.f32 %v2734_v57, %v9736_v1  ;;  %v9737_v35 = vld [vmem:[#allocation488_spill] sm:$0xff]  ;;  %v2802_v62 = vadd.f32 %v2546_v31, %v2290_v18  ;;  %2818 = sbr.rel (%p2958_p11) target bundleno = 1080 (0x438), region = 44 }
 0x352   : > { %v2798_v46 = vadd.f32 %v2797_v20, %v9737_v35  ;;  %v2799_v51 = vadd.f32 %v2357_v36, %v2287_v3  ;;  %v2800_v24 = vadd.f32 %v2420_v56, %v2288_v52  ;;  %v2801_v50 = vadd.f32 %v2483_v17, %v2289_v16 }
 0x353   : > { %v2803_v48 = vadd.f32 %v2609_v37, %v2291_v5  ;;  %v2804_v9 = vadd.f32 %v2672_v4, %v2292_v49  ;;  %v2805_v58 = vadd.f32 %v2735_v6, %v2293_v23  ;;  %2810 = vst [vmem:[#allocation2 + $0x18] sm:$0xff] %v2802_v62 }
 0x354   : > { %v2806_v54 = vadd.f32 %v2798_v46, %v2294_v15  ;;  %2807 = vst [vmem:[#allocation2] sm:$0xff] %v2799_v51  ;;  %2808 = vst [vmem:[#allocation2 + $0x8] sm:$0xff] %v2800_v24 }
 0x355   : > { %2809 = vst [vmem:[#allocation2 + $0x10] sm:$0xff] %v2801_v50  ;;  %2811 = vst [vmem:[#allocation2 + $0x20] sm:$0xff] %v2803_v48 }
 0x356   : > { %2812 = vst [vmem:[#allocation2 + $0x28] sm:$0xff] %v2804_v9  ;;  %2813 = vst [vmem:[#allocation2 + $0x30] sm:$0xff] %v2805_v58 }
 0x357   : > { %2814 = vst [vmem:[#allocation2 + $0x38] sm:$0xff] %v2806_v54 }
 0x35a   : > { %v2822_v47 = vld [vmem:[#allocation2 + $0x18] sm:$0xff] }
 0x35b   : > { %v2819_v2 = vld [vmem:[#allocation2] sm:$0xff]  ;;  %v2820_v21 = vld [vmem:[#allocation2 + $0x8] sm:$0xff] }
 0x35c   : > { %v2821_v59 = vld [vmem:[#allocation2 + $0x10] sm:$0xff]  ;;  %v2827_v10 = vadd.f32 %v2820_v21, %v2819_v2  ;;  %v2823_v55 = vld [vmem:[#allocation2 + $0x20] sm:$0xff] }
 0x35d   : > { %v2824_v39 = vld [vmem:[#allocation2 + $0x28] sm:$0xff]  ;;  %v2825_v40 = vld [vmem:[#allocation2 + $0x30] sm:$0xff] }
 0x35e   : > { %v2828_v7 = vadd.f32 %v2827_v10, %v2821_v59  ;;  %v2826_v19 = vld [vmem:[#allocation2 + $0x38] sm:$0xff] }
 0x360   : > { %v2829_v29 = vadd.f32 %v2828_v7, %v2822_v47 }
 0x362   : > { %v2830_v27 = vadd.f32 %v2829_v29, %v2823_v55 }
 0x364   : > { %v2831_v12 = vadd.f32 %v2830_v27, %v2824_v39 }
 0x366   : > { %v2832_v32 = vadd.f32 %v2831_v12, %v2825_v40 }
 0x368   : > { %v2833_v13 = vadd.f32 %v2832_v32, %v2826_v19 }
 0x36a   : > { %2834 = vadd.xlane.f32.xlu0 %v2833_v13 }
 0x3f7   : > { %v2835_v26 = vpop.xlane.xlu0 %2834 }
 0x3f8   : > { %v2836_v3 = vrot.slane %v2835_v26, 4 }
 0x3fa   : > { %v2837_v52 = vadd.f32 %v2836_v3, %v2835_v26 }
 0x3fc   : > { %v2838_v0 = vrot.slane %v2837_v52, 2 }
 0x3fe   : > { %v2839_v28 = vadd.f32 %v2838_v0, %v2837_v52 }
 0x400   : > { %v2840_v43 = vrot.slane %v2839_v28, 1 }
 0x402   : > { %v2841_v14 = vadd.f32 %v2840_v43, %v2839_v28 }
 0x404   : > { %2967 = vpush %v2841_v14 }
 0x435   : > { %s2968_s12 = spop %2967 }
 0x436   : > { %v2843_v33 = vstv %s2968_s12 }
 0x437   : > { %2845 = vst.msk [vmem:[#allocation8] sm:$0x1] %vm2844_vm0, %v2843_v33 }
 0x438 PF: > { %p7957_p4 = scmp.eq.s32.totalorder %s2943_s15, 1  ;;  %s3190_s26 = smov [#allocation8]  }
 0x439   : > { %s2855_s28 = sshll.u32 %s3190_s26, 4  ;;  %s2856_s28 = int_to_ptr.vmem [resolvable:$true] %s2855_s28 }
 0x43a   : > { %s3099_s4 = scalar_lea.vmem %s2856_s28, 16  ;;  %s3105_s7 = scalar_lea.vmem %s2856_s28, 32 }
 0x43b   : > { %p3100_p8 = scmp.ne.s32.totalorder %s2856_s28, %s3099_s4  ;;  %p3106_p13 = scmp.lt.s32.totalorder %s2856_s28, %s2856_s28 }
 0x43c   : > { %p3107_p3 = scmp.lt.s32.totalorder %s3105_s7, %s3099_s4 }
 0x43d   : > { %p3101_p1 = pnand %p3100_p8, %p7957_p4 }
 0x43e   : > { %p3108_p5 = por %p3107_p3, %p3106_p13 }
 0x43f   : > { %p3102_p2 = pneg %p3101_p1 }
 0x441   : > { %p3109_p6 = pnand %p3108_p5, %p3102_p2 }
 0x443   : > { %3112 = shalt.err (!%p3109_p6)
}
 0x444   : > { %s3113_s27 = scalar_lea.hbm %s8003_s2, 16 }
 0x445   : > { %p3114_p10 = scmp.ne.s32.totalorder %s8003_s2, %s3113_s27  ;;  %p3119_p7 = scmp.lt.u32.totalorder %s3113_s27, %s8003_s2 }
 0x447   : > { %p3115_p12 = pnand %p3114_p10, %p7957_p4 }
 0x449   : > { %p3116_p0 = pneg %p3115_p12 }
 0x44b   : > { %p3121_p9 = pnand %p3119_p7, %p3116_p0 }
 0x44d   : > { %3124 = shalt.err (!%p3121_p9)
}
 0x44e   : > { %2974 = dma.vmem_to_hbm [thread:$0]  (%p7957_p4), %s2856_s28, 16, %s8003_s2, [#allocation5]  }
 0x44f   : > { %3158 = dma.done.wait (%p7957_p4), [#allocation5], 16  }
 0x450   : > { %3160 = vsyncadd (%p7957_p4), [#allocation5], 4294967280 }
 0x451 PF: > { %s19_s14 = sadd.s32 1, %s3183_s14   ;;  %s9739_s9 = smov %s3167_s10 }
 0x452   : > { %p16_p11 = scmp.ge.s32.totalorder %s19_s14, 4   ;;  %s9740_s10 = smov %s3171_s11 }
 0x453   : > { %s9741_s11 = smov %s3257_s21  ;;  %s9742_s12 = smov %s3179_s13 }
 0x454   : > { %s9743_s13 = smov %s9745_s16  ;;  %18 = sbr.rel (!%p16_p11) target bundleno = 7 (0x7), region = 87 }
 0x45b   :  { %2868 = vsyncpa [#allocation4], 1 }
 0x45c   :  { %2870 = vsyncpa [#allocation4 + $0x1], 1 }
 0x45d   :  { %2871 = vsyncpa [#allocation7], 1 }
 0x45e   :  { %2873 = vsyncpa [#allocation7 + $0x1], 1 }
 0x45f   :  { %2874 = vsyncpa [#allocation5], 1 }
 0x460   :  { %2876 = vsyncpa [#allocation5 + $0x1], 1 }

</bundles_post_ra>
